<compile_context>
chip_gen: v7x
topology: tpu7x:2x2x1
jax: 0.10.0
libtpu: 0.0.40
codegen_flags: <defaults>
</compile_context>

<pallas_src>
import functools

import jax
import jax.numpy as jnp
from jax import lax
from jax.experimental import pallas as pl
from jax.experimental.pallas import tpu as pltpu


# ----------------------------------- kernel --------------------------------- #

def _fused_ode_func_kernel(tv_ref, v_ref, x_ref,
                           w1t_ref, w1x_ref, w2t_ref, w2h_ref, w3t_ref, w3h_ref,
                           gamma_ref, beta_ref, *rest,
                           H, W, eps, group_size):
    """conv1+ReLU -> conv2+GroupNorm+ReLU -> down_conv for one sample, all in VMEM."""
    if group_size > 1:
        bmat_ref, o_ref = rest
    else:
        (o_ref,) = rest

    hw = H * W
    tv = tv_ref[...]      # (HW, 9) bf16: t * tap-validity (t-channel conv contribution)
    vmat = v_ref[...]     # (HW, 9) f32 : tap-validity (column-edge masks per tap)

    def conv3x3(act, wt_ref, wh_ref):
        # act: (HW, Cin) f32.  Returns the 3x3 "same" ConcatConv2d output, (HW, Cout) f32.
        c = act.shape[1]
        zpad = jnp.zeros((W + 1, c), act.dtype)
        padded = jnp.concatenate([zpad, act, zpad], axis=0)       # (HW + 2W + 2, Cin)
        # t-channel contribution: t * (valid-tap pattern) @ W_t   -> (HW, Cout) f32
        acc = jnp.dot(tv, wt_ref[...], preferred_element_type=jnp.float32)
        k = 0
        for dh in (-1, 0, 1):
            for dw in (-1, 0, 1):
                off = dh * W + dw + (W + 1)
                xs = padded[off:off + hw, :]                      # shifted, zero-filled rows
                if dw != 0:
                    xs = xs * vmat[:, k:k + 1]                    # zero wrapped-row neighbours
                acc = acc + jnp.dot(xs.astype(jnp.bfloat16), wh_ref[k],
                                    preferred_element_type=jnp.float32)
                k += 1
        return acc

    x = x_ref[0]                                                  # (HW, channels+aug) f32
    h1 = jnp.maximum(conv3x3(x, w1t_ref, w1x_ref), 0.0)           # conv1 + ReLU
    y2 = conv3x3(h1, w2t_ref, w2h_ref)                            # conv2

    # GroupNorm(min(32, F), F): per-sample stats, centered two-pass variance.
    ch_sum = jnp.sum(y2, axis=0, keepdims=True)                   # (1, F)
    if group_size > 1:
        cnt = float(hw * group_size)
        mean = jnp.dot(ch_sum, bmat_ref[...],
                       preferred_element_type=jnp.float32) / cnt
        d = y2 - mean
        var = jnp.dot(jnp.sum(d * d, axis=0, keepdims=True), bmat_ref[...],
                      preferred_element_type=jnp.float32) / cnt
    else:  # groups == F: per-channel stats, no group-sum matmul / bmat DMA needed
        mean = ch_sum * (1.0 / hw)
        d = y2 - mean
        var = jnp.sum(d * d, axis=0, keepdims=True) * (1.0 / hw)
    h2 = jnp.maximum(d * lax.rsqrt(var + eps) * gamma_ref[...] + beta_ref[...], 0.0)

    y3 = conv3x3(h2, w3t_ref, w3h_ref)                            # down_conv, (HW, ch)
    # Store transposed -> lane-dense (channels, HW) block; reshapes to NCHW outside.
    o_ref[0] = jnp.transpose(y3).astype(o_ref.dtype)


# --------------------------------- JAX wrapper ------------------------------- #

def _valid_taps(h, w):
    """(H*W, 9) 0/1 matrix: [r, k] = 1 iff 3x3 tap k at flattened pixel r is in-bounds."""
    hh = jnp.arange(h)[:, None]
    ww = jnp.arange(w)[None, :]
    cols = []
    for dh in (-1, 0, 1):
        for dw in (-1, 0, 1):
            v = (hh + dh >= 0) & (hh + dh < h) & (ww + dw >= 0) & (ww + dw < w)
            cols.append(v.reshape(-1))
    return jnp.stack(cols, axis=1).astype(jnp.float32)


def tode_denoise_func(t, x_nchw, params, *, channels, aug, features):
    """Fused Pallas implementation of TODEDenoiseFunc.forward(t, x).  NCHW in/out."""
    n, c_in, h, w = x_nchw.shape
    assert c_in == channels
    hw = h * w
    groups = min(32, features)
    group_size = features // groups

    x = jnp.transpose(x_nchw, (0, 2, 3, 1)).astype(jnp.float32)        # NHWC
    if aug > 0:                                                        # augmented zeros
        x = jnp.concatenate([x, jnp.zeros((n, h, w, aug), x.dtype)], axis=-1)
    cin = channels + aug
    x2d = x.reshape(n, hw, cin)

    vmat = _valid_taps(h, w)                                           # (HW, 9) f32
    tv = (jnp.asarray(t, jnp.float32) * vmat).astype(jnp.bfloat16)     # (HW, 9) bf16

    in_specs = [
        pl.BlockSpec((hw, 9), lambda i: (0, 0)),                       # t * tap validity
        pl.BlockSpec((hw, 9), lambda i: (0, 0)),                       # tap validity masks
        pl.BlockSpec((1, hw, cin), lambda i: (i, 0, 0)),               # x, one sample
        pl.BlockSpec((9, features), lambda i: (0, 0)),                 # w1: t channel
        pl.BlockSpec((9, cin, features), lambda i: (0, 0, 0)),         # w1: x channels
        pl.BlockSpec((9, features), lambda i: (0, 0)),                 # w2: t channel
        pl.BlockSpec((9, features, features), lambda i: (0, 0, 0)),    # w2: h channels
        pl.BlockSpec((9, channels), lambda i: (0, 0)),                 # w3: t channel
        pl.BlockSpec((9, features, channels), lambda i: (0, 0, 0)),    # w3: h channels
        pl.BlockSpec((1, features), lambda i: (0, 0)),                 # gamma
        pl.BlockSpec((1, features), lambda i: (0, 0)),                 # beta
    ]
    args = [tv, vmat, x2d,
            params["w1t"], params["w1x"], params["w2t"], params["w2h"],
            params["w3t"], params["w3h"], params["gamma"], params["beta"]]
    if group_size > 1:                                                 # general GroupNorm
        in_specs.append(pl.BlockSpec((features, features), lambda i: (0, 0)))
        args.append(params["bmat"])

    kernel = functools.partial(_fused_ode_func_kernel, H=h, W=w, eps=1e-5,
                               group_size=group_size)

    out = pl.pallas_call(
        kernel,
        out_shape=jax.ShapeDtypeStruct((n, channels, hw), jnp.float32),
        grid_spec=pltpu.PrefetchScalarGridSpec(
            num_scalar_prefetch=0,
            grid=(n,),                      # one sample per step; megacore-parallel axis
            in_specs=in_specs,
            out_specs=pl.BlockSpec((1, channels, hw), lambda i: (i, 0, 0)),
        ),
        compiler_params=pltpu.CompilerParams(
            dimension_semantics=("parallel",)),
    )(*args)

    return out.reshape(n, channels, h, w)                              # already NCHW


# ----------------------------------- params --------------------------------- #

def init_params(key, channels, aug, features):
    """Random parameters for the three ConcatConv2d layers + GroupNorm affine.

    Conv weights are stored pre-split for the kernel (tap index k = 3*kh + kw):
      w*t : (9, Cout)       -- taps of the prepended t channel
      w*x : (9, Cin, Cout)  -- taps of the data channels
    cast to bf16 for the MXU.
    """
    cin1 = channels + aug
    k1, k2, k3, k4, k5 = jax.random.split(key, 5)

    def conv_w(k, cin, cout):
        fan_in = 9 * (cin + 1)
        wfull = jax.random.normal(k, (3, 3, cin + 1, cout), jnp.float32)
        wfull = wfull / jnp.sqrt(fan_in)
        wt = wfull[:, :, 0, :].reshape(9, cout).astype(jnp.bfloat16)
        wx = wfull[:, :, 1:, :].reshape(9, cin, cout).astype(jnp.bfloat16)
        return wt, wx

    groups = min(32, features)
    assert features % groups == 0, "GroupNorm needs features % min(32, features) == 0"
    gid = jnp.arange(features) // (features // groups)
    bmat = (gid[:, None] == gid[None, :]).astype(jnp.float32)          # same-group indicator

    w1t, w1x = conv_w(k1, cin1, features)
    w2t, w2h = conv_w(k2, features, features)
    w3t, w3h = conv_w(k3, features, channels)
    return {
        "w1t": w1t, "w1x": w1x,
        "w2t": w2t, "w2h": w2h,
        "w3t": w3t, "w3h": w3h,
        "gamma": 1.0 + 0.1 * jax.random.normal(k4, (1, features), jnp.float32),
        "beta": 0.1 * jax.random.normal(k5, (1, features), jnp.float32),
        # Only used when group_size > 1 (i.e. features > 32); harmless otherwise.
        "bmat": bmat,
    }


# ------------------------------ pure-JAX reference --------------------------- #

def _ref_ode_func(t, x_nchw, params, *, channels, aug, features):
    """XLA f32 reference (HIGHEST precision convs) used only for self-checking."""
    del channels
    n, _, h, w = x_nchw.shape
    x = jnp.transpose(x_nchw, (0, 2, 3, 1)).astype(jnp.float32)
    if aug > 0:
        x = jnp.concatenate([x, jnp.zeros((n, h, w, aug), x.dtype)], axis=-1)
    t = jnp.asarray(t, jnp.float32)

    def concat_conv(z, wt, wx):
        cout = wt.shape[-1]
        cin = wx.shape[1]
        w_full = jnp.concatenate(
            [wt.astype(jnp.float32).reshape(3, 3, 1, cout),
             wx.astype(jnp.float32).reshape(3, 3, cin, cout)], axis=2)
        tt = jnp.full(z.shape[:3] + (1,), t, z.dtype)
        zin = jnp.concatenate([tt, z], axis=-1)
        return lax.conv_general_dilated(
            zin, w_full, window_strides=(1, 1), padding="SAME",
            dimension_numbers=("NHWC", "HWIO", "NHWC"),
            precision=lax.Precision.HIGHEST)

    h1 = jax.nn.relu(concat_conv(x, params["w1t"], params["w1x"]))
    y2 = concat_conv(h1, params["w2t"], params["w2h"])
    groups = min(32, features)
    yg = y2.reshape(n, h, w, groups, features // groups)
    mean = yg.mean(axis=(1, 2, 4), keepdims=True)
    var = ((yg - mean) ** 2).mean(axis=(1, 2, 4), keepdims=True)
    yn = ((yg - mean) / jnp.sqrt(var + 1e-5)).reshape(n, h, w, features)
    h2 = jax.nn.relu(yn * params["gamma"][0] + params["beta"][0])
    out = concat_conv(h2, params["w3t"], params["w3h"])
    return jnp.transpose(out, (0, 3, 1, 2))


# ------------------------------------ main ----------------------------------- #

if __name__ == "__main__":
    N, C, H, W = 2, 4, 16, 16
    AUG, FEATURES = 0, 32

    key = jax.random.PRNGKey(0)
    kx, kp = jax.random.split(key)
    x = jax.random.normal(kx, (N, C, H, W), jnp.float32)
    t = jnp.asarray(0.5, jnp.float32)
    params = init_params(kp, C, AUG, FEATURES)

    fwd = jax.jit(functools.partial(tode_denoise_func, channels=C, aug=AUG,
                                    features=FEATURES))
    out = fwd(t, x, params)
    jax.block_until_ready(out)
    assert out.shape == (N, C, H, W) and out.dtype == jnp.float32
    assert bool(jnp.all(jnp.isfinite(out)))

    # Cross-check against a pure-XLA f32 reference; the kernel uses bf16 MXU inputs,
    # so compare with a loose tolerance.
    ref = jax.jit(functools.partial(_ref_ode_func, channels=C, aug=AUG,
                                    features=FEATURES))(t, x, params)
    err = float(jnp.max(jnp.abs(out - ref)))
    scale = float(jnp.max(jnp.abs(ref)))
    assert err <= 0.05 * scale + 0.05, (err, scale)

    print("KERNEL_OK")
</pallas_src>

<mosaic_0001>
module attributes {stable_mosaic.version = 11 : i64} {
  func.func @_fused_ode_func_kernel(%arg0: i32, %arg1: memref<256x9xbf16, #tpu.memory_space<vmem>>, %arg2: memref<256x9xf32, #tpu.memory_space<vmem>>, %arg3: memref<1x256x4xf32, #tpu.memory_space<vmem>>, %arg4: memref<9x32xbf16, #tpu.memory_space<vmem>>, %arg5: memref<9x4x32xbf16, #tpu.memory_space<vmem>>, %arg6: memref<9x32xbf16, #tpu.memory_space<vmem>>, %arg7: memref<9x32x32xbf16, #tpu.memory_space<vmem>>, %arg8: memref<9x4xbf16, #tpu.memory_space<vmem>>, %arg9: memref<9x32x4xbf16, #tpu.memory_space<vmem>>, %arg10: memref<1x32xf32, #tpu.memory_space<vmem>>, %arg11: memref<1x32xf32, #tpu.memory_space<vmem>>, %arg12: memref<1x4x256xf32, #tpu.memory_space<vmem>>) attributes {dimension_semantics = [#tpu.dimension_semantics<parallel>], iteration_bounds = array<i64: 2>, scalar_prefetch = 0 : i64, scratch_operands = 0 : i64, tpu.core_type = #tpu.core_type<tc>, window_params = [{pipeline_mode = #tpu.pipeline_mode<synchronous>, transform_indices = @transform_0, window_bounds = array<i64: 256, 9>}, {pipeline_mode = #tpu.pipeline_mode<synchronous>, transform_indices = @transform_1, window_bounds = array<i64: 256, 9>}, {transform_indices = @transform_2, window_bounds = array<i64: 1, 256, 4>}, {pipeline_mode = #tpu.pipeline_mode<synchronous>, transform_indices = @transform_3, window_bounds = array<i64: 9, 32>}, {pipeline_mode = #tpu.pipeline_mode<synchronous>, transform_indices = @transform_4, window_bounds = array<i64: 9, 4, 32>}, {pipeline_mode = #tpu.pipeline_mode<synchronous>, transform_indices = @transform_5, window_bounds = array<i64: 9, 32>}, {pipeline_mode = #tpu.pipeline_mode<synchronous>, transform_indices = @transform_6, window_bounds = array<i64: 9, 32, 32>}, {pipeline_mode = #tpu.pipeline_mode<synchronous>, transform_indices = @transform_7, window_bounds = array<i64: 9, 4>}, {pipeline_mode = #tpu.pipeline_mode<synchronous>, transform_indices = @transform_8, window_bounds = array<i64: 9, 32, 4>}, {pipeline_mode = #tpu.pipeline_mode<synchronous>, transform_indices = @transform_9, window_bounds = array<i64: 1, 32>}, {pipeline_mode = #tpu.pipeline_mode<synchronous>, transform_indices = @transform_10, window_bounds = array<i64: 1, 32>}, {transform_indices = @transform_11, window_bounds = array<i64: 1, 4, 256>}]} {
    %c0 = arith.constant 0 : index
    %c0_0 = arith.constant 0 : index
    %0 = vector.load %arg1[%c0, %c0_0] : memref<256x9xbf16, #tpu.memory_space<vmem>>, vector<256x9xbf16>
    %c0_1 = arith.constant 0 : index
    %c0_2 = arith.constant 0 : index
    %1 = vector.load %arg2[%c0_1, %c0_2] : memref<256x9xf32, #tpu.memory_space<vmem>>, vector<256x9xf32>
    %c0_3 = arith.constant 0 : index
    %c0_4 = arith.constant 0 : index
    %c0_5 = arith.constant 0 : index
    %2 = vector.load %arg3[%c0_3, %c0_4, %c0_5] : memref<1x256x4xf32, #tpu.memory_space<vmem>>, vector<1x256x4xf32>
    %3 = vector.shape_cast %2 : vector<1x256x4xf32> to vector<256x4xf32>
    %cst = arith.constant 0.000000e+00 : f32
    %4 = vector.broadcast %cst : f32 to vector<17x4xf32>
    %5 = tpu.concatenate %4, %3, %4 in 0 : vector<17x4xf32>, vector<256x4xf32>, vector<17x4xf32> -> vector<290x4xf32>
    %c0_6 = arith.constant 0 : index
    %c0_7 = arith.constant 0 : index
    %6 = vector.load %arg4[%c0_6, %c0_7] : memref<9x32xbf16, #tpu.memory_space<vmem>>, vector<9x32xbf16>
    %cst_8 = arith.constant dense<0.000000e+00> : vector<256x32xf32>
    %7 = tpu.matmul %0, %6, %cst_8 {dimension_numbers = #tpu.dot_dimension_numbers<[1], [0], [0], [1], [0, 0, 1, 1], [], []>} : vector<256x9xbf16>, vector<9x32xbf16>, vector<256x32xf32> -> vector<256x32xf32>
    %8 = vector.extract_strided_slice %5 {offsets = [0, 0], sizes = [256, 4], strides = [1, 1]} : vector<290x4xf32> to vector<256x4xf32>
    %9 = vector.extract_strided_slice %1 {offsets = [0, 0], sizes = [256, 1], strides = [1, 1]} : vector<256x9xf32> to vector<256x1xf32>
    %10 = vector.broadcast %9 : vector<256x1xf32> to vector<256x4xf32>
    %11 = arith.mulf %8, %10 : vector<256x4xf32>
    %12 = arith.truncf %11 : vector<256x4xf32> to vector<256x4xbf16>
    %c0_9 = arith.constant 0 : index
    %c0_10 = arith.constant 0 : index
    %c0_11 = arith.constant 0 : index
    %13 = vector.load %arg5[%c0_9, %c0_10, %c0_11] : memref<9x4x32xbf16, #tpu.memory_space<vmem>>, vector<1x4x32xbf16>
    %14 = vector.shape_cast %13 : vector<1x4x32xbf16> to vector<4x32xbf16>
    %cst_12 = arith.constant dense<0.000000e+00> : vector<256x32xf32>
    %15 = tpu.matmul %12, %14, %cst_12 {dimension_numbers = #tpu.dot_dimension_numbers<[1], [0], [0], [1], [0, 0, 1, 1], [], []>} : vector<256x4xbf16>, vector<4x32xbf16>, vector<256x32xf32> -> vector<256x32xf32>
    %16 = arith.addf %7, %15 : vector<256x32xf32>
    %17 = vector.extract_strided_slice %5 {offsets = [1, 0], sizes = [256, 4], strides = [1, 1]} : vector<290x4xf32> to vector<256x4xf32>
    %18 = arith.truncf %17 : vector<256x4xf32> to vector<256x4xbf16>
    %c1 = arith.constant 1 : index
    %c0_13 = arith.constant 0 : index
    %c0_14 = arith.constant 0 : index
    %19 = vector.load %arg5[%c1, %c0_13, %c0_14] : memref<9x4x32xbf16, #tpu.memory_space<vmem>>, vector<1x4x32xbf16>
    %20 = vector.shape_cast %19 : vector<1x4x32xbf16> to vector<4x32xbf16>
    %cst_15 = arith.constant dense<0.000000e+00> : vector<256x32xf32>
    %21 = tpu.matmul %18, %20, %cst_15 {dimension_numbers = #tpu.dot_dimension_numbers<[1], [0], [0], [1], [0, 0, 1, 1], [], []>} : vector<256x4xbf16>, vector<4x32xbf16>, vector<256x32xf32> -> vector<256x32xf32>
    %22 = arith.addf %16, %21 : vector<256x32xf32>
    %23 = vector.extract_strided_slice %5 {offsets = [2, 0], sizes = [256, 4], strides = [1, 1]} : vector<290x4xf32> to vector<256x4xf32>
    %24 = vector.extract_strided_slice %1 {offsets = [0, 2], sizes = [256, 1], strides = [1, 1]} : vector<256x9xf32> to vector<256x1xf32>
    %25 = vector.broadcast %24 : vector<256x1xf32> to vector<256x4xf32>
    %26 = arith.mulf %23, %25 : vector<256x4xf32>
    %27 = arith.truncf %26 : vector<256x4xf32> to vector<256x4xbf16>
    %c2 = arith.constant 2 : index
    %c0_16 = arith.constant 0 : index
    %c0_17 = arith.constant 0 : index
    %28 = vector.load %arg5[%c2, %c0_16, %c0_17] : memref<9x4x32xbf16, #tpu.memory_space<vmem>>, vector<1x4x32xbf16>
    %29 = vector.shape_cast %28 : vector<1x4x32xbf16> to vector<4x32xbf16>
    %cst_18 = arith.constant dense<0.000000e+00> : vector<256x32xf32>
    %30 = tpu.matmul %27, %29, %cst_18 {dimension_numbers = #tpu.dot_dimension_numbers<[1], [0], [0], [1], [0, 0, 1, 1], [], []>} : vector<256x4xbf16>, vector<4x32xbf16>, vector<256x32xf32> -> vector<256x32xf32>
    %31 = arith.addf %22, %30 : vector<256x32xf32>
    %32 = vector.extract_strided_slice %5 {offsets = [16, 0], sizes = [256, 4], strides = [1, 1]} : vector<290x4xf32> to vector<256x4xf32>
    %33 = vector.extract_strided_slice %1 {offsets = [0, 3], sizes = [256, 1], strides = [1, 1]} : vector<256x9xf32> to vector<256x1xf32>
    %34 = vector.broadcast %33 : vector<256x1xf32> to vector<256x4xf32>
    %35 = arith.mulf %32, %34 : vector<256x4xf32>
    %36 = arith.truncf %35 : vector<256x4xf32> to vector<256x4xbf16>
    %c3 = arith.constant 3 : index
    %c0_19 = arith.constant 0 : index
    %c0_20 = arith.constant 0 : index
    %37 = vector.load %arg5[%c3, %c0_19, %c0_20] : memref<9x4x32xbf16, #tpu.memory_space<vmem>>, vector<1x4x32xbf16>
    %38 = vector.shape_cast %37 : vector<1x4x32xbf16> to vector<4x32xbf16>
    %cst_21 = arith.constant dense<0.000000e+00> : vector<256x32xf32>
    %39 = tpu.matmul %36, %38, %cst_21 {dimension_numbers = #tpu.dot_dimension_numbers<[1], [0], [0], [1], [0, 0, 1, 1], [], []>} : vector<256x4xbf16>, vector<4x32xbf16>, vector<256x32xf32> -> vector<256x32xf32>
    %40 = arith.addf %31, %39 : vector<256x32xf32>
    %41 = vector.extract_strided_slice %5 {offsets = [17, 0], sizes = [256, 4], strides = [1, 1]} : vector<290x4xf32> to vector<256x4xf32>
    %42 = arith.truncf %41 : vector<256x4xf32> to vector<256x4xbf16>
    %c4 = arith.constant 4 : index
    %c0_22 = arith.constant 0 : index
    %c0_23 = arith.constant 0 : index
    %43 = vector.load %arg5[%c4, %c0_22, %c0_23] : memref<9x4x32xbf16, #tpu.memory_space<vmem>>, vector<1x4x32xbf16>
    %44 = vector.shape_cast %43 : vector<1x4x32xbf16> to vector<4x32xbf16>
    %cst_24 = arith.constant dense<0.000000e+00> : vector<256x32xf32>
    %45 = tpu.matmul %42, %44, %cst_24 {dimension_numbers = #tpu.dot_dimension_numbers<[1], [0], [0], [1], [0, 0, 1, 1], [], []>} : vector<256x4xbf16>, vector<4x32xbf16>, vector<256x32xf32> -> vector<256x32xf32>
    %46 = arith.addf %40, %45 : vector<256x32xf32>
    %47 = vector.extract_strided_slice %5 {offsets = [18, 0], sizes = [256, 4], strides = [1, 1]} : vector<290x4xf32> to vector<256x4xf32>
    %48 = vector.extract_strided_slice %1 {offsets = [0, 5], sizes = [256, 1], strides = [1, 1]} : vector<256x9xf32> to vector<256x1xf32>
    %49 = vector.broadcast %48 : vector<256x1xf32> to vector<256x4xf32>
    %50 = arith.mulf %47, %49 : vector<256x4xf32>
    %51 = arith.truncf %50 : vector<256x4xf32> to vector<256x4xbf16>
    %c5 = arith.constant 5 : index
    %c0_25 = arith.constant 0 : index
    %c0_26 = arith.constant 0 : index
    %52 = vector.load %arg5[%c5, %c0_25, %c0_26] : memref<9x4x32xbf16, #tpu.memory_space<vmem>>, vector<1x4x32xbf16>
    %53 = vector.shape_cast %52 : vector<1x4x32xbf16> to vector<4x32xbf16>
    %cst_27 = arith.constant dense<0.000000e+00> : vector<256x32xf32>
    %54 = tpu.matmul %51, %53, %cst_27 {dimension_numbers = #tpu.dot_dimension_numbers<[1], [0], [0], [1], [0, 0, 1, 1], [], []>} : vector<256x4xbf16>, vector<4x32xbf16>, vector<256x32xf32> -> vector<256x32xf32>
    %55 = arith.addf %46, %54 : vector<256x32xf32>
    %56 = vector.extract_strided_slice %5 {offsets = [32, 0], sizes = [256, 4], strides = [1, 1]} : vector<290x4xf32> to vector<256x4xf32>
    %57 = vector.extract_strided_slice %1 {offsets = [0, 6], sizes = [256, 1], strides = [1, 1]} : vector<256x9xf32> to vector<256x1xf32>
    %58 = vector.broadcast %57 : vector<256x1xf32> to vector<256x4xf32>
    %59 = arith.mulf %56, %58 : vector<256x4xf32>
    %60 = arith.truncf %59 : vector<256x4xf32> to vector<256x4xbf16>
    %c6 = arith.constant 6 : index
    %c0_28 = arith.constant 0 : index
    %c0_29 = arith.constant 0 : index
    %61 = vector.load %arg5[%c6, %c0_28, %c0_29] : memref<9x4x32xbf16, #tpu.memory_space<vmem>>, vector<1x4x32xbf16>
    %62 = vector.shape_cast %61 : vector<1x4x32xbf16> to vector<4x32xbf16>
    %cst_30 = arith.constant dense<0.000000e+00> : vector<256x32xf32>
    %63 = tpu.matmul %60, %62, %cst_30 {dimension_numbers = #tpu.dot_dimension_numbers<[1], [0], [0], [1], [0, 0, 1, 1], [], []>} : vector<256x4xbf16>, vector<4x32xbf16>, vector<256x32xf32> -> vector<256x32xf32>
    %64 = arith.addf %55, %63 : vector<256x32xf32>
    %65 = vector.extract_strided_slice %5 {offsets = [33, 0], sizes = [256, 4], strides = [1, 1]} : vector<290x4xf32> to vector<256x4xf32>
    %66 = arith.truncf %65 : vector<256x4xf32> to vector<256x4xbf16>
    %c7 = arith.constant 7 : index
    %c0_31 = arith.constant 0 : index
    %c0_32 = arith.constant 0 : index
    %67 = vector.load %arg5[%c7, %c0_31, %c0_32] : memref<9x4x32xbf16, #tpu.memory_space<vmem>>, vector<1x4x32xbf16>
    %68 = vector.shape_cast %67 : vector<1x4x32xbf16> to vector<4x32xbf16>
    %cst_33 = arith.constant dense<0.000000e+00> : vector<256x32xf32>
    %69 = tpu.matmul %66, %68, %cst_33 {dimension_numbers = #tpu.dot_dimension_numbers<[1], [0], [0], [1], [0, 0, 1, 1], [], []>} : vector<256x4xbf16>, vector<4x32xbf16>, vector<256x32xf32> -> vector<256x32xf32>
    %70 = arith.addf %64, %69 : vector<256x32xf32>
    %71 = vector.extract_strided_slice %5 {offsets = [34, 0], sizes = [256, 4], strides = [1, 1]} : vector<290x4xf32> to vector<256x4xf32>
    %72 = vector.extract_strided_slice %1 {offsets = [0, 8], sizes = [256, 1], strides = [1, 1]} : vector<256x9xf32> to vector<256x1xf32>
    %73 = vector.broadcast %72 : vector<256x1xf32> to vector<256x4xf32>
    %74 = arith.mulf %71, %73 : vector<256x4xf32>
    %75 = arith.truncf %74 : vector<256x4xf32> to vector<256x4xbf16>
    %c8 = arith.constant 8 : index
    %c0_34 = arith.constant 0 : index
    %c0_35 = arith.constant 0 : index
    %76 = vector.load %arg5[%c8, %c0_34, %c0_35] : memref<9x4x32xbf16, #tpu.memory_space<vmem>>, vector<1x4x32xbf16>
    %77 = vector.shape_cast %76 : vector<1x4x32xbf16> to vector<4x32xbf16>
    %cst_36 = arith.constant dense<0.000000e+00> : vector<256x32xf32>
    %78 = tpu.matmul %75, %77, %cst_36 {dimension_numbers = #tpu.dot_dimension_numbers<[1], [0], [0], [1], [0, 0, 1, 1], [], []>} : vector<256x4xbf16>, vector<4x32xbf16>, vector<256x32xf32> -> vector<256x32xf32>
    %79 = arith.addf %70, %78 : vector<256x32xf32>
    %cst_37 = arith.constant 0.000000e+00 : f32
    %80 = vector.broadcast %cst_37 : f32 to vector<256x32xf32>
    %81 = arith.maximumf %79, %80 : vector<256x32xf32>
    %cst_38 = arith.constant 0.000000e+00 : f32
    %82 = vector.broadcast %cst_38 : f32 to vector<17x32xf32>
    %83 = tpu.concatenate %82, %81, %82 in 0 : vector<17x32xf32>, vector<256x32xf32>, vector<17x32xf32> -> vector<290x32xf32>
    %c0_39 = arith.constant 0 : index
    %c0_40 = arith.constant 0 : index
    %84 = vector.load %arg6[%c0_39, %c0_40] : memref<9x32xbf16, #tpu.memory_space<vmem>>, vector<9x32xbf16>
    %cst_41 = arith.constant dense<0.000000e+00> : vector<256x32xf32>
    %85 = tpu.matmul %0, %84, %cst_41 {dimension_numbers = #tpu.dot_dimension_numbers<[1], [0], [0], [1], [0, 0, 1, 1], [], []>} : vector<256x9xbf16>, vector<9x32xbf16>, vector<256x32xf32> -> vector<256x32xf32>
    %86 = vector.extract_strided_slice %83 {offsets = [0, 0], sizes = [256, 32], strides = [1, 1]} : vector<290x32xf32> to vector<256x32xf32>
    %87 = vector.extract_strided_slice %1 {offsets = [0, 0], sizes = [256, 1], strides = [1, 1]} : vector<256x9xf32> to vector<256x1xf32>
    %88 = vector.broadcast %87 : vector<256x1xf32> to vector<256x32xf32>
    %89 = arith.mulf %86, %88 : vector<256x32xf32>
    %90 = arith.truncf %89 : vector<256x32xf32> to vector<256x32xbf16>
    %c0_42 = arith.constant 0 : index
    %c0_43 = arith.constant 0 : index
    %c0_44 = arith.constant 0 : index
    %91 = vector.load %arg7[%c0_42, %c0_43, %c0_44] : memref<9x32x32xbf16, #tpu.memory_space<vmem>>, vector<1x32x32xbf16>
    %92 = vector.shape_cast %91 : vector<1x32x32xbf16> to vector<32x32xbf16>
    %cst_45 = arith.constant dense<0.000000e+00> : vector<256x32xf32>
    %93 = tpu.matmul %90, %92, %cst_45 {dimension_numbers = #tpu.dot_dimension_numbers<[1], [0], [0], [1], [0, 0, 1, 1], [], []>} : vector<256x32xbf16>, vector<32x32xbf16>, vector<256x32xf32> -> vector<256x32xf32>
    %94 = arith.addf %85, %93 : vector<256x32xf32>
    %95 = vector.extract_strided_slice %83 {offsets = [1, 0], sizes = [256, 32], strides = [1, 1]} : vector<290x32xf32> to vector<256x32xf32>
    %96 = arith.truncf %95 : vector<256x32xf32> to vector<256x32xbf16>
    %c1_46 = arith.constant 1 : index
    %c0_47 = arith.constant 0 : index
    %c0_48 = arith.constant 0 : index
    %97 = vector.load %arg7[%c1_46, %c0_47, %c0_48] : memref<9x32x32xbf16, #tpu.memory_space<vmem>>, vector<1x32x32xbf16>
    %98 = vector.shape_cast %97 : vector<1x32x32xbf16> to vector<32x32xbf16>
    %cst_49 = arith.constant dense<0.000000e+00> : vector<256x32xf32>
    %99 = tpu.matmul %96, %98, %cst_49 {dimension_numbers = #tpu.dot_dimension_numbers<[1], [0], [0], [1], [0, 0, 1, 1], [], []>} : vector<256x32xbf16>, vector<32x32xbf16>, vector<256x32xf32> -> vector<256x32xf32>
    %100 = arith.addf %94, %99 : vector<256x32xf32>
    %101 = vector.extract_strided_slice %83 {offsets = [2, 0], sizes = [256, 32], strides = [1, 1]} : vector<290x32xf32> to vector<256x32xf32>
    %102 = vector.extract_strided_slice %1 {offsets = [0, 2], sizes = [256, 1], strides = [1, 1]} : vector<256x9xf32> to vector<256x1xf32>
    %103 = vector.broadcast %102 : vector<256x1xf32> to vector<256x32xf32>
    %104 = arith.mulf %101, %103 : vector<256x32xf32>
    %105 = arith.truncf %104 : vector<256x32xf32> to vector<256x32xbf16>
    %c2_50 = arith.constant 2 : index
    %c0_51 = arith.constant 0 : index
    %c0_52 = arith.constant 0 : index
    %106 = vector.load %arg7[%c2_50, %c0_51, %c0_52] : memref<9x32x32xbf16, #tpu.memory_space<vmem>>, vector<1x32x32xbf16>
    %107 = vector.shape_cast %106 : vector<1x32x32xbf16> to vector<32x32xbf16>
    %cst_53 = arith.constant dense<0.000000e+00> : vector<256x32xf32>
    %108 = tpu.matmul %105, %107, %cst_53 {dimension_numbers = #tpu.dot_dimension_numbers<[1], [0], [0], [1], [0, 0, 1, 1], [], []>} : vector<256x32xbf16>, vector<32x32xbf16>, vector<256x32xf32> -> vector<256x32xf32>
    %109 = arith.addf %100, %108 : vector<256x32xf32>
    %110 = vector.extract_strided_slice %83 {offsets = [16, 0], sizes = [256, 32], strides = [1, 1]} : vector<290x32xf32> to vector<256x32xf32>
    %111 = vector.extract_strided_slice %1 {offsets = [0, 3], sizes = [256, 1], strides = [1, 1]} : vector<256x9xf32> to vector<256x1xf32>
    %112 = vector.broadcast %111 : vector<256x1xf32> to vector<256x32xf32>
    %113 = arith.mulf %110, %112 : vector<256x32xf32>
    %114 = arith.truncf %113 : vector<256x32xf32> to vector<256x32xbf16>
    %c3_54 = arith.constant 3 : index
    %c0_55 = arith.constant 0 : index
    %c0_56 = arith.constant 0 : index
    %115 = vector.load %arg7[%c3_54, %c0_55, %c0_56] : memref<9x32x32xbf16, #tpu.memory_space<vmem>>, vector<1x32x32xbf16>
    %116 = vector.shape_cast %115 : vector<1x32x32xbf16> to vector<32x32xbf16>
    %cst_57 = arith.constant dense<0.000000e+00> : vector<256x32xf32>
    %117 = tpu.matmul %114, %116, %cst_57 {dimension_numbers = #tpu.dot_dimension_numbers<[1], [0], [0], [1], [0, 0, 1, 1], [], []>} : vector<256x32xbf16>, vector<32x32xbf16>, vector<256x32xf32> -> vector<256x32xf32>
    %118 = arith.addf %109, %117 : vector<256x32xf32>
    %119 = vector.extract_strided_slice %83 {offsets = [17, 0], sizes = [256, 32], strides = [1, 1]} : vector<290x32xf32> to vector<256x32xf32>
    %120 = arith.truncf %119 : vector<256x32xf32> to vector<256x32xbf16>
    %c4_58 = arith.constant 4 : index
    %c0_59 = arith.constant 0 : index
    %c0_60 = arith.constant 0 : index
    %121 = vector.load %arg7[%c4_58, %c0_59, %c0_60] : memref<9x32x32xbf16, #tpu.memory_space<vmem>>, vector<1x32x32xbf16>
    %122 = vector.shape_cast %121 : vector<1x32x32xbf16> to vector<32x32xbf16>
    %cst_61 = arith.constant dense<0.000000e+00> : vector<256x32xf32>
    %123 = tpu.matmul %120, %122, %cst_61 {dimension_numbers = #tpu.dot_dimension_numbers<[1], [0], [0], [1], [0, 0, 1, 1], [], []>} : vector<256x32xbf16>, vector<32x32xbf16>, vector<256x32xf32> -> vector<256x32xf32>
    %124 = arith.addf %118, %123 : vector<256x32xf32>
    %125 = vector.extract_strided_slice %83 {offsets = [18, 0], sizes = [256, 32], strides = [1, 1]} : vector<290x32xf32> to vector<256x32xf32>
    %126 = vector.extract_strided_slice %1 {offsets = [0, 5], sizes = [256, 1], strides = [1, 1]} : vector<256x9xf32> to vector<256x1xf32>
    %127 = vector.broadcast %126 : vector<256x1xf32> to vector<256x32xf32>
    %128 = arith.mulf %125, %127 : vector<256x32xf32>
    %129 = arith.truncf %128 : vector<256x32xf32> to vector<256x32xbf16>
    %c5_62 = arith.constant 5 : index
    %c0_63 = arith.constant 0 : index
    %c0_64 = arith.constant 0 : index
    %130 = vector.load %arg7[%c5_62, %c0_63, %c0_64] : memref<9x32x32xbf16, #tpu.memory_space<vmem>>, vector<1x32x32xbf16>
    %131 = vector.shape_cast %130 : vector<1x32x32xbf16> to vector<32x32xbf16>
    %cst_65 = arith.constant dense<0.000000e+00> : vector<256x32xf32>
    %132 = tpu.matmul %129, %131, %cst_65 {dimension_numbers = #tpu.dot_dimension_numbers<[1], [0], [0], [1], [0, 0, 1, 1], [], []>} : vector<256x32xbf16>, vector<32x32xbf16>, vector<256x32xf32> -> vector<256x32xf32>
    %133 = arith.addf %124, %132 : vector<256x32xf32>
    %134 = vector.extract_strided_slice %83 {offsets = [32, 0], sizes = [256, 32], strides = [1, 1]} : vector<290x32xf32> to vector<256x32xf32>
    %135 = vector.extract_strided_slice %1 {offsets = [0, 6], sizes = [256, 1], strides = [1, 1]} : vector<256x9xf32> to vector<256x1xf32>
    %136 = vector.broadcast %135 : vector<256x1xf32> to vector<256x32xf32>
    %137 = arith.mulf %134, %136 : vector<256x32xf32>
    %138 = arith.truncf %137 : vector<256x32xf32> to vector<256x32xbf16>
    %c6_66 = arith.constant 6 : index
    %c0_67 = arith.constant 0 : index
    %c0_68 = arith.constant 0 : index
    %139 = vector.load %arg7[%c6_66, %c0_67, %c0_68] : memref<9x32x32xbf16, #tpu.memory_space<vmem>>, vector<1x32x32xbf16>
    %140 = vector.shape_cast %139 : vector<1x32x32xbf16> to vector<32x32xbf16>
    %cst_69 = arith.constant dense<0.000000e+00> : vector<256x32xf32>
    %141 = tpu.matmul %138, %140, %cst_69 {dimension_numbers = #tpu.dot_dimension_numbers<[1], [0], [0], [1], [0, 0, 1, 1], [], []>} : vector<256x32xbf16>, vector<32x32xbf16>, vector<256x32xf32> -> vector<256x32xf32>
    %142 = arith.addf %133, %141 : vector<256x32xf32>
    %143 = vector.extract_strided_slice %83 {offsets = [33, 0], sizes = [256, 32], strides = [1, 1]} : vector<290x32xf32> to vector<256x32xf32>
    %144 = arith.truncf %143 : vector<256x32xf32> to vector<256x32xbf16>
    %c7_70 = arith.constant 7 : index
    %c0_71 = arith.constant 0 : index
    %c0_72 = arith.constant 0 : index
    %145 = vector.load %arg7[%c7_70, %c0_71, %c0_72] : memref<9x32x32xbf16, #tpu.memory_space<vmem>>, vector<1x32x32xbf16>
    %146 = vector.shape_cast %145 : vector<1x32x32xbf16> to vector<32x32xbf16>
    %cst_73 = arith.constant dense<0.000000e+00> : vector<256x32xf32>
    %147 = tpu.matmul %144, %146, %cst_73 {dimension_numbers = #tpu.dot_dimension_numbers<[1], [0], [0], [1], [0, 0, 1, 1], [], []>} : vector<256x32xbf16>, vector<32x32xbf16>, vector<256x32xf32> -> vector<256x32xf32>
    %148 = arith.addf %142, %147 : vector<256x32xf32>
    %149 = vector.extract_strided_slice %83 {offsets = [34, 0], sizes = [256, 32], strides = [1, 1]} : vector<290x32xf32> to vector<256x32xf32>
    %150 = vector.extract_strided_slice %1 {offsets = [0, 8], sizes = [256, 1], strides = [1, 1]} : vector<256x9xf32> to vector<256x1xf32>
    %151 = vector.broadcast %150 : vector<256x1xf32> to vector<256x32xf32>
    %152 = arith.mulf %149, %151 : vector<256x32xf32>
    %153 = arith.truncf %152 : vector<256x32xf32> to vector<256x32xbf16>
    %c8_74 = arith.constant 8 : index
    %c0_75 = arith.constant 0 : index
    %c0_76 = arith.constant 0 : index
    %154 = vector.load %arg7[%c8_74, %c0_75, %c0_76] : memref<9x32x32xbf16, #tpu.memory_space<vmem>>, vector<1x32x32xbf16>
    %155 = vector.shape_cast %154 : vector<1x32x32xbf16> to vector<32x32xbf16>
    %cst_77 = arith.constant dense<0.000000e+00> : vector<256x32xf32>
    %156 = tpu.matmul %153, %155, %cst_77 {dimension_numbers = #tpu.dot_dimension_numbers<[1], [0], [0], [1], [0, 0, 1, 1], [], []>} : vector<256x32xbf16>, vector<32x32xbf16>, vector<256x32xf32> -> vector<256x32xf32>
    %157 = arith.addf %148, %156 : vector<256x32xf32>
    %cst_78 = arith.constant dense<0.000000e+00> : vector<32xf32>
    %158 = vector.multi_reduction <add>, %157, %cst_78 [0] : vector<256x32xf32> to vector<32xf32>
    %159 = vector.shape_cast %158 : vector<32xf32> to vector<1x32xf32>
    %cst_79 = arith.constant 3.906250e-03 : f32
    %160 = vector.broadcast %cst_79 : f32 to vector<1x32xf32>
    %161 = arith.mulf %159, %160 : vector<1x32xf32>
    %162 = vector.broadcast %161 : vector<1x32xf32> to vector<256x32xf32>
    %163 = arith.subf %157, %162 : vector<256x32xf32>
    %164 = arith.mulf %163, %163 : vector<256x32xf32>
    %cst_80 = arith.constant dense<0.000000e+00> : vector<32xf32>
    %165 = vector.multi_reduction <add>, %164, %cst_80 [0] : vector<256x32xf32> to vector<32xf32>
    %166 = vector.shape_cast %165 : vector<32xf32> to vector<1x32xf32>
    %cst_81 = arith.constant 3.906250e-03 : f32
    %167 = vector.broadcast %cst_81 : f32 to vector<1x32xf32>
    %168 = arith.mulf %166, %167 : vector<1x32xf32>
    %cst_82 = arith.constant 9.99999974E-6 : f32
    %169 = vector.broadcast %cst_82 : f32 to vector<1x32xf32>
    %170 = arith.addf %168, %169 : vector<1x32xf32>
    %171 = math.rsqrt %170 : vector<1x32xf32>
    %172 = vector.broadcast %171 : vector<1x32xf32> to vector<256x32xf32>
    %173 = arith.mulf %163, %172 : vector<256x32xf32>
    %c0_83 = arith.constant 0 : index
    %c0_84 = arith.constant 0 : index
    %174 = vector.load %arg10[%c0_83, %c0_84] : memref<1x32xf32, #tpu.memory_space<vmem>>, vector<1x32xf32>
    %175 = vector.broadcast %174 : vector<1x32xf32> to vector<256x32xf32>
    %176 = arith.mulf %173, %175 : vector<256x32xf32>
    %c0_85 = arith.constant 0 : index
    %c0_86 = arith.constant 0 : index
    %177 = vector.load %arg11[%c0_85, %c0_86] : memref<1x32xf32, #tpu.memory_space<vmem>>, vector<1x32xf32>
    %178 = vector.broadcast %177 : vector<1x32xf32> to vector<256x32xf32>
    %179 = arith.addf %176, %178 : vector<256x32xf32>
    %cst_87 = arith.constant 0.000000e+00 : f32
    %180 = vector.broadcast %cst_87 : f32 to vector<256x32xf32>
    %181 = arith.maximumf %179, %180 : vector<256x32xf32>
    %cst_88 = arith.constant 0.000000e+00 : f32
    %182 = vector.broadcast %cst_88 : f32 to vector<17x32xf32>
    %183 = tpu.concatenate %182, %181, %182 in 0 : vector<17x32xf32>, vector<256x32xf32>, vector<17x32xf32> -> vector<290x32xf32>
    %c0_89 = arith.constant 0 : index
    %c0_90 = arith.constant 0 : index
    %184 = vector.load %arg8[%c0_89, %c0_90] : memref<9x4xbf16, #tpu.memory_space<vmem>>, vector<9x4xbf16>
    %cst_91 = arith.constant dense<0.000000e+00> : vector<256x4xf32>
    %185 = tpu.matmul %0, %184, %cst_91 {dimension_numbers = #tpu.dot_dimension_numbers<[1], [0], [0], [1], [0, 0, 1, 1], [], []>} : vector<256x9xbf16>, vector<9x4xbf16>, vector<256x4xf32> -> vector<256x4xf32>
    %186 = vector.extract_strided_slice %183 {offsets = [0, 0], sizes = [256, 32], strides = [1, 1]} : vector<290x32xf32> to vector<256x32xf32>
    %187 = vector.extract_strided_slice %1 {offsets = [0, 0], sizes = [256, 1], strides = [1, 1]} : vector<256x9xf32> to vector<256x1xf32>
    %188 = vector.broadcast %187 : vector<256x1xf32> to vector<256x32xf32>
    %189 = arith.mulf %186, %188 : vector<256x32xf32>
    %190 = arith.truncf %189 : vector<256x32xf32> to vector<256x32xbf16>
    %c0_92 = arith.constant 0 : index
    %c0_93 = arith.constant 0 : index
    %c0_94 = arith.constant 0 : index
    %191 = vector.load %arg9[%c0_92, %c0_93, %c0_94] : memref<9x32x4xbf16, #tpu.memory_space<vmem>>, vector<1x32x4xbf16>
    %192 = vector.shape_cast %191 : vector<1x32x4xbf16> to vector<32x4xbf16>
    %cst_95 = arith.constant dense<0.000000e+00> : vector<256x4xf32>
    %193 = tpu.matmul %190, %192, %cst_95 {dimension_numbers = #tpu.dot_dimension_numbers<[1], [0], [0], [1], [0, 0, 1, 1], [], []>} : vector<256x32xbf16>, vector<32x4xbf16>, vector<256x4xf32> -> vector<256x4xf32>
    %194 = arith.addf %185, %193 : vector<256x4xf32>
    %195 = vector.extract_strided_slice %183 {offsets = [1, 0], sizes = [256, 32], strides = [1, 1]} : vector<290x32xf32> to vector<256x32xf32>
    %196 = arith.truncf %195 : vector<256x32xf32> to vector<256x32xbf16>
    %c1_96 = arith.constant 1 : index
    %c0_97 = arith.constant 0 : index
    %c0_98 = arith.constant 0 : index
    %197 = vector.load %arg9[%c1_96, %c0_97, %c0_98] : memref<9x32x4xbf16, #tpu.memory_space<vmem>>, vector<1x32x4xbf16>
    %198 = vector.shape_cast %197 : vector<1x32x4xbf16> to vector<32x4xbf16>
    %cst_99 = arith.constant dense<0.000000e+00> : vector<256x4xf32>
    %199 = tpu.matmul %196, %198, %cst_99 {dimension_numbers = #tpu.dot_dimension_numbers<[1], [0], [0], [1], [0, 0, 1, 1], [], []>} : vector<256x32xbf16>, vector<32x4xbf16>, vector<256x4xf32> -> vector<256x4xf32>
    %200 = arith.addf %194, %199 : vector<256x4xf32>
    %201 = vector.extract_strided_slice %183 {offsets = [2, 0], sizes = [256, 32], strides = [1, 1]} : vector<290x32xf32> to vector<256x32xf32>
    %202 = vector.extract_strided_slice %1 {offsets = [0, 2], sizes = [256, 1], strides = [1, 1]} : vector<256x9xf32> to vector<256x1xf32>
    %203 = vector.broadcast %202 : vector<256x1xf32> to vector<256x32xf32>
    %204 = arith.mulf %201, %203 : vector<256x32xf32>
    %205 = arith.truncf %204 : vector<256x32xf32> to vector<256x32xbf16>
    %c2_100 = arith.constant 2 : index
    %c0_101 = arith.constant 0 : index
    %c0_102 = arith.constant 0 : index
    %206 = vector.load %arg9[%c2_100, %c0_101, %c0_102] : memref<9x32x4xbf16, #tpu.memory_space<vmem>>, vector<1x32x4xbf16>
    %207 = vector.shape_cast %206 : vector<1x32x4xbf16> to vector<32x4xbf16>
    %cst_103 = arith.constant dense<0.000000e+00> : vector<256x4xf32>
    %208 = tpu.matmul %205, %207, %cst_103 {dimension_numbers = #tpu.dot_dimension_numbers<[1], [0], [0], [1], [0, 0, 1, 1], [], []>} : vector<256x32xbf16>, vector<32x4xbf16>, vector<256x4xf32> -> vector<256x4xf32>
    %209 = arith.addf %200, %208 : vector<256x4xf32>
    %210 = vector.extract_strided_slice %183 {offsets = [16, 0], sizes = [256, 32], strides = [1, 1]} : vector<290x32xf32> to vector<256x32xf32>
    %211 = vector.extract_strided_slice %1 {offsets = [0, 3], sizes = [256, 1], strides = [1, 1]} : vector<256x9xf32> to vector<256x1xf32>
    %212 = vector.broadcast %211 : vector<256x1xf32> to vector<256x32xf32>
    %213 = arith.mulf %210, %212 : vector<256x32xf32>
    %214 = arith.truncf %213 : vector<256x32xf32> to vector<256x32xbf16>
    %c3_104 = arith.constant 3 : index
    %c0_105 = arith.constant 0 : index
    %c0_106 = arith.constant 0 : index
    %215 = vector.load %arg9[%c3_104, %c0_105, %c0_106] : memref<9x32x4xbf16, #tpu.memory_space<vmem>>, vector<1x32x4xbf16>
    %216 = vector.shape_cast %215 : vector<1x32x4xbf16> to vector<32x4xbf16>
    %cst_107 = arith.constant dense<0.000000e+00> : vector<256x4xf32>
    %217 = tpu.matmul %214, %216, %cst_107 {dimension_numbers = #tpu.dot_dimension_numbers<[1], [0], [0], [1], [0, 0, 1, 1], [], []>} : vector<256x32xbf16>, vector<32x4xbf16>, vector<256x4xf32> -> vector<256x4xf32>
    %218 = arith.addf %209, %217 : vector<256x4xf32>
    %219 = vector.extract_strided_slice %183 {offsets = [17, 0], sizes = [256, 32], strides = [1, 1]} : vector<290x32xf32> to vector<256x32xf32>
    %220 = arith.truncf %219 : vector<256x32xf32> to vector<256x32xbf16>
    %c4_108 = arith.constant 4 : index
    %c0_109 = arith.constant 0 : index
    %c0_110 = arith.constant 0 : index
    %221 = vector.load %arg9[%c4_108, %c0_109, %c0_110] : memref<9x32x4xbf16, #tpu.memory_space<vmem>>, vector<1x32x4xbf16>
    %222 = vector.shape_cast %221 : vector<1x32x4xbf16> to vector<32x4xbf16>
    %cst_111 = arith.constant dense<0.000000e+00> : vector<256x4xf32>
    %223 = tpu.matmul %220, %222, %cst_111 {dimension_numbers = #tpu.dot_dimension_numbers<[1], [0], [0], [1], [0, 0, 1, 1], [], []>} : vector<256x32xbf16>, vector<32x4xbf16>, vector<256x4xf32> -> vector<256x4xf32>
    %224 = arith.addf %218, %223 : vector<256x4xf32>
    %225 = vector.extract_strided_slice %183 {offsets = [18, 0], sizes = [256, 32], strides = [1, 1]} : vector<290x32xf32> to vector<256x32xf32>
    %226 = vector.extract_strided_slice %1 {offsets = [0, 5], sizes = [256, 1], strides = [1, 1]} : vector<256x9xf32> to vector<256x1xf32>
    %227 = vector.broadcast %226 : vector<256x1xf32> to vector<256x32xf32>
    %228 = arith.mulf %225, %227 : vector<256x32xf32>
    %229 = arith.truncf %228 : vector<256x32xf32> to vector<256x32xbf16>
    %c5_112 = arith.constant 5 : index
    %c0_113 = arith.constant 0 : index
    %c0_114 = arith.constant 0 : index
    %230 = vector.load %arg9[%c5_112, %c0_113, %c0_114] : memref<9x32x4xbf16, #tpu.memory_space<vmem>>, vector<1x32x4xbf16>
    %231 = vector.shape_cast %230 : vector<1x32x4xbf16> to vector<32x4xbf16>
    %cst_115 = arith.constant dense<0.000000e+00> : vector<256x4xf32>
    %232 = tpu.matmul %229, %231, %cst_115 {dimension_numbers = #tpu.dot_dimension_numbers<[1], [0], [0], [1], [0, 0, 1, 1], [], []>} : vector<256x32xbf16>, vector<32x4xbf16>, vector<256x4xf32> -> vector<256x4xf32>
    %233 = arith.addf %224, %232 : vector<256x4xf32>
    %234 = vector.extract_strided_slice %183 {offsets = [32, 0], sizes = [256, 32], strides = [1, 1]} : vector<290x32xf32> to vector<256x32xf32>
    %235 = vector.extract_strided_slice %1 {offsets = [0, 6], sizes = [256, 1], strides = [1, 1]} : vector<256x9xf32> to vector<256x1xf32>
    %236 = vector.broadcast %235 : vector<256x1xf32> to vector<256x32xf32>
    %237 = arith.mulf %234, %236 : vector<256x32xf32>
    %238 = arith.truncf %237 : vector<256x32xf32> to vector<256x32xbf16>
    %c6_116 = arith.constant 6 : index
    %c0_117 = arith.constant 0 : index
    %c0_118 = arith.constant 0 : index
    %239 = vector.load %arg9[%c6_116, %c0_117, %c0_118] : memref<9x32x4xbf16, #tpu.memory_space<vmem>>, vector<1x32x4xbf16>
    %240 = vector.shape_cast %239 : vector<1x32x4xbf16> to vector<32x4xbf16>
    %cst_119 = arith.constant dense<0.000000e+00> : vector<256x4xf32>
    %241 = tpu.matmul %238, %240, %cst_119 {dimension_numbers = #tpu.dot_dimension_numbers<[1], [0], [0], [1], [0, 0, 1, 1], [], []>} : vector<256x32xbf16>, vector<32x4xbf16>, vector<256x4xf32> -> vector<256x4xf32>
    %242 = arith.addf %233, %241 : vector<256x4xf32>
    %243 = vector.extract_strided_slice %183 {offsets = [33, 0], sizes = [256, 32], strides = [1, 1]} : vector<290x32xf32> to vector<256x32xf32>
    %244 = arith.truncf %243 : vector<256x32xf32> to vector<256x32xbf16>
    %c7_120 = arith.constant 7 : index
    %c0_121 = arith.constant 0 : index
    %c0_122 = arith.constant 0 : index
    %245 = vector.load %arg9[%c7_120, %c0_121, %c0_122] : memref<9x32x4xbf16, #tpu.memory_space<vmem>>, vector<1x32x4xbf16>
    %246 = vector.shape_cast %245 : vector<1x32x4xbf16> to vector<32x4xbf16>
    %cst_123 = arith.constant dense<0.000000e+00> : vector<256x4xf32>
    %247 = tpu.matmul %244, %246, %cst_123 {dimension_numbers = #tpu.dot_dimension_numbers<[1], [0], [0], [1], [0, 0, 1, 1], [], []>} : vector<256x32xbf16>, vector<32x4xbf16>, vector<256x4xf32> -> vector<256x4xf32>
    %248 = arith.addf %242, %247 : vector<256x4xf32>
    %249 = vector.extract_strided_slice %183 {offsets = [34, 0], sizes = [256, 32], strides = [1, 1]} : vector<290x32xf32> to vector<256x32xf32>
    %250 = vector.extract_strided_slice %1 {offsets = [0, 8], sizes = [256, 1], strides = [1, 1]} : vector<256x9xf32> to vector<256x1xf32>
    %251 = vector.broadcast %250 : vector<256x1xf32> to vector<256x32xf32>
    %252 = arith.mulf %249, %251 : vector<256x32xf32>
    %253 = arith.truncf %252 : vector<256x32xf32> to vector<256x32xbf16>
    %c8_124 = arith.constant 8 : index
    %c0_125 = arith.constant 0 : index
    %c0_126 = arith.constant 0 : index
    %254 = vector.load %arg9[%c8_124, %c0_125, %c0_126] : memref<9x32x4xbf16, #tpu.memory_space<vmem>>, vector<1x32x4xbf16>
    %255 = vector.shape_cast %254 : vector<1x32x4xbf16> to vector<32x4xbf16>
    %cst_127 = arith.constant dense<0.000000e+00> : vector<256x4xf32>
    %256 = tpu.matmul %253, %255, %cst_127 {dimension_numbers = #tpu.dot_dimension_numbers<[1], [0], [0], [1], [0, 0, 1, 1], [], []>} : vector<256x32xbf16>, vector<32x4xbf16>, vector<256x4xf32> -> vector<256x4xf32>
    %257 = arith.addf %248, %256 : vector<256x4xf32>
    %258 = tpu.transpose %257, [1, 0] : vector<256x4xf32> -> vector<4x256xf32>
    %c0_128 = arith.constant 0 : index
    %c0_129 = arith.constant 0 : index
    %c0_130 = arith.constant 0 : index
    %259 = vector.load %arg12[%c0_128, %c0_129, %c0_130] : memref<1x4x256xf32, #tpu.memory_space<vmem>>, vector<1x4x256xf32>
    %260 = vector.shape_cast %259 : vector<1x4x256xf32> to vector<4x256xf32>
    %261 = vector.shape_cast %258 : vector<4x256xf32> to vector<1x4x256xf32>
    tpu.vector_store %arg12[%c0_128, %c0_129, %c0_130], %261 {strides = array<i32>} : memref<1x4x256xf32, #tpu.memory_space<vmem>>, vector<1x4x256xf32>,
    return
  }
  func.func @transform_0(%arg0: i32) -> (i32, i32) {
    %c0_i32 = arith.constant 0 : i32
    %c0_i32_0 = arith.constant 0 : i32
    %c0_i32_1 = arith.constant 0 : i32
    return %c0_i32, %c0_i32_0 : i32, i32
  }
  func.func @transform_1(%arg0: i32) -> (i32, i32) {
    %c0_i32 = arith.constant 0 : i32
    %c0_i32_0 = arith.constant 0 : i32
    %c0_i32_1 = arith.constant 0 : i32
    return %c0_i32, %c0_i32_0 : i32, i32
  }
  func.func @transform_2(%arg0: i32) -> (i32, i32, i32) {
    %c0_i32 = arith.constant 0 : i32
    %c0_i32_0 = arith.constant 0 : i32
    %c0_i32_1 = arith.constant 0 : i32
    return %arg0, %c0_i32, %c0_i32_0 : i32, i32, i32
  }
  func.func @transform_3(%arg0: i32) -> (i32, i32) {
    %c0_i32 = arith.constant 0 : i32
    %c0_i32_0 = arith.constant 0 : i32
    %c0_i32_1 = arith.constant 0 : i32
    return %c0_i32, %c0_i32_0 : i32, i32
  }
  func.func @transform_4(%arg0: i32) -> (i32, i32, i32) {
    %c0_i32 = arith.constant 0 : i32
    %c0_i32_0 = arith.constant 0 : i32
    %c0_i32_1 = arith.constant 0 : i32
    %c0_i32_2 = arith.constant 0 : i32
    return %c0_i32, %c0_i32_0, %c0_i32_1 : i32, i32, i32
  }
  func.func @transform_5(%arg0: i32) -> (i32, i32) {
    %c0_i32 = arith.constant 0 : i32
    %c0_i32_0 = arith.constant 0 : i32
    %c0_i32_1 = arith.constant 0 : i32
    return %c0_i32, %c0_i32_0 : i32, i32
  }
  func.func @transform_6(%arg0: i32) -> (i32, i32, i32) {
    %c0_i32 = arith.constant 0 : i32
    %c0_i32_0 = arith.constant 0 : i32
    %c0_i32_1 = arith.constant 0 : i32
    %c0_i32_2 = arith.constant 0 : i32
    return %c0_i32, %c0_i32_0, %c0_i32_1 : i32, i32, i32
  }
  func.func @transform_7(%arg0: i32) -> (i32, i32) {
    %c0_i32 = arith.constant 0 : i32
    %c0_i32_0 = arith.constant 0 : i32
    %c0_i32_1 = arith.constant 0 : i32
    return %c0_i32, %c0_i32_0 : i32, i32
  }
  func.func @transform_8(%arg0: i32) -> (i32, i32, i32) {
    %c0_i32 = arith.constant 0 : i32
    %c0_i32_0 = arith.constant 0 : i32
    %c0_i32_1 = arith.constant 0 : i32
    %c0_i32_2 = arith.constant 0 : i32
    return %c0_i32, %c0_i32_0, %c0_i32_1 : i32, i32, i32
  }
  func.func @transform_9(%arg0: i32) -> (i32, i32) {
    %c0_i32 = arith.constant 0 : i32
    %c0_i32_0 = arith.constant 0 : i32
    %c0_i32_1 = arith.constant 0 : i32
    return %c0_i32, %c0_i32_0 : i32, i32
  }
  func.func @transform_10(%arg0: i32) -> (i32, i32) {
    %c0_i32 = arith.constant 0 : i32
    %c0_i32_0 = arith.constant 0 : i32
    %c0_i32_1 = arith.constant 0 : i32
    return %c0_i32, %c0_i32_0 : i32, i32
  }
  func.func @transform_11(%arg0: i32) -> (i32, i32, i32) {
    %c0_i32 = arith.constant 0 : i32
    %c0_i32_0 = arith.constant 0 : i32
    %c0_i32_1 = arith.constant 0 : i32
    return %arg0, %c0_i32, %c0_i32_0 : i32, i32, i32
  }
}

</mosaic_0001>

<bundles_post_ra>
// kernel: tode_denoise_func.1
= control target key start
LH: loop header
LB: loop body
LE: loop exit
PB: predicated region body
PF: predicated region fallthrough
CT: control target
= control target key end

     0   :  { %s14662_s17 = smov 0   ;;  %s19528_s0 = inlined_call_operand.vmem [shape: bf16[256,9], index: 0, kind: input, shape index: {}]   ;;  %s19529_s1 = inlined_call_operand.vmem [shape: f32[256,9], index: 1, kind: input, shape index: {}]   ;;  %s19530_s2 = inlined_call_operand.vmem [shape: f32[2,256,4], index: 2, kind: input, shape index: {}]   ;;  %s19531_s3 = inlined_call_operand.vmem [shape: bf16[9,32], index: 3, kind: input, shape index: {}]   ;;  %s19532_s4 = inlined_call_operand.vmem [shape: bf16[9,4,32], index: 4, kind: input, shape index: {}]   ;;  %s19533_s5 = inlined_call_operand.vmem [shape: bf16[9,32], index: 5, kind: input, shape index: {}]   ;;  %s19534_s6 = inlined_call_operand.vmem [shape: bf16[9,32,32], index: 6, kind: input, shape index: {}]   ;;  %s19535_s7 = inlined_call_operand.vmem [shape: bf16[9,4], index: 7, kind: input, shape index: {}]   ;;  %s19536_s8 = inlined_call_operand.vmem [shape: bf16[9,32,4], index: 8, kind: input, shape index: {}]   ;;  %s19537_s9 = inlined_call_operand.vmem [shape: f32[1,32], index: 9, kind: input, shape index: {}]   ;;  %s19538_s10 = inlined_call_operand.vmem [shape: f32[1,32], index: 10, kind: input, shape index: {}]   ;;  %s19539_s11 = inlined_call_operand.vmem [shape: f32[2,4,256], index: 11, kind: output, shape index: {}]  }
   0x1 LB: > { %s11335_s18 = sadd.s32 4294967295, %s14592_s17   ;;  %p11339_p0 = scmp.ge.s32.totalorder %s14592_s17, 1  ;;  %s14592_s17 = sphi %s14662_s17, %s21_s17  }
   0x2   : > { %p337_p1 = scmp.lt.s32.totalorder %s14592_s17, 3 }
   0x4   : > { %p338_p2 = pnand %p11339_p0, %p337_p1 }
   0x6   : > { %341 = sbr.rel (%p338_p2) target bundleno = 2697 (0xa89), region = 64 }
   0xd   : > { %v14673_v0 = vld [vmem:[%s19529_s1 + $0x10] sm:$0xff]  ;;  %v14678_v1 = vld [vmem:[%s19529_s1] sm:$0xff]  ;;  %v19540_v2 = vmov 0   ;;  %p377_p3 = scmp.lt.s32.totalorder %s11335_s18, 1  ;;  %v14687_v3 = vld [vmem:[%s19529_s1 + $0x18] sm:$0xff]  ;;  %vm875_vm0 = vcmask 1041408  }
   0xe   : > { %14431 = vset.pattern.permute.xlu1 %v19540_v2  ;;  %14430 = vset.pattern.permute.xlu0 %v19540_v2  ;;  %v14692_v4 = vld [vmem:[%s19529_s1 + $0x8] sm:$0xff]  ;;  %v14707_v6 = vld [vmem:[%s19529_s1 + $0x20] sm:$0xff]  ;;  %v14719_v7 = vld [vmem:[%s19529_s1 + $0x38] sm:$0xff]  ;;  %vm516_vm1 = vcmask 1040384   ;;  %vm1361_vm2 = vsmask.f32 7424 }
   0xf   : > { %629 = vperm.xlu1 %14431, %v14673_v0   ;;  %619 = vperm.xlu0 %14430, %v14678_v1   ;;  %s20983_s18 = smov (!%p377_p3, %s11335_s18), 1  ;;  %v14702_v5 = vld [vmem:[%s19529_s1 + $0x28] sm:$0xff]  ;;  %v14724_v8 = vld [vmem:[%s19529_s1 + $0x30] sm:$0xff]  ;;  %v825_v12 = vld [vmem:[%s19532_s4] sm:$0x3]  ;;  %vm826_vm3 = vcmask 31744  }
  0x10   : > { %s11955_s27 = sshll.u32 %s20983_s18, 8  ;;  %14405 = vmatprep.subr.msk.bf16.mxu1 %vm875_vm0, %v825_v12  ;;  %v877_v15 = vsel %vm875_vm0, %v825_v12, 0  ;;  %v14740_v20 = vld [vmem:[%s19529_s1 + $0x48] sm:$0xff]  ;;  %v14758_v29 = vld [vmem:[%s19529_s1 + $0x40] sm:$0xff]  ;;  %v14781_v39 = vld [vmem:[%s19529_s1 + $0x58] sm:$0xff]  ;;  %vm1174_vm4 = vcmask 1043456  }
  0x11   : > { %s14712_s15 = scalar_lea.vmem %s19530_s2, %s11955_s27  ;;  %12486 = vmatpush3.bf16.msra.mxu1 %v877_v15  ;;  %v11444_v34 = vld [vmem:[%s19532_s4 + $0x8] sm:$0x3]  ;;  %v14786_v40 = vld [vmem:[%s19529_s1 + $0x50] sm:$0xff]  ;;  %vm1175_vm5 = vcmask 1044480   ;;  %vm1125_vm6 = vcmask 72704   ;;  %vm1999_vm7 = vcmask 1046528  }
  0x12   : > { %v452_v9 = vld [vmem:[%s14712_s15] sm:$0xff]  ;;  %v453_v11 = vld [vmem:[%s14712_s15 + $0x8] sm:$0xff]  ;;  %v454_v13 = vld [vmem:[%s14712_s15 + $0x10] sm:$0xff]  ;;  %14409 = vmatprep.subr.msk.bf16.mxu0 %vm875_vm0, %v11444_v34  ;;  %v2723_v42 = vsel %vm875_vm0, %v11444_v34, 0  ;;  %vm4855_vm8 = vcmask 261120   ;;  %s11956_s22 = sshll.u32 %s20983_s18, 3 }
  0x13   : > { %634 = vperm.xlu1 %14431, %v14687_v3   ;;  %624 = vperm.xlu0 %14430, %v14692_v4   ;;  %v517_v10 = vrot.slane %v452_v9, 7  ;;  %v518_v14 = vrot.slane %v453_v11, 7  ;;  %v455_v16 = vld [vmem:[%s14712_s15 + $0x18] sm:$0xff]  ;;  %v520_v17 = vrot.slane %v454_v13, 7  ;;  %v456_v18 = vld [vmem:[%s14712_s15 + $0x20] sm:$0xff]  ;;  %v457_v19 = vld [vmem:[%s14712_s15 + $0x28] sm:$0xff]  ;;  %s386_s25 = scalar_lea.vmem %s19539_s11, %s11956_s22 }
  0x14   : > { %v522_v21 = vrot.slane %v455_v16, 7  ;;  %v524_v22 = vrot.slane %v456_v18, 7  ;;  %v526_v23 = vrot.slane %v457_v19, 7  ;;  %v458_v27 = vld [vmem:[%s14712_s15 + $0x30] sm:$0xff]  ;;  %v459_v28 = vld [vmem:[%s14712_s15 + $0x38] sm:$0xff]  ;;  %v460_v46 = vld [vmem:[%s14712_s15 + $0x40] sm:$0xff]  ;;  %12656 = vmatpush3.bf16.msra.mxu0 %v2723_v42 }
  0x15   : > { %v14745_v24 = vsel %vm516_vm1, 0.0, %v517_v10  ;;  %v14748_v25 = vsel %vm516_vm1, %v517_v10, %v518_v14  ;;  %v14751_v26 = vsel %vm516_vm1, %v518_v14, %v520_v17  ;;  %v528_v33 = vrot.slane %v458_v27, 7  ;;  %v461_v47 = vld [vmem:[%s14712_s15 + $0x48] sm:$0xff]  ;;  %v462_v61 = vld [vmem:[%s14712_s15 + $0x50] sm:$0xff]  ;;  %v463_v62 = vld [vmem:[%s14712_s15 + $0x58] sm:$0xff] }
  0x16   : > { %20083 = vst [vmem:[#allocation2_spill] sm:$0xff] %v14745_v24  ;;  %20084 = vst [vmem:[#allocation3_spill] sm:$0xff] %v14748_v25  ;;  %v14761_v30 = vsel %vm516_vm1, %v520_v17, %v522_v21  ;;  %v14764_v31 = vsel %vm516_vm1, %v524_v22, %v526_v23  ;;  %v14767_v32 = vsel %vm516_vm1, %v522_v21, %v524_v22  ;;  %v530_v35 = vrot.slane %v459_v28, 7  ;;  %v14807_v55 = vld [vmem:[%s19529_s1 + $0x68] sm:$0xff]  ;;  %v14825_v10 = vld [vmem:[%s19529_s1 + $0x60] sm:$0xff] }
  0x17   : > { %644 = vperm.xlu1 %14431, %v14702_v5   ;;  %639 = vperm.xlu0 %14430, %v14707_v6   ;;  %v1343_v36 = vpack.c.bf16 %v14748_v25, %v14745_v24  ;;  %v1344_v37 = vpack.c.bf16 %v14761_v30, %v14751_v26  ;;  %v1345_v38 = vpack.c.bf16 %v14764_v31, %v14767_v32  ;;  %v532_v50 = vrot.slane %v460_v46, 7  ;;  %v14833_v19 = vld [vmem:[%s19529_s1 + $0x78] sm:$0xff]  ;;  %v14838_v21 = vld [vmem:[%s19529_s1 + $0x70] sm:$0xff]  ;;  %v464_v28 = vld [vmem:[%s14712_s15 + $0x60] sm:$0xff] }
  0x18   : > { %v14790_v41 = vsel %vm516_vm1, %v526_v23, %v528_v33  ;;  %v14796_v43 = vsel %vm516_vm1, %v528_v33, %v530_v35  ;;  %v534_v51 = vrot.slane %v461_v47, 7  ;;  %v536_v12 = vrot.slane %v462_v61, 7  ;;  %v465_v33 = vld [vmem:[%s14712_s15 + $0x68] sm:$0xff]  ;;  %v14951_v2 = vld [vmem:[%s19529_s1 + $0xb0] sm:$0xff] }
  0x19   : > { %v1370_v44 = vshll.u32 %v1343_v36, 16  ;;  %v1374_v45 = vshrl.u32 %v1343_v36, 16  ;;  %v1378_v48 = vshll.u32 %v1344_v37, 16  ;;  %v1382_v49 = vshrl.u32 %v1344_v37, 16 }
  0x1a   : > { %v1386_v53 = vshll.u32 %v1345_v38, 16  ;;  %v1346_v54 = vpack.c.bf16 %v14796_v43, %v14790_v41  ;;  %v14810_v57 = vsel %vm516_vm1, %v532_v50, %v534_v51  ;;  %v14813_v58 = vsel %vm516_vm1, %v530_v35, %v532_v50 }
  0x1b   : > { %654 = vperm.xlu1 %14431, %v14719_v7   ;;  %649 = vperm.xlu0 %14430, %v14724_v8   ;;  %v14800_v52 = vrot.slane %v1370_v44, 1  ;;  %v1380_v56 = vrot.slane %v1378_v48, 1  ;;  %v1347_v9 = vpack.c.bf16 %v14810_v57, %v14813_v58  ;;  %v538_v13 = vrot.slane %v463_v62, 7  ;;  %v466_v48 = vld [vmem:[%s14712_s15 + $0x70] sm:$0xff] }
  0x1c   : > { %v1388_v60 = vrot.slane %v1386_v53, 1  ;;  %v1394_v63 = vshll.u32 %v1346_v54, 16  ;;  %v1390_v14 = vshrl.u32 %v1345_v38, 16  ;;  %v1398_v17 = vshrl.u32 %v1346_v54, 16  ;;  %v14884_v53 = vld [vmem:[%s19529_s1 + $0x80] sm:$0xff] }
  0x1d   : > { %20085 = vst [vmem:[#allocation4_spill] sm:$0xff] %v14800_v52  ;;  %v1376_v59 = vor.u32 %v1374_v45, %v14800_v52  ;;  %v1384_v11 = vor.u32 %v1382_v49, %v1380_v56  ;;  %v1402_v18 = vshll.u32 %v1347_v9, 16  ;;  %v14848_v27 = vsel %vm516_vm1, %v536_v12, %v538_v13  ;;  %v14867_v45 = vld [vmem:[%s19529_s1 + $0x88] sm:$0xff]  ;;  %v467_v49 = vld [vmem:[%s14712_s15 + $0x78] sm:$0xff] }
  0x1e   : > { %v1396_v16 = vrot.slane %v1394_v63, 1  ;;  %v1392_v23 = vor.u32 %v1390_v14, %v1388_v60  ;;  %v14855_v35 = vsel %vm516_vm1, %v534_v51, %v536_v12  ;;  %v540_v37 = vrot.slane %v464_v28, 7  ;;  %v14897_v12 = vld [vmem:[%s19529_s1 + $0x90] sm:$0xff]  ;;  %v468_v14 = vld [vmem:[%s14712_s15 + $0x80] sm:$0xff] }
  0x1f   : > { %664 = vperm.xlu1 %14431, %v14740_v20   ;;  %659 = vperm.xlu0 %14430, %v14758_v29   ;;  %v14828_v15 = vsel %vm1361_vm2, %v1376_v59, %v1380_v56  ;;  %v14843_v22 = vsel %vm1361_vm2, %v1384_v11, %v1388_v60  ;;  %v1404_v34 = vrot.slane %v1402_v18, 1  ;;  %v542_v38 = vrot.slane %v465_v33, 7  ;;  %v14892_v11 = vld [vmem:[%s19529_s1 + $0x98] sm:$0xff] }
  0x20   : > { %20086 = vst [vmem:[#allocation5_spill] sm:$0xff] %v14828_v15  ;;  %12657 = vmatprep.mubr.msk.bf16.mxu0 %vm826_vm3, %v14828_v15  ;;  %20087 = vst [vmem:[#allocation6_spill] sm:$0xff] %v14843_v22  ;;  %v14858_v36 = vsel %vm1361_vm2, %v1392_v23, %v1396_v16  ;;  %v1400_v42 = vor.u32 %v1398_v17, %v1396_v16  ;;  %v1348_v44 = vpack.c.bf16 %v14848_v27, %v14855_v35  ;;  %v469_v16 = vld [vmem:[%s14712_s15 + $0x88] sm:$0xff] }
  0x21   : > { %12658 = vmatmul.mubr.msk.bf16.vlgmr.msra.gmra.mrb[0].mxu0 %vm826_vm3, %v14843_v22  ;;  %20088 = vst [vmem:[#allocation7_spill] sm:$0xff] %v14858_v36  ;;  %v14870_v46 = vsel %vm516_vm1, %v540_v37, %v542_v38  ;;  %v14873_v47 = vsel %vm516_vm1, %v538_v13, %v540_v37  ;;  %v544_v54 = vrot.slane %v466_v48, 7  ;;  %v546_v56 = vrot.slane %v467_v49, 7  ;;  %v470_v48 = vld [vmem:[%s14712_s15 + $0x90] sm:$0xff]  ;;  %v471_v49 = vld [vmem:[%s14712_s15 + $0x98] sm:$0xff] }
  0x22   : > { %12661 = vmatprep.mubr.msk.bf16.mxu0 %vm826_vm3, %v14858_v36  ;;  %20089 = vst [vmem:[#allocation8_spill] sm:$0xff] %v14870_v46  ;;  %20090 = vst [vmem:[#allocation9_spill] sm:$0xff] %v14873_v47  ;;  %v1410_v50 = vshll.u32 %v1348_v44, 16  ;;  %v1349_v51 = vpack.c.bf16 %v14870_v46, %v14873_v47  ;;  %v1406_v59 = vshrl.u32 %v1347_v9, 16  ;;  %v14887_v60 = vsel %vm1361_vm2, %v1400_v42, %v1404_v34  ;;  %v14921_v42 = vld [vmem:[%s19529_s1 + $0xa8] sm:$0xff] }
  0x23   : > { %674 = vperm.xlu1 %14431, %v14781_v39   ;;  %669 = vperm.xlu0 %14430, %v14786_v40   ;;  %20091 = vst [vmem:[#allocation10_spill] sm:$0xff] %v14887_v60  ;;  %v1414_v62 = vshrl.u32 %v1348_v44, 16  ;;  %v14902_v9 = vsel %vm516_vm1, %v544_v54, %v546_v56  ;;  %v14909_v18 = vsel %vm516_vm1, %v542_v38, %v544_v54  ;;  %v548_v28 = vrot.slane %v468_v14, 7 }
  0x24   : > { %v1412_v61 = vrot.slane %v1410_v50, 1  ;;  %v1418_v63 = vshll.u32 %v1349_v51, 16  ;;  %v1408_v13 = vor.u32 %v1406_v59, %v1404_v34  ;;  %20092 = vst [vmem:[#allocation11_spill] sm:$0xff] %v14902_v9  ;;  %20093 = vst [vmem:[#allocation12_spill] sm:$0xff] %v14909_v18  ;;  %v550_v33 = vrot.slane %v469_v16, 7  ;;  %v14938_v59 = vld [vmem:[%s19529_s1 + $0xa0] sm:$0xff] }
  0x25   : > { %v1350_v37 = vpack.c.bf16 %v14902_v9, %v14909_v18  ;;  %v14927_v44 = vsel %vm516_vm1, %v546_v56, %v548_v28  ;;  %v554_v56 = vrot.slane %v471_v49, 7  ;;  %v15054_v18 = vld [vmem:[%s19529_s1 + $0xf8] sm:$0xff] }
  0x26   : > { %v1420_v17 = vrot.slane %v1418_v63, 1  ;;  %v14912_v23 = vsel %vm1361_vm2, %v1408_v13, %v1412_v61  ;;  %v1416_v34 = vor.u32 %v1414_v62, %v1412_v61  ;;  %v14924_v38 = vsel %vm516_vm1, %v548_v28, %v550_v33  ;;  %20096 = vst [vmem:[#allocation15_spill] sm:$0xff] %v14927_v44  ;;  %v14946_v28 = vld [vmem:[%s19529_s1 + $0xb8] sm:$0xff] }
  0x27   : > { %684 = vperm.xlu1 %14431, %v14807_v55   ;;  %679 = vperm.xlu0 %14430, %v14825_v10   ;;  %20094 = vst [vmem:[#allocation13_spill] sm:$0xff] %v14912_v23  ;;  %20095 = vst [vmem:[#allocation14_spill] sm:$0xff] %v14924_v38  ;;  %v1426_v50 = vshll.u32 %v1350_v37, 16  ;;  %v1351_v54 = vpack.c.bf16 %v14924_v38, %v14927_v44  ;;  %v552_v61 = vrot.slane %v470_v48, 7  ;;  %v1422_v62 = vshrl.u32 %v1349_v51, 16 }
  0x28   : > { %v14941_v63 = vsel %vm1361_vm2, %v1416_v34, %v1420_v17  ;;  %v1430_v14 = vshrl.u32 %v1350_v37, 16  ;;  %v472_v34 = vld [vmem:[%s14712_s15 + $0xa0] sm:$0xff]  ;;  %v473_v37 = vld [vmem:[%s14712_s15 + $0xa8] sm:$0xff] }
  0x29   : > { %12662 = vmatmul.mubr.msk.bf16.gmra.mrb[4].mxu0 %vm826_vm3, %v14887_v60  ;;  %20097 = vst [vmem:[#allocation16_spill] sm:$0xff] %v14941_v63  ;;  %v1428_v13 = vrot.slane %v1426_v50, 1  ;;  %v1434_v16 = vshll.u32 %v1351_v54, 16  ;;  %v14956_v51 = vsel %vm516_vm1, %v552_v61, %v554_v56  ;;  %v14963_v49 = vsel %vm516_vm1, %v550_v33, %v552_v61  ;;  %v474_v61 = vld [vmem:[%s14712_s15 + $0xb0] sm:$0xff] }
  0x2a   : > { %12665 = vmatprep.mubr.msk.bf16.mxu0 %vm826_vm3, %v14912_v23  ;;  %v1424_v23 = vor.u32 %v1422_v62, %v1420_v17  ;;  %20098 = vst [vmem:[#allocation17_spill] sm:$0xff] %v14956_v51  ;;  %20099 = vst [vmem:[#allocation18_spill] sm:$0xff] %v14963_v49  ;;  %v556_v50 = vrot.slane %v472_v34, 7  ;;  %v558_v62 = vrot.slane %v473_v37, 7  ;;  %v1352_v36 = vpack.c.bf16 %v14956_v51, %v14963_v49  ;;  %v14992_v37 = vld [vmem:[%s19529_s1 + $0xc0] sm:$0xff]  ;;  %v15000_v49 = vld [vmem:[%s19529_s1 + $0xd8] sm:$0xff] }
  0x2b   : > { %694 = vperm.xlu1 %14431, %v14833_v19   ;;  %689 = vperm.xlu0 %14430, %v14838_v21   ;;  %v1436_v48 = vrot.slane %v1434_v16, 1  ;;  %v1432_v60 = vor.u32 %v1430_v14, %v1428_v13  ;;  %v14975_v16 = vld [vmem:[%s19529_s1 + $0xc8] sm:$0xff] }
  0x2c   : > { %v14966_v17 = vsel %vm1361_vm2, %v1424_v23, %v1428_v13  ;;  %v14978_v33 = vsel %vm516_vm1, %v556_v50, %v558_v62  ;;  %v14981_v23 = vsel %vm516_vm1, %v554_v56, %v556_v50  ;;  %v475_v13 = vld [vmem:[%s14712_s15 + $0xb8] sm:$0xff]  ;;  %v1442_v14 = vshll.u32 %v1352_v36, 16 }
  0x2d   : > { %20100 = vst [vmem:[#allocation19_spill] sm:$0xff] %v14966_v17  ;;  %20101 = vst [vmem:[#allocation20_spill] sm:$0xff] %v14978_v33  ;;  %v1353_v34 = vpack.c.bf16 %v14978_v33, %v14981_v23  ;;  %v562_v56 = vrot.slane %v475_v13, 7  ;;  %v1438_v50 = vshrl.u32 %v1351_v54, 16  ;;  %v1446_v15 = vshrl.u32 %v1352_v36, 16  ;;  %v476_v36 = vld [vmem:[%s14712_s15 + $0xc0] sm:$0xff] }
  0x2e   : > { %20102 = vst [vmem:[#allocation21_spill] sm:$0xff] %v14981_v23  ;;  %v1444_v22 = vrot.slane %v1442_v14, 1  ;;  %v15005_v23 = vld [vmem:[%s19529_s1 + $0xd0] sm:$0xff]  ;;  %v477_v54 = vld [vmem:[%s14712_s15 + $0xc8] sm:$0xff]  ;;  %v564_v14 = vrot.slane %v476_v36, 7 }
  0x2f   : > { %704 = vperm.xlu1 %14431, %v14867_v45   ;;  %699 = vperm.xlu0 %14430, %v14884_v53   ;;  %v1450_v52 = vshll.u32 %v1353_v34, 16  ;;  %v1440_v33 = vor.u32 %v1438_v50, %v1436_v48  ;;  %v566_v50 = vrot.slane %v477_v54, 7  ;;  %v15046_v54 = vld [vmem:[%s19529_s1 + $0xe0] sm:$0xff] }
  0x30   : > { %v1448_v51 = vor.u32 %v1446_v15, %v1444_v22  ;;  %v479_v15 = vld [vmem:[%s14712_s15 + $0xd8] sm:$0xff] }
  0x31   : > { %12666 = vmatmul.mubr.msk.bf16.gmra.mrb[8].mxu0 %vm826_vm3, %v14941_v63  ;;  %v14995_v63 = vsel %vm1361_vm2, %v1432_v60, %v1436_v48  ;;  %v15020_v48 = vsel %vm1361_vm2, %v1440_v33, %v1444_v22  ;;  %v478_v33 = vld [vmem:[%s14712_s15 + $0xd0] sm:$0xff] }
  0x32   : > { %12669 = vmatprep.mubr.msk.bf16.mxu0 %vm826_vm3, %v14966_v17  ;;  %v560_v17 = vrot.slane %v474_v61, 7  ;;  %20103 = vst [vmem:[#allocation22_spill] sm:$0xff] %v14995_v63  ;;  %v1452_v61 = vrot.slane %v1450_v52, 1  ;;  %20106 = vst [vmem:[#allocation25_spill] sm:$0xff] %v15020_v48  ;;  %v15029_v52 = vld [vmem:[%s19529_s1 + $0xe8] sm:$0xff] }
  0x33   : > { %714 = vperm.xlu1 %14431, %v14892_v11   ;;  %709 = vperm.xlu0 %14430, %v14897_v12  }
  0x34   : > { %v15010_v60 = vsel %vm516_vm1, %v560_v17, %v562_v56  ;;  %v15017_v13 = vsel %vm516_vm1, %v558_v62, %v560_v17  ;;  %v15032_v17 = vsel %vm516_vm1, %v564_v14, %v566_v50  ;;  %v15035_v62 = vsel %vm516_vm1, %v562_v56, %v564_v14 }
  0x35   : > { %20104 = vst [vmem:[#allocation23_spill] sm:$0xff] %v15010_v60  ;;  %20105 = vst [vmem:[#allocation24_spill] sm:$0xff] %v15017_v13  ;;  %v1354_v44 = vpack.c.bf16 %v15010_v60, %v15017_v13  ;;  %v1355_v36 = vpack.c.bf16 %v15032_v17, %v15035_v62  ;;  %v570_v56 = vrot.slane %v479_v15, 7  ;;  %v1454_v14 = vshrl.u32 %v1353_v34, 16  ;;  %v481_v34 = vld [vmem:[%s14712_s15 + $0xe8] sm:$0xff] }
  0x36   : > { %20107 = vst [vmem:[#allocation26_spill] sm:$0xff] %v15032_v17  ;;  %20108 = vst [vmem:[#allocation27_spill] sm:$0xff] %v15035_v62  ;;  %v15059_v62 = vld [vmem:[%s19529_s1 + $0xf0] sm:$0xff] }
  0x37   : > { %724 = vperm.xlu1 %14431, %v14921_v42   ;;  %719 = vperm.xlu0 %14430, %v14938_v59   ;;  %v1458_v22 = vshll.u32 %v1354_v44, 16  ;;  %v1462_v60 = vshrl.u32 %v1354_v44, 16  ;;  %v1466_v38 = vshll.u32 %v1355_v36, 16  ;;  %v1456_v17 = vor.u32 %v1454_v14, %v1452_v61  ;;  %v480_v44 = vld [vmem:[%s14712_s15 + $0xe0] sm:$0xff] }
  0x38   : > { %v574_v14 = vrot.slane %v481_v34, 7 }
  0x39   : > { %12670 = vmatmul.mubr.msk.bf16.gmra.mrb[12].mxu0 %vm826_vm3, %v14995_v63  ;;  %v15049_v63 = vsel %vm1361_vm2, %v1448_v51, %v1452_v61  ;;  %v1460_v13 = vrot.slane %v1458_v22, 1  ;;  %v572_v61 = vrot.slane %v480_v44, 7  ;;  %v1470_v44 = vshrl.u32 %v1355_v36, 16 }
  0x3a   : > { %12673 = vmatprep.mubr.msk.bf16.mxu0 %vm826_vm3, %v15020_v48  ;;  %v568_v48 = vrot.slane %v478_v33, 7  ;;  %20109 = vst [vmem:[#allocation28_spill] sm:$0xff] %v15049_v63  ;;  %v1468_v33 = vrot.slane %v1466_v38, 1 }
  0x3b   : > { %734 = vperm.xlu1 %14431, %v14946_v28   ;;  %729 = vperm.xlu0 %14430, %v14951_v2   ;;  %v15074_v22 = vsel %vm1361_vm2, %v1456_v17, %v1460_v13  ;;  %v15081_v38 = vsel %vm516_vm1, %v572_v61, %v574_v14 }
  0x3c   : > { %v15064_v51 = vsel %vm516_vm1, %v568_v48, %v570_v56  ;;  %v15071_v15 = vsel %vm516_vm1, %v566_v50, %v568_v48  ;;  %20112 = vst [vmem:[#allocation31_spill] sm:$0xff] %v15074_v22  ;;  %v1464_v48 = vor.u32 %v1462_v60, %v1460_v13  ;;  %v14595_v13 = vmov 5  }
  0x3d   : > { %20110 = vst [vmem:[#allocation29_spill] sm:$0xff] %v15064_v51  ;;  %20111 = vst [vmem:[#allocation30_spill] sm:$0xff] %v15071_v15  ;;  %v1356_v9 = vpack.c.bf16 %v15064_v51, %v15071_v15  ;;  %v482_v15 = vld [vmem:[%s14712_s15 + $0xf0] sm:$0xff]  ;;  %v483_v51 = vld [vmem:[%s14712_s15 + $0xf8] sm:$0xff] }
  0x3e   : > { %v15093_v46 = vsel %vm1361_vm2, %v1464_v48, %v1468_v33  ;;  %v578_v60 = vrot.slane %v483_v51, 7 }
  0x3f   : > { %744 = vperm.xlu1 %14431, %v14975_v16   ;;  %739 = vperm.xlu0 %14430, %v14992_v37   ;;  %v1474_v50 = vshll.u32 %v1356_v9, 16  ;;  %20114 = vst [vmem:[#allocation33_spill] sm:$0xff] %v15093_v46 }
  0x40   : > { %v15113_v48 = vsel %vm516_vm1, %v578_v60, 0.0 }
  0x41   : > { %12674 = vmatmul.mubr.msk.bf16.gmra.mrb[16].mxu0 %vm826_vm3, %v15049_v63  ;;  %v15084_v63 = vsel %vm516_vm1, %v570_v56, %v572_v61  ;;  %v1476_v34 = vrot.slane %v1474_v50, 1  ;;  %v1472_v56 = vor.u32 %v1470_v44, %v1468_v33  ;;  %v576_v61 = vrot.slane %v482_v15, 7 }
  0x42   : > { %12677 = vmatprep.mubr.msk.bf16.mxu0 %vm826_vm3, %v15074_v22  ;;  %20113 = vst [vmem:[#allocation32_spill] sm:$0xff] %v15084_v63  ;;  %v1357_v17 = vpack.c.bf16 %v15081_v38, %v15084_v63  ;;  %v1478_v22 = vshrl.u32 %v1356_v9, 16 }
  0x43   : > { %754 = vperm.xlu1 %14431, %v15000_v49   ;;  %749 = vperm.xlu0 %14430, %v15005_v23   ;;  %v15098_v36 = vsel %vm1361_vm2, %v1472_v56, %v1476_v34  ;;  %v15101_v9 = vsel %vm516_vm1, %v574_v14, %v576_v61  ;;  %v15104_v50 = vsel %vm516_vm1, %v576_v61, %v578_v60 }
  0x44   : > { %v1482_v47 = vshll.u32 %v1357_v17, 16  ;;  %20115 = vst [vmem:[#allocation34_spill] sm:$0xff] %v15098_v36  ;;  %20116 = vst [vmem:[#allocation35_spill] sm:$0xff] %v15104_v50  ;;  %v2699_v51 = vpack.c.bf16 %v15104_v50, %v15101_v9  ;;  %v1480_v33 = vor.u32 %v1478_v22, %v1476_v34  ;;  %v2700_v14 = vpack.c.bf16 %v15113_v48, %v15113_v48 }
  0x45   : > { %v1486_v56 = vshrl.u32 %v1357_v17, 16 }
  0x46   : > { %v1484_v15 = vrot.slane %v1482_v47, 1  ;;  %v2704_v44 = vshll.u32 %v2699_v51, 16  ;;  %v2708_v22 = vshrl.u32 %v2699_v51, 16  ;;  %v2712_v47 = vshll.u32 %v2700_v14, 16  ;;  %v11461_v51 = vld [vmem:[%s19532_s4 + $0xa] sm:$0x3] }
  0x47   : > { %764 = vperm.xlu1 %14431, %v15029_v52   ;;  %759 = vperm.xlu0 %14430, %v15046_v54   ;;  %v14596_v14 = vmov 65535  }
  0x48   : > { %v2706_v61 = vrot.slane %v2704_v44, 1  ;;  %v2714_v60 = vrot.slane %v2712_v47, 1  ;;  %14410 = vmatprep.subr.msk.bf16.mxu0 %vm875_vm0, %v11461_v51  ;;  %v14459_v44 = vld [vmem:[%s19531_s3] sm:$0x1f]  }
  0x49   : > { %12678 = vmatmul.mubr.msk.bf16.gmra.mrb[20].mxu0 %vm826_vm3, %v15093_v46  ;;  %v15122_v46 = vor.u32 %v1486_v56, %v1484_v15  ;;  %v1176_v56 = vsel %vm1174_vm4, 4294967295, %v14596_v14 }
  0x4a   : > { %12681 = vmatprep.mubr.msk.bf16.mxu0 %vm826_vm3, %v15098_v36  ;;  %v15134_v17 = vor.u32 %v2708_v22, %v2706_v61 }
  0x4b   : > { %774 = vperm.xlu1 %14431, %v15054_v18   ;;  %769 = vperm.xlu0 %14430, %v15059_v62   ;;  %20118 = vst [vmem:[#allocation37_spill] sm:$0xff] %v15122_v46  ;;  %v15128_v34 = vsel %vm1361_vm2, %v15122_v46, %v2706_v61  ;;  %v15151_v61 = vsel %vm1175_vm5, %v1176_v56, 0 }
  0x4c   : > { %20119 = vst [vmem:[#allocation38_spill] sm:$0xff] %v15128_v34  ;;  %20120 = vst [vmem:[#allocation39_spill] sm:$0xff] %v15134_v17  ;;  %v1179_v22 = vand.u32 %v14459_v44, %v15151_v61 }
  0x4d   : > { %20121 = vst [vmem:[#allocation40_spill] sm:$0xff] %v15151_v61 }
  0x4e   : > { %12519 = vmatprep.subr.bf16.mxu1 %v1179_v22 }
  0x4f   : > { %14433 = vset.pattern.permute.xlu1 %v14595_v13  ;;  %14432 = vset.pattern.permute.xlu0 %v14595_v13  ;;  %v15120_v13 = vsel %vm1361_vm2, %v1480_v33, %v1484_v15  ;;  %v2715_v33 = vsel %vm1361_vm2, %v15134_v17, %v2714_v60  ;;  %v3261_v15 = vsel %vm875_vm0, %v11461_v51, 0  ;;  %v14597_v51 = vmov 6  }
  0x50   : > { %2922 = vperm.xlu1 %14433, %v14692_v4   ;;  %2919 = vperm.xlu0 %14432, %v14678_v1   ;;  %20117 = vst [vmem:[#allocation36_spill] sm:$0xff] %v15120_v13 }
  0x51   : > { %12682 = vmatmul.mubr.msk.bf16.gmra.mrb[24].mxu0 %vm826_vm3, %v15120_v13 }
  0x52   : > { %12685 = vmatprep.mubr.msk.bf16.mxu0 %vm826_vm3, %v15128_v34  ;;  %12690 = vmatpush3.bf16.msra.mxu0 %v3261_v15 }
  0x54   : > { %2925 = vperm.xlu1 %14433, %v14673_v0   ;;  %2928 = vperm.xlu0 %14432, %v14687_v3  }
  0x58   : > { %2931 = vperm.xlu1 %14433, %v14707_v6   ;;  %2934 = vperm.xlu0 %14432, %v14702_v5  }
  0x59   : > { %12686 = vmatmul.mubr.msk.bf16.gmra.mrb[28].mxu0 %vm826_vm3, %v2715_v33 }
  0x5c   : > { %2937 = vperm.xlu1 %14433, %v14724_v8   ;;  %2940 = vperm.xlu0 %14432, %v14719_v7  }
  0x60   : > { %2943 = vperm.xlu1 %14433, %v14758_v29   ;;  %2946 = vperm.xlu0 %14432, %v14740_v20  }
  0x64   : > { %2949 = vperm.xlu1 %14433, %v14786_v40   ;;  %2952 = vperm.xlu0 %14432, %v14781_v39  }
  0x68   : > { %2955 = vperm.xlu1 %14433, %v14825_v10   ;;  %2958 = vperm.xlu0 %14432, %v14807_v55  }
  0x6c   : > { %2961 = vperm.xlu1 %14433, %v14838_v21   ;;  %2964 = vperm.xlu0 %14432, %v14833_v19  }
  0x70   : > { %2967 = vperm.xlu1 %14433, %v14884_v53   ;;  %2970 = vperm.xlu0 %14432, %v14867_v45  }
  0x74   : > { %2973 = vperm.xlu1 %14433, %v14897_v12   ;;  %2976 = vperm.xlu0 %14432, %v14892_v11  }
  0x78   : > { %2979 = vperm.xlu1 %14433, %v14938_v59   ;;  %2982 = vperm.xlu0 %14432, %v14921_v42  }
  0x7c   : > { %2985 = vperm.xlu1 %14433, %v14951_v2   ;;  %2988 = vperm.xlu0 %14432, %v14946_v28  }
  0x80   : > { %2991 = vperm.xlu1 %14433, %v14992_v37   ;;  %2994 = vperm.xlu0 %14432, %v14975_v16  }
  0x84   : > { %2997 = vperm.xlu1 %14433, %v15005_v23   ;;  %3000 = vperm.xlu0 %14432, %v15000_v49  }
  0x88   : > { %3003 = vperm.xlu1 %14433, %v15046_v54   ;;  %3006 = vperm.xlu0 %14432, %v15029_v52  }
  0x8c   : > { %3009 = vperm.xlu1 %14433, %v15059_v62   ;;  %3012 = vperm.xlu0 %14432, %v15054_v18  }
  0x8e   : > { %v15176_v47 = vpop.permute.xlu1 %629  ;;  %v620_v60 = vpop.permute.xlu0 %619 }
  0x8f   : > { %20122 = vst [vmem:[#allocation41_spill] sm:$0xff] %v15176_v47  ;;  %v777_v33 = vmul.f32 0.0, %v620_v60  ;;  %v779_v14 = vmul.f32 %v15176_v47, %v14745_v24 }
  0x90   : > { %14434 = vset.pattern.permute.xlu1 %v14597_v51  ;;  %14435 = vset.pattern.permute.xlu0 %v14597_v51 }
  0x91   : > { %3457 = vperm.xlu1 %14434, %v14678_v1   ;;  %3461 = vperm.xlu0 %14435, %v14692_v4  }
  0x92   : > { %v15180_v15 = vpop.permute.xlu1 %634  ;;  %v625_v44 = vpop.permute.xlu0 %624 }
  0x93   : > { %20123 = vst [vmem:[#allocation42_spill] sm:$0xff] %v15180_v15  ;;  %v780_v56 = vmul.f32 %v15180_v15, %v14748_v25  ;;  %v778_v61 = vmul.f32 0.0, %v625_v44 }
  0x95   : > { %v15186_v34 = vpack.c.bf16 %v778_v61, %v777_v33  ;;  %3465 = vperm.xlu1 %14434, %v14673_v0   ;;  %3473 = vperm.xlu0 %14435, %v14707_v6   ;;  %v810_v60 = vpack.c.bf16 %v780_v56, %v779_v14 }
  0x96   : > { %v15190_v1 = vpop.permute.xlu1 %644  ;;  %v15192_v4 = vpop.permute.xlu0 %639 }
  0x97   : > { %20124 = vst [vmem:[#allocation43_spill] sm:$0xff] %v15186_v34  ;;  %20125 = vst [vmem:[#allocation44_spill] sm:$0xff] %v15190_v1  ;;  %v782_v51 = vmul.f32 %v15190_v1, %v14761_v30  ;;  %v781_v47 = vmul.f32 %v15192_v4, %v14751_v26  ;;  %12487 = vmatprep.mubr.msk.bf16.mxu1 %vm826_vm3, %v15186_v34 }
  0x98   : > { %20126 = vst [vmem:[#allocation45_spill] sm:$0xff] %v15192_v4  ;;  %12488 = vmatmul.mubr.msk.bf16.vlgmr.msra.gmra.mrb[0].mxu1 %vm826_vm3, %v810_v60 }
  0x99   : > { %3469 = vperm.xlu1 %14434, %v14687_v3   ;;  %3481 = vperm.xlu0 %14435, %v14724_v8   ;;  %v811_v0 = vpack.c.bf16 %v782_v51, %v781_v47  ;;  %v15217_v8 = vld [vmem:[%s19532_s4 + $0xc] sm:$0x3] }
  0x9a   : > { %v15203_v6 = vpop.permute.xlu1 %654  ;;  %v15205_v61 = vpop.permute.xlu0 %649  ;;  %12520 = vmatpush3.bf16.msra.mxu1 %v1179_v22  ;;  %14411 = vmatprep.subr.msk.bf16.mxu0 %vm875_vm0, %v15217_v8 }
  0x9b   : > { %20127 = vst [vmem:[#allocation46_spill] sm:$0xff] %v15203_v6  ;;  %20128 = vst [vmem:[#allocation47_spill] sm:$0xff] %v15205_v61  ;;  %v784_v33 = vmul.f32 %v15203_v6, %v14764_v31  ;;  %v783_v44 = vmul.f32 %v15205_v61, %v14767_v32  ;;  %12491 = vmatprep.mubr.msk.bf16.mxu1 %vm826_vm3, %v811_v0 }
  0x9d   : > { %3477 = vperm.xlu1 %14434, %v14702_v5   ;;  %3489 = vperm.xlu0 %14435, %v14758_v29   ;;  %v812_v3 = vpack.c.bf16 %v784_v33, %v783_v44  ;;  %v15244_v33 = vld [vmem:[%s19532_s4 + $0x2] sm:$0x3] }
  0x9e   : > { %v15219_v47 = vpop.permute.xlu1 %664  ;;  %v15221_v22 = vpop.permute.xlu0 %659  ;;  %14406 = vmatprep.subr.msk.bf16.mxu1 %vm875_vm0, %v15244_v33 }
  0x9f   : > { %20129 = vst [vmem:[#allocation48_spill] sm:$0xff] %v15219_v47  ;;  %20130 = vst [vmem:[#allocation49_spill] sm:$0xff] %v15221_v22  ;;  %v786_v14 = vmul.f32 %v15219_v47, %v14796_v43  ;;  %v785_v5 = vmul.f32 %v15221_v22, %v14790_v41 }
  0xa0   : > { %12492 = vmatmul.mubr.msk.bf16.gmra.mrb[4].mxu1 %vm826_vm3, %v812_v3 }
  0xa1   : > { %3485 = vperm.xlu1 %14434, %v14719_v7   ;;  %3497 = vperm.xlu0 %14435, %v14786_v40   ;;  %v813_v29 = vpack.c.bf16 %v786_v14, %v785_v5 }
  0xa2   : > { %v15232_v56 = vpop.permute.xlu1 %674  ;;  %v15234_v60 = vpop.permute.xlu0 %669 }
  0xa3   : > { %20131 = vst [vmem:[#allocation50_spill] sm:$0xff] %v15232_v56  ;;  %20132 = vst [vmem:[#allocation51_spill] sm:$0xff] %v15234_v60  ;;  %v788_v51 = vmul.f32 %v15232_v56, %v14810_v57  ;;  %v787_v0 = vmul.f32 %v15234_v60, %v14813_v58  ;;  %12495 = vmatprep.mubr.msk.bf16.mxu1 %vm826_vm3, %v813_v29  ;;  %v20137_v29 = vld [vmem:[#allocation8_spill] sm:$0xff] }
  0xa5   : > { %3493 = vperm.xlu1 %14434, %v14740_v20   ;;  %3505 = vperm.xlu0 %14435, %v14825_v10   ;;  %v814_v7 = vpack.c.bf16 %v788_v51, %v787_v0  ;;  %v20138_v0 = vld [vmem:[#allocation9_spill] sm:$0xff] }
  0xa6   : > { %v15248_v40 = vpop.permute.xlu1 %684  ;;  %v15250_v44 = vpop.permute.xlu0 %679 }
  0xa7   : > { %20133 = vst [vmem:[#allocation52_spill] sm:$0xff] %v15248_v40  ;;  %20134 = vst [vmem:[#allocation53_spill] sm:$0xff] %v15250_v44  ;;  %v790_v3 = vmul.f32 %v15248_v40, %v14848_v27  ;;  %v789_v14 = vmul.f32 %v15250_v44, %v14855_v35  ;;  %v20142_v44 = vld [vmem:[#allocation12_spill] sm:$0xff] }
  0xa8   : > { %12496 = vmatmul.mubr.msk.bf16.gmra.mrb[8].mxu1 %vm826_vm3, %v814_v7 }
  0xa9   : > { %3501 = vperm.xlu1 %14434, %v14781_v39   ;;  %3513 = vperm.xlu0 %14435, %v14838_v21   ;;  %v815_v20 = vpack.c.bf16 %v790_v3, %v789_v14  ;;  %v20141_v3 = vld [vmem:[#allocation11_spill] sm:$0xff] }
  0xaa   : > { %v15261_v10 = vpop.permute.xlu1 %694  ;;  %v15263_v5 = vpop.permute.xlu0 %689 }
  0xab   : > { %20135 = vst [vmem:[#allocation54_spill] sm:$0xff] %v15261_v10  ;;  %20136 = vst [vmem:[#allocation55_spill] sm:$0xff] %v15263_v5  ;;  %v792_v51 = vmul.f32 %v15261_v10, %v20137_v29  ;;  %v791_v56 = vmul.f32 %v15263_v5, %v20138_v0  ;;  %12499 = vmatprep.mubr.msk.bf16.mxu1 %vm826_vm3, %v815_v20  ;;  %v20146_v5 = vld [vmem:[#allocation15_spill] sm:$0xff] }
  0xad   : > { %3509 = vperm.xlu1 %14434, %v14807_v55   ;;  %3521 = vperm.xlu0 %14435, %v14884_v53   ;;  %v816_v39 = vpack.c.bf16 %v792_v51, %v791_v56  ;;  %v20145_v56 = vld [vmem:[#allocation14_spill] sm:$0xff] }
  0xae   : > { %v15272_v7 = vpop.permute.xlu1 %704  ;;  %v15274_v21 = vpop.permute.xlu0 %699 }
  0xaf   : > { %20139 = vst [vmem:[#allocation8_spill] sm:$0xff] %v15272_v7  ;;  %20140 = vst [vmem:[#allocation9_spill] sm:$0xff] %v15274_v21  ;;  %v794_v14 = vmul.f32 %v15272_v7, %v20141_v3  ;;  %v793_v10 = vmul.f32 %v15274_v21, %v20142_v44  ;;  %v20150_v21 = vld [vmem:[#allocation18_spill] sm:$0xff] }
  0xb0   : > { %12500 = vmatmul.mubr.msk.bf16.gmra.mrb[12].mxu1 %vm826_vm3, %v816_v39 }
  0xb1   : > { %3517 = vperm.xlu1 %14434, %v14833_v19   ;;  %3529 = vperm.xlu0 %14435, %v14897_v12   ;;  %v817_v55 = vpack.c.bf16 %v794_v14, %v793_v10  ;;  %v20149_v10 = vld [vmem:[#allocation17_spill] sm:$0xff] }
  0xb2   : > { %v15283_v20 = vpop.permute.xlu1 %714  ;;  %v15285_v53 = vpop.permute.xlu0 %709 }
  0xb3   : > { %20143 = vst [vmem:[#allocation11_spill] sm:$0xff] %v15283_v20  ;;  %20144 = vst [vmem:[#allocation12_spill] sm:$0xff] %v15285_v53  ;;  %v796_v51 = vmul.f32 %v15283_v20, %v20145_v56  ;;  %v795_v7 = vmul.f32 %v15285_v53, %v20146_v5  ;;  %12503 = vmatprep.mubr.msk.bf16.mxu1 %vm826_vm3, %v817_v55  ;;  %v20154_v53 = vld [vmem:[#allocation21_spill] sm:$0xff] }
  0xb5   : > { %3525 = vperm.xlu1 %14434, %v14867_v45   ;;  %3537 = vperm.xlu0 %14435, %v14938_v59   ;;  %v818_v19 = vpack.c.bf16 %v796_v51, %v795_v7  ;;  %v20153_v7 = vld [vmem:[#allocation20_spill] sm:$0xff] }
  0xb6   : > { %v15294_v39 = vpop.permute.xlu1 %724  ;;  %v15296_v12 = vpop.permute.xlu0 %719 }
  0xb7   : > { %20147 = vst [vmem:[#allocation14_spill] sm:$0xff] %v15294_v39  ;;  %20148 = vst [vmem:[#allocation15_spill] sm:$0xff] %v15296_v12  ;;  %v798_v14 = vmul.f32 %v15294_v39, %v20149_v10  ;;  %v797_v20 = vmul.f32 %v15296_v12, %v20150_v21  ;;  %v20158_v12 = vld [vmem:[#allocation24_spill] sm:$0xff] }
  0xb8   : > { %12504 = vmatmul.mubr.msk.bf16.gmra.mrb[16].mxu1 %vm826_vm3, %v818_v19 }
  0xb9   : > { %3533 = vperm.xlu1 %14434, %v14892_v11   ;;  %3545 = vperm.xlu0 %14435, %v14951_v2   ;;  %v819_v45 = vpack.c.bf16 %v798_v14, %v797_v20  ;;  %v20157_v20 = vld [vmem:[#allocation23_spill] sm:$0xff] }
  0xba   : > { %v15305_v55 = vpop.permute.xlu1 %734  ;;  %v15307_v59 = vpop.permute.xlu0 %729 }
  0xbb   : > { %20151 = vst [vmem:[#allocation56_spill] sm:$0xff] %v15305_v55  ;;  %20152 = vst [vmem:[#allocation57_spill] sm:$0xff] %v15307_v59  ;;  %v800_v51 = vmul.f32 %v15305_v55, %v20153_v7  ;;  %v799_v39 = vmul.f32 %v15307_v59, %v20154_v53  ;;  %12507 = vmatprep.mubr.msk.bf16.mxu1 %vm826_vm3, %v819_v45  ;;  %v20162_v59 = vld [vmem:[#allocation27_spill] sm:$0xff] }
  0xbd   : > { %3541 = vperm.xlu1 %14434, %v14921_v42   ;;  %3553 = vperm.xlu0 %14435, %v14992_v37   ;;  %v820_v11 = vpack.c.bf16 %v800_v51, %v799_v39  ;;  %v20161_v39 = vld [vmem:[#allocation26_spill] sm:$0xff] }
  0xbe   : > { %v15316_v19 = vpop.permute.xlu1 %744  ;;  %v15318_v2 = vpop.permute.xlu0 %739 }
  0xbf   : > { %20155 = vst [vmem:[#allocation21_spill] sm:$0xff] %v15316_v19  ;;  %20156 = vst [vmem:[#allocation58_spill] sm:$0xff] %v15318_v2  ;;  %v802_v14 = vmul.f32 %v15316_v19, %v20157_v20  ;;  %v801_v55 = vmul.f32 %v15318_v2, %v20158_v12  ;;  %v20166_v2 = vld [vmem:[#allocation30_spill] sm:$0xff] }
  0xc0   : > { %12508 = vmatmul.mubr.msk.bf16.gmra.mrb[20].mxu1 %vm826_vm3, %v820_v11 }
  0xc1   : > { %3549 = vperm.xlu1 %14434, %v14946_v28   ;;  %3561 = vperm.xlu0 %14435, %v15005_v23   ;;  %v821_v42 = vpack.c.bf16 %v802_v14, %v801_v55  ;;  %v20165_v55 = vld [vmem:[#allocation29_spill] sm:$0xff] }
  0xc2   : > { %v15327_v45 = vpop.permute.xlu1 %754  ;;  %v15329_v37 = vpop.permute.xlu0 %749 }
  0xc3   : > { %20159 = vst [vmem:[#allocation59_spill] sm:$0xff] %v15327_v45  ;;  %20160 = vst [vmem:[#allocation60_spill] sm:$0xff] %v15329_v37  ;;  %v804_v51 = vmul.f32 %v15327_v45, %v20161_v39  ;;  %v803_v19 = vmul.f32 %v15329_v37, %v20162_v59  ;;  %12511 = vmatprep.mubr.msk.bf16.mxu1 %vm826_vm3, %v821_v42 }
  0xc5   : > { %3557 = vperm.xlu1 %14434, %v14975_v16   ;;  %3569 = vperm.xlu0 %14435, %v15046_v54   ;;  %v822_v28 = vpack.c.bf16 %v804_v51, %v803_v19 }
  0xc6   : > { %v15338_v11 = vpop.permute.xlu1 %764  ;;  %v15340_v23 = vpop.permute.xlu0 %759 }
  0xc7   : > { %20163 = vst [vmem:[#allocation61_spill] sm:$0xff] %v15338_v11  ;;  %20164 = vst [vmem:[#allocation62_spill] sm:$0xff] %v15340_v23  ;;  %v806_v14 = vmul.f32 %v15338_v11, %v20165_v55  ;;  %v805_v45 = vmul.f32 %v15340_v23, %v20166_v2  ;;  %v14461_v23 = vld [vmem:[%s19528_s0 + $0x8] sm:$0xff]   ;;  %v14462_v11 = vld [vmem:[%s19528_s0 + $0x10] sm:$0xff]  }
  0xc8   : > { %12512 = vmatmul.mubr.msk.bf16.gmra.mrb[24].mxu1 %vm826_vm3, %v822_v28  ;;  %v14598_v28 = vmov 2  }
  0xc9   : > { %3565 = vperm.xlu1 %14434, %v15000_v49   ;;  %3577 = vperm.xlu0 %14435, %v15059_v62   ;;  %v823_v16 = vpack.c.bf16 %v806_v14, %v805_v45  ;;  %v14460_v62 = vld [vmem:[%s19528_s0] sm:$0xff]  }
  0xca   : > { %v15349_v42 = vpop.permute.xlu1 %774  ;;  %v15351_v54 = vpop.permute.xlu0 %769  ;;  %v15365_v45 = vld [vmem:[%s19529_s1] sm:$0xff] }
  0xcb   : > { %20167 = vst [vmem:[#allocation63_spill] sm:$0xff] %v15349_v42  ;;  %20168 = vst [vmem:[#allocation64_spill] sm:$0xff] %v15351_v54  ;;  %v808_v19 = vmul.f32 %v15349_v42, %v15081_v38  ;;  %v807_v51 = vmul.f32 %v15351_v54, %v15084_v63  ;;  %12515 = vmatprep.mubr.msk.bf16.mxu1 %vm826_vm3, %v823_v16 }
  0xcd   : > { %3573 = vperm.xlu1 %14434, %v15029_v52   ;;  %14436 = vset.pattern.permute.xlu0 %v14598_v28  ;;  %v824_v49 = vpack.c.bf16 %v808_v19, %v807_v51  ;;  %v15380_v19 = vld [vmem:[%s19529_s1 + $0x18] sm:$0xff] }
  0xce   : > { %1739 = vperm.xlu0 %14436, %v15365_v45  }
  0xcf   : > { %v2923_v14 = vpop.permute.xlu1 %2922  ;;  %v2920_v42 = vpop.permute.xlu0 %2919 }
  0xd0   : > { %v3015_v16 = vrot.slane %v2923_v14, 6  ;;  %v15368_v54 = vrot.slane %v2920_v42, 6  ;;  %12516 = vmatmul.mubr.msk.bf16.gmra.mrb[28].mxu1 %vm826_vm3, %v824_v49 }
  0xd1   : > { %3581 = vperm.xlu1 %14434, %v15054_v18   ;;  %12521 = vmatprep.mubr.msk.bf16.mxu1 %vm1125_vm6, %v14460_v62 }
  0xd2   : > { %20169 = vst [vmem:[#allocation65_spill] sm:$0xff] %v15368_v54  ;;  %v15375_v52 = vsel %vm875_vm0, %v15368_v54, %v3015_v16  ;;  %1748 = vperm.xlu0 %14436, %v15380_v19   ;;  %v3110_v42 = vmul.f32 %v15368_v54, %v14745_v24 }
  0xd3   : > { %20170 = vst [vmem:[#allocation66_spill] sm:$0xff] %v15375_v52  ;;  %v2926_v51 = vpop.permute.xlu1 %2925  ;;  %v2929_v49 = vpop.permute.xlu0 %2928  ;;  %v3111_v18 = vmul.f32 %v15375_v52, %v14748_v25 }
  0xd4   : > { %v3017_v62 = vrot.slane %v2926_v51, 6  ;;  %v3019_v14 = vrot.slane %v2929_v49, 6  ;;  %v15402_v51 = vld [vmem:[%s19529_s1 + $0x8] sm:$0xff] }
  0xd5   : > { %14437 = vset.pattern.permute.xlu1 %v14598_v28  ;;  %v15408_v28 = vld [vmem:[%s19529_s1 + $0x28] sm:$0xff]  ;;  %v3143_v6 = vpack.c.bf16 %v3111_v18, %v3110_v42 }
  0xd6   : > { %v15394_v37 = vsel %vm875_vm0, %v3015_v16, %v3017_v62  ;;  %v15397_v40 = vsel %vm875_vm0, %v3017_v62, %v3019_v14  ;;  %1742 = vperm.xlu1 %14437, %v15402_v51   ;;  %1754 = vperm.xlu0 %14436, %v15408_v28   ;;  %v1543_v16 = vsel %vm875_vm0, %v15244_v33, 0 }
  0xd7   : > { %20171 = vst [vmem:[#allocation67_spill] sm:$0xff] %v15394_v37  ;;  %20172 = vst [vmem:[#allocation68_spill] sm:$0xff] %v15397_v40  ;;  %v3112_v49 = vmul.f32 %v15394_v37, %v14751_v26  ;;  %v3113_v62 = vmul.f32 %v15397_v40, %v14761_v30  ;;  %v2932_v60 = vpop.permute.xlu1 %2931  ;;  %v2935_v22 = vpop.permute.xlu0 %2934  ;;  %v15428_v40 = vld [vmem:[%s19529_s1 + $0x10] sm:$0xff]  ;;  %v3179_v42 = vrot.slane %v3143_v6, 1  ;;  %v15457_v6 = vld [vmem:[%s19529_s1 + $0x20] sm:$0xff] }
  0xd8   : > { %v3021_v47 = vrot.slane %v2932_v60, 6  ;;  %v3023_v61 = vrot.slane %v2935_v22, 6  ;;  %12522 = vmatmul.mubr.msk.bf16.vlgmr.msra.gmra.mrb[0].mxu1 %vm1125_vm6, %v14461_v23  ;;  %v15434_v22 = vld [vmem:[%s19529_s1 + $0x38] sm:$0xff] }
  0xd9   : > { %v3144_v52 = vpack.c.bf16 %v3113_v62, %v3112_v49  ;;  %12525 = vmatprep.mubr.msk.bf16.mxu1 %vm1125_vm6, %v14462_v11  ;;  %12554 = vmatpush3.bf16.msra.mxu1 %v1543_v16  ;;  %v14463_v49 = vld [vmem:[%s19528_s0 + $0x18] sm:$0xff]  }
  0xda   : > { %v15420_v54 = vsel %vm875_vm0, %v3019_v14, %v3021_v47  ;;  %v15423_v33 = vsel %vm875_vm0, %v3021_v47, %v3023_v61  ;;  %1745 = vperm.xlu1 %14437, %v15428_v40   ;;  %1760 = vperm.xlu0 %14436, %v15434_v22  }
  0xdb   : > { %20173 = vst [vmem:[#allocation69_spill] sm:$0xff] %v15420_v54  ;;  %20174 = vst [vmem:[#allocation70_spill] sm:$0xff] %v15423_v33  ;;  %v3114_v60 = vmul.f32 %v15420_v54, %v14767_v32  ;;  %v3115_v47 = vmul.f32 %v15423_v33, %v14764_v31  ;;  %v2938_v11 = vpop.permute.xlu1 %2937  ;;  %v2941_v23 = vpop.permute.xlu0 %2940  ;;  %v3180_v18 = vrot.slane %v3144_v52, 1  ;;  %v14464_v54 = vld [vmem:[%s19528_s0 + $0x20] sm:$0xff]   ;;  %v15463_v52 = vld [vmem:[%s19529_s1 + $0x48] sm:$0xff] }
  0xdc   : > { %v3025_v14 = vrot.slane %v2938_v11, 6  ;;  %v3027_v16 = vrot.slane %v2941_v23, 6 }
  0xdd   : > { %v3145_v62 = vpack.c.bf16 %v3115_v47, %v3114_v60  ;;  %v3181_v37 = vsel %vm1999_vm7, %v3179_v42, %v3180_v18 }
  0xde   : > { %v15449_v4 = vsel %vm875_vm0, %v3023_v61, %v3025_v14  ;;  %v15452_v33 = vsel %vm875_vm0, %v3025_v14, %v3027_v16  ;;  %1751 = vperm.xlu1 %14437, %v15457_v6   ;;  %1766 = vperm.xlu0 %14436, %v15463_v52  }
  0xdf   : > { %20175 = vst [vmem:[#allocation71_spill] sm:$0xff] %v15449_v4  ;;  %20176 = vst [vmem:[#allocation72_spill] sm:$0xff] %v15452_v33  ;;  %v3182_v60 = vrot.slane %v3145_v62, 1  ;;  %v3116_v61 = vmul.f32 %v15449_v4, %v14790_v41  ;;  %v3117_v47 = vmul.f32 %v15452_v33, %v14796_v43  ;;  %12691 = vmatprep.mubr.msk.bf16.mxu0 %vm826_vm3, %v3181_v37  ;;  %v2944_v11 = vpop.permute.xlu1 %2943  ;;  %v2947_v23 = vpop.permute.xlu0 %2946  ;;  %v3683_v62 = vsel %vm875_vm0, %v15217_v8, 0  ;;  %v15485_v37 = vld [vmem:[%s19529_s1 + $0x30] sm:$0xff] }
  0xe0   : > { %v3029_v42 = vrot.slane %v2944_v11, 6  ;;  %v3031_v14 = vrot.slane %v2947_v23, 6  ;;  %12526 = vmatmul.mubr.msk.bf16.gmra.mrb[4].mxu1 %vm1125_vm6, %v14463_v49  ;;  %v14465_v23 = vld [vmem:[%s19528_s0 + $0x28] sm:$0xff]  }
  0xe1   : > { %v3183_v15 = vsel %vm1999_vm7, %v3180_v18, %v3182_v60  ;;  %v3146_v1 = vpack.c.bf16 %v3117_v47, %v3116_v61  ;;  %12529 = vmatprep.mubr.msk.bf16.mxu1 %vm1125_vm6, %v14464_v54  ;;  %v15491_v54 = vld [vmem:[%s19529_s1 + $0x58] sm:$0xff] }
  0xe2   : > { %v15477_v4 = vsel %vm875_vm0, %v3027_v16, %v3029_v42  ;;  %v15480_v33 = vsel %vm875_vm0, %v3029_v42, %v3031_v14  ;;  %1757 = vperm.xlu1 %14437, %v15485_v37   ;;  %1772 = vperm.xlu0 %14436, %v15491_v54   ;;  %v15505_v42 = vld [vmem:[%s19532_s4 + $0x4] sm:$0x3] }
  0xe3   : > { %20177 = vst [vmem:[#allocation73_spill] sm:$0xff] %v15477_v4  ;;  %20178 = vst [vmem:[#allocation74_spill] sm:$0xff] %v15480_v33  ;;  %v3118_v8 = vmul.f32 %v15477_v4, %v14813_v58  ;;  %v3119_v18 = vmul.f32 %v15480_v33, %v14810_v57  ;;  %12692 = vmatmul.mubr.msk.bf16.vlgmr.msra.gmra.mrb[0].mxu0 %vm826_vm3, %v3183_v15  ;;  %v2950_v16 = vpop.permute.xlu1 %2949  ;;  %v2953_v49 = vpop.permute.xlu0 %2952  ;;  %v3184_v61 = vrot.slane %v3146_v1, 1  ;;  %v14466_v15 = vld [vmem:[%s19528_s0 + $0x30] sm:$0xff]   ;;  %14407 = vmatprep.subr.msk.bf16.mxu1 %vm875_vm0, %v15505_v42 }
  0xe4   : > { %v3033_v47 = vrot.slane %v2950_v16, 6  ;;  %v3035_v11 = vrot.slane %v2953_v49, 6  ;;  %12724 = vmatpush3.bf16.msra.mxu0 %v3683_v62  ;;  %v15522_v16 = vld [vmem:[%s19529_s1 + $0x40] sm:$0xff] }
  0xe5   : > { %v3185_v4 = vsel %vm1999_vm7, %v3182_v60, %v3184_v61  ;;  %v3147_v33 = vpack.c.bf16 %v3119_v18, %v3118_v8  ;;  %v15528_v60 = vld [vmem:[%s19529_s1 + $0x68] sm:$0xff] }
  0xe6   : > { %v15514_v1 = vsel %vm875_vm0, %v3031_v14, %v3033_v47  ;;  %v15517_v62 = vsel %vm875_vm0, %v3033_v47, %v3035_v11  ;;  %1763 = vperm.xlu1 %14437, %v15522_v16   ;;  %20181 = vst [vmem:[#allocation77_spill] sm:$0xff] %v15528_v60  ;;  %1778 = vperm.xlu0 %14436, %v15528_v60  }
  0xe7   : > { %20179 = vst [vmem:[#allocation75_spill] sm:$0xff] %v15514_v1  ;;  %20180 = vst [vmem:[#allocation76_spill] sm:$0xff] %v15517_v62  ;;  %v3120_v14 = vmul.f32 %v15514_v1, %v14855_v35  ;;  %v3121_v8 = vmul.f32 %v15517_v62, %v14848_v27  ;;  %12695 = vmatprep.mubr.msk.bf16.mxu0 %vm826_vm3, %v3185_v4  ;;  %v2956_v18 = vpop.permute.xlu1 %2955  ;;  %v2959_v49 = vpop.permute.xlu0 %2958  ;;  %v3186_v47 = vrot.slane %v3147_v33, 1  ;;  %v15542_v1 = vld [vmem:[%s19532_s4 + $0xe] sm:$0x3]  ;;  %v15553_v33 = vld [vmem:[%s19529_s1 + $0x50] sm:$0xff] }
  0xe8   : > { %v3037_v34 = vrot.slane %v2956_v18, 6  ;;  %v3039_v17 = vrot.slane %v2959_v49, 6  ;;  %12530 = vmatmul.mubr.msk.bf16.gmra.mrb[8].mxu1 %vm1125_vm6, %v14465_v23  ;;  %20184 = vst [vmem:[#allocation80_spill] sm:$0xff] %v15553_v33  ;;  %14412 = vmatprep.subr.msk.bf16.mxu0 %vm875_vm0, %v15542_v1  ;;  %v14467_v49 = vld [vmem:[%s19528_s0 + $0x38] sm:$0xff]  }
  0xe9   : > { %v3187_v25 = vsel %vm1999_vm7, %v3184_v61, %v3186_v47  ;;  %v3148_v24 = vpack.c.bf16 %v3121_v8, %v3120_v14  ;;  %12533 = vmatprep.mubr.msk.bf16.mxu1 %vm1125_vm6, %v14466_v15  ;;  %v15559_v61 = vld [vmem:[%s19529_s1 + $0x78] sm:$0xff] }
  0xea   : > { %v15545_v62 = vsel %vm875_vm0, %v3035_v11, %v3037_v34  ;;  %v15548_v4 = vsel %vm875_vm0, %v3037_v34, %v3039_v17  ;;  %1769 = vperm.xlu1 %14437, %v15553_v33   ;;  %1784 = vperm.xlu0 %14436, %v15559_v61  }
  0xeb   : > { %20182 = vst [vmem:[#allocation78_spill] sm:$0xff] %v15545_v62  ;;  %20183 = vst [vmem:[#allocation79_spill] sm:$0xff] %v15548_v4  ;;  %v3122_v11 = vmul.f32 %v15545_v62, %v20138_v0  ;;  %v3123_v34 = vmul.f32 %v15548_v4, %v20137_v29  ;;  %12696 = vmatmul.mubr.msk.bf16.gmra.mrb[4].mxu0 %vm826_vm3, %v3187_v25  ;;  %v2962_v23 = vpop.permute.xlu1 %2961  ;;  %v2965_v15 = vpop.permute.xlu0 %2964  ;;  %v3188_v14 = vrot.slane %v3148_v24, 1  ;;  %v14468_v4 = vld [vmem:[%s19528_s0 + $0x40] sm:$0xff]  }
  0xec   : > { %v3041_v8 = vrot.slane %v2962_v23, 6  ;;  %v3043_v18 = vrot.slane %v2965_v15, 6  ;;  %v15585_v23 = vld [vmem:[%s19529_s1 + $0x60] sm:$0xff] }
  0xed   : > { %v3189_v60 = vsel %vm1999_vm7, %v3186_v47, %v3188_v14  ;;  %v3149_v62 = vpack.c.bf16 %v3123_v34, %v3122_v11  ;;  %20187 = vst [vmem:[#allocation83_spill] sm:$0xff] %v15585_v23  ;;  %v15591_v47 = vld [vmem:[%s19529_s1 + $0x88] sm:$0xff] }
  0xee   : > { %v15577_v25 = vsel %vm875_vm0, %v3039_v17, %v3041_v8  ;;  %v15580_v24 = vsel %vm875_vm0, %v3041_v8, %v3043_v18  ;;  %1775 = vperm.xlu1 %14437, %v15585_v23   ;;  %20188 = vst [vmem:[#allocation84_spill] sm:$0xff] %v15591_v47  ;;  %1790 = vperm.xlu0 %14436, %v15591_v47  }
  0xef   : > { %20185 = vst [vmem:[#allocation81_spill] sm:$0xff] %v15577_v25  ;;  %20186 = vst [vmem:[#allocation82_spill] sm:$0xff] %v15580_v24  ;;  %v3124_v17 = vmul.f32 %v15577_v25, %v20142_v44  ;;  %v3125_v11 = vmul.f32 %v15580_v24, %v20141_v3  ;;  %12699 = vmatprep.mubr.msk.bf16.mxu0 %vm826_vm3, %v3189_v60  ;;  %v2968_v34 = vpop.permute.xlu1 %2967  ;;  %v2971_v15 = vpop.permute.xlu0 %2970  ;;  %v3190_v8 = vrot.slane %v3149_v62, 1  ;;  %v15611_v60 = vld [vmem:[%s19529_s1 + $0x70] sm:$0xff]  ;;  %v15617_v62 = vld [vmem:[%s19529_s1 + $0x98] sm:$0xff] }
  0xf0   : > { %v3045_v46 = vrot.slane %v2968_v34, 6  ;;  %v3047_v13 = vrot.slane %v2971_v15, 6  ;;  %12534 = vmatmul.mubr.msk.bf16.gmra.mrb[12].mxu1 %vm1125_vm6, %v14467_v49  ;;  %20191 = vst [vmem:[#allocation87_spill] sm:$0xff] %v15611_v60  ;;  %v14469_v34 = vld [vmem:[%s19528_s0 + $0x48] sm:$0xff]  }
  0xf1   : > { %v3191_v36 = vsel %vm1999_vm7, %v3188_v14, %v3190_v8  ;;  %v3150_v23 = vpack.c.bf16 %v3125_v11, %v3124_v17  ;;  %12537 = vmatprep.mubr.msk.bf16.mxu1 %vm1125_vm6, %v14468_v4 }
  0xf2   : > { %v15603_v47 = vsel %vm875_vm0, %v3043_v18, %v3045_v46  ;;  %v15606_v25 = vsel %vm875_vm0, %v3045_v46, %v3047_v13  ;;  %1781 = vperm.xlu1 %14437, %v15611_v60   ;;  %1796 = vperm.xlu0 %14436, %v15617_v62  }
  0xf3   : > { %20189 = vst [vmem:[#allocation85_spill] sm:$0xff] %v15603_v47  ;;  %20190 = vst [vmem:[#allocation86_spill] sm:$0xff] %v15606_v25  ;;  %v3126_v4 = vmul.f32 %v15603_v47, %v20146_v5  ;;  %v3127_v46 = vmul.f32 %v15606_v25, %v20145_v56  ;;  %12700 = vmatmul.mubr.msk.bf16.gmra.mrb[8].mxu0 %vm826_vm3, %v3191_v36  ;;  %v2974_v14 = vpop.permute.xlu1 %2973  ;;  %v2977_v18 = vpop.permute.xlu0 %2976  ;;  %v3192_v49 = vrot.slane %v3150_v23, 1  ;;  %v14470_v47 = vld [vmem:[%s19528_s0 + $0x50] sm:$0xff]   ;;  %v15641_v23 = vld [vmem:[%s19529_s1 + $0x80] sm:$0xff] }
  0xf4   : > { %v3049_v17 = vrot.slane %v2974_v14, 6  ;;  %v3051_v11 = vrot.slane %v2977_v18, 6  ;;  %20194 = vst [vmem:[#allocation90_spill] sm:$0xff] %v15641_v23 }
  0xf5   : > { %v3193_v15 = vsel %vm1999_vm7, %v3190_v8, %v3192_v49  ;;  %v3151_v24 = vpack.c.bf16 %v3127_v46, %v3126_v4  ;;  %v15647_v8 = vld [vmem:[%s19529_s1 + $0xa8] sm:$0xff] }
  0xf6   : > { %v15633_v25 = vsel %vm875_vm0, %v3047_v13, %v3049_v17  ;;  %v15636_v36 = vsel %vm875_vm0, %v3049_v17, %v3051_v11  ;;  %1787 = vperm.xlu1 %14437, %v15641_v23   ;;  %20195 = vst [vmem:[#allocation91_spill] sm:$0xff] %v15647_v8  ;;  %1802 = vperm.xlu0 %14436, %v15647_v8  }
  0xf7   : > { %20192 = vst [vmem:[#allocation88_spill] sm:$0xff] %v15633_v25  ;;  %20193 = vst [vmem:[#allocation89_spill] sm:$0xff] %v15636_v36  ;;  %v3128_v13 = vmul.f32 %v15633_v25, %v20150_v21  ;;  %v3129_v4 = vmul.f32 %v15636_v36, %v20149_v10  ;;  %12703 = vmatprep.mubr.msk.bf16.mxu0 %vm826_vm3, %v3193_v15  ;;  %v2980_v46 = vpop.permute.xlu1 %2979  ;;  %v2983_v14 = vpop.permute.xlu0 %2982  ;;  %v3194_v18 = vrot.slane %v3151_v24, 1  ;;  %v15667_v15 = vld [vmem:[%s19529_s1 + $0x90] sm:$0xff]  ;;  %v15673_v24 = vld [vmem:[%s19529_s1 + $0xb8] sm:$0xff] }
  0xf8   : > { %v3053_v17 = vrot.slane %v2980_v46, 6  ;;  %v3055_v60 = vrot.slane %v2983_v14, 6  ;;  %12538 = vmatmul.mubr.msk.bf16.gmra.mrb[16].mxu1 %vm1125_vm6, %v14469_v34  ;;  %20198 = vst [vmem:[#allocation94_spill] sm:$0xff] %v15667_v15  ;;  %v14471_v14 = vld [vmem:[%s19528_s0 + $0x58] sm:$0xff]  }
  0xf9   : > { %v3195_v23 = vsel %vm1999_vm7, %v3192_v49, %v3194_v18  ;;  %v3152_v33 = vpack.c.bf16 %v3129_v4, %v3128_v13  ;;  %12541 = vmatprep.mubr.msk.bf16.mxu1 %vm1125_vm6, %v14470_v47 }
  0xfa   : > { %v15659_v8 = vsel %vm875_vm0, %v3051_v11, %v3053_v17  ;;  %v15662_v25 = vsel %vm875_vm0, %v3053_v17, %v3055_v60  ;;  %1793 = vperm.xlu1 %14437, %v15667_v15   ;;  %1808 = vperm.xlu0 %14436, %v15673_v24  }
  0xfb   : > { %20196 = vst [vmem:[#allocation92_spill] sm:$0xff] %v15659_v8  ;;  %20197 = vst [vmem:[#allocation93_spill] sm:$0xff] %v15662_v25  ;;  %v3130_v47 = vmul.f32 %v15659_v8, %v20154_v53  ;;  %v3131_v49 = vmul.f32 %v15662_v25, %v20153_v7  ;;  %12704 = vmatmul.mubr.msk.bf16.gmra.mrb[12].mxu0 %vm826_vm3, %v3195_v23  ;;  %v2986_v11 = vpop.permute.xlu1 %2985  ;;  %v2989_v34 = vpop.permute.xlu0 %2988  ;;  %v3196_v13 = vrot.slane %v3152_v33, 1  ;;  %v14472_v8 = vld [vmem:[%s19528_s0 + $0x60] sm:$0xff]  }
  0xfc   : > { %v3057_v4 = vrot.slane %v2986_v11, 6  ;;  %v3059_v46 = vrot.slane %v2989_v34, 6  ;;  %v15697_v33 = vld [vmem:[%s19529_s1 + $0xa0] sm:$0xff] }
  0xfd   : > { %v3197_v17 = vsel %vm1999_vm7, %v3194_v18, %v3196_v13  ;;  %v3153_v36 = vpack.c.bf16 %v3131_v49, %v3130_v47  ;;  %20201 = vst [vmem:[#allocation97_spill] sm:$0xff] %v15697_v33  ;;  %v15703_v18 = vld [vmem:[%s19529_s1 + $0xc8] sm:$0xff] }
  0xfe   : > { %v15689_v25 = vsel %vm875_vm0, %v3055_v60, %v3057_v4  ;;  %v15692_v23 = vsel %vm875_vm0, %v3057_v4, %v3059_v46  ;;  %1799 = vperm.xlu1 %14437, %v15697_v33   ;;  %20202 = vst [vmem:[#allocation98_spill] sm:$0xff] %v15703_v18  ;;  %1814 = vperm.xlu0 %14436, %v15703_v18  }
  0xff   : > { %20199 = vst [vmem:[#allocation95_spill] sm:$0xff] %v15689_v25  ;;  %20200 = vst [vmem:[#allocation96_spill] sm:$0xff] %v15692_v23  ;;  %v3132_v60 = vmul.f32 %v15689_v25, %v20158_v12  ;;  %v3133_v47 = vmul.f32 %v15692_v23, %v20157_v20  ;;  %12707 = vmatprep.mubr.msk.bf16.mxu0 %vm826_vm3, %v3197_v17  ;;  %v2992_v49 = vpop.permute.xlu1 %2991  ;;  %v2995_v11 = vpop.permute.xlu0 %2994  ;;  %v3198_v34 = vrot.slane %v3153_v36, 1  ;;  %v15723_v17 = vld [vmem:[%s19529_s1 + $0xb0] sm:$0xff]  ;;  %v15729_v36 = vld [vmem:[%s19529_s1 + $0xd8] sm:$0xff] }
 0x100   : > { %v3061_v4 = vrot.slane %v2992_v49, 6  ;;  %v3063_v15 = vrot.slane %v2995_v11, 6  ;;  %12542 = vmatmul.mubr.msk.bf16.gmra.mrb[20].mxu1 %vm1125_vm6, %v14471_v14  ;;  %20205 = vst [vmem:[#allocation101_spill] sm:$0xff] %v15723_v17  ;;  %v14473_v11 = vld [vmem:[%s19528_s0 + $0x68] sm:$0xff]  }
 0x101   : > { %v3199_v33 = vsel %vm1999_vm7, %v3196_v13, %v3198_v34  ;;  %v3154_v7 = vpack.c.bf16 %v3133_v47, %v3132_v60  ;;  %12545 = vmatprep.mubr.msk.bf16.mxu1 %vm1125_vm6, %v14472_v8 }
 0x102   : > { %v15715_v18 = vsel %vm875_vm0, %v3059_v46, %v3061_v4  ;;  %v15718_v25 = vsel %vm875_vm0, %v3061_v4, %v3063_v15  ;;  %1805 = vperm.xlu1 %14437, %v15723_v17   ;;  %1820 = vperm.xlu0 %14436, %v15729_v36  }
 0x103   : > { %20203 = vst [vmem:[#allocation99_spill] sm:$0xff] %v15715_v18  ;;  %20204 = vst [vmem:[#allocation100_spill] sm:$0xff] %v15718_v25  ;;  %v3134_v8 = vmul.f32 %v15715_v18, %v20162_v59  ;;  %v3135_v13 = vmul.f32 %v15718_v25, %v20161_v39  ;;  %12708 = vmatmul.mubr.msk.bf16.gmra.mrb[16].mxu0 %vm826_vm3, %v3199_v33  ;;  %v2998_v46 = vpop.permute.xlu1 %2997  ;;  %v3001_v14 = vpop.permute.xlu0 %3000  ;;  %v3200_v60 = vrot.slane %v3154_v7, 1  ;;  %v14474_v18 = vld [vmem:[%s19528_s0 + $0x70] sm:$0xff]   ;;  %v15753_v7 = vld [vmem:[%s19529_s1 + $0xc0] sm:$0xff] }
 0x104   : > { %v3065_v47 = vrot.slane %v2998_v46, 6  ;;  %v3067_v49 = vrot.slane %v3001_v14, 6  ;;  %20208 = vst [vmem:[#allocation104_spill] sm:$0xff] %v15753_v7 }
 0x105   : > { %v3201_v4 = vsel %vm1999_vm7, %v3198_v34, %v3200_v60  ;;  %v3155_v23 = vpack.c.bf16 %v3135_v13, %v3134_v8  ;;  %v15759_v34 = vld [vmem:[%s19529_s1 + $0xe8] sm:$0xff] }
 0x106   : > { %v15745_v25 = vsel %vm875_vm0, %v3063_v15, %v3065_v47  ;;  %v15748_v33 = vsel %vm875_vm0, %v3065_v47, %v3067_v49  ;;  %1811 = vperm.xlu1 %14437, %v15753_v7   ;;  %20209 = vst [vmem:[#allocation105_spill] sm:$0xff] %v15759_v34  ;;  %1826 = vperm.xlu0 %14436, %v15759_v34   ;;  %v20210_v7 = vmov 0  }
 0x107   : > { %20206 = vst [vmem:[#allocation102_spill] sm:$0xff] %v15745_v25  ;;  %20207 = vst [vmem:[#allocation103_spill] sm:$0xff] %v15748_v33  ;;  %v3136_v15 = vmul.f32 %v15745_v25, %v20166_v2  ;;  %v3137_v8 = vmul.f32 %v15748_v33, %v20165_v55  ;;  %12711 = vmatprep.mubr.msk.bf16.mxu0 %vm826_vm3, %v3201_v4  ;;  %v3004_v13 = vpop.permute.xlu1 %3003  ;;  %v3007_v46 = vpop.permute.xlu0 %3006  ;;  %v3202_v14 = vrot.slane %v3155_v23, 1  ;;  %v15769_v39 = vrot.slane %v20210_v7, 1  ;;  %v15782_v23 = vld [vmem:[%s19529_s1 + $0xd0] sm:$0xff] }
 0x108   : > { %v3069_v47 = vrot.slane %v3004_v13, 6  ;;  %v3071_v17 = vrot.slane %v3007_v46, 6  ;;  %12546 = vmatmul.mubr.msk.bf16.gmra.mrb[24].mxu1 %vm1125_vm6, %v14473_v11  ;;  %20214 = vst [vmem:[#allocation109_spill] sm:$0xff] %v15782_v23  ;;  %v14475_v46 = vld [vmem:[%s19528_s0 + $0x78] sm:$0xff]  }
 0x109   : > { %20211 = vst [vmem:[#allocation106_spill] sm:$0xff] %v15769_v39  ;;  %v3203_v34 = vsel %vm1999_vm7, %v3200_v60, %v3202_v14  ;;  %v3156_v59 = vpack.c.bf16 %v3137_v8, %v3136_v15  ;;  %12549 = vmatprep.mubr.msk.bf16.mxu1 %vm1125_vm6, %v14474_v18  ;;  %v15788_v60 = vld [vmem:[%s19529_s1 + $0xf8] sm:$0xff] }
 0x10a   : > { %v15774_v25 = vsel %vm875_vm0, %v3067_v49, %v3069_v47  ;;  %v15777_v4 = vsel %vm875_vm0, %v3069_v47, %v3071_v17  ;;  %1817 = vperm.xlu1 %14437, %v15782_v23   ;;  %1832 = vperm.xlu0 %14436, %v15788_v60   ;;  %v20216_v23 = vld [vmem:[#allocation4_spill] sm:$0xff] }
 0x10b   : > { %20212 = vst [vmem:[#allocation107_spill] sm:$0xff] %v15774_v25  ;;  %20213 = vst [vmem:[#allocation108_spill] sm:$0xff] %v15777_v4  ;;  %v3138_v18 = vmul.f32 %v15774_v25, %v15084_v63  ;;  %v3139_v49 = vmul.f32 %v15777_v4, %v15081_v38  ;;  %12712 = vmatmul.mubr.msk.bf16.gmra.mrb[20].mxu0 %vm826_vm3, %v3203_v34  ;;  %v3010_v11 = vpop.permute.xlu1 %3009  ;;  %v3013_v7 = vpop.permute.xlu0 %3012  ;;  %v3204_v15 = vrot.slane %v3156_v59, 1  ;;  %v15815_v34 = vld [vmem:[%s19529_s1 + $0xe0] sm:$0xff] }
 0x10c   : > { %v3073_v8 = vrot.slane %v3010_v11, 6  ;;  %v15796_v13 = vrot.slane %v3013_v7, 6  ;;  %v1373_v25 = vsel %vm1361_vm2, %v15769_v39, %v20216_v23  ;;  %20219 = vst [vmem:[#allocation112_spill] sm:$0xff] %v15815_v34 }
 0x10d   : > { %v3205_v47 = vsel %vm1999_vm7, %v3202_v14, %v3204_v15  ;;  %v3157_v33 = vpack.c.bf16 %v3139_v49, %v3138_v18  ;;  %v19760_v14 = vmov 8  }
 0x10e   : > { %20215 = vst [vmem:[#allocation110_spill] sm:$0xff] %v15796_v13  ;;  %v15806_v4 = vsel %vm875_vm0, %v3071_v17, %v3073_v8  ;;  %v15810_v59 = vsel %vm875_vm0, %v3073_v8, %v15796_v13  ;;  %1823 = vperm.xlu1 %14437, %v15815_v34   ;;  %14439 = vset.pattern.permute.xlu0 %v19760_v14 }
 0x10f   : > { %20217 = vst [vmem:[#allocation4_spill] sm:$0xff] %v15806_v4  ;;  %20218 = vst [vmem:[#allocation111_spill] sm:$0xff] %v15810_v59  ;;  %v3142_v23 = vmul.f32 %v15796_v13, %v15113_v48  ;;  %v3140_v17 = vmul.f32 %v15806_v4, %v15101_v9  ;;  %12715 = vmatprep.mubr.msk.bf16.mxu0 %vm826_vm3, %v3205_v47  ;;  %4096 = vperm.xlu0 %14439, %v15402_v51   ;;  %v3206_v18 = vrot.slane %v3157_v33, 1  ;;  %v15837_v47 = vld [vmem:[%s19529_s1 + $0xf0] sm:$0xff]  ;;  %v20227_v4 = vld [vmem:[#allocation5_spill] sm:$0xff] }
 0x110   : > { %v3141_v49 = vmul.f32 %v15810_v59, %v15104_v50  ;;  %v15827_v11 = vpop.permute.xlu1 %3457  ;;  %v15829_v7 = vpop.permute.xlu0 %3461  ;;  %12550 = vmatmul.mubr.msk.bf16.gmra.mrb[28].mxu1 %vm1125_vm6, %v14475_v46 }
 0x111   : > { %20220 = vst [vmem:[#allocation113_spill] sm:$0xff] %v15827_v11  ;;  %20221 = vst [vmem:[#allocation114_spill] sm:$0xff] %v15829_v7  ;;  %v3207_v8 = vsel %vm1999_vm7, %v3204_v15, %v3206_v18  ;;  %12555 = vmatprep.mubr.msk.bf16.mxu1 %vm826_vm3, %v1373_v25  ;;  %v3159_v33 = vpack.c.bf16 %v3142_v23, %v3142_v23  ;;  %v3584_v25 = vmul.f32 %v15827_v11, %v14751_v26 }
 0x112   : > { %v3158_v14 = vpack.c.bf16 %v3141_v49, %v3140_v17  ;;  %1829 = vperm.xlu1 %14437, %v15837_v47   ;;  %v3585_v17 = vmul.f32 %v15829_v7, %v14761_v30  ;;  %v20224_v49 = vmov 8   ;;  %v20228_v7 = vld [vmem:[#allocation6_spill] sm:$0xff] }
 0x113   : > { %12716 = vmatmul.mubr.msk.bf16.gmra.mrb[24].mxu0 %vm826_vm3, %v3207_v8  ;;  %4105 = vperm.xlu0 %14439, %v15457_v6   ;;  %v3210_v23 = vrot.slane %v3159_v33, 1 }
 0x114   : > { %v3208_v13 = vrot.slane %v3158_v14, 1  ;;  %v15842_v59 = vpop.permute.xlu1 %3465  ;;  %v15844_v46 = vpop.permute.xlu0 %3473  ;;  %v2082_v14 = vsel %vm875_vm0, %v15505_v42, 0 }
 0x115   : > { %20222 = vst [vmem:[#allocation115_spill] sm:$0xff] %v15842_v59  ;;  %20223 = vst [vmem:[#allocation116_spill] sm:$0xff] %v15844_v46 }
 0x116   : > { %v3209_v15 = vsel %vm1999_vm7, %v3206_v18, %v3208_v13  ;;  %14438 = vset.pattern.permute.xlu1 %v20224_v49  ;;  %v3211_v33 = vsel %vm1999_vm7, %v3208_v13, %v3210_v23 }
 0x117   : > { %12719 = vmatprep.mubr.msk.bf16.mxu0 %vm826_vm3, %v3209_v15  ;;  %4093 = vperm.xlu1 %14438, %v15365_v45   ;;  %v3616_v15 = vpack.c.bf16 %v3585_v17, %v3584_v25  ;;  %v3586_v25 = vmul.f32 %v15842_v59, %v14767_v32 }
 0x118   : > { %4114 = vperm.xlu0 %14439, %v15434_v22   ;;  %v15857_v8 = vpop.permute.xlu1 %3469  ;;  %v15859_v18 = vpop.permute.xlu0 %3481  ;;  %12556 = vmatmul.mubr.msk.bf16.vlgmr.msra.gmra.mrb[0].mxu1 %vm826_vm3, %v20227_v4 }
 0x119   : > { %20225 = vst [vmem:[#allocation117_spill] sm:$0xff] %v15857_v8  ;;  %20226 = vst [vmem:[#allocation118_spill] sm:$0xff] %v15859_v18  ;;  %12559 = vmatprep.mubr.msk.bf16.mxu1 %vm826_vm3, %v20228_v7  ;;  %12588 = vmatpush3.bf16.msra.mxu1 %v2082_v14  ;;  %v3587_v4 = vmul.f32 %v15857_v8, %v14764_v31  ;;  %v3588_v14 = vmul.f32 %v15844_v46, %v14790_v41  ;;  %v20234_v8 = vld [vmem:[#allocation10_spill] sm:$0xff] }
 0x11b   : > { %12720 = vmatmul.mubr.msk.bf16.gmra.mrb[28].mxu0 %vm826_vm3, %v3211_v33  ;;  %4099 = vperm.xlu1 %14438, %v15428_v40   ;;  %v20233_v33 = vld [vmem:[#allocation7_spill] sm:$0xff] }
 0x11c   : > { %4126 = vperm.xlu0 %14439, %v15491_v54   ;;  %12725 = vmatprep.mubr.msk.bf16.mxu0 %vm826_vm3, %v3616_v15  ;;  %v15870_v42 = vpop.permute.xlu1 %3477  ;;  %v15872_v11 = vpop.permute.xlu0 %3489  ;;  %v3617_v15 = vpack.c.bf16 %v3587_v4, %v3586_v25  ;;  %v3590_v4 = vmul.f32 %v15859_v18, %v14813_v58  ;;  %v19797_v25 = vmov 3  }
 0x11d   : > { %20229 = vst [vmem:[#allocation5_spill] sm:$0xff] %v15870_v42  ;;  %20230 = vst [vmem:[#allocation6_spill] sm:$0xff] %v15872_v11  ;;  %v3589_v13 = vmul.f32 %v15870_v42, %v14796_v43  ;;  %v3897_v42 = vsel %vm875_vm0, %v15542_v1, 0  ;;  %v3592_v1 = vmul.f32 %v15872_v11, %v14855_v35  ;;  %v20240_v11 = vld [vmem:[#allocation16_spill] sm:$0xff] }
 0x11f   : > { %4102 = vperm.xlu1 %14438, %v15380_v19   ;;  %v3618_v46 = vpack.c.bf16 %v3589_v13, %v3588_v14 }
 0x120   : > { %4138 = vperm.xlu0 %14439, %v15559_v61   ;;  %v15884_v17 = vpop.permute.xlu1 %3485  ;;  %v15886_v23 = vpop.permute.xlu0 %3497  ;;  %12560 = vmatmul.mubr.msk.bf16.gmra.mrb[4].mxu1 %vm826_vm3, %v20233_v33 }
 0x121   : > { %20231 = vst [vmem:[#allocation119_spill] sm:$0xff] %v15884_v17  ;;  %20232 = vst [vmem:[#allocation120_spill] sm:$0xff] %v15886_v23  ;;  %12563 = vmatprep.mubr.msk.bf16.mxu1 %vm826_vm3, %v20234_v8  ;;  %v3591_v14 = vmul.f32 %v15884_v17, %v14810_v57  ;;  %v20239_v17 = vld [vmem:[#allocation13_spill] sm:$0xff] }
 0x123   : > { %12726 = vmatmul.mubr.msk.bf16.vlgmr.msra.gmra.mrb[0].mxu0 %vm826_vm3, %v3617_v15  ;;  %4108 = vperm.xlu1 %14438, %v15408_v28   ;;  %v3619_v18 = vpack.c.bf16 %v3591_v14, %v3590_v4  ;;  %v3594_v14 = vmul.f32 %v15886_v23, %v20138_v0 }
 0x124   : > { %4150 = vperm.xlu0 %14439, %v15617_v62   ;;  %12729 = vmatprep.mubr.msk.bf16.mxu0 %vm826_vm3, %v3618_v46  ;;  %v15898_v59 = vpop.permute.xlu1 %3493  ;;  %v15900_v34 = vpop.permute.xlu0 %3505 }
 0x125   : > { %20235 = vst [vmem:[#allocation7_spill] sm:$0xff] %v15898_v59  ;;  %20236 = vst [vmem:[#allocation10_spill] sm:$0xff] %v15900_v34  ;;  %12758 = vmatpush3.bf16.msra.mxu0 %v3897_v42  ;;  %v3593_v13 = vmul.f32 %v15898_v59, %v14848_v27  ;;  %v15922_v42 = vld [vmem:[%s19532_s4 + $0x10] sm:$0x3] }
 0x126   : > { %14413 = vmatprep.subr.msk.bf16.mxu0 %vm875_vm0, %v15922_v42 }
 0x127   : > { %14440 = vset.pattern.permute.xlu1 %v19797_v25  ;;  %v3620_v59 = vpack.c.bf16 %v3593_v13, %v3592_v1  ;;  %v3596_v13 = vmul.f32 %v15900_v34, %v20142_v44 }
 0x128   : > { %4162 = vperm.xlu0 %14439, %v15673_v24   ;;  %2282 = vperm.xlu1 %14440, %v15402_v51   ;;  %v15913_v46 = vpop.permute.xlu1 %3501  ;;  %v15915_v15 = vpop.permute.xlu0 %3513 }
 0x129   : > { %20237 = vst [vmem:[#allocation121_spill] sm:$0xff] %v15913_v46  ;;  %20238 = vst [vmem:[#allocation122_spill] sm:$0xff] %v15915_v15  ;;  %12564 = vmatmul.mubr.msk.bf16.gmra.mrb[8].mxu1 %vm826_vm3, %v20239_v17  ;;  %v3595_v1 = vmul.f32 %v15913_v46, %v20137_v29  ;;  %v20245_v46 = vld [vmem:[#allocation19_spill] sm:$0xff] }
 0x12a   : > { %12567 = vmatprep.mubr.msk.bf16.mxu1 %vm826_vm3, %v20240_v11 }
 0x12b   : > { %12730 = vmatmul.mubr.msk.bf16.gmra.mrb[4].mxu0 %vm826_vm3, %v3619_v18  ;;  %v3621_v23 = vpack.c.bf16 %v3595_v1, %v3594_v14  ;;  %v3598_v14 = vmul.f32 %v15915_v15, %v20146_v5 }
 0x12c   : > { %4174 = vperm.xlu0 %14439, %v15729_v36   ;;  %12733 = vmatprep.mubr.msk.bf16.mxu0 %vm826_vm3, %v3620_v59  ;;  %v15931_v51 = vpop.permute.xlu1 %3509  ;;  %v15933_v4 = vpop.permute.xlu0 %3521 }
 0x12d   : > { %20241 = vst [vmem:[#allocation13_spill] sm:$0xff] %v15931_v51  ;;  %20242 = vst [vmem:[#allocation16_spill] sm:$0xff] %v15933_v4  ;;  %2286 = vperm.xlu1 %14440, %v15428_v40   ;;  %v3597_v18 = vmul.f32 %v15931_v51, %v20141_v3  ;;  %v20246_v51 = vld [vmem:[#allocation22_spill] sm:$0xff]  ;;  %v3600_v1 = vmul.f32 %v15933_v4, %v20150_v21  ;;  %v20252_v4 = vld [vmem:[#allocation28_spill] sm:$0xff] }
 0x12f   : > { %v3622_v40 = vpack.c.bf16 %v3597_v18, %v3596_v13 }
 0x130   : > { %14452 = vset.pattern.permute.xlu0 %v19797_v25  ;;  %v15945_v59 = vpop.permute.xlu1 %3517  ;;  %v15947_v39 = vpop.permute.xlu0 %3529 }
 0x131   : > { %20243 = vst [vmem:[#allocation123_spill] sm:$0xff] %v15945_v59  ;;  %20244 = vst [vmem:[#allocation124_spill] sm:$0xff] %v15947_v39  ;;  %14441 = vset.pattern.permute.xlu1 %v20224_v49  ;;  %2278 = vperm.xlu0 %14452, %v15365_v45   ;;  %v15965_v45 = vld [vmem:[%s19532_s4 + $0x6] sm:$0x3] }
 0x132   : > { %4111 = vperm.xlu1 %14441, %v15485_v37   ;;  %12568 = vmatmul.mubr.msk.bf16.gmra.mrb[12].mxu1 %vm826_vm3, %v20245_v46 }
 0x133   : > { %12734 = vmatmul.mubr.msk.bf16.gmra.mrb[8].mxu0 %vm826_vm3, %v3621_v23  ;;  %12571 = vmatprep.mubr.msk.bf16.mxu1 %vm826_vm3, %v20246_v51  ;;  %v3599_v23 = vmul.f32 %v15945_v59, %v20145_v56  ;;  %v20251_v59 = vld [vmem:[#allocation25_spill] sm:$0xff] }
 0x134   : > { %12737 = vmatprep.mubr.msk.bf16.mxu0 %vm826_vm3, %v3622_v40  ;;  %v15958_v25 = vpop.permute.xlu1 %3525  ;;  %v15960_v34 = vpop.permute.xlu0 %3537  ;;  %14408 = vmatprep.subr.msk.bf16.mxu1 %vm875_vm0, %v15965_v45 }
 0x135   : > { %20247 = vst [vmem:[#allocation19_spill] sm:$0xff] %v15958_v25  ;;  %20248 = vst [vmem:[#allocation22_spill] sm:$0xff] %v15960_v34  ;;  %2290 = vperm.xlu0 %14452, %v15380_v19   ;;  %v3601_v13 = vmul.f32 %v15958_v25, %v20149_v10  ;;  %v3623_v15 = vpack.c.bf16 %v3599_v23, %v3598_v14  ;;  %v20255_v14 = vld [vmem:[#allocation20_spill] sm:$0xff] }
 0x136   : > { %4117 = vperm.xlu1 %14441, %v15522_v16  }
 0x137   : > { %v3624_v19 = vpack.c.bf16 %v3601_v13, %v3600_v1  ;;  %v20256_v13 = vmov 3  }
 0x138   : > { %v15979_v18 = vpop.permute.xlu1 %3533  ;;  %v15981_v40 = vpop.permute.xlu0 %3545 }
 0x139   : > { %20249 = vst [vmem:[#allocation125_spill] sm:$0xff] %v15979_v18  ;;  %20250 = vst [vmem:[#allocation126_spill] sm:$0xff] %v15981_v40  ;;  %2294 = vperm.xlu0 %14452, %v15457_v6   ;;  %v3602_v6 = vmul.f32 %v15947_v39, %v20154_v53  ;;  %v3603_v23 = vmul.f32 %v15979_v18, %v20255_v14  ;;  %v20259_v14 = vld [vmem:[#allocation31_spill] sm:$0xff] }
 0x13a   : > { %4120 = vperm.xlu1 %14441, %v15463_v52   ;;  %12572 = vmatmul.mubr.msk.bf16.gmra.mrb[16].mxu1 %vm826_vm3, %v20251_v59 }
 0x13b   : > { %12738 = vmatmul.mubr.msk.bf16.gmra.mrb[12].mxu0 %vm826_vm3, %v3623_v15  ;;  %12575 = vmatprep.mubr.msk.bf16.mxu1 %vm826_vm3, %v20252_v4  ;;  %v3604_v15 = vmul.f32 %v15960_v34, %v20158_v12  ;;  %v3625_v39 = vpack.c.bf16 %v3603_v23, %v3602_v6  ;;  %v20262_v6 = vld [vmem:[#allocation33_spill] sm:$0xff]  ;;  %v20265_v34 = vld [vmem:[#allocation80_spill] sm:$0xff] }
 0x13c   : > { %12741 = vmatprep.mubr.msk.bf16.mxu0 %vm826_vm3, %v3624_v19  ;;  %v15991_v25 = vpop.permute.xlu1 %3541  ;;  %v15993_v10 = vpop.permute.xlu0 %3553 }
 0x13d   : > { %20253 = vst [vmem:[#allocation25_spill] sm:$0xff] %v15991_v25  ;;  %20254 = vst [vmem:[#allocation28_spill] sm:$0xff] %v15993_v10  ;;  %2306 = vperm.xlu0 %14452, %v15434_v22   ;;  %v3605_v1 = vmul.f32 %v15991_v25, %v20157_v20  ;;  %v1358_v22 = vpack.c.bf16 %v15101_v9, %v15101_v9 }
 0x13e   : > { %14442 = vset.pattern.permute.xlu1 %v20256_v13 }
 0x13f   : > { %2298 = vperm.xlu1 %14442, %v15408_v28   ;;  %v3626_v18 = vpack.c.bf16 %v3605_v1, %v3604_v15  ;;  %v20264_v15 = vld [vmem:[#allocation26_spill] sm:$0xff]  ;;  %v1490_v1 = vshll.u32 %v1358_v22, 16 }
 0x140   : > { %v16006_v19 = vpop.permute.xlu1 %3549  ;;  %v16008_v21 = vpop.permute.xlu0 %3561 }
 0x141   : > { %20257 = vst [vmem:[#allocation127_spill] sm:$0xff] %v16006_v19  ;;  %20258 = vst [vmem:[#allocation128_spill] sm:$0xff] %v16008_v21  ;;  %2310 = vperm.xlu0 %14452, %v15522_v16   ;;  %v20263_v16 = vld [vmem:[#allocation27_spill] sm:$0xff] }
 0x142   : > { %12576 = vmatmul.mubr.msk.bf16.gmra.mrb[20].mxu1 %vm826_vm3, %v20259_v14  ;;  %v3606_v23 = vmul.f32 %v15981_v40, %v20263_v16  ;;  %v20268_v16 = vld [vmem:[#allocation83_spill] sm:$0xff] }
 0x143   : > { %2302 = vperm.xlu1 %14442, %v15485_v37   ;;  %12742 = vmatmul.mubr.msk.bf16.gmra.mrb[16].mxu0 %vm826_vm3, %v3625_v39  ;;  %v3607_v37 = vmul.f32 %v16006_v19, %v20264_v15  ;;  %v3608_v39 = vmul.f32 %v15993_v10, %v20166_v2  ;;  %v20270_v10 = vld [vmem:[#allocation36_spill] sm:$0xff] }
 0x144   : > { %12745 = vmatprep.mubr.msk.bf16.mxu0 %vm826_vm3, %v3626_v18  ;;  %v16018_v28 = vpop.permute.xlu1 %3557  ;;  %v16020_v25 = vpop.permute.xlu0 %3569  ;;  %12579 = vmatprep.mubr.msk.bf16.mxu1 %vm826_vm3, %v20262_v6 }
 0x145   : > { %20260 = vst [vmem:[#allocation31_spill] sm:$0xff] %v16018_v28  ;;  %20261 = vst [vmem:[#allocation129_spill] sm:$0xff] %v16020_v25  ;;  %2322 = vperm.xlu0 %14452, %v15491_v54   ;;  %v3609_v18 = vmul.f32 %v16018_v28, %v20165_v55  ;;  %v3627_v40 = vpack.c.bf16 %v3607_v37, %v3606_v23  ;;  %v20269_v54 = vld [vmem:[#allocation34_spill] sm:$0xff]  ;;  %v1492_v28 = vrot.slane %v1490_v1, 1  ;;  %v20273_v1 = vld [vmem:[#allocation77_spill] sm:$0xff] }
 0x146   : > { %v3610_v23 = vmul.f32 %v16008_v21, %v15084_v63  ;;  %v20274_v63 = vld [vmem:[#allocation90_spill] sm:$0xff] }
 0x147   : > { %14443 = vset.pattern.permute.xlu1 %v20224_v49  ;;  %v3628_v19 = vpack.c.bf16 %v3609_v18, %v3608_v39 }
 0x148   : > { %4123 = vperm.xlu1 %14443, %v20265_v34   ;;  %v16035_v20 = vpop.permute.xlu1 %3565  ;;  %v16037_v12 = vpop.permute.xlu0 %3577 }
 0x149   : > { %20266 = vst [vmem:[#allocation33_spill] sm:$0xff] %v16035_v20  ;;  %20267 = vst [vmem:[#allocation26_spill] sm:$0xff] %v16037_v12  ;;  %2326 = vperm.xlu0 %14452, %v20268_v16   ;;  %v3611_v37 = vmul.f32 %v16035_v20, %v15081_v38 }
 0x14a   : > { %12580 = vmatmul.mubr.msk.bf16.gmra.mrb[24].mxu1 %vm826_vm3, %v20269_v54 }
 0x14b   : > { %12746 = vmatmul.mubr.msk.bf16.gmra.mrb[20].mxu0 %vm826_vm3, %v3627_v40  ;;  %12583 = vmatprep.mubr.msk.bf16.mxu1 %vm826_vm3, %v20270_v10  ;;  %v3612_v40 = vmul.f32 %v16020_v25, %v15101_v9  ;;  %v3629_v2 = vpack.c.bf16 %v3611_v37, %v3610_v23 }
 0x14c   : > { %4129 = vperm.xlu1 %14443, %v20268_v16   ;;  %12749 = vmatprep.mubr.msk.bf16.mxu0 %vm826_vm3, %v3628_v19  ;;  %v16047_v22 = vpop.permute.xlu1 %3573  ;;  %v20272_v16 = vld [vmem:[#allocation37_spill] sm:$0xff] }
 0x14d   : > { %20271 = vst [vmem:[#allocation80_spill] sm:$0xff] %v16047_v22  ;;  %v1740_v39 = vpop.permute.xlu0 %1739  ;;  %2338 = vperm.xlu0 %14452, %v15559_v61   ;;  %v3613_v18 = vmul.f32 %v16047_v22, %v15104_v50  ;;  %v1493_v19 = vsel %vm1361_vm2, %v20272_v16, %v1492_v28  ;;  %v3614_v28 = vmul.f32 %v16037_v12, %v15113_v48 }
 0x14e   : > { %v1834_v61 = vrot.slane %v1740_v39, 6 }
 0x14f   : > { %v3630_v20 = vpack.c.bf16 %v3613_v18, %v3612_v40 }
 0x150   : > { %4132 = vperm.xlu1 %14443, %v20273_v1   ;;  %v3582_v55 = vpop.permute.xlu1 %3581  ;;  %v1930_v39 = vmul.f32 0.0, %v1834_v61 }
 0x151   : > { %v1749_v21 = vpop.permute.xlu0 %1748  ;;  %2342 = vperm.xlu0 %14452, %v20274_v63   ;;  %v16068_v16 = vmul.f32 0.0, %v3582_v55  ;;  %v20276_v55 = vld [vmem:[#allocation97_spill] sm:$0xff] }
 0x152   : > { %12584 = vmatmul.mubr.msk.bf16.gmra.mrb[28].mxu1 %vm826_vm3, %v1493_v19  ;;  %v1839_v18 = vrot.slane %v1749_v21, 6 }
 0x153   : > { %12750 = vmatmul.mubr.msk.bf16.gmra.mrb[24].mxu0 %vm826_vm3, %v3629_v2  ;;  %20275 = vst [vmem:[#allocation83_spill] sm:$0xff] %v16068_v16  ;;  %v3631_v19 = vpack.c.bf16 %v16068_v16, %v3614_v28  ;;  %v20280_v28 = vld [vmem:[#allocation3_spill] sm:$0xff] }
 0x154   : > { %14444 = vset.pattern.permute.xlu1 %v20256_v13  ;;  %12753 = vmatprep.mubr.msk.bf16.mxu0 %vm826_vm3, %v3630_v20 }
 0x155   : > { %2314 = vperm.xlu1 %14444, %v15463_v52   ;;  %v1743_v23 = vpop.permute.xlu1 %1742  ;;  %v1755_v37 = vpop.permute.xlu0 %1754  ;;  %2354 = vperm.xlu0 %14452, %v15617_v62  }
 0x156   : > { %v1835_v40 = vrot.slane %v1743_v23, 6  ;;  %v1843_v52 = vrot.slane %v1755_v37, 6 }
 0x158   : > { %v1836_v2 = vsel %vm875_vm0, %v1834_v61, %v1835_v40  ;;  %v20279_v61 = vld [vmem:[#allocation2_spill] sm:$0xff] }
 0x159   : > { %v1931_v22 = vmul.f32 0.0, %v1836_v2  ;;  %2318 = vperm.xlu1 %14444, %v20265_v34   ;;  %v1746_v20 = vpop.permute.xlu1 %1745  ;;  %v1761_v12 = vpop.permute.xlu0 %1760  ;;  %2358 = vperm.xlu0 %14452, %v20276_v55  }
 0x15a   : > { %v1837_v25 = vrot.slane %v1746_v20, 6  ;;  %v1847_v16 = vrot.slane %v1761_v12, 6 }
 0x15b   : > { %12754 = vmatmul.mubr.msk.bf16.gmra.mrb[28].mxu0 %vm826_vm3, %v3631_v19  ;;  %v1963_v37 = vpack.c.bf16 %v1931_v22, %v1930_v39 }
 0x15c   : > { %v16078_v62 = vsel %vm875_vm0, %v1835_v40, %v1837_v25  ;;  %v16081_v21 = vsel %vm875_vm0, %v1837_v25, %v1839_v18  ;;  %12759 = vmatprep.mubr.msk.bf16.mxu0 %vm826_vm3, %v20228_v7  ;;  %v20281_v40 = vld [vmem:[#allocation87_spill] sm:$0xff] }
 0x15d   : > { %20277 = vst [vmem:[#allocation34_spill] sm:$0xff] %v16078_v62  ;;  %20278 = vst [vmem:[#allocation36_spill] sm:$0xff] %v16081_v21  ;;  %v1932_v34 = vmul.f32 %v16078_v62, %v20279_v61  ;;  %v1933_v23 = vmul.f32 %v16081_v21, %v20280_v28  ;;  %14445 = vset.pattern.permute.xlu1 %v20224_v49  ;;  %v1752_v2 = vpop.permute.xlu1 %1751  ;;  %v1767_v19 = vpop.permute.xlu0 %1766  ;;  %2370 = vperm.xlu0 %14452, %v15673_v24   ;;  %v16104_v24 = vrot.slane %v1963_v37, 1 }
 0x15e   : > { %4135 = vperm.xlu1 %14445, %v20281_v40   ;;  %v1841_v25 = vrot.slane %v1752_v2, 6 }
 0x15f   : > { %v1964_v20 = vpack.c.bf16 %v1933_v23, %v1932_v34  ;;  %20284 = vst [vmem:[#allocation90_spill] sm:$0xff] %v16104_v24  ;;  %v20285_v34 = vld [vmem:[#allocation104_spill] sm:$0xff] }
 0x160   : > { %v16093_v7 = vsel %vm875_vm0, %v1839_v18, %v1841_v25  ;;  %v16096_v62 = vsel %vm875_vm0, %v1841_v25, %v1843_v52  ;;  %v4435_v18 = vsel %vm875_vm0, %v15922_v42, 0 }
 0x161   : > { %20282 = vst [vmem:[#allocation37_spill] sm:$0xff] %v16093_v7  ;;  %20283 = vst [vmem:[#allocation77_spill] sm:$0xff] %v16096_v62  ;;  %v1934_v21 = vmul.f32 %v16093_v7, %v14751_v26  ;;  %v1935_v50 = vmul.f32 %v16096_v62, %v14761_v30  ;;  %v1758_v22 = vpop.permute.xlu1 %1757  ;;  %v16102_v39 = vpop.permute.xlu0 %1772  ;;  %v2001_v2 = vrot.slane %v1964_v20, 1  ;;  %2374 = vperm.xlu0 %14452, %v20285_v34   ;;  %v1851_v62 = vrot.slane %v1767_v19, 6 }
 0x162   : > { %4141 = vperm.xlu1 %14445, %v20274_v63   ;;  %v1845_v12 = vrot.slane %v1758_v22, 6  ;;  %v2504_v22 = vsel %vm875_vm0, %v15965_v45, 0 }
 0x163   : > { %v1965_v23 = vpack.c.bf16 %v1935_v50, %v1934_v21  ;;  %v2002_v25 = vsel %vm1999_vm7, %v16104_v24, %v2001_v2  ;;  %12760 = vmatmul.mubr.msk.bf16.vlgmr.msra.gmra.mrb[0].mxu0 %vm826_vm3, %v20233_v33 }
 0x164   : > { %v16115_v37 = vsel %vm875_vm0, %v1843_v52, %v1845_v12  ;;  %v16118_v20 = vsel %vm875_vm0, %v1845_v12, %v1847_v16  ;;  %12589 = vmatprep.mubr.msk.bf16.mxu1 %vm826_vm3, %v2002_v25  ;;  %12763 = vmatprep.mubr.msk.bf16.mxu0 %vm826_vm3, %v20234_v8  ;;  %v20288_v52 = vld [vmem:[#allocation84_spill] sm:$0xff] }
 0x165   : > { %20286 = vst [vmem:[#allocation97_spill] sm:$0xff] %v16115_v37  ;;  %20287 = vst [vmem:[#allocation2_spill] sm:$0xff] %v16118_v20  ;;  %v2003_v63 = vrot.slane %v1965_v23, 1  ;;  %v1936_v50 = vmul.f32 %v16115_v37, %v14767_v32  ;;  %v1937_v42 = vmul.f32 %v16118_v20, %v14764_v31  ;;  %v1764_v33 = vpop.permute.xlu1 %1763  ;;  %v1779_v21 = vpop.permute.xlu0 %1778  ;;  %2386 = vperm.xlu0 %14452, %v15729_v36   ;;  %12792 = vmatpush3.bf16.msra.mxu0 %v4435_v18 }
 0x166   : > { %4144 = vperm.xlu1 %14445, %v20288_v52   ;;  %v1849_v19 = vrot.slane %v1764_v33, 6  ;;  %v1855_v23 = vrot.slane %v16102_v39, 6 }
 0x167   : > { %v2004_v8 = vsel %vm1999_vm7, %v2001_v2, %v2003_v63  ;;  %v1966_v12 = vpack.c.bf16 %v1937_v42, %v1936_v50  ;;  %v1859_v42 = vrot.slane %v1779_v21, 6 }
 0x168   : > { %v16134_v25 = vsel %vm875_vm0, %v1847_v16, %v1849_v19  ;;  %v16137_v24 = vsel %vm875_vm0, %v1849_v19, %v1851_v62  ;;  %12590 = vmatmul.mubr.msk.bf16.vlgmr.msra.gmra.mrb[0].mxu1 %vm826_vm3, %v2004_v8 }
 0x169   : > { %20289 = vst [vmem:[#allocation3_spill] sm:$0xff] %v16134_v25  ;;  %20290 = vst [vmem:[#allocation87_spill] sm:$0xff] %v16137_v24  ;;  %v1938_v36 = vmul.f32 %v16134_v25, %v14790_v41  ;;  %v1939_v18 = vmul.f32 %v16137_v24, %v14796_v43  ;;  %v1770_v45 = vpop.permute.xlu1 %1769  ;;  %v1785_v33 = vpop.permute.xlu0 %1784  ;;  %v2005_v2 = vrot.slane %v1966_v12, 1  ;;  %14455 = vset.pattern.permute.xlu0 %v20224_v49  ;;  %12622 = vmatpush3.bf16.msra.mxu1 %v2504_v22 }
 0x16a   : > { %14446 = vset.pattern.permute.xlu1 %v20256_v13  ;;  %v1853_v16 = vrot.slane %v1770_v45, 6  ;;  %4186 = vperm.xlu0 %14455, %v15788_v60  }
 0x16b   : > { %2330 = vperm.xlu1 %14446, %v20273_v1   ;;  %v2006_v39 = vsel %vm1999_vm7, %v2003_v63, %v2005_v2  ;;  %v1967_v50 = vpack.c.bf16 %v1939_v18, %v1938_v36  ;;  %12764 = vmatmul.mubr.msk.bf16.gmra.mrb[4].mxu0 %vm826_vm3, %v20239_v17 }
 0x16c   : > { %v16152_v19 = vsel %vm875_vm0, %v1851_v62, %v1853_v16  ;;  %v16155_v8 = vsel %vm875_vm0, %v1853_v16, %v1855_v23  ;;  %12593 = vmatprep.mubr.msk.bf16.mxu1 %vm826_vm3, %v2006_v39  ;;  %12767 = vmatprep.mubr.msk.bf16.mxu0 %vm826_vm3, %v20240_v11  ;;  %v1863_v11 = vrot.slane %v1785_v33, 6 }
 0x16d   : > { %20291 = vst [vmem:[#allocation104_spill] sm:$0xff] %v16152_v19  ;;  %20292 = vst [vmem:[#allocation84_spill] sm:$0xff] %v16155_v8  ;;  %v1940_v60 = vmul.f32 %v16152_v19, %v14813_v58  ;;  %v1941_v1 = vmul.f32 %v16155_v8, %v14810_v57  ;;  %v1776_v63 = vpop.permute.xlu1 %1775  ;;  %v1791_v17 = vpop.permute.xlu0 %1790  ;;  %v2007_v21 = vrot.slane %v1967_v50, 1  ;;  %v20325_v8 = vld [vmem:[#allocation38_spill] sm:$0xff] }
 0x16e   : > { %v1857_v22 = vrot.slane %v1776_v63, 6  ;;  %14457 = vset.pattern.permute.xlu0 %v20256_v13 }
 0x16f   : > { %2334 = vperm.xlu1 %14446, %v20281_v40   ;;  %v2008_v62 = vsel %vm1999_vm7, %v2005_v2, %v2007_v21  ;;  %v1968_v12 = vpack.c.bf16 %v1941_v1, %v1940_v60  ;;  %2398 = vperm.xlu0 %14457, %v15837_v47   ;;  %v1867_v60 = vrot.slane %v1791_v17, 6 }
 0x170   : > { %v16169_v36 = vsel %vm875_vm0, %v1855_v23, %v1857_v22  ;;  %v16172_v18 = vsel %vm875_vm0, %v1857_v22, %v1859_v42  ;;  %12594 = vmatmul.mubr.msk.bf16.gmra.mrb[4].mxu1 %vm826_vm3, %v2008_v62  ;;  %v20297_v22 = vld [vmem:[#allocation94_spill] sm:$0xff] }
 0x171   : > { %20293 = vst [vmem:[#allocation130_spill] sm:$0xff] %v16169_v36  ;;  %20294 = vst [vmem:[#allocation131_spill] sm:$0xff] %v16172_v18  ;;  %v1942_v45 = vmul.f32 %v16169_v36, %v14855_v35  ;;  %v1943_v40 = vmul.f32 %v16172_v18, %v14848_v27  ;;  %v1782_v16 = vpop.permute.xlu1 %1781  ;;  %v1797_v2 = vpop.permute.xlu0 %1796  ;;  %v2009_v39 = vrot.slane %v1968_v12, 1  ;;  %v20323_v36 = vld [vmem:[#allocation39_spill] sm:$0xff] }
 0x172   : > { %v1861_v50 = vrot.slane %v1782_v16, 6  ;;  %v1871_v16 = vrot.slane %v1797_v2, 6 }
 0x173   : > { %14447 = vset.pattern.permute.xlu1 %v20224_v49  ;;  %v2010_v23 = vsel %vm1999_vm7, %v2007_v21, %v2009_v39  ;;  %v1969_v33 = vpack.c.bf16 %v1943_v40, %v1942_v45  ;;  %12768 = vmatmul.mubr.msk.bf16.gmra.mrb[8].mxu0 %vm826_vm3, %v20245_v46 }
 0x174   : > { %v16184_v1 = vsel %vm875_vm0, %v1859_v42, %v1861_v50  ;;  %v16187_v63 = vsel %vm875_vm0, %v1861_v50, %v1863_v11  ;;  %4147 = vperm.xlu1 %14447, %v20297_v22   ;;  %12597 = vmatprep.mubr.msk.bf16.mxu1 %vm826_vm3, %v2010_v23 }
 0x175   : > { %20295 = vst [vmem:[#allocation132_spill] sm:$0xff] %v16184_v1  ;;  %20296 = vst [vmem:[#allocation133_spill] sm:$0xff] %v16187_v63  ;;  %v1944_v62 = vmul.f32 %v16184_v1, %v20138_v0  ;;  %v1945_v21 = vmul.f32 %v16187_v63, %v20137_v29  ;;  %v1788_v12 = vpop.permute.xlu1 %1787  ;;  %v1803_v45 = vpop.permute.xlu0 %1802  ;;  %v2011_v46 = vrot.slane %v1969_v33, 1  ;;  %12771 = vmatprep.mubr.msk.bf16.mxu0 %vm826_vm3, %v20246_v51 }
 0x176   : > { %v1865_v42 = vrot.slane %v1788_v12, 6 }
 0x177   : > { %v2012_v17 = vsel %vm1999_vm7, %v2009_v39, %v2011_v46  ;;  %v1970_v40 = vpack.c.bf16 %v1945_v21, %v1944_v62 }
 0x178   : > { %v16199_v50 = vsel %vm875_vm0, %v1863_v11, %v1865_v42  ;;  %v16202_v23 = vsel %vm875_vm0, %v1865_v42, %v1867_v60  ;;  %4153 = vperm.xlu1 %14447, %v20276_v55   ;;  %12598 = vmatmul.mubr.msk.bf16.gmra.mrb[8].mxu1 %vm826_vm3, %v2012_v17  ;;  %v1875_v42 = vrot.slane %v1803_v45, 6 }
 0x179   : > { %20298 = vst [vmem:[#allocation94_spill] sm:$0xff] %v16199_v50  ;;  %20299 = vst [vmem:[#allocation134_spill] sm:$0xff] %v16202_v23  ;;  %v1946_v33 = vmul.f32 %v16199_v50, %v20142_v44  ;;  %v1947_v51 = vmul.f32 %v16202_v23, %v20141_v3  ;;  %v1794_v12 = vpop.permute.xlu1 %1793  ;;  %v1809_v39 = vpop.permute.xlu0 %1808  ;;  %v2013_v62 = vrot.slane %v1970_v40, 1  ;;  %v20302_v50 = vld [vmem:[#allocation91_spill] sm:$0xff] }
 0x17a   : > { %v1869_v2 = vrot.slane %v1794_v12, 6 }
 0x17b   : > { %v2014_v11 = vsel %vm1999_vm7, %v2011_v46, %v2013_v62  ;;  %v1971_v21 = vpack.c.bf16 %v1947_v51, %v1946_v33  ;;  %12772 = vmatmul.mubr.msk.bf16.gmra.mrb[12].mxu0 %vm826_vm3, %v20251_v59 }
 0x17c   : > { %v16214_v55 = vsel %vm875_vm0, %v1867_v60, %v1869_v2  ;;  %v16217_v17 = vsel %vm875_vm0, %v1869_v2, %v1871_v16  ;;  %4156 = vperm.xlu1 %14447, %v20302_v50   ;;  %12601 = vmatprep.mubr.msk.bf16.mxu1 %vm826_vm3, %v2014_v11  ;;  %v1879_v2 = vrot.slane %v1809_v39, 6 }
 0x17d   : > { %20300 = vst [vmem:[#allocation135_spill] sm:$0xff] %v16214_v55  ;;  %20301 = vst [vmem:[#allocation136_spill] sm:$0xff] %v16217_v17  ;;  %v1948_v40 = vmul.f32 %v16214_v55, %v20146_v5  ;;  %v1949_v46 = vmul.f32 %v16217_v17, %v20145_v56  ;;  %v1800_v33 = vpop.permute.xlu1 %1799  ;;  %v1815_v51 = vpop.permute.xlu0 %1814  ;;  %v2015_v59 = vrot.slane %v1971_v21, 1  ;;  %12775 = vmatprep.mubr.msk.bf16.mxu0 %vm826_vm3, %v20252_v4  ;;  %v20305_v17 = vld [vmem:[#allocation18_spill] sm:$0xff]  ;;  %v20306_v55 = vld [vmem:[#allocation17_spill] sm:$0xff] }
 0x17e   : > { %v1873_v60 = vrot.slane %v1800_v33, 6 }
 0x17f   : > { %v2016_v45 = vsel %vm1999_vm7, %v2013_v62, %v2015_v59  ;;  %v1972_v12 = vpack.c.bf16 %v1949_v46, %v1948_v40 }
 0x180   : > { %v16229_v50 = vsel %vm875_vm0, %v1871_v16, %v1873_v60  ;;  %v16232_v11 = vsel %vm875_vm0, %v1873_v60, %v1875_v42  ;;  %14448 = vset.pattern.permute.xlu1 %v20256_v13  ;;  %12602 = vmatmul.mubr.msk.bf16.gmra.mrb[12].mxu1 %vm826_vm3, %v2016_v45  ;;  %v1883_v60 = vrot.slane %v1815_v51, 6 }
 0x181   : > { %20303 = vst [vmem:[#allocation91_spill] sm:$0xff] %v16229_v50  ;;  %20304 = vst [vmem:[#allocation137_spill] sm:$0xff] %v16232_v11  ;;  %v1950_v21 = vmul.f32 %v16229_v50, %v20305_v17  ;;  %v1951_v4 = vmul.f32 %v16232_v11, %v20306_v55  ;;  %2346 = vperm.xlu1 %14448, %v20288_v52   ;;  %v1806_v62 = vpop.permute.xlu1 %1805  ;;  %v1821_v39 = vpop.permute.xlu0 %1820  ;;  %v2017_v40 = vrot.slane %v1972_v12, 1 }
 0x182   : > { %v1877_v16 = vrot.slane %v1806_v62, 6 }
 0x183   : > { %v2018_v46 = vsel %vm1999_vm7, %v2015_v59, %v2017_v40  ;;  %v1973_v33 = vpack.c.bf16 %v1951_v4, %v1950_v21  ;;  %12776 = vmatmul.mubr.msk.bf16.gmra.mrb[16].mxu0 %vm826_vm3, %v20259_v14  ;;  %v20309_v59 = vld [vmem:[#allocation20_spill] sm:$0xff]  ;;  %v19871_v21 = vmov 0.0  }
 0x184   : > { %v16245_v45 = vsel %vm875_vm0, %v1875_v42, %v1877_v16  ;;  %v16248_v50 = vsel %vm875_vm0, %v1877_v16, %v1879_v2  ;;  %12605 = vmatprep.mubr.msk.bf16.mxu1 %vm826_vm3, %v2018_v46  ;;  %12779 = vmatprep.mubr.msk.bf16.mxu0 %vm826_vm3, %v20262_v6  ;;  %v3878_v4 = vpack.c.bf16 %v19871_v21, %v15113_v48  ;;  %v1887_v6 = vrot.slane %v1821_v39, 6 }
 0x185   : > { %20307 = vst [vmem:[#allocation18_spill] sm:$0xff] %v16245_v45  ;;  %20308 = vst [vmem:[#allocation17_spill] sm:$0xff] %v16248_v50  ;;  %v1952_v52 = vmul.f32 %v16245_v45, %v20154_v53  ;;  %v1953_v12 = vmul.f32 %v16248_v50, %v20309_v59  ;;  %2350 = vperm.xlu1 %14448, %v20297_v22   ;;  %v1812_v14 = vpop.permute.xlu1 %1811  ;;  %v1827_v51 = vpop.permute.xlu0 %1826  ;;  %v2019_v42 = vrot.slane %v1973_v33, 1  ;;  %v20312_v22 = vld [vmem:[#allocation24_spill] sm:$0xff]  ;;  %v20313_v50 = vld [vmem:[#allocation23_spill] sm:$0xff] }
 0x186   : > { %v1881_v62 = vrot.slane %v1812_v14, 6  ;;  %v3882_v39 = vshll.u32 %v3878_v4, 16 }
 0x187   : > { %v2020_v16 = vsel %vm1999_vm7, %v2017_v40, %v2019_v42  ;;  %v1974_v46 = vpack.c.bf16 %v1953_v12, %v1952_v52  ;;  %v20314_v12 = vld [vmem:[#allocation101_spill] sm:$0xff] }
 0x188   : > { %v16262_v11 = vsel %vm875_vm0, %v1879_v2, %v1881_v62  ;;  %v16265_v45 = vsel %vm875_vm0, %v1881_v62, %v1883_v60  ;;  %12606 = vmatmul.mubr.msk.bf16.gmra.mrb[16].mxu1 %vm826_vm3, %v2020_v16  ;;  %v1891_v16 = vrot.slane %v1827_v51, 6  ;;  %v3884_v51 = vrot.slane %v3882_v39, 1  ;;  %v20322_v39 = vld [vmem:[#allocation29_spill] sm:$0xff] }
 0x189   : > { %20310 = vst [vmem:[#allocation20_spill] sm:$0xff] %v16262_v11  ;;  %20311 = vst [vmem:[#allocation138_spill] sm:$0xff] %v16265_v45  ;;  %v1954_v33 = vmul.f32 %v16262_v11, %v20312_v22  ;;  %v1955_v63 = vmul.f32 %v16265_v45, %v20313_v50  ;;  %14449 = vset.pattern.permute.xlu1 %v20224_v49  ;;  %v1818_v14 = vpop.permute.xlu1 %1817  ;;  %v1833_v40 = vpop.permute.xlu0 %1832  ;;  %v2021_v52 = vrot.slane %v1974_v46, 1  ;;  %v20317_v46 = vld [vmem:[#allocation27_spill] sm:$0xff] }
 0x18a   : > { %4159 = vperm.xlu1 %14449, %v20314_v12   ;;  %v1885_v2 = vrot.slane %v1818_v14, 6 }
 0x18b   : > { %v2022_v62 = vsel %vm1999_vm7, %v2019_v42, %v2021_v52  ;;  %v1975_v21 = vpack.c.bf16 %v1955_v63, %v1954_v33  ;;  %12780 = vmatmul.mubr.msk.bf16.gmra.mrb[20].mxu0 %vm826_vm3, %v20269_v54  ;;  %v16290_v33 = vrot.slane %v1833_v40, 6 }
 0x18c   : > { %v16278_v11 = vsel %vm875_vm0, %v1883_v60, %v1885_v2  ;;  %v16281_v45 = vsel %vm875_vm0, %v1885_v2, %v1887_v6  ;;  %12609 = vmatprep.mubr.msk.bf16.mxu1 %vm826_vm3, %v2022_v62  ;;  %12783 = vmatprep.mubr.msk.bf16.mxu0 %vm826_vm3, %v20270_v10 }
 0x18d   : > { %20315 = vst [vmem:[#allocation24_spill] sm:$0xff] %v16278_v11  ;;  %20316 = vst [vmem:[#allocation23_spill] sm:$0xff] %v16281_v45  ;;  %v1956_v14 = vmul.f32 %v16278_v11, %v20317_v46  ;;  %v1957_v63 = vmul.f32 %v16281_v45, %v20264_v15  ;;  %v1824_v42 = vpop.permute.xlu1 %1823  ;;  %v2023_v54 = vrot.slane %v1975_v21, 1  ;;  %v3886_v45 = vshrl.u32 %v3878_v4, 16  ;;  %v20321_v21 = vld [vmem:[#allocation30_spill] sm:$0xff] }
 0x18e   : > { %20318 = vst [vmem:[#allocation101_spill] sm:$0xff] %v16290_v33  ;;  %4165 = vperm.xlu1 %14449, %v20285_v34   ;;  %v1889_v60 = vrot.slane %v1824_v42, 6  ;;  %v4097_v2 = vpop.permute.xlu0 %4096 }
 0x18f   : > { %v2024_v62 = vsel %vm1999_vm7, %v2021_v52, %v2023_v54  ;;  %v1976_v23 = vpack.c.bf16 %v1957_v63, %v1956_v14  ;;  %v3885_v52 = vsel %vm1361_vm2, %v20323_v36, %v3884_v51  ;;  %v20324_v14 = vld [vmem:[#allocation98_spill] sm:$0xff]  ;;  %v3888_v36 = vor.u32 %v3886_v45, %v3884_v51 }
 0x190   : > { %v16295_v10 = vsel %vm875_vm0, %v1887_v6, %v1889_v60  ;;  %v16298_v11 = vsel %vm875_vm0, %v1889_v60, %v1891_v16  ;;  %12610 = vmatmul.mubr.msk.bf16.gmra.mrb[20].mxu1 %vm826_vm3, %v2024_v62  ;;  %v1962_v6 = vmul.f32 %v16290_v33, %v15101_v9 }
 0x191   : > { %20319 = vst [vmem:[#allocation27_spill] sm:$0xff] %v16295_v10  ;;  %20320 = vst [vmem:[#allocation139_spill] sm:$0xff] %v16298_v11  ;;  %v1958_v40 = vmul.f32 %v16295_v10, %v20321_v21  ;;  %v1959_v34 = vmul.f32 %v16298_v11, %v20322_v39  ;;  %v1830_v42 = vpop.permute.xlu1 %1829  ;;  %v2025_v1 = vrot.slane %v1976_v23, 1 }
 0x192   : > { %4168 = vperm.xlu1 %14449, %v20324_v14   ;;  %v1893_v63 = vrot.slane %v1830_v42, 6  ;;  %v4106_v60 = vpop.permute.xlu0 %4105  ;;  %v20328_v42 = vld [vmem:[#allocation32_spill] sm:$0xff] }
 0x193   : > { %v2026_v4 = vsel %vm1999_vm7, %v2023_v54, %v2025_v1  ;;  %v1977_v62 = vpack.c.bf16 %v1959_v34, %v1958_v40  ;;  %12784 = vmatmul.mubr.msk.bf16.gmra.mrb[24].mxu0 %vm826_vm3, %v20325_v8  ;;  %v1979_v34 = vpack.c.bf16 %v1962_v6, %v1962_v6 }
 0x194   : > { %v16314_v10 = vsel %vm875_vm0, %v1891_v16, %v1893_v63  ;;  %v16318_v23 = vsel %vm875_vm0, %v1893_v63, %v16290_v33  ;;  %12613 = vmatprep.mubr.msk.bf16.mxu1 %vm826_vm3, %v2026_v4  ;;  %12787 = vmatprep.mubr.msk.bf16.mxu0 %vm826_vm3, %v3885_v52  ;;  %v4189_v63 = vrot.slane %v4097_v2, 6  ;;  %v14548_v4 = vld [vmem:[%s19529_s1 + $0xa8] sm:$0xff] }
 0x195   : > { %20326 = vst [vmem:[#allocation30_spill] sm:$0xff] %v16314_v10  ;;  %20327 = vst [vmem:[#allocation29_spill] sm:$0xff] %v16318_v23  ;;  %v1960_v14 = vmul.f32 %v16314_v10, %v20328_v42  ;;  %v1961_v54 = vmul.f32 %v16318_v23, %v15081_v38  ;;  %v2027_v40 = vrot.slane %v1977_v62, 1  ;;  %v20330_v62 = vld [vmem:[#allocation106_spill] sm:$0xff] }
 0x196   : > { %14450 = vset.pattern.permute.xlu1 %v20256_v13  ;;  %v4094_v8 = vpop.permute.xlu1 %4093  ;;  %v3889_v33 = vsel %vm1361_vm2, %v3888_v36, %v20330_v62 }
 0x197   : > { %v16327_v16 = vpop.permute.xlu0 %4114  ;;  %2362 = vperm.xlu1 %14450, %v14548_v4   ;;  %v16332_v45 = vrot.slane %v4094_v8, 6  ;;  %v2028_v51 = vsel %vm1999_vm7, %v2025_v1, %v2027_v40  ;;  %v1978_v52 = vpack.c.bf16 %v1961_v54, %v1960_v14  ;;  %v2031_v1 = vrot.slane %v1979_v34, 1  ;;  %v20333_v34 = vld [vmem:[#allocation109_spill] sm:$0xff] }
 0x198   : > { %12614 = vmatmul.mubr.msk.bf16.gmra.mrb[24].mxu1 %vm826_vm3, %v2028_v51  ;;  %v4195_v51 = vrot.slane %v4106_v60, 6 }
 0x199   : > { %20329 = vst [vmem:[#allocation39_spill] sm:$0xff] %v16332_v45  ;;  %v2029_v23 = vrot.slane %v1978_v52, 1  ;;  %v16340_v2 = vsel %vm875_vm0, %v16332_v45, %v4189_v63  ;;  %v4284_v36 = vmul.f32 %v16332_v45, %v14751_v26 }
 0x19a   : > { %v4100_v10 = vpop.permute.xlu1 %4099  ;;  %20331 = vst [vmem:[#allocation98_spill] sm:$0xff] %v16340_v2  ;;  %v4285_v54 = vmul.f32 %v16340_v2, %v14761_v30 }
 0x19b   : > { %2366 = vperm.xlu1 %14450, %v20314_v12   ;;  %v4191_v6 = vrot.slane %v4100_v10, 6  ;;  %v16343_v4 = vpop.permute.xlu0 %4126  ;;  %v2030_v8 = vsel %vm1999_vm7, %v2027_v40, %v2029_v23  ;;  %12788 = vmatmul.mubr.msk.bf16.gmra.mrb[28].mxu0 %vm826_vm3, %v3889_v33  ;;  %v2032_v33 = vsel %vm1999_vm7, %v2029_v23, %v2031_v1  ;;  %v20336_v1 = vld [vmem:[#allocation112_spill] sm:$0xff] }
 0x19c   : > { %12617 = vmatprep.mubr.msk.bf16.mxu1 %vm826_vm3, %v2030_v8  ;;  %v4317_v62 = vpack.c.bf16 %v4285_v54, %v4284_v36 }
 0x19d   : > { %v16353_v12 = vsel %vm875_vm0, %v4189_v63, %v4191_v6 }
 0x19e   : > { %v4103_v14 = vpop.permute.xlu1 %4102  ;;  %20332 = vst [vmem:[#allocation38_spill] sm:$0xff] %v16353_v12  ;;  %v4286_v60 = vmul.f32 %v16353_v12, %v14767_v32  ;;  %v20339_v12 = vld [vmem:[#allocation105_spill] sm:$0xff] }
 0x19f   : > { %14451 = vset.pattern.permute.xlu1 %v20224_v49  ;;  %v4193_v10 = vrot.slane %v4103_v14, 6  ;;  %v16356_v40 = vpop.permute.xlu0 %4138 }
 0x1a0   : > { %4171 = vperm.xlu1 %14451, %v20333_v34   ;;  %12618 = vmatmul.mubr.msk.bf16.gmra.mrb[28].mxu1 %vm826_vm3, %v2032_v33 }
 0x1a1   : > { %v16362_v52 = vsel %vm875_vm0, %v4191_v6, %v4193_v10  ;;  %v16369_v14 = vsel %vm875_vm0, %v4193_v10, %v4195_v51 }
 0x1a2   : > { %20334 = vst [vmem:[#allocation32_spill] sm:$0xff] %v16362_v52  ;;  %v4287_v63 = vmul.f32 %v16362_v52, %v14764_v31  ;;  %v4109_v8 = vpop.permute.xlu1 %4108  ;;  %20335 = vst [vmem:[#allocation109_spill] sm:$0xff] %v16369_v14  ;;  %v4288_v18 = vmul.f32 %v16369_v14, %v14790_v41  ;;  %v4353_v52 = vrot.slane %v4317_v62, 1 }
 0x1a3   : > { %v4197_v11 = vrot.slane %v4109_v8, 6  ;;  %v16371_v23 = vpop.permute.xlu0 %4150 }
 0x1a4   : > { %4177 = vperm.xlu1 %14451, %v20336_v1   ;;  %v4318_v33 = vpack.c.bf16 %v4287_v63, %v4286_v60 }
 0x1a5   : > { %v16375_v6 = vsel %vm875_vm0, %v4195_v51, %v4197_v11 }
 0x1a6   : > { %20337 = vst [vmem:[#allocation112_spill] sm:$0xff] %v16375_v6  ;;  %v4289_v19 = vmul.f32 %v16375_v6, %v14796_v43  ;;  %v4354_v36 = vrot.slane %v4318_v33, 1  ;;  %v14549_v33 = vld [vmem:[%s19529_s1 + $0xc8] sm:$0xff] }
 0x1a7   : > { %v16381_v54 = vpop.permute.xlu1 %2282  ;;  %v16383_v10 = vpop.permute.xlu0 %4162 }
 0x1a8   : > { %20338 = vst [vmem:[#allocation140_spill] sm:$0xff] %v16381_v54  ;;  %v4319_v8 = vpack.c.bf16 %v4289_v19, %v4288_v18  ;;  %4180 = vperm.xlu1 %14451, %v20339_v12   ;;  %v4355_v60 = vsel %vm1999_vm7, %v4353_v52, %v4354_v36  ;;  %v4201_v19 = vrot.slane %v16327_v16, 6  ;;  %v2406_v12 = vmul.f32 %v16381_v54, %v20280_v28 }
 0x1a9   : > { %12793 = vmatprep.mubr.msk.bf16.mxu0 %vm826_vm3, %v4355_v60 }
 0x1aa   : > { %v4356_v51 = vrot.slane %v4319_v8, 1 }
 0x1ab   : > { %v16388_v63 = vpop.permute.xlu0 %4174 }
 0x1ac   : > { %14453 = vset.pattern.permute.xlu1 %v20256_v13  ;;  %v16391_v1 = vpop.permute.xlu1 %2286  ;;  %v4357_v62 = vsel %vm1999_vm7, %v4354_v36, %v4356_v51 }
 0x1ad   : > { %20340 = vst [vmem:[#allocation105_spill] sm:$0xff] %v16391_v1  ;;  %2378 = vperm.xlu1 %14453, %v14549_v33   ;;  %12794 = vmatmul.mubr.msk.bf16.vlgmr.msra.gmra.mrb[0].mxu0 %vm826_vm3, %v4357_v62  ;;  %v2407_v33 = vmul.f32 %v16391_v1, %v14751_v26 }
 0x1b0   : > { %v16399_v18 = vpop.permute.xlu0 %2278 }
 0x1b1   : > { %20341 = vst [vmem:[#allocation141_spill] sm:$0xff] %v16399_v18  ;;  %v2405_v52 = vmul.f32 %v16399_v18, %v20279_v61  ;;  %2382 = vperm.xlu1 %14453, %v20333_v34   ;;  %v4112_v36 = vpop.permute.xlu1 %4111 }
 0x1b2   : > { %v4199_v8 = vrot.slane %v4112_v36, 6 }
 0x1b3   : > { %v2437_v60 = vpack.c.bf16 %v2406_v12, %v2405_v52 }
 0x1b4   : > { %v16409_v62 = vsel %vm875_vm0, %v4197_v11, %v4199_v8  ;;  %v16412_v16 = vsel %vm875_vm0, %v4199_v8, %v4201_v19  ;;  %v16414_v6 = vpop.permute.xlu0 %2290 }
 0x1b5   : > { %20342 = vst [vmem:[#allocation142_spill] sm:$0xff] %v16409_v62  ;;  %20343 = vst [vmem:[#allocation143_spill] sm:$0xff] %v16412_v16  ;;  %v4290_v28 = vmul.f32 %v16409_v62, %v14813_v58  ;;  %v4291_v61 = vmul.f32 %v16412_v16, %v14810_v57  ;;  %v2408_v34 = vmul.f32 %v16414_v6, %v14761_v30  ;;  %14454 = vset.pattern.permute.xlu1 %v20224_v49  ;;  %v4118_v26 = vpop.permute.xlu1 %4117 }
 0x1b6   : > { %20344 = vst [vmem:[#allocation144_spill] sm:$0xff] %v16414_v6  ;;  %12623 = vmatprep.mubr.msk.bf16.mxu1 %vm826_vm3, %v2437_v60  ;;  %v4203_v11 = vrot.slane %v4118_v26, 6  ;;  %4183 = vperm.xlu1 %14454, %v15837_v47   ;;  %v14550_v60 = vld [vmem:[%s19529_s1 + $0xe0] sm:$0xff]  ;;  %v14551_v26 = vld [vmem:[%s19529_s1 + $0xe8] sm:$0xff] }
 0x1b7   : > { %v2438_v12 = vpack.c.bf16 %v2408_v34, %v2407_v33  ;;  %v4320_v52 = vpack.c.bf16 %v4291_v61, %v4290_v28 }
 0x1b8   : > { %v16425_v36 = vpop.permute.xlu0 %2294  ;;  %v16429_v16 = vsel %vm875_vm0, %v4201_v19, %v4203_v11 }
 0x1b9   : > { %20345 = vst [vmem:[#allocation145_spill] sm:$0xff] %v16425_v36  ;;  %v4121_v8 = vpop.permute.xlu1 %4120  ;;  %12624 = vmatmul.mubr.msk.bf16.vlgmr.msra.gmra.mrb[0].mxu1 %vm826_vm3, %v2438_v12  ;;  %v4358_v62 = vrot.slane %v4320_v52, 1  ;;  %20346 = vst [vmem:[#allocation146_spill] sm:$0xff] %v16429_v16  ;;  %v4292_v28 = vmul.f32 %v16429_v16, %v14855_v35 }
 0x1ba   : > { %v4205_v30 = vrot.slane %v4121_v8, 6  ;;  %14456 = vset.pattern.permute.xlu1 %v20256_v13  ;;  %v2409_v13 = vmul.f32 %v16425_v36, %v14767_v32 }
 0x1bb   : > { %2390 = vperm.xlu1 %14456, %v14550_v60   ;;  %v4359_v47 = vsel %vm1999_vm7, %v4356_v51, %v4358_v62 }
 0x1bc   : > { %v16437_v33 = vsel %vm875_vm0, %v4203_v11, %v4205_v30  ;;  %12797 = vmatprep.mubr.msk.bf16.mxu0 %vm826_vm3, %v4359_v47  ;;  %v16448_v34 = vpop.permute.xlu0 %2306 }
 0x1bd   : > { %20347 = vst [vmem:[#allocation147_spill] sm:$0xff] %v16437_v33  ;;  %v4293_v19 = vmul.f32 %v16437_v33, %v14848_v27  ;;  %20349 = vst [vmem:[#allocation149_spill] sm:$0xff] %v16448_v34  ;;  %v2412_v52 = vmul.f32 %v16448_v34, %v14796_v43  ;;  %v4209_v43 = vrot.slane %v16343_v4, 6 }
 0x1be   : > { %v16446_v61 = vpop.permute.xlu1 %2298 }
 0x1bf   : > { %20348 = vst [vmem:[#allocation148_spill] sm:$0xff] %v16446_v61  ;;  %v2410_v51 = vmul.f32 %v16446_v61, %v14764_v31  ;;  %2394 = vperm.xlu1 %14456, %v14551_v26   ;;  %v4321_v11 = vpack.c.bf16 %v4293_v19, %v4292_v28  ;;  %v14552_v31 = vld [vmem:[%s19529_s1 + $0xf8] sm:$0xff] }
 0x1c0   : > { %v16479_v4 = vpop.permute.xlu0 %2310 }
 0x1c1   : > { %v2439_v12 = vpack.c.bf16 %v2410_v51, %v2409_v13  ;;  %v4360_v8 = vrot.slane %v4321_v11, 1  ;;  %20353 = vst [vmem:[#allocation153_spill] sm:$0xff] %v16479_v4 }
 0x1c2   : > { %v16457_v60 = vpop.permute.xlu1 %2302 }
 0x1c3   : > { %20350 = vst [vmem:[#allocation150_spill] sm:$0xff] %v16457_v60  ;;  %v2411_v32 = vmul.f32 %v16457_v60, %v14790_v41  ;;  %2402 = vperm.xlu1 %14456, %v14552_v31   ;;  %12627 = vmatprep.mubr.msk.bf16.mxu1 %vm826_vm3, %v2439_v12  ;;  %v4361_v47 = vsel %vm1999_vm7, %v4358_v62, %v4360_v8 }
 0x1c4   : > { %12798 = vmatmul.mubr.msk.bf16.gmra.mrb[4].mxu0 %vm826_vm3, %v4361_v47 }
 0x1c5   : > { %v2440_v28 = vpack.c.bf16 %v2412_v52, %v2411_v32 }
 0x1c7   : > { %v4124_v19 = vpop.permute.xlu1 %4123  ;;  %12628 = vmatmul.mubr.msk.bf16.gmra.mrb[4].mxu1 %vm826_vm3, %v2440_v28 }
 0x1c8   : > { %v4207_v13 = vrot.slane %v4124_v19, 6 }
 0x1ca   : > { %v16470_v41 = vsel %vm875_vm0, %v4205_v30, %v4207_v13  ;;  %v16473_v51 = vsel %vm875_vm0, %v4207_v13, %v4209_v43 }
 0x1cb   : > { %20351 = vst [vmem:[#allocation151_spill] sm:$0xff] %v16470_v41  ;;  %20352 = vst [vmem:[#allocation152_spill] sm:$0xff] %v16473_v51  ;;  %v4294_v26 = vmul.f32 %v16470_v41, %v20138_v0  ;;  %v4295_v62 = vmul.f32 %v16473_v51, %v20137_v29  ;;  %v4130_v11 = vpop.permute.xlu1 %4129 }
 0x1cc   : > { %v4211_v12 = vrot.slane %v4130_v11, 6 }
 0x1cd   : > { %v4322_v52 = vpack.c.bf16 %v4295_v62, %v4294_v26  ;;  %v2413_v62 = vmul.f32 %v16479_v4, %v14813_v58 }
 0x1ce   : > { %v16482_v47 = vsel %vm875_vm0, %v4209_v43, %v4211_v12  ;;  %v16497_v43 = vpop.permute.xlu0 %2322 }
 0x1cf   : > { %v4133_v32 = vpop.permute.xlu1 %4132  ;;  %v4362_v31 = vrot.slane %v4322_v52, 1  ;;  %20354 = vst [vmem:[#allocation154_spill] sm:$0xff] %v16482_v47  ;;  %v4296_v13 = vmul.f32 %v16482_v47, %v20142_v44  ;;  %20357 = vst [vmem:[#allocation157_spill] sm:$0xff] %v16497_v43 }
 0x1d0   : > { %v4213_v30 = vrot.slane %v4133_v32, 6  ;;  %v2416_v32 = vmul.f32 %v16497_v43, %v14848_v27 }
 0x1d1   : > { %v4363_v28 = vsel %vm1999_vm7, %v4360_v8, %v4362_v31 }
 0x1d2   : > { %v16486_v19 = vsel %vm875_vm0, %v4211_v12, %v4213_v30  ;;  %12801 = vmatprep.mubr.msk.bf16.mxu0 %vm826_vm3, %v4363_v28 }
 0x1d3   : > { %20355 = vst [vmem:[#allocation155_spill] sm:$0xff] %v16486_v19  ;;  %v4297_v26 = vmul.f32 %v16486_v19, %v20141_v3 }
 0x1d4   : > { %v16495_v11 = vpop.permute.xlu1 %2314 }
 0x1d5   : > { %20356 = vst [vmem:[#allocation156_spill] sm:$0xff] %v16495_v11  ;;  %v2414_v8 = vmul.f32 %v16495_v11, %v14810_v57  ;;  %v4323_v12 = vpack.c.bf16 %v4297_v26, %v4296_v13  ;;  %v4217_v57 = vrot.slane %v16356_v40, 6 }
 0x1d7   : > { %v2441_v52 = vpack.c.bf16 %v2414_v8, %v2413_v62  ;;  %v4364_v28 = vrot.slane %v4323_v12, 1 }
 0x1d8   : > { %v16503_v49 = vpop.permute.xlu1 %2318 }
 0x1d9   : > { %20358 = vst [vmem:[#allocation158_spill] sm:$0xff] %v16503_v49  ;;  %v2415_v19 = vmul.f32 %v16503_v49, %v14855_v35  ;;  %12631 = vmatprep.mubr.msk.bf16.mxu1 %vm826_vm3, %v2441_v52  ;;  %v4365_v58 = vsel %vm1999_vm7, %v4362_v31, %v4364_v28 }
 0x1da   : > { %12802 = vmatmul.mubr.msk.bf16.gmra.mrb[8].mxu0 %vm826_vm3, %v4365_v58 }
 0x1db   : > { %v2442_v47 = vpack.c.bf16 %v2416_v32, %v2415_v19 }
 0x1dd   : > { %v4136_v13 = vpop.permute.xlu1 %4135  ;;  %12632 = vmatmul.mubr.msk.bf16.gmra.mrb[8].mxu1 %vm826_vm3, %v2442_v47 }
 0x1de   : > { %v4215_v26 = vrot.slane %v4136_v13, 6 }
 0x1e0   : > { %v16513_v27 = vsel %vm875_vm0, %v4213_v30, %v4215_v26  ;;  %v16516_v62 = vsel %vm875_vm0, %v4215_v26, %v4217_v57  ;;  %v16525_v30 = vpop.permute.xlu0 %2326 }
 0x1e1   : > { %20359 = vst [vmem:[#allocation159_spill] sm:$0xff] %v16513_v27  ;;  %20360 = vst [vmem:[#allocation160_spill] sm:$0xff] %v16516_v62  ;;  %v4298_v35 = vmul.f32 %v16513_v27, %v20146_v5  ;;  %v4299_v31 = vmul.f32 %v16516_v62, %v20145_v56  ;;  %v4142_v8 = vpop.permute.xlu1 %4141 }
 0x1e2   : > { %v4219_v19 = vrot.slane %v4142_v8, 6  ;;  %20362 = vst [vmem:[#allocation162_spill] sm:$0xff] %v16525_v30 }
 0x1e3   : > { %v4324_v12 = vpack.c.bf16 %v4299_v31, %v4298_v35 }
 0x1e4   : > { %v16523_v47 = vsel %vm875_vm0, %v4217_v57, %v4219_v19  ;;  %v2417_v57 = vmul.f32 %v16525_v30, %v20138_v0 }
 0x1e5   : > { %v4145_v40 = vpop.permute.xlu1 %4144  ;;  %v4366_v52 = vrot.slane %v4324_v12, 1  ;;  %20361 = vst [vmem:[#allocation161_spill] sm:$0xff] %v16523_v47  ;;  %v4300_v26 = vmul.f32 %v16523_v47, %v20305_v17  ;;  %v16542_v12 = vpop.permute.xlu0 %2338 }
 0x1e6   : > { %v4221_v32 = vrot.slane %v4145_v40, 6  ;;  %20365 = vst [vmem:[#allocation165_spill] sm:$0xff] %v16542_v12  ;;  %v2420_v40 = vmul.f32 %v16542_v12, %v20141_v3 }
 0x1e7   : > { %v4367_v58 = vsel %vm1999_vm7, %v4364_v28, %v4366_v52 }
 0x1e8   : > { %v16529_v13 = vsel %vm875_vm0, %v4219_v19, %v4221_v32  ;;  %12805 = vmatprep.mubr.msk.bf16.mxu0 %vm826_vm3, %v4367_v58 }
 0x1e9   : > { %20363 = vst [vmem:[#allocation163_spill] sm:$0xff] %v16529_v13  ;;  %v4301_v35 = vmul.f32 %v16529_v13, %v20306_v55 }
 0x1ea   : > { %v16538_v31 = vpop.permute.xlu1 %2330 }
 0x1eb   : > { %20364 = vst [vmem:[#allocation164_spill] sm:$0xff] %v16538_v31  ;;  %v2418_v8 = vmul.f32 %v16538_v31, %v20137_v29  ;;  %v4325_v28 = vpack.c.bf16 %v4301_v35, %v4300_v26  ;;  %v4225_v35 = vrot.slane %v16371_v23, 6 }
 0x1ed   : > { %v2443_v19 = vpack.c.bf16 %v2418_v8, %v2417_v57  ;;  %v4368_v58 = vrot.slane %v4325_v28, 1 }
 0x1ee   : > { %v16546_v47 = vpop.permute.xlu1 %2334 }
 0x1ef   : > { %20366 = vst [vmem:[#allocation166_spill] sm:$0xff] %v16546_v47  ;;  %v2419_v13 = vmul.f32 %v16546_v47, %v20142_v44  ;;  %12635 = vmatprep.mubr.msk.bf16.mxu1 %vm826_vm3, %v2443_v19  ;;  %v4369_v0 = vsel %vm1999_vm7, %v4366_v52, %v4368_v58 }
 0x1f0   : > { %12806 = vmatmul.mubr.msk.bf16.gmra.mrb[12].mxu0 %vm826_vm3, %v4369_v0 }
 0x1f1   : > { %v2444_v29 = vpack.c.bf16 %v2420_v40, %v2419_v13 }
 0x1f3   : > { %v4148_v26 = vpop.permute.xlu1 %4147  ;;  %12636 = vmatmul.mubr.msk.bf16.gmra.mrb[12].mxu1 %vm826_vm3, %v2444_v29 }
 0x1f4   : > { %v4223_v57 = vrot.slane %v4148_v26, 6  ;;  %v16569_v26 = vpop.permute.xlu0 %2342 }
 0x1f5   : > { %20370 = vst [vmem:[#allocation170_spill] sm:$0xff] %v16569_v26 }
 0x1f6   : > { %v16556_v3 = vsel %vm875_vm0, %v4221_v32, %v4223_v57  ;;  %v16559_v8 = vsel %vm875_vm0, %v4223_v57, %v4225_v35 }
 0x1f7   : > { %20367 = vst [vmem:[#allocation167_spill] sm:$0xff] %v16556_v3  ;;  %20368 = vst [vmem:[#allocation168_spill] sm:$0xff] %v16559_v8  ;;  %v4302_v44 = vmul.f32 %v16556_v3, %v20154_v53  ;;  %v4303_v52 = vmul.f32 %v16559_v8, %v20309_v59  ;;  %v4154_v28 = vpop.permute.xlu1 %4153  ;;  %v2421_v8 = vmul.f32 %v16569_v26, %v20146_v5 }
 0x1f8   : > { %v4227_v13 = vrot.slane %v4154_v28, 6 }
 0x1f9   : > { %v4326_v19 = vpack.c.bf16 %v4303_v52, %v4302_v44 }
 0x1fa   : > { %v16566_v23 = vsel %vm875_vm0, %v4225_v35, %v4227_v13 }
 0x1fb   : > { %v4157_v40 = vpop.permute.xlu1 %4156  ;;  %v4370_v0 = vrot.slane %v4326_v19, 1  ;;  %20369 = vst [vmem:[#allocation169_spill] sm:$0xff] %v16566_v23  ;;  %v4304_v44 = vmul.f32 %v16566_v23, %v20312_v22 }
 0x1fc   : > { %v4229_v29 = vrot.slane %v4157_v40, 6  ;;  %v16585_v40 = vpop.permute.xlu0 %2354 }
 0x1fd   : > { %v4371_v32 = vsel %vm1999_vm7, %v4368_v58, %v4370_v0  ;;  %20373 = vst [vmem:[#allocation173_spill] sm:$0xff] %v16585_v40  ;;  %v2424_v5 = vmul.f32 %v16585_v40, %v20306_v55 }
 0x1fe   : > { %v16572_v57 = vsel %vm875_vm0, %v4227_v13, %v4229_v29  ;;  %12809 = vmatprep.mubr.msk.bf16.mxu0 %vm826_vm3, %v4371_v32 }
 0x1ff   : > { %20371 = vst [vmem:[#allocation171_spill] sm:$0xff] %v16572_v57  ;;  %v4305_v35 = vmul.f32 %v16572_v57, %v20313_v50 }
 0x200   : > { %v16581_v52 = vpop.permute.xlu1 %2346 }
 0x201   : > { %20372 = vst [vmem:[#allocation172_spill] sm:$0xff] %v16581_v52  ;;  %v2422_v58 = vmul.f32 %v16581_v52, %v20145_v56  ;;  %v4327_v28 = vpack.c.bf16 %v4305_v35, %v4304_v44 }
 0x203   : > { %v2445_v19 = vpack.c.bf16 %v2422_v58, %v2421_v8  ;;  %v4372_v13 = vrot.slane %v4327_v28, 1  ;;  %v4233_v8 = vrot.slane %v16383_v10, 6  ;;  %v14476_v10 = vld [vmem:[%s19534_s6] sm:$0xff]  }
 0x204   : > { %v16587_v32 = vpop.permute.xlu1 %2350  ;;  %12825 = vmatprep.subr.bf16.mxu1 %v14476_v10 }
 0x205   : > { %20374 = vst [vmem:[#allocation174_spill] sm:$0xff] %v16587_v32  ;;  %v2423_v23 = vmul.f32 %v16587_v32, %v20305_v17  ;;  %12639 = vmatprep.mubr.msk.bf16.mxu1 %vm826_vm3, %v2445_v19  ;;  %v4373_v57 = vsel %vm1999_vm7, %v4370_v0, %v4372_v13  ;;  %12826 = vmatpush3.bf16.msra.mxu1 %v14476_v10 }
 0x206   : > { %12810 = vmatmul.mubr.msk.bf16.gmra.mrb[16].mxu0 %vm826_vm3, %v4373_v57 }
 0x207   : > { %v2446_v56 = vpack.c.bf16 %v2424_v5, %v2423_v23 }
 0x209   : > { %v4160_v44 = vpop.permute.xlu1 %4159  ;;  %12640 = vmatmul.mubr.msk.bf16.gmra.mrb[16].mxu1 %vm826_vm3, %v2446_v56 }
 0x20a   : > { %v4231_v35 = vrot.slane %v4160_v44, 6 }
 0x20c   : > { %v16599_v58 = vsel %vm875_vm0, %v4229_v29, %v4231_v35  ;;  %v16602_v55 = vsel %vm875_vm0, %v4231_v35, %v4233_v8  ;;  %v16615_v35 = vpop.permute.xlu0 %2358 }
 0x20d   : > { %20375 = vst [vmem:[#allocation175_spill] sm:$0xff] %v16599_v58  ;;  %20376 = vst [vmem:[#allocation176_spill] sm:$0xff] %v16602_v55  ;;  %v4306_v17 = vmul.f32 %v16599_v58, %v20317_v46  ;;  %v4307_v0 = vmul.f32 %v16602_v55, %v20264_v15  ;;  %v4166_v57 = vpop.permute.xlu1 %4165 }
 0x20e   : > { %v4235_v23 = vrot.slane %v4166_v57, 6  ;;  %20378 = vst [vmem:[#allocation178_spill] sm:$0xff] %v16615_v35  ;;  %v2425_v57 = vmul.f32 %v16615_v35, %v20154_v53 }
 0x20f   : > { %v4328_v28 = vpack.c.bf16 %v4307_v0, %v4306_v17 }
 0x210   : > { %v16612_v29 = vsel %vm875_vm0, %v4233_v8, %v4235_v23  ;;  %v14477_v8 = vld [vmem:[%s19534_s6 + $0x8] sm:$0xff]  }
 0x211   : > { %v4169_v19 = vpop.permute.xlu1 %4168  ;;  %v4374_v5 = vrot.slane %v4328_v28, 1  ;;  %20377 = vst [vmem:[#allocation177_spill] sm:$0xff] %v16612_v29  ;;  %v4308_v17 = vmul.f32 %v16612_v29, %v20321_v21  ;;  %12827 = vmatprep.subr.bf16.mxu1 %v14477_v8 }
 0x212   : > { %v4237_v56 = vrot.slane %v4169_v19, 6  ;;  %12828 = vmatpush3.bf16.msra.mxu1 %v14477_v8 }
 0x213   : > { %v4375_v44 = vsel %vm1999_vm7, %v4372_v13, %v4374_v5 }
 0x214   : > { %v16618_v55 = vsel %vm875_vm0, %v4235_v23, %v4237_v56  ;;  %12813 = vmatprep.mubr.msk.bf16.mxu0 %vm826_vm3, %v4375_v44  ;;  %v16634_v44 = vpop.permute.xlu0 %2370 }
 0x215   : > { %20379 = vst [vmem:[#allocation179_spill] sm:$0xff] %v16618_v55  ;;  %v4309_v0 = vmul.f32 %v16618_v55, %v20322_v39  ;;  %20381 = vst [vmem:[#allocation181_spill] sm:$0xff] %v16634_v44  ;;  %v2428_v29 = vmul.f32 %v16634_v44, %v20313_v50 }
 0x216   : > { %v16628_v13 = vpop.permute.xlu1 %2362 }
 0x217   : > { %20380 = vst [vmem:[#allocation180_spill] sm:$0xff] %v16628_v13  ;;  %v2426_v23 = vmul.f32 %v16628_v13, %v20309_v59  ;;  %v4329_v28 = vpack.c.bf16 %v4309_v0, %v4308_v17  ;;  %v4241_v0 = vrot.slane %v16388_v63, 6 }
 0x219   : > { %v2447_v19 = vpack.c.bf16 %v2426_v23, %v2425_v57  ;;  %v4376_v10 = vrot.slane %v4329_v28, 1  ;;  %v16647_v57 = vpop.permute.xlu0 %2374 }
 0x21a   : > { %v16636_v55 = vpop.permute.xlu1 %2366  ;;  %20383 = vst [vmem:[#allocation183_spill] sm:$0xff] %v16647_v57 }
 0x21b   : > { %20382 = vst [vmem:[#allocation182_spill] sm:$0xff] %v16636_v55  ;;  %v2427_v58 = vmul.f32 %v16636_v55, %v20312_v22  ;;  %12643 = vmatprep.mubr.msk.bf16.mxu1 %vm826_vm3, %v2447_v19  ;;  %v4377_v53 = vsel %vm1999_vm7, %v4374_v5, %v4376_v10 }
 0x21c   : > { %12814 = vmatmul.mubr.msk.bf16.gmra.mrb[20].mxu0 %vm826_vm3, %v4377_v53 }
 0x21d   : > { %v2448_v59 = vpack.c.bf16 %v2428_v29, %v2427_v58  ;;  %v16659_v53 = vpop.permute.xlu0 %2386 }
 0x21e   : > { %20386 = vst [vmem:[#allocation186_spill] sm:$0xff] %v16659_v53 }
 0x21f   : > { %v4172_v17 = vpop.permute.xlu1 %4171  ;;  %12644 = vmatmul.mubr.msk.bf16.gmra.mrb[20].mxu1 %vm826_vm3, %v2448_v59 }
 0x220   : > { %v4239_v8 = vrot.slane %v4172_v17, 6 }
 0x222   : > { %v16650_v50 = vsel %vm875_vm0, %v4237_v56, %v4239_v8  ;;  %v16653_v22 = vsel %vm875_vm0, %v4239_v8, %v4241_v0 }
 0x223   : > { %20384 = vst [vmem:[#allocation184_spill] sm:$0xff] %v16650_v50  ;;  %20385 = vst [vmem:[#allocation185_spill] sm:$0xff] %v16653_v22  ;;  %v4310_v5 = vmul.f32 %v16650_v50, %v20328_v42  ;;  %v4311_v58 = vmul.f32 %v16653_v22, %v15081_v38  ;;  %v4178_v29 = vpop.permute.xlu1 %4177 }
 0x224   : > { %v4243_v23 = vrot.slane %v4178_v29, 6  ;;  %v20389_v29 = vld [vmem:[#allocation35_spill] sm:$0xff] }
 0x225   : > { %v4330_v28 = vpack.c.bf16 %v4311_v58, %v4310_v5 }
 0x226   : > { %v16662_v59 = vsel %vm875_vm0, %v4241_v0, %v4243_v23  ;;  %v2429_v0 = vmul.f32 %v16647_v57, %v20317_v46 }
 0x227   : > { %v4181_v19 = vpop.permute.xlu1 %4180  ;;  %v4378_v63 = vrot.slane %v4330_v28, 1  ;;  %20387 = vst [vmem:[#allocation187_spill] sm:$0xff] %v16662_v59  ;;  %v4312_v22 = vmul.f32 %v16662_v59, %v15101_v9  ;;  %v4187_v28 = vpop.permute.xlu0 %4186  ;;  %v2432_v59 = vmul.f32 %v16659_v53, %v20322_v39 }
 0x228   : > { %v4245_v56 = vrot.slane %v4181_v19, 6  ;;  %v4249_v3 = vrot.slane %v4187_v28, 6 }
 0x229   : > { %v4379_v17 = vsel %vm1999_vm7, %v4376_v10, %v4378_v63 }
 0x22a   : > { %v16666_v8 = vsel %vm875_vm0, %v4243_v23, %v4245_v56  ;;  %12817 = vmatprep.mubr.msk.bf16.mxu0 %vm826_vm3, %v4379_v17 }
 0x22b   : > { %20388 = vst [vmem:[#allocation188_spill] sm:$0xff] %v16666_v8  ;;  %v4313_v5 = vmul.f32 %v16666_v8, %v20389_v29 }
 0x22c   : > { %v16673_v58 = vpop.permute.xlu1 %2378 }
 0x22d   : > { %20390 = vst [vmem:[#allocation35_spill] sm:$0xff] %v16673_v58  ;;  %v2430_v10 = vmul.f32 %v16673_v58, %v20264_v15  ;;  %v4331_v19 = vpack.c.bf16 %v4313_v5, %v4312_v22  ;;  %v4316_v15 = vmul.f32 0.0, %v4249_v3 }
 0x22f   : > { %v2449_v23 = vpack.c.bf16 %v2430_v10, %v2429_v0  ;;  %v4380_v50 = vrot.slane %v4331_v19, 1  ;;  %v4333_v28 = vpack.c.bf16 %v4316_v15, %v4316_v15 }
 0x230   : > { %v16679_v17 = vpop.permute.xlu1 %2382 }
 0x231   : > { %20391 = vst [vmem:[#allocation189_spill] sm:$0xff] %v16679_v17  ;;  %v2431_v8 = vmul.f32 %v16679_v17, %v20321_v21  ;;  %12647 = vmatprep.mubr.msk.bf16.mxu1 %vm826_vm3, %v2449_v23  ;;  %v4381_v44 = vsel %vm1999_vm7, %v4378_v63, %v4380_v50  ;;  %v16704_v23 = vpop.permute.xlu0 %2398 }
 0x232   : > { %12818 = vmatmul.mubr.msk.bf16.gmra.mrb[24].mxu0 %vm826_vm3, %v4381_v44  ;;  %v16699_v44 = vrot.slane %v4333_v28, 1  ;;  %20397 = vst [vmem:[#allocation195_spill] sm:$0xff] %v16704_v23  ;;  %v20399_v28 = vld [vmem:[#allocation43_spill] sm:$0xff] }
 0x233   : > { %v2450_v46 = vpack.c.bf16 %v2432_v59, %v2431_v8 }
 0x234   : > { %20395 = vst [vmem:[#allocation193_spill] sm:$0xff] %v16699_v44 }
 0x235   : > { %v4184_v22 = vpop.permute.xlu1 %4183  ;;  %12648 = vmatmul.mubr.msk.bf16.gmra.mrb[24].mxu1 %vm826_vm3, %v2450_v46 }
 0x236   : > { %v4247_v5 = vrot.slane %v4184_v22, 6  ;;  %v2435_v22 = vmul.f32 %v16704_v23, %v15101_v9  ;;  %v14478_v9 = vld [vmem:[%s19533_s5] sm:$0x1f]  }
 0x238   : > { %v16690_v0 = vsel %vm875_vm0, %v4245_v56, %v4247_v5  ;;  %v4250_v39 = vsel %vm875_vm0, %v4247_v5, %v4249_v3 }
 0x239   : > { %20392 = vst [vmem:[#allocation190_spill] sm:$0xff] %v16690_v0  ;;  %v4314_v21 = vmul.f32 %v16690_v0, %v15113_v48  ;;  %v16695_v10 = vmul.f32 0.0, %v4250_v39 }
 0x23a   : > { %v16697_v63 = vpop.permute.xlu1 %2390 }
 0x23b   : > { %20393 = vst [vmem:[#allocation191_spill] sm:$0xff] %v16695_v10  ;;  %20394 = vst [vmem:[#allocation192_spill] sm:$0xff] %v16697_v63  ;;  %v4332_v59 = vpack.c.bf16 %v16695_v10, %v4314_v21  ;;  %v2433_v3 = vmul.f32 %v16697_v63, %v20328_v42 }
 0x23d   : > { %v4382_v8 = vrot.slane %v4332_v59, 1 }
 0x23e   : > { %v16702_v19 = vpop.permute.xlu1 %2394 }
 0x23f   : > { %20396 = vst [vmem:[#allocation194_spill] sm:$0xff] %v16702_v19  ;;  %v2434_v48 = vmul.f32 %v16702_v19, %v15081_v38  ;;  %v4383_v56 = vsel %vm1999_vm7, %v4380_v50, %v4382_v8  ;;  %v4385_v46 = vsel %vm1999_vm7, %v4382_v8, %v16699_v44  ;;  %v20400_v50 = vld [vmem:[#allocation40_spill] sm:$0xff] }
 0x240   : > { %12821 = vmatprep.mubr.msk.bf16.mxu0 %vm826_vm3, %v4383_v56  ;;  %v5070_v39 = vand.u32 %v14478_v9, %v20400_v50 }
 0x241   : > { %v2451_v15 = vpack.c.bf16 %v2434_v48, %v2433_v3  ;;  %12822 = vmatmul.mubr.msk.bf16.gmra.mrb[28].mxu0 %vm826_vm3, %v4385_v46 }
 0x242   : > { %v16717_v5 = vpop.permute.xlu1 %2402  ;;  %13187 = vmatprep.mubr.msk.bf16.mxu0 %vm4855_vm8, %v20399_v28  ;;  %12861 = vmatprep.subr.bf16.mxu1 %v5070_v39 }
 0x243   : > { %20398 = vst [vmem:[#allocation196_spill] sm:$0xff] %v16717_v5  ;;  %v2436_v38 = vmul.f32 %v16717_v5, %v20389_v29  ;;  %12651 = vmatprep.mubr.msk.bf16.mxu1 %vm826_vm3, %v2451_v15 }
 0x245   : > { %v2452_v42 = vpack.c.bf16 %v2436_v38, %v2435_v22 }
 0x247   : > { %12652 = vmatmul.mubr.msk.bf16.gmra.mrb[28].mxu1 %vm826_vm3, %v2452_v42 }
 0x248   : > { %12829 = vmatprep.mubr.msk.bf16.mxu1 %vm4855_vm8, %v20399_v28 }
 0x280   : > { %v12795_v21 = vpop.f32.mrb[0].mxu0 }
 0x281   : > { %v4471_v59 = vpop.f32.mrb[1].mxu0 }
 0x282   : > { %v12796_v8 = vpop.f32.mrb[2].mxu0 }
 0x283   : > { %v4474_v3 = vpop.f32.mrb[3].mxu0 }
 0x28c   : > { %v12625_v29 = vpop.f32.mrb[0].mxu1 }
 0x28d   : > { %v13541_v48 = vadd.f32 %v12795_v21, %v12625_v29  ;;  %v2540_v56 = vpop.f32.mrb[1].mxu1 }
 0x28e   : > { %v13542_v46 = vadd.f32 %v4471_v59, %v2540_v56  ;;  %v12626_v15 = vpop.f32.mrb[2].mxu1  ;;  %v20401_v59 = vld [vmem:[#allocation41_spill] sm:$0xff]  ;;  %v20403_v56 = vld [vmem:[#allocation34_spill] sm:$0xff] }
 0x28f   : > { %v4632_v22 = vmax.f32 %v13541_v48, 0.0  ;;  %v13543_v38 = vadd.f32 %v12796_v8, %v12626_v15  ;;  %v2543_v42 = vpop.f32.mrb[3].mxu1 }
 0x290   : > { %v4630_v28 = vmax.f32 %v13542_v46, 0.0  ;;  %v13544_v44 = vadd.f32 %v4474_v3, %v2543_v42  ;;  %v20402_v3 = vld [vmem:[#allocation44_spill] sm:$0xff]  ;;  %v20404_v46 = vld [vmem:[#allocation42_spill] sm:$0xff] }
 0x291   : > { %v4633_v10 = vmax.f32 %v13543_v38, 0.0  ;;  %v4697_v23 = vrot.slane %v4632_v22, 7 }
 0x292   : > { %v4694_v0 = vrot.slane %v4630_v28, 7  ;;  %v4631_v5 = vmax.f32 %v13544_v44, 0.0 }
 0x293   : > { %v16731_v9 = vrot.slane %v4633_v10, 7 }
 0x294   : > { %v4790_v50 = vsel %vm516_vm1, 0.0, %v4694_v0  ;;  %v4695_v19 = vrot.slane %v4631_v5, 7  ;;  %v20405_v5 = vld [vmem:[#allocation45_spill] sm:$0xff] }
 0x295   : > { %v16736_v21 = vsel %vm516_vm1, %v4697_v23, %v16731_v9  ;;  %v4794_v29 = vmul.f32 %v4790_v50, %v20401_v59  ;;  %v5632_v10 = vmul.f32 %v4790_v50, %v20403_v56 }
 0x296   : > { %v4696_v8 = vsel %vm516_vm1, %v4694_v0, %v4695_v19  ;;  %v16741_v48 = vsel %vm516_vm1, %v4695_v19, %v4697_v23  ;;  %v4797_v44 = vmul.f32 %v16736_v21, %v20402_v3  ;;  %v20406_v0 = vld [vmem:[#allocation36_spill] sm:$0xff]  ;;  %v20407_v23 = vld [vmem:[#allocation77_spill] sm:$0xff] }
 0x297   : > { %v4795_v15 = vmul.f32 %v4696_v8, %v20404_v46  ;;  %v12799_v22 = vpop.f32.mrb[4].mxu0  ;;  %v4796_v38 = vmul.f32 %v16741_v48, %v20405_v5  ;;  %v5233_v42 = vpack.c.bf16 %v4696_v8, %v4790_v50  ;;  %v5234_v59 = vpack.c.bf16 %v16736_v21, %v16741_v48 }
 0x298   : > { %v4487_v28 = vpop.f32.mrb[5].mxu0  ;;  %v5633_v63 = vmul.f32 %v4696_v8, %v20406_v0  ;;  %v5634_v19 = vmul.f32 %v16741_v48, %v16093_v7  ;;  %v5635_v3 = vmul.f32 %v16736_v21, %v20407_v23  ;;  %v16758_v5 = vmul.f32 %v16736_v21, %v16414_v6 }
 0x299   : > { %v4824_v56 = vpack.c.bf16 %v4795_v15, %v4794_v29  ;;  %v12800_v53 = vpop.f32.mrb[6].mxu0  ;;  %v4825_v46 = vpack.c.bf16 %v4797_v44, %v4796_v38  ;;  %v5255_v17 = vshll.u32 %v5233_v42, 16  ;;  %v5263_v55 = vshll.u32 %v5234_v59, 16 }
 0x29a   : > { %20408 = vst [vmem:[#allocation43_spill] sm:$0xff] %v16758_v5  ;;  %v12629_v58 = vpop.f32.mrb[4].mxu1  ;;  %v4490_v57 = vpop.f32.mrb[7].mxu0  ;;  %v5663_v13 = vpack.c.bf16 %v5633_v63, %v5632_v10  ;;  %v5664_v35 = vpack.c.bf16 %v5635_v3, %v5634_v19  ;;  %v16762_v0 = vmul.f32 %v16741_v48, %v16391_v1  ;;  %v5259_v44 = vshrl.u32 %v5233_v42, 16  ;;  %v20411_v19 = vld [vmem:[#allocation65_spill] sm:$0xff] }
 0x29b   : > { %v13545_v7 = vadd.f32 %v12799_v22, %v12629_v58  ;;  %v2556_v62 = vpop.f32.mrb[5].mxu1  ;;  %12830 = vmatmul.mubr.msk.bf16.vlgmr.msra.gmra.mrb[32].mxu1 %vm4855_vm8, %v4824_v56  ;;  %v16765_v29 = vrot.slane %v5255_v17, 1  ;;  %v16773_v3 = vmul.f32 %v4696_v8, %v16381_v54  ;;  %v5265_v17 = vrot.slane %v5263_v55, 1  ;;  %v20423_v54 = vld [vmem:[#allocation46_spill] sm:$0xff] }
 0x29c   : > { %20409 = vst [vmem:[#allocation197_spill] sm:$0xff] %v16762_v0  ;;  %v13546_v15 = vadd.f32 %v4487_v28, %v2556_v62  ;;  %v12630_v38 = vpop.f32.mrb[6].mxu1  ;;  %12833 = vmatprep.mubr.msk.bf16.mxu1 %vm4855_vm8, %v4825_v46  ;;  %12862 = vmatpush3.bf16.msra.mxu1 %v5070_v39  ;;  %v16768_v6 = vrot.slane %v5663_v13, 1  ;;  %v16770_v63 = vrot.slane %v5664_v35, 1  ;;  %v16777_v42 = vmul.f32 %v4790_v50, %v20411_v19  ;;  %v20415_v19 = vld [vmem:[#allocation67_spill] sm:$0xff] }
 0x29d   : > { %20410 = vst [vmem:[#allocation198_spill] sm:$0xff] %v16773_v3  ;;  %v4636_v10 = vmax.f32 %v13545_v7, 0.0  ;;  %v13547_v58 = vadd.f32 %v12800_v53, %v12630_v38  ;;  %v2559_v22 = vpop.f32.mrb[7].mxu1  ;;  %v5261_v56 = vor.u32 %v5259_v44, %v16765_v29  ;;  %v16780_v39 = vmul.f32 %v4790_v50, %v16399_v18  ;;  %v20424_v18 = vld [vmem:[#allocation49_spill] sm:$0xff] }
 0x29e   : > { %v4634_v62 = vmax.f32 %v13546_v15, 0.0  ;;  %v13548_v28 = vadd.f32 %v4490_v57, %v2559_v22  ;;  %v5267_v46 = vshrl.u32 %v5234_v59, 16  ;;  %v16788_v7 = vsel %vm1999_vm7, %v16768_v6, %v16770_v63 }
 0x29f   : > { %20412 = vst [vmem:[#allocation199_spill] sm:$0xff] %v16780_v39  ;;  %v4637_v13 = vmax.f32 %v13547_v58, 0.0  ;;  %v16783_v35 = vsel %vm1361_vm2, %v5261_v56, %v5265_v17  ;;  %20413 = vst [vmem:[#allocation200_spill] sm:$0xff] %v16788_v7  ;;  %v4705_v50 = vrot.slane %v4636_v10, 7  ;;  %v20414_v58 = vld [vmem:[#allocation66_spill] sm:$0xff]  ;;  %v20417_v10 = vld [vmem:[#allocation47_spill] sm:$0xff] }
 0x2a0   : > { %v4701_v53 = vrot.slane %v4634_v62, 7  ;;  %v4635_v55 = vmax.f32 %v13548_v28, 0.0  ;;  %v5269_v38 = vor.u32 %v5267_v46, %v5265_v17  ;;  %v6523_v22 = vmul.f32 %v4696_v8, %v20414_v58  ;;  %v20416_v28 = vld [vmem:[#allocation68_spill] sm:$0xff] }
 0x2a1   : > { %v16794_v15 = vrot.slane %v4637_v13, 7  ;;  %v6524_v62 = vmul.f32 %v16741_v48, %v20415_v19  ;;  %v6525_v44 = vmul.f32 %v16736_v21, %v20416_v28  ;;  %v20418_v13 = vld [vmem:[#allocation113_spill] sm:$0xff]  ;;  %v20422_v19 = vld [vmem:[#allocation48_spill] sm:$0xff] }
 0x2a2   : > { %v16799_v59 = vsel %vm516_vm1, %v16731_v9, %v4701_v53  ;;  %v4703_v56 = vrot.slane %v4635_v55, 7  ;;  %v16813_v8 = vmul.f32 %v16741_v48, %v20418_v13  ;;  %v20420_v9 = vld [vmem:[#allocation114_spill] sm:$0xff] }
 0x2a3   : > { %v16807_v57 = vsel %vm516_vm1, %v4705_v50, %v16794_v15  ;;  %v4798_v17 = vmul.f32 %v16799_v59, %v20417_v10  ;;  %v16817_v46 = vmul.f32 %v16736_v21, %v20420_v9 }
 0x2a4   : > { %20419 = vst [vmem:[#allocation201_spill] sm:$0xff] %v16813_v8  ;;  %v16820_v55 = vsel %vm516_vm1, %v4701_v53, %v4703_v56  ;;  %v16823_v28 = vsel %vm516_vm1, %v4703_v56, %v4705_v50  ;;  %v4801_v58 = vmul.f32 %v16807_v57, %v20422_v19  ;;  %v5639_v1 = vmul.f32 %v16807_v57, %v16137_v24  ;;  %v20425_v50 = vld [vmem:[#allocation117_spill] sm:$0xff] }
 0x2a5   : > { %20421 = vst [vmem:[#allocation202_spill] sm:$0xff] %v16817_v46  ;;  %v4799_v13 = vmul.f32 %v16820_v55, %v20423_v54  ;;  %v4800_v23 = vmul.f32 %v16823_v28, %v20424_v18  ;;  %v5235_v9 = vpack.c.bf16 %v16820_v55, %v16799_v59  ;;  %v5636_v53 = vmul.f32 %v16799_v59, %v16115_v37 }
 0x2a6   : > { %v16839_v56 = vmul.f32 %v16820_v55, %v20425_v50  ;;  %v16843_v19 = vpack.c.bf16 %v16807_v57, %v16823_v28  ;;  %v5637_v24 = vmul.f32 %v16820_v55, %v16118_v20  ;;  %v5638_v18 = vmul.f32 %v16823_v28, %v16134_v25 }
 0x2a7   : > { %v4826_v54 = vpack.c.bf16 %v4799_v13, %v4798_v17  ;;  %v4827_v10 = vpack.c.bf16 %v4801_v58, %v4800_v23  ;;  %v5271_v0 = vshll.u32 %v5235_v9, 16  ;;  %v16851_v37 = vmul.f32 %v16799_v59, %v16425_v36 }
 0x2a8   : > { %20426 = vst [vmem:[#allocation203_spill] sm:$0xff] %v16839_v56  ;;  %v5275_v5 = vshrl.u32 %v5235_v9, 16  ;;  %v5279_v50 = vshll.u32 %v16843_v19, 16  ;;  %v5665_v39 = vpack.c.bf16 %v5637_v24, %v5636_v53  ;;  %v5666_v3 = vpack.c.bf16 %v5639_v1, %v5638_v18  ;;  %v14479_v24 = vld [vmem:[%s19534_s6 + $0x10] sm:$0xff]   ;;  %v20431_v53 = vld [vmem:[#allocation115_spill] sm:$0xff] }
 0x2a9   : > { %20427 = vst [vmem:[#allocation204_spill] sm:$0xff] %v16851_v37  ;;  %12834 = vmatmul.mubr.msk.bf16.gmra.mrb[36].mxu1 %vm4855_vm8, %v4826_v54  ;;  %v5273_v7 = vrot.slane %v5271_v0, 1  ;;  %v16857_v20 = vmul.f32 %v16820_v55, %v16446_v61  ;;  %v16861_v23 = vmul.f32 %v16823_v28, %v16457_v60  ;;  %v16865_v58 = vmul.f32 %v16807_v57, %v16448_v34 }
 0x2aa   : > { %12837 = vmatprep.mubr.msk.bf16.mxu1 %vm4855_vm8, %v4827_v10  ;;  %v16871_v54 = vrot.slane %v5279_v50, 1  ;;  %v5704_v1 = vrot.slane %v5665_v39, 1  ;;  %v16873_v18 = vrot.slane %v5666_v3, 1  ;;  %v6555_v0 = vpack.c.bf16 %v6523_v22, %v16777_v42  ;;  %12895 = vmatprep.subr.bf16.mxu1 %v14479_v24  ;;  %v20433_v22 = vld [vmem:[#allocation69_spill] sm:$0xff]  ;;  %v20434_v10 = vld [vmem:[#allocation70_spill] sm:$0xff] }
 0x2ab   : > { %20428 = vst [vmem:[#allocation205_spill] sm:$0xff] %v16857_v20  ;;  %20429 = vst [vmem:[#allocation206_spill] sm:$0xff] %v16861_v23  ;;  %v16877_v17 = vsel %vm1361_vm2, %v5269_v38, %v5273_v7  ;;  %v5277_v13 = vor.u32 %v5275_v5, %v5273_v7  ;;  %v16885_v34 = vmul.f32 %v16799_v59, %v20431_v53  ;;  %v20435_v53 = vld [vmem:[#allocation71_spill] sm:$0xff] }
 0x2ac   : > { %20430 = vst [vmem:[#allocation207_spill] sm:$0xff] %v16865_v58  ;;  %v16889_v3 = vsel %vm1999_vm7, %v16770_v63, %v5704_v1  ;;  %v16893_v42 = vsel %vm1999_vm7, %v5704_v1, %v16873_v18  ;;  %v6556_v5 = vpack.c.bf16 %v6525_v44, %v6524_v62  ;;  %v6594_v38 = vrot.slane %v6555_v0, 1  ;;  %v20436_v1 = vld [vmem:[#allocation72_spill] sm:$0xff] }
 0x2ad   : > { %20432 = vst [vmem:[#allocation208_spill] sm:$0xff] %v16885_v34  ;;  %v12803_v39 = vpop.f32.mrb[8].mxu0  ;;  %v16897_v7 = vsel %vm1361_vm2, %v5277_v13, %v16871_v54  ;;  %v6526_v50 = vmul.f32 %v16799_v59, %v20433_v22  ;;  %v6527_v24 = vmul.f32 %v16820_v55, %v20434_v10  ;;  %v6528_v60 = vmul.f32 %v16823_v28, %v20435_v53  ;;  %v20437_v22 = vld [vmem:[#allocation116_spill] sm:$0xff]  ;;  %v20439_v10 = vld [vmem:[#allocation5_spill] sm:$0xff] }
 0x2ae   : > { %v4503_v9 = vpop.f32.mrb[9].mxu0  ;;  %v6595_v63 = vrot.slane %v6556_v5, 1  ;;  %v6529_v44 = vmul.f32 %v16807_v57, %v20436_v1  ;;  %v16913_v36 = vmul.f32 %v16823_v28, %v20437_v22  ;;  %v16917_v5 = vmul.f32 %v16807_v57, %v20439_v10  ;;  %v20442_v10 = vld [vmem:[#allocation38_spill] sm:$0xff]  ;;  %v20624_v58 = vld [vmem:[#allocation196_spill] sm:$0xff] }
 0x2af   : > { %v12804_v13 = vpop.f32.mrb[10].mxu0  ;;  %v6557_v61 = vpack.c.bf16 %v6527_v24, %v6526_v50  ;;  %v7411_v50 = vmul.f32 %v16741_v48, %v16332_v45  ;;  %v7412_v24 = vmul.f32 %v16736_v21, %v16340_v2  ;;  %v7413_v56 = vmul.f32 %v16799_v59, %v20442_v10 }
 0x2b0   : > { %20438 = vst [vmem:[#allocation209_spill] sm:$0xff] %v16913_v36  ;;  %20440 = vst [vmem:[#allocation210_spill] sm:$0xff] %v16917_v5  ;;  %v12633_v53 = vpop.f32.mrb[8].mxu1  ;;  %v4506_v25 = vpop.f32.mrb[11].mxu0  ;;  %v16920_v1 = vsel %vm1999_vm7, %v6594_v38, %v6595_v63  ;;  %v6558_v23 = vpack.c.bf16 %v6529_v44, %v6528_v60  ;;  %v20443_v60 = vld [vmem:[#allocation32_spill] sm:$0xff]  ;;  %v20473_v5 = vld [vmem:[#allocation143_spill] sm:$0xff] }
 0x2b1   : > { %20441 = vst [vmem:[#allocation211_spill] sm:$0xff] %v16920_v1  ;;  %v13549_v0 = vadd.f32 %v12803_v39, %v12633_v53  ;;  %v2572_v62 = vpop.f32.mrb[9].mxu1  ;;  %v6597_v22 = vrot.slane %v6557_v61, 1  ;;  %v7414_v44 = vmul.f32 %v16820_v55, %v20443_v60  ;;  %v7442_v48 = vpack.c.bf16 %v7412_v24, %v7411_v50  ;;  %v20446_v55 = vld [vmem:[#allocation112_spill] sm:$0xff]  ;;  %v20455_v60 = vld [vmem:[#allocation130_spill] sm:$0xff] }
 0x2b2   : > { %v13550_v8 = vadd.f32 %v4503_v9, %v2572_v62  ;;  %v12634_v46 = vpop.f32.mrb[10].mxu1  ;;  %v16930_v38 = vrot.slane %v6558_v23, 1  ;;  %v16939_v61 = vmul.f32 %v16823_v28, %v16369_v14  ;;  %v5283_v28 = vshrl.u32 %v16843_v19, 16 }
 0x2b3   : > { %v4640_v45 = vmax.f32 %v13549_v0, 0.0  ;;  %v13551_v1 = vadd.f32 %v12804_v13, %v12634_v46  ;;  %v2575_v21 = vpop.f32.mrb[11].mxu1  ;;  %v16935_v53 = vsel %vm1999_vm7, %v6595_v63, %v6597_v22  ;;  %v7443_v9 = vpack.c.bf16 %v7414_v44, %v7413_v56 }
 0x2b4   : > { %20444 = vst [vmem:[#allocation212_spill] sm:$0xff] %v16935_v53  ;;  %v4638_v39 = vmax.f32 %v13550_v8, 0.0  ;;  %v13552_v59 = vadd.f32 %v4506_v25, %v2575_v21  ;;  %v16943_v23 = vsel %vm1999_vm7, %v6597_v22, %v16930_v38  ;;  %v7416_v0 = vmul.f32 %v16807_v57, %v20446_v55 }
 0x2b5   : > { %20445 = vst [vmem:[#allocation213_spill] sm:$0xff] %v16943_v23  ;;  %v4641_v62 = vmax.f32 %v13551_v1, 0.0  ;;  %v7479_v50 = vrot.slane %v7442_v48, 1  ;;  %v16947_v63 = vrot.slane %v7443_v9, 1  ;;  %v4713_v24 = vrot.slane %v4640_v45, 7  ;;  %v20448_v1 = vld [vmem:[#allocation51_spill] sm:$0xff] }
 0x2b6   : > { %v4709_v46 = vrot.slane %v4638_v39, 7  ;;  %v4639_v13 = vmax.f32 %v13552_v59, 0.0  ;;  %v7444_v25 = vpack.c.bf16 %v7416_v0, %v16939_v61  ;;  %v5285_v44 = vor.u32 %v5283_v28, %v16871_v54  ;;  %v20449_v48 = vld [vmem:[#allocation104_spill] sm:$0xff]  ;;  %v20451_v59 = vld [vmem:[#allocation131_spill] sm:$0xff] }
 0x2b7   : > { %v16949_v34 = vrot.slane %v4641_v62, 7  ;;  %v16957_v22 = vsel %vm1999_vm7, %v7479_v50, %v16947_v63  ;;  %v20452_v62 = vld [vmem:[#allocation50_spill] sm:$0xff]  ;;  %v20454_v54 = vld [vmem:[#allocation84_spill] sm:$0xff] }
 0x2b8   : > { %v4710_v8 = vsel %vm516_vm1, %v16794_v15, %v4709_v46  ;;  %v4711_v56 = vrot.slane %v4639_v13, 7  ;;  %20447 = vst [vmem:[#allocation214_spill] sm:$0xff] %v16957_v22  ;;  %v20450_v15 = vld [vmem:[#allocation52_spill] sm:$0xff]  ;;  %v20453_v13 = vld [vmem:[#allocation53_spill] sm:$0xff] }
 0x2b9   : > { %v16961_v57 = vsel %vm516_vm1, %v4713_v24, %v16949_v34  ;;  %v4802_v45 = vmul.f32 %v4710_v8, %v20448_v1  ;;  %v5640_v19 = vmul.f32 %v4710_v8, %v20449_v48 }
 0x2ba   : > { %v4712_v21 = vsel %vm516_vm1, %v4709_v46, %v4711_v56  ;;  %v4714_v61 = vsel %vm516_vm1, %v4711_v56, %v4713_v24  ;;  %v4805_v39 = vmul.f32 %v16961_v57, %v20450_v15  ;;  %v5643_v9 = vmul.f32 %v16961_v57, %v20451_v59 }
 0x2bb   : > { %v4803_v0 = vmul.f32 %v4712_v21, %v20452_v62  ;;  %v4804_v50 = vmul.f32 %v4714_v61, %v20453_v13  ;;  %v5237_v55 = vpack.c.bf16 %v4712_v21, %v4710_v8  ;;  %v16975_v14 = vpack.c.bf16 %v16961_v57, %v4714_v61 }
 0x2bc   : > { %v5641_v28 = vmul.f32 %v4712_v21, %v20454_v54  ;;  %v5642_v46 = vmul.f32 %v4714_v61, %v20455_v60  ;;  %v16980_v24 = vmul.f32 %v4710_v8, %v16479_v4  ;;  %v16983_v56 = vmul.f32 %v4712_v21, %v16495_v11 }
 0x2bd   : > { %v4828_v10 = vpack.c.bf16 %v4803_v0, %v4802_v45  ;;  %v4829_v2 = vpack.c.bf16 %v4805_v39, %v4804_v50  ;;  %v5287_v59 = vshll.u32 %v5237_v55, 16  ;;  %v16986_v48 = vmul.f32 %v4714_v61, %v16503_v49  ;;  %v20460_v45 = vld [vmem:[#allocation73_spill] sm:$0xff]  ;;  %v20468_v49 = vld [vmem:[#allocation6_spill] sm:$0xff] }
 0x2be   : > { %20456 = vst [vmem:[#allocation215_spill] sm:$0xff] %v16980_v24  ;;  %20457 = vst [vmem:[#allocation216_spill] sm:$0xff] %v16983_v56  ;;  %v5291_v15 = vshrl.u32 %v5237_v55, 16  ;;  %v5295_v13 = vshll.u32 %v16975_v14, 16  ;;  %v5667_v62 = vpack.c.bf16 %v5641_v28, %v5640_v19  ;;  %v5668_v1 = vpack.c.bf16 %v5643_v9, %v5642_v46  ;;  %v20461_v19 = vld [vmem:[#allocation74_spill] sm:$0xff]  ;;  %v20462_v46 = vld [vmem:[#allocation75_spill] sm:$0xff] }
 0x2bf   : > { %20458 = vst [vmem:[#allocation217_spill] sm:$0xff] %v16986_v48  ;;  %12838 = vmatmul.mubr.msk.bf16.gmra.mrb[40].mxu1 %vm4855_vm8, %v4828_v10  ;;  %v5289_v60 = vrot.slane %v5287_v59, 1  ;;  %v16994_v11 = vmul.f32 %v16961_v57, %v16497_v43  ;;  %v6530_v39 = vmul.f32 %v4710_v8, %v20460_v45  ;;  %v6531_v9 = vmul.f32 %v4712_v21, %v20461_v19 }
 0x2c0   : > { %12841 = vmatprep.mubr.msk.bf16.mxu1 %vm4855_vm8, %v4829_v2  ;;  %v5297_v0 = vrot.slane %v5295_v13, 1  ;;  %v5708_v55 = vrot.slane %v5667_v62, 1  ;;  %v16998_v50 = vrot.slane %v5668_v1, 1  ;;  %v6532_v4 = vmul.f32 %v4714_v61, %v20462_v46  ;;  %v20466_v46 = vld [vmem:[#allocation119_spill] sm:$0xff] }
 0x2c1   : > { %20459 = vst [vmem:[#allocation218_spill] sm:$0xff] %v16994_v11  ;;  %v17002_v10 = vsel %vm1361_vm2, %v5285_v44, %v5289_v60  ;;  %v5293_v59 = vor.u32 %v5291_v15, %v5289_v60  ;;  %v6559_v1 = vpack.c.bf16 %v6531_v9, %v6530_v39  ;;  %v20463_v44 = vld [vmem:[#allocation76_spill] sm:$0xff]  ;;  %v20464_v15 = vld [vmem:[#allocation118_spill] sm:$0xff]  ;;  %v17024_v19 = vmul.f32 %v4712_v21, %v20466_v46 }
 0x2c2   : > { %v17009_v45 = vsel %vm1999_vm7, %v16873_v18, %v5708_v55  ;;  %v17013_v2 = vsel %vm1999_vm7, %v5708_v55, %v16998_v50  ;;  %v6533_v60 = vmul.f32 %v16961_v57, %v20463_v44  ;;  %v17021_v28 = vmul.f32 %v4710_v8, %v20464_v15  ;;  %v20470_v55 = vld [vmem:[#allocation7_spill] sm:$0xff]  ;;  %v20472_v15 = vld [vmem:[#allocation142_spill] sm:$0xff] }
 0x2c3   : > { %v12807_v62 = vpop.f32.mrb[12].mxu0  ;;  %v17016_v13 = vsel %vm1361_vm2, %v5293_v59, %v5297_v0  ;;  %20467 = vst [vmem:[#allocation220_spill] sm:$0xff] %v17024_v19  ;;  %v6601_v43 = vrot.slane %v6559_v1, 1  ;;  %v17027_v54 = vmul.f32 %v4714_v61, %v20468_v49  ;;  %v17031_v39 = vmul.f32 %v16961_v57, %v20470_v55 }
 0x2c4   : > { %20465 = vst [vmem:[#allocation219_spill] sm:$0xff] %v17021_v28  ;;  %v4519_v18 = vpop.f32.mrb[13].mxu0  ;;  %v7482_v9 = vrot.slane %v7444_v25, 1  ;;  %v6560_v22 = vpack.c.bf16 %v6533_v60, %v6532_v4  ;;  %v7417_v36 = vmul.f32 %v4710_v8, %v20472_v15  ;;  %v7418_v46 = vmul.f32 %v4712_v21, %v20473_v5 }
 0x2c5   : > { %20469 = vst [vmem:[#allocation221_spill] sm:$0xff] %v17027_v54  ;;  %20471 = vst [vmem:[#allocation222_spill] sm:$0xff] %v17031_v39  ;;  %v12808_v59 = vpop.f32.mrb[14].mxu0  ;;  %v17039_v1 = vsel %vm1999_vm7, %v16930_v38, %v6601_v43  ;;  %v7419_v4 = vmul.f32 %v4714_v61, %v16429_v16  ;;  %v7420_v5 = vmul.f32 %v16961_v57, %v16437_v33  ;;  %v20485_v16 = vld [vmem:[#allocation133_spill] sm:$0xff]  ;;  %v20503_v39 = vld [vmem:[#allocation154_spill] sm:$0xff] }
 0x2c6   : > { %v12637_v23 = vpop.f32.mrb[12].mxu1  ;;  %v4522_v53 = vpop.f32.mrb[15].mxu0  ;;  %20474 = vst [vmem:[#allocation223_spill] sm:$0xff] %v17039_v1  ;;  %v17045_v25 = vsel %vm1999_vm7, %v16947_v63, %v7482_v9  ;;  %v17048_v8 = vrot.slane %v6560_v22, 1  ;;  %v7445_v21 = vpack.c.bf16 %v7418_v46, %v7417_v36 }
 0x2c7   : > { %20475 = vst [vmem:[#allocation224_spill] sm:$0xff] %v17045_v25  ;;  %v13553_v60 = vadd.f32 %v12807_v62, %v12637_v23  ;;  %v2588_v44 = vpop.f32.mrb[13].mxu1  ;;  %v7446_v23 = vpack.c.bf16 %v7420_v5, %v7419_v4  ;;  %v20481_v4 = vld [vmem:[#allocation8_spill] sm:$0xff] }
 0x2c8   : > { %v13554_v15 = vadd.f32 %v4519_v18, %v2588_v44  ;;  %v12638_v38 = vpop.f32.mrb[14].mxu1  ;;  %v17054_v55 = vsel %vm1999_vm7, %v6601_v43, %v17048_v8  ;;  %v7484_v63 = vrot.slane %v7445_v21, 1 }
 0x2c9   : > { %v4644_v49 = vmax.f32 %v13553_v60, 0.0  ;;  %v13555_v28 = vadd.f32 %v12808_v59, %v12638_v38  ;;  %v2591_v19 = vpop.f32.mrb[15].mxu1  ;;  %20476 = vst [vmem:[#allocation225_spill] sm:$0xff] %v17054_v55  ;;  %v17059_v57 = vrot.slane %v7446_v23, 1  ;;  %v5299_v59 = vshrl.u32 %v16975_v14, 16 }
 0x2ca   : > { %v4642_v25 = vmax.f32 %v13554_v15, 0.0  ;;  %v13556_v61 = vadd.f32 %v4522_v53, %v2591_v19  ;;  %v17057_v22 = vsel %vm1999_vm7, %v7482_v9, %v7484_v63  ;;  %v20479_v19 = vld [vmem:[#allocation55_spill] sm:$0xff]  ;;  %v20480_v9 = vld [vmem:[#allocation132_spill] sm:$0xff] }
 0x2cb   : > { %v4645_v62 = vmax.f32 %v13555_v28, 0.0  ;;  %20477 = vst [vmem:[#allocation226_spill] sm:$0xff] %v17057_v22  ;;  %v4721_v44 = vrot.slane %v4644_v49, 7  ;;  %v17068_v5 = vsel %vm1999_vm7, %v7484_v63, %v17059_v57  ;;  %v5301_v15 = vor.u32 %v5299_v59, %v5297_v0  ;;  %v20484_v63 = vld [vmem:[#allocation9_spill] sm:$0xff]  ;;  %v20486_v0 = vld [vmem:[#allocation94_spill] sm:$0xff] }
 0x2cc   : > { %v4717_v36 = vrot.slane %v4642_v25, 7  ;;  %v4643_v46 = vmax.f32 %v13556_v61, 0.0  ;;  %20478 = vst [vmem:[#allocation227_spill] sm:$0xff] %v17068_v5  ;;  %v20483_v61 = vld [vmem:[#allocation54_spill] sm:$0xff] }
 0x2cd   : > { %v17061_v18 = vrot.slane %v4645_v62, 7 }
 0x2ce   : > { %v4718_v43 = vsel %vm516_vm1, %v16949_v34, %v4717_v36  ;;  %v4719_v60 = vrot.slane %v4643_v46, 7  ;;  %v20482_v34 = vld [vmem:[#allocation134_spill] sm:$0xff] }
 0x2cf   : > { %v4724_v53 = vsel %vm516_vm1, %v4721_v44, %v17061_v18  ;;  %v4806_v28 = vmul.f32 %v4718_v43, %v20479_v19  ;;  %v5644_v49 = vmul.f32 %v4718_v43, %v20480_v9  ;;  %v17085_v9 = vmul.f32 %v4718_v43, %v16525_v30 }
 0x2d0   : > { %v4720_v25 = vsel %vm516_vm1, %v4717_v36, %v4719_v60  ;;  %v4722_v14 = vsel %vm516_vm1, %v4719_v60, %v4721_v44  ;;  %v4809_v21 = vmul.f32 %v4724_v53, %v20481_v4  ;;  %v5647_v38 = vmul.f32 %v4724_v53, %v20482_v34 }
 0x2d1   : > { %v4807_v23 = vmul.f32 %v4720_v25, %v20483_v61  ;;  %v4808_v62 = vmul.f32 %v4722_v14, %v20484_v63  ;;  %v5239_v46 = vpack.c.bf16 %v4720_v25, %v4718_v43  ;;  %v17080_v33 = vpack.c.bf16 %v4724_v53, %v4722_v14  ;;  %20487 = vst [vmem:[#allocation228_spill] sm:$0xff] %v17085_v9 }
 0x2d2   : > { %v5645_v19 = vmul.f32 %v4720_v25, %v20485_v16  ;;  %v5646_v59 = vmul.f32 %v4722_v14, %v20486_v0  ;;  %v17088_v36 = vmul.f32 %v4720_v25, %v16538_v31  ;;  %v17091_v4 = vmul.f32 %v4722_v14, %v16546_v47  ;;  %v20492_v47 = vld [vmem:[#allocation79_spill] sm:$0xff] }
 0x2d3   : > { %v4830_v44 = vpack.c.bf16 %v4807_v23, %v4806_v28  ;;  %v4831_v60 = vpack.c.bf16 %v4809_v21, %v4808_v62  ;;  %v5303_v34 = vshll.u32 %v5239_v46, 16  ;;  %v5307_v63 = vshrl.u32 %v5239_v46, 16  ;;  %v20491_v28 = vld [vmem:[#allocation78_spill] sm:$0xff] }
 0x2d4   : > { %20488 = vst [vmem:[#allocation229_spill] sm:$0xff] %v17088_v36  ;;  %20489 = vst [vmem:[#allocation230_spill] sm:$0xff] %v17091_v4  ;;  %v5311_v61 = vshll.u32 %v17080_v33, 16  ;;  %v5669_v5 = vpack.c.bf16 %v5645_v19, %v5644_v49  ;;  %v5670_v22 = vpack.c.bf16 %v5647_v38, %v5646_v59  ;;  %v17098_v31 = vmul.f32 %v4724_v53, %v16542_v12  ;;  %v20493_v59 = vld [vmem:[#allocation81_spill] sm:$0xff]  ;;  %v20499_v12 = vld [vmem:[#allocation10_spill] sm:$0xff] }
 0x2d5   : > { %12842 = vmatmul.mubr.msk.bf16.gmra.mrb[44].mxu1 %vm4855_vm8, %v4830_v44  ;;  %v5305_v0 = vrot.slane %v5303_v34, 1  ;;  %v6534_v21 = vmul.f32 %v4718_v43, %v20491_v28  ;;  %v6535_v19 = vmul.f32 %v4720_v25, %v20492_v47  ;;  %v6536_v44 = vmul.f32 %v4722_v14, %v20493_v59  ;;  %v20497_v38 = vld [vmem:[#allocation121_spill] sm:$0xff] }
 0x2d6   : > { %20490 = vst [vmem:[#allocation231_spill] sm:$0xff] %v17098_v31  ;;  %12845 = vmatprep.mubr.msk.bf16.mxu1 %vm4855_vm8, %v4831_v60  ;;  %v5313_v23 = vrot.slane %v5311_v61, 1  ;;  %v5712_v62 = vrot.slane %v5669_v5, 1  ;;  %v17102_v46 = vrot.slane %v5670_v22, 1  ;;  %v17127_v59 = vmul.f32 %v4720_v25, %v20497_v38 }
 0x2d7   : > { %v17106_v49 = vsel %vm1361_vm2, %v5301_v15, %v5305_v0  ;;  %v5309_v34 = vor.u32 %v5307_v63, %v5305_v0  ;;  %v6561_v22 = vpack.c.bf16 %v6535_v19, %v6534_v21  ;;  %v20494_v15 = vld [vmem:[#allocation82_spill] sm:$0xff]  ;;  %v20495_v0 = vld [vmem:[#allocation120_spill] sm:$0xff]  ;;  %v17130_v16 = vmul.f32 %v4722_v14, %v20499_v12  ;;  %v20505_v12 = vld [vmem:[#allocation155_spill] sm:$0xff] }
 0x2d8   : > { %v17113_v30 = vsel %vm1999_vm7, %v16998_v50, %v5712_v62  ;;  %v17117_v5 = vsel %vm1999_vm7, %v5712_v62, %v17102_v46  ;;  %v6537_v63 = vmul.f32 %v4724_v53, %v20494_v15  ;;  %v17124_v47 = vmul.f32 %v4718_v43, %v20495_v0  ;;  %20498 = vst [vmem:[#allocation233_spill] sm:$0xff] %v17127_v59  ;;  %v20501_v62 = vld [vmem:[#allocation13_spill] sm:$0xff] }
 0x2d9   : > { %v12811_v61 = vpop.f32.mrb[16].mxu0  ;;  %v17120_v60 = vsel %vm1361_vm2, %v5309_v34, %v5313_v23  ;;  %v6605_v50 = vrot.slane %v6561_v22, 1  ;;  %20500 = vst [vmem:[#allocation234_spill] sm:$0xff] %v17130_v16  ;;  %v17133_v54 = vmul.f32 %v4724_v53, %v20501_v62  ;;  %v7421_v21 = vmul.f32 %v4718_v43, %v16470_v41 }
 0x2da   : > { %20496 = vst [vmem:[#allocation232_spill] sm:$0xff] %v17124_v47  ;;  %v4535_v28 = vpop.f32.mrb[17].mxu0  ;;  %v6562_v34 = vpack.c.bf16 %v6537_v63, %v6536_v44  ;;  %v7422_v0 = vmul.f32 %v4720_v25, %v16473_v51  ;;  %v7423_v38 = vmul.f32 %v4722_v14, %v20503_v39  ;;  %v7424_v43 = vmul.f32 %v4724_v53, %v20505_v12 }
 0x2db   : > { %20502 = vst [vmem:[#allocation235_spill] sm:$0xff] %v17133_v54  ;;  %v12812_v19 = vpop.f32.mrb[18].mxu0  ;;  %v17142_v22 = vsel %vm1999_vm7, %v17048_v8, %v6605_v50 }
 0x2dc   : > { %v12641_v55 = vpop.f32.mrb[16].mxu1  ;;  %v4538_v1 = vpop.f32.mrb[19].mxu0  ;;  %20504 = vst [vmem:[#allocation236_spill] sm:$0xff] %v17142_v22  ;;  %v17147_v63 = vrot.slane %v6562_v34, 1  ;;  %v7447_v15 = vpack.c.bf16 %v7422_v0, %v7421_v21  ;;  %v7448_v51 = vpack.c.bf16 %v7424_v43, %v7423_v38  ;;  %v20513_v43 = vld [vmem:[#allocation11_spill] sm:$0xff] }
 0x2dd   : > { %v13557_v41 = vadd.f32 %v12811_v61, %v12641_v55  ;;  %v2604_v44 = vpop.f32.mrb[17].mxu1 }
 0x2de   : > { %v13558_v47 = vadd.f32 %v4535_v28, %v2604_v44  ;;  %v12642_v25 = vpop.f32.mrb[18].mxu1  ;;  %v17151_v8 = vsel %vm1999_vm7, %v6605_v50, %v17147_v63  ;;  %v7488_v22 = vrot.slane %v7447_v15, 1  ;;  %v17153_v16 = vrot.slane %v7448_v51, 1 }
 0x2df   : > { %v4648_v14 = vmax.f32 %v13557_v41, 0.0  ;;  %v13559_v39 = vadd.f32 %v12812_v19, %v12642_v25  ;;  %v2607_v59 = vpop.f32.mrb[19].mxu1  ;;  %20506 = vst [vmem:[#allocation237_spill] sm:$0xff] %v17151_v8  ;;  %v5315_v15 = vshrl.u32 %v17080_v33, 16  ;;  %v20511_v19 = vld [vmem:[#allocation14_spill] sm:$0xff]  ;;  %v20534_v8 = vld [vmem:[#allocation161_spill] sm:$0xff] }
 0x2e0   : > { %v4646_v4 = vmax.f32 %v13558_v47, 0.0  ;;  %v13560_v62 = vadd.f32 %v4538_v1, %v2607_v59  ;;  %v17157_v53 = vsel %vm1999_vm7, %v17059_v57, %v7488_v22  ;;  %v17161_v41 = vsel %vm1999_vm7, %v7488_v22, %v17153_v16  ;;  %v20509_v1 = vld [vmem:[#allocation12_spill] sm:$0xff]  ;;  %v20510_v59 = vld [vmem:[#allocation135_spill] sm:$0xff]  ;;  %v20512_v22 = vld [vmem:[#allocation137_spill] sm:$0xff] }
 0x2e1   : > { %v4649_v55 = vmax.f32 %v13559_v39, 0.0  ;;  %20507 = vst [vmem:[#allocation238_spill] sm:$0xff] %v17157_v53  ;;  %20508 = vst [vmem:[#allocation239_spill] sm:$0xff] %v17161_v41  ;;  %v4729_v38 = vrot.slane %v4648_v14, 7 }
 0x2e2   : > { %v4725_v28 = vrot.slane %v4646_v4, 7  ;;  %v4647_v61 = vmax.f32 %v13560_v62, 0.0  ;;  %v5317_v4 = vor.u32 %v5315_v15, %v5313_v23  ;;  %v20516_v23 = vld [vmem:[#allocation91_spill] sm:$0xff] }
 0x2e3   : > { %v17163_v0 = vrot.slane %v4649_v55, 7 }
 0x2e4   : > { %v4726_v51 = vsel %vm516_vm1, %v17061_v18, %v4725_v28  ;;  %v4727_v47 = vrot.slane %v4647_v61, 7  ;;  %v20514_v18 = vld [vmem:[#allocation15_spill] sm:$0xff]  ;;  %v20515_v61 = vld [vmem:[#allocation136_spill] sm:$0xff] }
 0x2e5   : > { %v4732_v39 = vsel %vm516_vm1, %v4729_v38, %v17163_v0  ;;  %v4810_v57 = vmul.f32 %v4726_v51, %v20509_v1  ;;  %v5648_v50 = vmul.f32 %v4726_v51, %v20510_v59  ;;  %v17183_v59 = vmul.f32 %v4726_v51, %v16569_v26 }
 0x2e6   : > { %v4728_v62 = vsel %vm516_vm1, %v4725_v28, %v4727_v47  ;;  %v4730_v21 = vsel %vm516_vm1, %v4727_v47, %v4729_v38  ;;  %v4813_v34 = vmul.f32 %v4732_v39, %v20511_v19  ;;  %v5651_v33 = vmul.f32 %v4732_v39, %v20512_v22 }
 0x2e7   : > { %v4811_v44 = vmul.f32 %v4728_v62, %v20513_v43  ;;  %v4812_v25 = vmul.f32 %v4730_v21, %v20514_v18  ;;  %v5241_v14 = vpack.c.bf16 %v4728_v62, %v4726_v51  ;;  %v17178_v55 = vpack.c.bf16 %v4732_v39, %v4730_v21  ;;  %20517 = vst [vmem:[#allocation240_spill] sm:$0xff] %v17183_v59 }
 0x2e8   : > { %v5649_v12 = vmul.f32 %v4728_v62, %v20515_v61  ;;  %v5650_v15 = vmul.f32 %v4730_v21, %v20516_v23  ;;  %v17186_v28 = vmul.f32 %v4728_v62, %v16581_v52  ;;  %v17189_v19 = vmul.f32 %v4730_v21, %v16587_v32  ;;  %v20522_v32 = vld [vmem:[#allocation86_spill] sm:$0xff] }
 0x2e9   : > { %v4832_v38 = vpack.c.bf16 %v4811_v44, %v4810_v57  ;;  %v4833_v47 = vpack.c.bf16 %v4813_v34, %v4812_v25  ;;  %v5319_v22 = vshll.u32 %v5241_v14, 16  ;;  %v5323_v18 = vshrl.u32 %v5241_v14, 16  ;;  %v20521_v57 = vld [vmem:[#allocation85_spill] sm:$0xff] }
 0x2ea   : > { %20518 = vst [vmem:[#allocation241_spill] sm:$0xff] %v17186_v28  ;;  %20519 = vst [vmem:[#allocation242_spill] sm:$0xff] %v17189_v19  ;;  %v5327_v43 = vshll.u32 %v17178_v55, 16  ;;  %v5671_v1 = vpack.c.bf16 %v5649_v12, %v5648_v50  ;;  %v5672_v41 = vpack.c.bf16 %v5651_v33, %v5650_v15  ;;  %v17196_v52 = vmul.f32 %v4732_v39, %v16585_v40  ;;  %v20523_v15 = vld [vmem:[#allocation88_spill] sm:$0xff]  ;;  %v20527_v33 = vld [vmem:[#allocation123_spill] sm:$0xff] }
 0x2eb   : > { %12846 = vmatmul.mubr.msk.bf16.gmra.mrb[48].mxu1 %vm4855_vm8, %v4832_v38  ;;  %v5321_v23 = vrot.slane %v5319_v22, 1  ;;  %v6538_v34 = vmul.f32 %v4726_v51, %v20521_v57  ;;  %v6539_v12 = vmul.f32 %v4728_v62, %v20522_v32  ;;  %v6540_v38 = vmul.f32 %v4730_v21, %v20523_v15  ;;  %v20529_v40 = vld [vmem:[#allocation16_spill] sm:$0xff]  ;;  %v20570_v28 = vld [vmem:[#allocation169_spill] sm:$0xff] }
 0x2ec   : > { %20520 = vst [vmem:[#allocation243_spill] sm:$0xff] %v17196_v52  ;;  %12849 = vmatprep.mubr.msk.bf16.mxu1 %vm4855_vm8, %v4833_v47  ;;  %v5329_v44 = vrot.slane %v5327_v43, 1  ;;  %v5716_v25 = vrot.slane %v5671_v1, 1  ;;  %v17200_v14 = vrot.slane %v5672_v41, 1  ;;  %v17225_v15 = vmul.f32 %v4728_v62, %v20527_v33 }
 0x2ed   : > { %v17204_v50 = vsel %vm1361_vm2, %v5317_v4, %v5321_v23  ;;  %v5325_v22 = vor.u32 %v5323_v18, %v5321_v23  ;;  %v6563_v41 = vpack.c.bf16 %v6539_v12, %v6538_v34  ;;  %v20524_v4 = vld [vmem:[#allocation89_spill] sm:$0xff]  ;;  %v20525_v23 = vld [vmem:[#allocation122_spill] sm:$0xff]  ;;  %v17228_v61 = vmul.f32 %v4730_v21, %v20529_v40  ;;  %v20536_v40 = vld [vmem:[#allocation163_spill] sm:$0xff] }
 0x2ee   : > { %v17211_v26 = vsel %vm1999_vm7, %v17102_v46, %v5716_v25  ;;  %v17215_v1 = vsel %vm1999_vm7, %v5716_v25, %v17200_v14  ;;  %v6541_v18 = vmul.f32 %v4732_v39, %v20524_v4  ;;  %v17222_v32 = vmul.f32 %v4726_v51, %v20525_v23  ;;  %20528 = vst [vmem:[#allocation245_spill] sm:$0xff] %v17225_v15  ;;  %v20531_v25 = vld [vmem:[#allocation19_spill] sm:$0xff]  ;;  %v20533_v23 = vld [vmem:[#allocation160_spill] sm:$0xff] }
 0x2ef   : > { %v12815_v43 = vpop.f32.mrb[20].mxu0  ;;  %v17218_v47 = vsel %vm1361_vm2, %v5325_v22, %v5329_v44  ;;  %v6609_v46 = vrot.slane %v6563_v41, 1  ;;  %20530 = vst [vmem:[#allocation246_spill] sm:$0xff] %v17228_v61  ;;  %v17231_v53 = vmul.f32 %v4732_v39, %v20531_v25  ;;  %v7425_v34 = vmul.f32 %v4726_v51, %v16513_v27 }
 0x2f0   : > { %20526 = vst [vmem:[#allocation244_spill] sm:$0xff] %v17222_v32  ;;  %v4551_v57 = vpop.f32.mrb[21].mxu0  ;;  %v6564_v22 = vpack.c.bf16 %v6541_v18, %v6540_v38  ;;  %v7426_v54 = vmul.f32 %v4728_v62, %v20533_v23  ;;  %v7427_v33 = vmul.f32 %v4730_v21, %v20534_v8  ;;  %v7428_v51 = vmul.f32 %v4732_v39, %v20536_v40 }
 0x2f1   : > { %20532 = vst [vmem:[#allocation247_spill] sm:$0xff] %v17231_v53  ;;  %v12816_v12 = vpop.f32.mrb[22].mxu0  ;;  %v17240_v41 = vsel %vm1999_vm7, %v17147_v63, %v6609_v46 }
 0x2f2   : > { %v12645_v19 = vpop.f32.mrb[20].mxu1  ;;  %v4554_v52 = vpop.f32.mrb[23].mxu0  ;;  %20535 = vst [vmem:[#allocation248_spill] sm:$0xff] %v17240_v41  ;;  %v17245_v18 = vrot.slane %v6564_v22, 1  ;;  %v7449_v4 = vpack.c.bf16 %v7426_v54, %v7425_v34  ;;  %v7450_v23 = vpack.c.bf16 %v7428_v51, %v7427_v33  ;;  %v20544_v51 = vld [vmem:[#allocation56_spill] sm:$0xff] }
 0x2f3   : > { %v13561_v27 = vadd.f32 %v12815_v43, %v12645_v19  ;;  %v2620_v38 = vpop.f32.mrb[21].mxu1 }
 0x2f4   : > { %v13562_v32 = vadd.f32 %v4551_v57, %v2620_v38  ;;  %v12646_v62 = vpop.f32.mrb[22].mxu1  ;;  %v17249_v63 = vsel %vm1999_vm7, %v6609_v46, %v17245_v18  ;;  %v7492_v41 = vrot.slane %v7449_v4, 1  ;;  %v17251_v61 = vrot.slane %v7450_v23, 1  ;;  %v20541_v23 = vld [vmem:[#allocation18_spill] sm:$0xff] }
 0x2f5   : > { %v4652_v21 = vmax.f32 %v13561_v27, 0.0  ;;  %v13563_v8 = vadd.f32 %v12816_v12, %v12646_v62  ;;  %v2623_v15 = vpop.f32.mrb[23].mxu1  ;;  %20537 = vst [vmem:[#allocation249_spill] sm:$0xff] %v17249_v63  ;;  %v5331_v4 = vshrl.u32 %v17178_v55, 16  ;;  %v20542_v12 = vld [vmem:[#allocation21_spill] sm:$0xff] }
 0x2f6   : > { %v4650_v59 = vmax.f32 %v13562_v32, 0.0  ;;  %v13564_v25 = vadd.f32 %v4554_v52, %v2623_v15  ;;  %v17255_v19 = vsel %vm1999_vm7, %v17153_v16, %v7492_v41  ;;  %v17259_v27 = vsel %vm1999_vm7, %v7492_v41, %v17251_v61  ;;  %v20540_v16 = vld [vmem:[#allocation57_spill] sm:$0xff]  ;;  %v20543_v41 = vld [vmem:[#allocation138_spill] sm:$0xff] }
 0x2f7   : > { %v4653_v39 = vmax.f32 %v13563_v8, 0.0  ;;  %20538 = vst [vmem:[#allocation250_spill] sm:$0xff] %v17255_v19  ;;  %20539 = vst [vmem:[#allocation251_spill] sm:$0xff] %v17259_v27  ;;  %v4737_v33 = vrot.slane %v4652_v21, 7  ;;  %v20552_v27 = vld [vmem:[#allocation182_spill] sm:$0xff] }
 0x2f8   : > { %v4733_v54 = vrot.slane %v4650_v59, 7  ;;  %v4651_v57 = vmax.f32 %v13564_v25, 0.0  ;;  %v5333_v59 = vor.u32 %v5331_v4, %v5329_v44  ;;  %v20547_v44 = vld [vmem:[#allocation20_spill] sm:$0xff] }
 0x2f9   : > { %v17261_v43 = vrot.slane %v4653_v39, 7 }
 0x2fa   : > { %v4734_v52 = vsel %vm516_vm1, %v17163_v0, %v4733_v54  ;;  %v4735_v32 = vrot.slane %v4651_v57, 7  ;;  %v20545_v0 = vld [vmem:[#allocation58_spill] sm:$0xff]  ;;  %v20546_v57 = vld [vmem:[#allocation17_spill] sm:$0xff] }
 0x2fb   : > { %v4740_v8 = vsel %vm516_vm1, %v4737_v33, %v17261_v43  ;;  %v4814_v15 = vmul.f32 %v4734_v52, %v20540_v16  ;;  %v5652_v46 = vmul.f32 %v4734_v52, %v20541_v23  ;;  %v20548_v23 = vld [vmem:[#allocation178_spill] sm:$0xff] }
 0x2fc   : > { %v4736_v25 = vsel %vm516_vm1, %v4733_v54, %v4735_v32  ;;  %v4738_v34 = vsel %vm516_vm1, %v4735_v32, %v4737_v33  ;;  %v4817_v22 = vmul.f32 %v4740_v8, %v20542_v12  ;;  %v5655_v55 = vmul.f32 %v4740_v8, %v20543_v41  ;;  %v20550_v54 = vld [vmem:[#allocation180_spill] sm:$0xff] }
 0x2fd   : > { %v4815_v38 = vmul.f32 %v4736_v25, %v20544_v51  ;;  %v4816_v62 = vmul.f32 %v4738_v34, %v20545_v0  ;;  %v5243_v21 = vpack.c.bf16 %v4736_v25, %v4734_v52  ;;  %v17276_v39 = vpack.c.bf16 %v4740_v8, %v4738_v34 }
 0x2fe   : > { %v5653_v40 = vmul.f32 %v4736_v25, %v20546_v57  ;;  %v5654_v4 = vmul.f32 %v4738_v34, %v20547_v44  ;;  %v17281_v16 = vmul.f32 %v4734_v52, %v20548_v23  ;;  %v17284_v33 = vmul.f32 %v4736_v25, %v20550_v54  ;;  %v20554_v57 = vld [vmem:[#allocation181_spill] sm:$0xff] }
 0x2ff   : > { %v4834_v32 = vpack.c.bf16 %v4815_v38, %v4814_v15  ;;  %v4835_v12 = vpack.c.bf16 %v4817_v22, %v4816_v62  ;;  %v5335_v41 = vshll.u32 %v5243_v21, 16  ;;  %v17287_v51 = vmul.f32 %v4738_v34, %v20552_v27  ;;  %v20556_v15 = vld [vmem:[#allocation92_spill] sm:$0xff]  ;;  %v20557_v27 = vld [vmem:[#allocation93_spill] sm:$0xff] }
 0x300   : > { %20549 = vst [vmem:[#allocation252_spill] sm:$0xff] %v17281_v16  ;;  %20551 = vst [vmem:[#allocation253_spill] sm:$0xff] %v17284_v33  ;;  %v5339_v0 = vshrl.u32 %v5243_v21, 16  ;;  %v5343_v19 = vshll.u32 %v17276_v39, 16  ;;  %v5673_v53 = vpack.c.bf16 %v5653_v40, %v5652_v46  ;;  %v5674_v63 = vpack.c.bf16 %v5655_v55, %v5654_v4  ;;  %v20558_v4 = vld [vmem:[#allocation95_spill] sm:$0xff]  ;;  %v20562_v55 = vld [vmem:[#allocation125_spill] sm:$0xff] }
 0x301   : > { %20553 = vst [vmem:[#allocation254_spill] sm:$0xff] %v17287_v51  ;;  %12850 = vmatmul.mubr.msk.bf16.gmra.mrb[52].mxu1 %vm4855_vm8, %v4834_v32  ;;  %v5337_v44 = vrot.slane %v5335_v41, 1  ;;  %v17294_v54 = vmul.f32 %v4740_v8, %v20554_v57  ;;  %v6542_v22 = vmul.f32 %v4734_v52, %v20556_v15  ;;  %v6543_v40 = vmul.f32 %v4736_v25, %v20557_v27  ;;  %v20564_v57 = vld [vmem:[#allocation22_spill] sm:$0xff] }
 0x302   : > { %12853 = vmatprep.mubr.msk.bf16.mxu1 %vm4855_vm8, %v4835_v12  ;;  %v5345_v38 = vrot.slane %v5343_v19, 1  ;;  %v5720_v62 = vrot.slane %v5673_v53, 1  ;;  %v17298_v21 = vrot.slane %v5674_v63, 1  ;;  %v6544_v32 = vmul.f32 %v4738_v34, %v20558_v4 }
 0x303   : > { %20555 = vst [vmem:[#allocation255_spill] sm:$0xff] %v17294_v54  ;;  %v17302_v46 = vsel %vm1361_vm2, %v5333_v59, %v5337_v44  ;;  %v5341_v41 = vor.u32 %v5339_v0, %v5337_v44  ;;  %v6565_v63 = vpack.c.bf16 %v6543_v40, %v6542_v22  ;;  %v20559_v59 = vld [vmem:[#allocation96_spill] sm:$0xff]  ;;  %v17323_v4 = vmul.f32 %v4736_v25, %v20562_v55  ;;  %v20568_v22 = vld [vmem:[#allocation167_spill] sm:$0xff] }
 0x304   : > { %v17309_v23 = vsel %vm1999_vm7, %v17200_v14, %v5720_v62  ;;  %v17313_v53 = vsel %vm1999_vm7, %v5720_v62, %v17298_v21  ;;  %v6545_v0 = vmul.f32 %v4740_v8, %v20559_v59  ;;  %v20560_v44 = vld [vmem:[#allocation124_spill] sm:$0xff]  ;;  %v17326_v51 = vmul.f32 %v4738_v34, %v20564_v57  ;;  %v20566_v62 = vld [vmem:[#allocation25_spill] sm:$0xff]  ;;  %v20572_v57 = vld [vmem:[#allocation171_spill] sm:$0xff] }
 0x305   : > { %v12819_v19 = vpop.f32.mrb[24].mxu0  ;;  %v17316_v12 = vsel %vm1361_vm2, %v5341_v41, %v5345_v38  ;;  %v17320_v27 = vmul.f32 %v4734_v52, %v20560_v44  ;;  %20563 = vst [vmem:[#allocation257_spill] sm:$0xff] %v17323_v4  ;;  %v6613_v14 = vrot.slane %v6565_v63, 1  ;;  %v17329_v54 = vmul.f32 %v4740_v8, %v20566_v62  ;;  %v20569_v44 = vld [vmem:[#allocation168_spill] sm:$0xff] }
 0x306   : > { %v4567_v15 = vpop.f32.mrb[25].mxu0  ;;  %20565 = vst [vmem:[#allocation258_spill] sm:$0xff] %v17326_v51  ;;  %v7429_v40 = vmul.f32 %v4734_v52, %v20568_v22  ;;  %v6566_v16 = vpack.c.bf16 %v6545_v0, %v6544_v32  ;;  %v7430_v33 = vmul.f32 %v4736_v25, %v20569_v44  ;;  %v7431_v55 = vmul.f32 %v4738_v34, %v20570_v28 }
 0x307   : > { %20561 = vst [vmem:[#allocation256_spill] sm:$0xff] %v17320_v27  ;;  %20567 = vst [vmem:[#allocation259_spill] sm:$0xff] %v17329_v54  ;;  %v12820_v41 = vpop.f32.mrb[26].mxu0  ;;  %v17338_v63 = vsel %vm1999_vm7, %v17245_v18, %v6613_v14  ;;  %v7432_v52 = vmul.f32 %v4740_v8, %v20572_v57 }
 0x308   : > { %v12649_v31 = vpop.f32.mrb[24].mxu1  ;;  %v4570_v9 = vpop.f32.mrb[27].mxu0  ;;  %20571 = vst [vmem:[#allocation260_spill] sm:$0xff] %v17338_v63  ;;  %v17343_v0 = vrot.slane %v6566_v16, 1  ;;  %v7451_v59 = vpack.c.bf16 %v7430_v33, %v7429_v40  ;;  %v20579_v40 = vld [vmem:[#allocation139_spill] sm:$0xff] }
 0x309   : > { %v13565_v22 = vadd.f32 %v12819_v19, %v12649_v31  ;;  %v2636_v32 = vpop.f32.mrb[25].mxu1  ;;  %v7452_v44 = vpack.c.bf16 %v7432_v52, %v7431_v55 }
 0x30a   : > { %v13566_v27 = vadd.f32 %v4567_v15, %v2636_v32  ;;  %v12650_v25 = vpop.f32.mrb[26].mxu1  ;;  %v17347_v18 = vsel %vm1999_vm7, %v6613_v14, %v17343_v0  ;;  %v7496_v63 = vrot.slane %v7451_v59, 1  ;;  %v5347_v59 = vshrl.u32 %v17276_v39, 16  ;;  %v20581_v32 = vld [vmem:[#allocation62_spill] sm:$0xff] }
 0x30b   : > { %v4656_v34 = vmax.f32 %v13565_v22, 0.0  ;;  %v13567_v28 = vadd.f32 %v12820_v41, %v12650_v25  ;;  %v2639_v4 = vpop.f32.mrb[27].mxu1  ;;  %20573 = vst [vmem:[#allocation261_spill] sm:$0xff] %v17347_v18  ;;  %v17349_v51 = vrot.slane %v7452_v44, 1  ;;  %v20577_v44 = vld [vmem:[#allocation24_spill] sm:$0xff] }
 0x30c   : > { %v4654_v36 = vmax.f32 %v13566_v27, 0.0  ;;  %v13568_v62 = vadd.f32 %v4570_v9, %v2639_v4  ;;  %v17353_v8 = vsel %vm1999_vm7, %v17251_v61, %v7496_v63  ;;  %v5349_v4 = vor.u32 %v5347_v59, %v5345_v38 }
 0x30d   : > { %v4657_v31 = vmax.f32 %v13567_v28, 0.0  ;;  %20574 = vst [vmem:[#allocation262_spill] sm:$0xff] %v17353_v8  ;;  %v17357_v15 = vsel %vm1999_vm7, %v7496_v63, %v17349_v51  ;;  %v4745_v55 = vrot.slane %v4656_v34, 7  ;;  %v20580_v63 = vld [vmem:[#allocation59_spill] sm:$0xff] }
 0x30e   : > { %v4741_v16 = vrot.slane %v4654_v36, 7  ;;  %v4655_v33 = vmax.f32 %v13568_v62, 0.0  ;;  %20575 = vst [vmem:[#allocation263_spill] sm:$0xff] %v17357_v15  ;;  %v20576_v36 = vld [vmem:[#allocation60_spill] sm:$0xff]  ;;  %v20588_v15 = vld [vmem:[#allocation189_spill] sm:$0xff] }
 0x30f   : > { %v17359_v19 = vrot.slane %v4657_v31, 7 }
 0x310   : > { %v17364_v9 = vsel %vm516_vm1, %v17261_v43, %v4741_v16  ;;  %v4743_v28 = vrot.slane %v4655_v33, 7  ;;  %v20578_v43 = vld [vmem:[#allocation61_spill] sm:$0xff] }
 0x311   : > { %v17368_v61 = vsel %vm516_vm1, %v4745_v55, %v17359_v19  ;;  %v4818_v27 = vmul.f32 %v17364_v9, %v20576_v36  ;;  %v5656_v14 = vmul.f32 %v17364_v9, %v20577_v44 }
 0x312   : > { %v17375_v62 = vsel %vm516_vm1, %v4741_v16, %v4743_v28  ;;  %v17378_v39 = vsel %vm516_vm1, %v4743_v28, %v4745_v55  ;;  %v4821_v22 = vmul.f32 %v17368_v61, %v20578_v43  ;;  %v5659_v41 = vmul.f32 %v17368_v61, %v20579_v40  ;;  %v20582_v16 = vld [vmem:[#allocation23_spill] sm:$0xff] }
 0x313   : > { %v4819_v52 = vmul.f32 %v17375_v62, %v20580_v63  ;;  %v4820_v38 = vmul.f32 %v17378_v39, %v20581_v32  ;;  %v5245_v25 = vpack.c.bf16 %v17375_v62, %v17364_v9  ;;  %v17392_v34 = vpack.c.bf16 %v17368_v61, %v17378_v39  ;;  %v20583_v55 = vld [vmem:[#allocation27_spill] sm:$0xff] }
 0x314   : > { %v12823_v31 = vpop.f32.mrb[28].mxu0  ;;  %v5657_v33 = vmul.f32 %v17375_v62, %v20582_v16  ;;  %v5658_v59 = vmul.f32 %v17378_v39, %v20583_v55  ;;  %v20584_v28 = vld [vmem:[#allocation183_spill] sm:$0xff]  ;;  %v17408_v8 = vmul.f32 %v17378_v39, %v20588_v15 }
 0x315   : > { %v17400_v57 = vmul.f32 %v17364_v9, %v20584_v28  ;;  %v20586_v40 = vld [vmem:[#allocation35_spill] sm:$0xff]  ;;  %v4583_v43 = vpop.f32.mrb[29].mxu0  ;;  %v4836_v32 = vpack.c.bf16 %v4819_v52, %v4818_v27  ;;  %v4837_v63 = vpack.c.bf16 %v4821_v22, %v4820_v38  ;;  %v5351_v36 = vshll.u32 %v5245_v25, 16  ;;  %v20590_v27 = vld [vmem:[#allocation186_spill] sm:$0xff] }
 0x316   : > { %v17404_v44 = vmul.f32 %v17375_v62, %v20586_v40  ;;  %20589 = vst [vmem:[#allocation266_spill] sm:$0xff] %v17408_v8  ;;  %v12824_v16 = vpop.f32.mrb[30].mxu0  ;;  %v5355_v54 = vshrl.u32 %v5245_v25, 16  ;;  %v5359_v55 = vshll.u32 %v17392_v34, 16  ;;  %v5675_v18 = vpack.c.bf16 %v5657_v33, %v5656_v14  ;;  %v20592_v52 = vld [vmem:[#allocation99_spill] sm:$0xff]  ;;  %v20594_v40 = vld [vmem:[#allocation102_spill] sm:$0xff] }
 0x317   : > { %20585 = vst [vmem:[#allocation264_spill] sm:$0xff] %v17400_v57  ;;  %v5676_v48 = vpack.c.bf16 %v5659_v41, %v5658_v59  ;;  %v4586_v28 = vpop.f32.mrb[31].mxu0  ;;  %12854 = vmatmul.mubr.msk.bf16.gmra.mrb[56].mxu1 %vm4855_vm8, %v4836_v32  ;;  %v5353_v11 = vrot.slane %v5351_v36, 1  ;;  %v17416_v22 = vmul.f32 %v17368_v61, %v20590_v27  ;;  %v6546_v38 = vmul.f32 %v17364_v9, %v20592_v52  ;;  %v20593_v41 = vld [vmem:[#allocation100_spill] sm:$0xff]  ;;  %v20598_v57 = vld [vmem:[#allocation127_spill] sm:$0xff] }
 0x318   : > { %20587 = vst [vmem:[#allocation265_spill] sm:$0xff] %v17404_v44  ;;  %12857 = vmatprep.mubr.msk.bf16.mxu1 %vm4855_vm8, %v4837_v63  ;;  %v5361_v25 = vrot.slane %v5359_v55, 1  ;;  %v5724_v15 = vrot.slane %v5675_v18, 1  ;;  %v6547_v32 = vmul.f32 %v17375_v62, %v20593_v41  ;;  %v6548_v27 = vmul.f32 %v17378_v39, %v20594_v40  ;;  %v20596_v41 = vld [vmem:[#allocation126_spill] sm:$0xff] }
 0x319   : > { %20591 = vst [vmem:[#allocation267_spill] sm:$0xff] %v17416_v22  ;;  %v17421_v14 = vrot.slane %v5676_v48, 1  ;;  %v17426_v36 = vsel %vm1361_vm2, %v5349_v4, %v5353_v11  ;;  %v5357_v33 = vor.u32 %v5355_v54, %v5353_v11  ;;  %v20595_v54 = vld [vmem:[#allocation103_spill] sm:$0xff]  ;;  %v17447_v40 = vmul.f32 %v17364_v9, %v20596_v41 }
 0x31a   : > { %v12653_v52 = vpop.f32.mrb[28].mxu1  ;;  %v17434_v63 = vsel %vm1999_vm7, %v17298_v21, %v5724_v15  ;;  %v6567_v18 = vpack.c.bf16 %v6547_v32, %v6546_v38  ;;  %v6549_v59 = vmul.f32 %v17368_v61, %v20595_v54  ;;  %v20600_v38 = vld [vmem:[#allocation28_spill] sm:$0xff]  ;;  %v20602_v54 = vld [vmem:[#allocation31_spill] sm:$0xff] }
 0x31b   : > { %v17438_v48 = vsel %vm1999_vm7, %v5724_v15, %v17421_v14  ;;  %v13569_v55 = vadd.f32 %v12823_v31, %v12653_v52  ;;  %v2652_v4 = vpop.f32.mrb[29].mxu1  ;;  %v17441_v11 = vsel %vm1361_vm2, %v5357_v33, %v5361_v25  ;;  %20597 = vst [vmem:[#allocation268_spill] sm:$0xff] %v17447_v40  ;;  %v17451_v15 = vmul.f32 %v17375_v62, %v20598_v57 }
 0x31c   : > { %v13570_v8 = vadd.f32 %v4583_v43, %v2652_v4  ;;  %v12654_v21 = vpop.f32.mrb[30].mxu1  ;;  %v6617_v22 = vrot.slane %v6567_v18, 1  ;;  %v17455_v31 = vmul.f32 %v17378_v39, %v20600_v38  ;;  %v6568_v44 = vpack.c.bf16 %v6549_v59, %v6548_v27 }
 0x31d   : > { %20599 = vst [vmem:[#allocation269_spill] sm:$0xff] %v17451_v15  ;;  %v4660_v52 = vmax.f32 %v13569_v55, 0.0  ;;  %v13571_v32 = vadd.f32 %v12824_v16, %v12654_v21  ;;  %v2655_v33 = vpop.f32.mrb[31].mxu1  ;;  %v17459_v24 = vmul.f32 %v17368_v61, %v20602_v54  ;;  %v5363_v38 = vshrl.u32 %v17392_v34, 16  ;;  %v20605_v21 = vld [vmem:[#allocation175_spill] sm:$0xff]  ;;  %v20616_v54 = vld [vmem:[#allocation29_spill] sm:$0xff] }
 0x31e   : > { %20601 = vst [vmem:[#allocation270_spill] sm:$0xff] %v17455_v31  ;;  %v4658_v41 = vmax.f32 %v13570_v8, 0.0  ;;  %v13572_v43 = vadd.f32 %v4586_v28, %v2655_v33  ;;  %v17463_v18 = vsel %vm1999_vm7, %v17343_v0, %v6617_v22  ;;  %v17468_v55 = vrot.slane %v6568_v44, 1  ;;  %v20606_v28 = vld [vmem:[#allocation176_spill] sm:$0xff] }
 0x31f   : > { %20603 = vst [vmem:[#allocation271_spill] sm:$0xff] %v17459_v24  ;;  %20604 = vst [vmem:[#allocation272_spill] sm:$0xff] %v17463_v18  ;;  %v4661_v57 = vmax.f32 %v13571_v32, 0.0  ;;  %v17474_v8 = vmul.f32 %v17364_v9, %v20605_v21  ;;  %v17478_v0 = vmul.f32 %v17375_v62, %v20606_v28  ;;  %v4753_v33 = vrot.slane %v4660_v52, 7  ;;  %v20615_v28 = vld [vmem:[#allocation63_spill] sm:$0xff] }
 0x320   : > { %v4749_v27 = vrot.slane %v4658_v41, 7  ;;  %v4659_v59 = vmax.f32 %v13572_v43, 0.0  ;;  %v5365_v32 = vor.u32 %v5363_v38, %v5361_v25  ;;  %v17482_v44 = vsel %vm1999_vm7, %v6617_v22, %v17468_v55  ;;  %v20608_v43 = vld [vmem:[#allocation177_spill] sm:$0xff]  ;;  %v20610_v22 = vld [vmem:[#allocation64_spill] sm:$0xff]  ;;  %v20611_v38 = vld [vmem:[#allocation179_spill] sm:$0xff] }
 0x321   : > { %v4755_v4 = vrot.slane %v4661_v57, 7  ;;  %20607 = vst [vmem:[#allocation273_spill] sm:$0xff] %v17482_v44  ;;  %v17492_v16 = vmul.f32 %v17378_v39, %v20608_v43  ;;  %v20612_v52 = vmov 0.0   ;;  %v20614_v43 = vld [vmem:[#allocation30_spill] sm:$0xff] }
 0x322   : > { %v17486_v34 = vsel %vm516_vm1, %v17359_v19, %v4749_v27  ;;  %v4751_v41 = vrot.slane %v4659_v59, 7  ;;  %v17504_v19 = vmul.f32 %v17368_v61, %v20611_v38 }
 0x323   : > { %v17495_v62 = vsel %vm516_vm1, %v4753_v33, %v4755_v4  ;;  %v17498_v57 = vsel %vm516_vm1, %v4755_v4, 0.0  ;;  %v4822_v25 = vmul.f32 %v17486_v34, %v20610_v22  ;;  %v5660_v4 = vmul.f32 %v17486_v34, %v20614_v43  ;;  %v20620_v43 = vld [vmem:[#allocation194_spill] sm:$0xff] }
 0x324   : > { %20609 = vst [vmem:[#allocation274_spill] sm:$0xff] %v17498_v57  ;;  %v17508_v59 = vpack.c.bf16 %v20612_v52, %v17498_v57  ;;  %v17511_v39 = vsel %vm516_vm1, %v4749_v27, %v4751_v41  ;;  %v17514_v9 = vsel %vm516_vm1, %v4751_v41, %v4753_v33  ;;  %v20617_v27 = vld [vmem:[#allocation101_spill] sm:$0xff]  ;;  %v20618_v33 = vld [vmem:[#allocation192_spill] sm:$0xff] }
 0x325   : > { %v4823_v21 = vmul.f32 %v17511_v39, %v20615_v28  ;;  %v5247_v61 = vpack.c.bf16 %v17511_v39, %v17486_v34  ;;  %v5248_v38 = vpack.c.bf16 %v17514_v9, %v17514_v9  ;;  %v5661_v52 = vmul.f32 %v17511_v39, %v20616_v54  ;;  %v20622_v28 = vld [vmem:[#allocation195_spill] sm:$0xff] }
 0x326   : > { %20613 = vst [vmem:[#allocation275_spill] sm:$0xff] %v17508_v59  ;;  %v5662_v22 = vmul.f32 %v17514_v9, %v20617_v27  ;;  %v17530_v41 = vmul.f32 %v17486_v34, %v20618_v33  ;;  %v17534_v31 = vmul.f32 %v17511_v39, %v20620_v43  ;;  %v17538_v24 = vmul.f32 %v17514_v9, %v20622_v28 }
 0x327   : > { %v4838_v40 = vpack.c.bf16 %v4823_v21, %v4822_v25  ;;  %v5367_v15 = vshll.u32 %v5247_v61, 16  ;;  %v5371_v44 = vshrl.u32 %v5247_v61, 16  ;;  %v5375_v18 = vshll.u32 %v5248_v38, 16 }
 0x328   : > { %20619 = vst [vmem:[#allocation276_spill] sm:$0xff] %v17530_v41  ;;  %20621 = vst [vmem:[#allocation277_spill] sm:$0xff] %v17534_v31  ;;  %v5677_v54 = vpack.c.bf16 %v5661_v52, %v5660_v4  ;;  %v5678_v56 = vpack.c.bf16 %v5662_v22, %v5662_v22  ;;  %v17544_v33 = vmul.f32 %v17495_v62, %v20624_v58  ;;  %v14553_v22 = vld [vmem:[%s19528_s0] sm:$0xff]   ;;  %v20633_v31 = vld [vmem:[#allocation33_spill] sm:$0xff] }
 0x329   : > { %20623 = vst [vmem:[#allocation278_spill] sm:$0xff] %v17538_v24  ;;  %12858 = vmatmul.mubr.msk.bf16.gmra.mrb[60].mxu1 %vm4855_vm8, %v4838_v40  ;;  %v5369_v43 = vrot.slane %v5367_v15, 1  ;;  %v5377_v37 = vrot.slane %v5375_v18, 1  ;;  %v6291_v28 = vpack.c.bf16 %v17495_v62, %v17514_v9  ;;  %v6292_v21 = vpack.c.bf16 %v17498_v57, %v17498_v57  ;;  %v20626_v40 = vld [vmem:[#allocation107_spill] sm:$0xff]  ;;  %v20631_v41 = vld [vmem:[#allocation110_spill] sm:$0xff] }
 0x32a   : > { %20625 = vst [vmem:[#allocation279_spill] sm:$0xff] %v17544_v33  ;;  %12863 = vmatprep.mubr.msk.bf16.mxu1 %vm1125_vm6, %v14553_v22  ;;  %v5728_v25 = vrot.slane %v5677_v54, 1  ;;  %v5730_v38 = vrot.slane %v5678_v56, 1  ;;  %v6550_v15 = vmul.f32 %v17486_v34, %v20626_v40  ;;  %v20628_v54 = vld [vmem:[#allocation108_spill] sm:$0xff] }
 0x32b   : > { %v17560_v18 = vsel %vm1361_vm2, %v5365_v32, %v5369_v43  ;;  %v5373_v4 = vor.u32 %v5371_v44, %v5369_v43  ;;  %v6299_v61 = vshll.u32 %v6291_v28, 16  ;;  %v6303_v27 = vshrl.u32 %v6291_v28, 16  ;;  %v20629_v32 = vld [vmem:[#allocation4_spill] sm:$0xff]  ;;  %v20630_v43 = vld [vmem:[#allocation111_spill] sm:$0xff] }
 0x32c   : > { %v17564_v58 = vsel %vm1999_vm7, %v17421_v14, %v5728_v25  ;;  %v17567_v22 = vsel %vm1999_vm7, %v5728_v25, %v5730_v38  ;;  %v6307_v56 = vshll.u32 %v6292_v21, 16  ;;  %v6551_v52 = vmul.f32 %v17511_v39, %v20628_v54  ;;  %v20632_v38 = vld [vmem:[#allocation128_spill] sm:$0xff] }
 0x32d   : > { %20627 = vst [vmem:[#allocation280_spill] sm:$0xff] %v17567_v22  ;;  %v17572_v24 = vsel %vm1361_vm2, %v5373_v4, %v5377_v37  ;;  %v6301_v40 = vrot.slane %v6299_v61, 1  ;;  %v6552_v44 = vmul.f32 %v17514_v9, %v20629_v32  ;;  %v6553_v28 = vmul.f32 %v17495_v62, %v20630_v43  ;;  %v14480_v37 = vld [vmem:[%s19534_s6 + $0x18] sm:$0xff]   ;;  %v20636_v22 = vld [vmem:[#allocation190_spill] sm:$0xff] }
 0x32e   : > { %v6309_v33 = vrot.slane %v6307_v56, 1  ;;  %v6569_v14 = vpack.c.bf16 %v6551_v52, %v6550_v15  ;;  %v6554_v25 = vmul.f32 %v17498_v57, %v20631_v41  ;;  %v17582_v21 = vmul.f32 %v17486_v34, %v20632_v38  ;;  %v20634_v41 = vld [vmem:[#allocation129_spill] sm:$0xff]  ;;  %v20635_v38 = vld [vmem:[#allocation80_spill] sm:$0xff] }
 0x32f   : > { %v17588_v61 = vsel %vm1361_vm2, %v5373_v4, %v6301_v40  ;;  %v6305_v54 = vor.u32 %v6303_v27, %v6301_v40  ;;  %v6570_v32 = vpack.c.bf16 %v6553_v28, %v6552_v44  ;;  %v17592_v56 = vmul.f32 %v17511_v39, %v20633_v31  ;;  %v14554_v27 = vld [vmem:[%s19528_s0 + $0x8] sm:$0xff]   ;;  %v20638_v31 = vld [vmem:[#allocation184_spill] sm:$0xff] }
 0x330   : > { %v6621_v52 = vrot.slane %v6569_v14, 1  ;;  %v6571_v15 = vpack.c.bf16 %v6554_v25, %v6554_v25  ;;  %v17596_v43 = vmul.f32 %v17514_v9, %v20634_v41  ;;  %v17600_v20 = vmul.f32 %v17495_v62, %v20635_v38  ;;  %v14555_v14 = vld [vmem:[%s19534_s6 + $0x10] sm:$0xff]  }
 0x331   : > { %v7441_v4 = vmul.f32 %v17498_v57, %v20636_v22  ;;  %12864 = vmatmul.mubr.msk.bf16.vlgmr.msra.gmra.mrb[32].mxu1 %vm1125_vm6, %v14554_v27  ;;  %v17609_v40 = vsel %vm1361_vm2, %v6305_v54, %v6309_v33  ;;  %v6623_v44 = vrot.slane %v6570_v32, 1  ;;  %v14556_v25 = vld [vmem:[%s19528_s0 + $0x10] sm:$0xff]   ;;  %v7192_v28 = vshll.u32 %v17508_v59, 16 }
 0x332   : > { %12896 = vmatpush3.bf16.msra.mxu1 %v14555_v14  ;;  %12867 = vmatprep.mubr.msk.bf16.mxu1 %vm1125_vm6, %v14556_v25  ;;  %v17622_v27 = vsel %vm1999_vm7, %v17468_v55, %v6621_v52  ;;  %v6625_v33 = vrot.slane %v6571_v15, 1  ;;  %v14481_v14 = vld [vmem:[%s19534_s6 + $0x20] sm:$0xff]   ;;  %v20637_v25 = vpack.c.bf16 %v17478_v0, %v17474_v8  ;;  %v7454_v32 = vpack.c.bf16 %v17504_v19, %v17492_v16  ;;  %v20640_v8 = vld [vmem:[#allocation187_spill] sm:$0xff] }
 0x333   : > { %12897 = vmatprep.subr.bf16.mxu1 %v14480_v37  ;;  %v17631_v38 = vsel %vm1999_vm7, %v6621_v52, %v6623_v44  ;;  %v17639_v15 = vrot.slane %v7192_v28, 1  ;;  %v7437_v22 = vmul.f32 %v17486_v34, %v20638_v31  ;;  %v20639_v52 = vld [vmem:[#allocation185_spill] sm:$0xff]  ;;  %v7439_v0 = vmul.f32 %v17514_v9, %v20640_v8  ;;  %v20642_v34 = vld [vmem:[#allocation191_spill] sm:$0xff] }
 0x334   : > { %v7500_v41 = vrot.slane %v20637_v25, 1  ;;  %v17637_v55 = vsel %vm1999_vm7, %v6623_v44, %v6625_v33  ;;  %v7438_v57 = vmul.f32 %v17511_v39, %v20639_v52  ;;  %v20641_v44 = vld [vmem:[#allocation188_spill] sm:$0xff]  ;;  %v7502_v19 = vrot.slane %v7454_v32, 1  ;;  %v14557_v9 = vld [vmem:[%s19528_s0 + $0x18] sm:$0xff]  }
 0x335   : > { %v7440_v28 = vmul.f32 %v17495_v62, %v20641_v44  ;;  %v17657_v16 = vsel %vm1361_vm2, %v6305_v54, %v17639_v15  ;;  %v7457_v33 = vpack.c.bf16 %v20642_v34, %v7441_v4  ;;  %v14559_v4 = vld [vmem:[%s19528_s0 + $0x28] sm:$0xff]   ;;  %v14560_v32 = vld [vmem:[%s19528_s0 + $0x30] sm:$0xff]  }
 0x336   : > { %v17647_v59 = vsel %vm1999_vm7, %v17349_v51, %v7500_v41  ;;  %12898 = vmatpush3.bf16.msra.mxu1 %v14480_v37  ;;  %v7455_v51 = vpack.c.bf16 %v7438_v57, %v7437_v22  ;;  %v17661_v31 = vsel %vm1999_vm7, %v7500_v41, %v7502_v19  ;;  %v14558_v37 = vld [vmem:[%s19528_s0 + $0x20] sm:$0xff]  }
 0x337   : > { %12931 = vmatprep.subr.bf16.mxu1 %v14481_v14  ;;  %v7456_v25 = vpack.c.bf16 %v7440_v28, %v7439_v0  ;;  %v17663_v39 = vrot.slane %v7457_v33, 1  ;;  %v14561_v0 = vld [vmem:[%s19528_s0 + $0x38] sm:$0xff]   ;;  %v14562_v28 = vld [vmem:[%s19528_s0 + $0x40] sm:$0xff]   ;;  %v14564_v33 = vld [vmem:[%s19528_s0 + $0x50] sm:$0xff]  }
 0x338   : > { %v7504_v62 = vrot.slane %v7455_v51, 1  ;;  %v14565_v51 = vld [vmem:[%s19528_s0 + $0x58] sm:$0xff]  }
 0x339   : > { %12868 = vmatmul.mubr.msk.bf16.gmra.mrb[36].mxu1 %vm1125_vm6, %v14557_v9  ;;  %v7506_v54 = vrot.slane %v7456_v25, 1  ;;  %v14566_v25 = vld [vmem:[%s19528_s0 + $0x60] sm:$0xff]   ;;  %v14567_v9 = vld [vmem:[%s19528_s0 + $0x68] sm:$0xff]  }
 0x33a   : > { %12871 = vmatprep.mubr.msk.bf16.mxu1 %vm1125_vm6, %v14558_v37  ;;  %v17674_v57 = vsel %vm1999_vm7, %v7502_v19, %v7504_v62  ;;  %v14563_v19 = vld [vmem:[%s19528_s0 + $0x48] sm:$0xff]   ;;  %v20643_v37 = vld [vmem:[#allocation106_spill] sm:$0xff] }
 0x33b   : > { %v17677_v41 = vsel %vm1999_vm7, %v7504_v62, %v7506_v54  ;;  %v17681_v22 = vsel %vm1999_vm7, %v7506_v54, %v17663_v39  ;;  %v14568_v62 = vld [vmem:[%s19528_s0 + $0x70] sm:$0xff]   ;;  %v14569_v54 = vld [vmem:[%s19528_s0 + $0x78] sm:$0xff]  }
 0x341   : > { %12872 = vmatmul.mubr.msk.bf16.gmra.mrb[40].mxu1 %vm1125_vm6, %v14559_v4  ;;  %v5258_v4 = vsel %vm1361_vm2, %v20643_v37, %v16765_v29  ;;  %v20644_v29 = vld [vmem:[#allocation90_spill] sm:$0xff] }
 0x342   : > { %12875 = vmatprep.mubr.msk.bf16.mxu1 %vm1125_vm6, %v14560_v32  ;;  %v14482_v32 = vld [vmem:[%s19534_s6 + $0x28] sm:$0xff]  }
 0x349   : > { %12876 = vmatmul.mubr.msk.bf16.gmra.mrb[44].mxu1 %vm1125_vm6, %v14561_v0  ;;  %v14483_v0 = vld [vmem:[%s19534_s6 + $0x30] sm:$0xff]  }
 0x34a   : > { %12879 = vmatprep.mubr.msk.bf16.mxu1 %vm1125_vm6, %v14562_v28  ;;  %v14484_v28 = vld [vmem:[%s19534_s6 + $0x38] sm:$0xff]  }
 0x351   : > { %12880 = vmatmul.mubr.msk.bf16.gmra.mrb[48].mxu1 %vm1125_vm6, %v14563_v19  ;;  %v20645_v19 = vld [vmem:[#allocation200_spill] sm:$0xff] }
 0x352   : > { %12883 = vmatprep.mubr.msk.bf16.mxu1 %vm1125_vm6, %v14564_v33 }
 0x359   : > { %12884 = vmatmul.mubr.msk.bf16.gmra.mrb[52].mxu1 %vm1125_vm6, %v14565_v51  ;;  %v20659_v51 = vld [vmem:[#allocation216_spill] sm:$0xff] }
 0x35a   : > { %12887 = vmatprep.mubr.msk.bf16.mxu1 %vm1125_vm6, %v14566_v25  ;;  %v20660_v25 = vld [vmem:[#allocation215_spill] sm:$0xff] }
 0x361   : > { %12888 = vmatmul.mubr.msk.bf16.gmra.mrb[56].mxu1 %vm1125_vm6, %v14567_v9  ;;  %v20661_v9 = vpack.c.bf16 %v20659_v51, %v20660_v25  ;;  %v20686_v25 = vld [vmem:[#allocation267_spill] sm:$0xff] }
 0x362   : > { %12891 = vmatprep.mubr.msk.bf16.mxu1 %vm1125_vm6, %v14568_v62  ;;  %v20662_v62 = vld [vmem:[#allocation218_spill] sm:$0xff] }
 0x369   : > { %12892 = vmatmul.mubr.msk.bf16.gmra.mrb[60].mxu1 %vm1125_vm6, %v14569_v54  ;;  %v20663_v54 = vld [vmem:[#allocation217_spill] sm:$0xff] }
 0x36a   : > { %12899 = vmatprep.mubr.msk.bf16.mxu1 %vm4855_vm8, %v5258_v4  ;;  %v20664_v4 = vpack.c.bf16 %v20662_v62, %v20663_v54  ;;  %v20689_v54 = vld [vmem:[#allocation277_spill] sm:$0xff] }
 0x371   : > { %12900 = vmatmul.mubr.msk.bf16.vlgmr.msra.gmra.mrb[32].mxu1 %vm4855_vm8, %v16783_v35 }
 0x372   : > { %12932 = vmatpush3.bf16.msra.mxu1 %v14481_v14  ;;  %12903 = vmatprep.mubr.msk.bf16.mxu1 %vm4855_vm8, %v16877_v17  ;;  %v5701_v14 = vsel %vm1999_vm7, %v20644_v29, %v16768_v6  ;;  %v20646_v6 = vld [vmem:[#allocation280_spill] sm:$0xff] }
 0x373   : > { %12933 = vmatprep.subr.bf16.mxu1 %v14482_v32 }
 0x376   : > { %12934 = vmatpush3.bf16.msra.mxu1 %v14482_v32  ;;  %v20665_v32 = vld [vmem:[#allocation229_spill] sm:$0xff] }
 0x377   : > { %12967 = vmatprep.subr.bf16.mxu1 %v14483_v0 }
 0x379   : > { %12904 = vmatmul.mubr.msk.bf16.gmra.mrb[36].mxu1 %vm4855_vm8, %v16897_v7 }
 0x37a   : > { %12907 = vmatprep.mubr.msk.bf16.mxu1 %vm4855_vm8, %v17002_v10 }
 0x381   : > { %12908 = vmatmul.mubr.msk.bf16.gmra.mrb[40].mxu1 %vm4855_vm8, %v17016_v13 }
 0x382   : > { %12911 = vmatprep.mubr.msk.bf16.mxu1 %vm4855_vm8, %v17106_v49 }
 0x389   : > { %12912 = vmatmul.mubr.msk.bf16.gmra.mrb[44].mxu1 %vm4855_vm8, %v17120_v60 }
 0x38a   : > { %12915 = vmatprep.mubr.msk.bf16.mxu1 %vm4855_vm8, %v17204_v50 }
 0x391   : > { %12916 = vmatmul.mubr.msk.bf16.gmra.mrb[48].mxu1 %vm4855_vm8, %v17218_v47 }
 0x392   : > { %12919 = vmatprep.mubr.msk.bf16.mxu1 %vm4855_vm8, %v17302_v46 }
 0x399   : > { %12920 = vmatmul.mubr.msk.bf16.gmra.mrb[52].mxu1 %vm4855_vm8, %v17316_v12 }
 0x39a   : > { %12923 = vmatprep.mubr.msk.bf16.mxu1 %vm4855_vm8, %v17426_v36 }
 0x3a1   : > { %12924 = vmatmul.mubr.msk.bf16.gmra.mrb[56].mxu1 %vm4855_vm8, %v17441_v11 }
 0x3a2   : > { %12927 = vmatprep.mubr.msk.bf16.mxu1 %vm4855_vm8, %v17560_v18 }
 0x3a9   : > { %12928 = vmatmul.mubr.msk.bf16.gmra.mrb[60].mxu1 %vm4855_vm8, %v17572_v24  ;;  %v14485_v24 = vld [vmem:[%s19534_s6 + $0x40] sm:$0xff]  }
 0x3aa   : > { %12935 = vmatprep.mubr.msk.bf16.mxu1 %vm4855_vm8, %v5701_v14 }
 0x3b1   : > { %12936 = vmatmul.mubr.msk.bf16.vlgmr.msra.gmra.mrb[32].mxu1 %vm4855_vm8, %v20645_v19  ;;  %v20669_v19 = vld [vmem:[#allocation230_spill] sm:$0xff] }
 0x3b2   : > { %12968 = vmatpush3.bf16.msra.mxu1 %v14483_v0  ;;  %12939 = vmatprep.mubr.msk.bf16.mxu1 %vm4855_vm8, %v16889_v3  ;;  %v20666_v0 = vld [vmem:[#allocation228_spill] sm:$0xff] }
 0x3b3   : > { %12969 = vmatprep.subr.bf16.mxu1 %v14484_v28  ;;  %v20667_v14 = vpack.c.bf16 %v20665_v32, %v20666_v0  ;;  %v20692_v0 = vld [vmem:[#allocation279_spill] sm:$0xff] }
 0x3b6   : > { %12970 = vmatpush3.bf16.msra.mxu1 %v14484_v28  ;;  %v20668_v28 = vld [vmem:[#allocation231_spill] sm:$0xff] }
 0x3b7   : > { %13003 = vmatprep.subr.bf16.mxu1 %v14485_v24 }
 0x3b9   : > { %12940 = vmatmul.mubr.msk.bf16.gmra.mrb[36].mxu1 %vm4855_vm8, %v16893_v42  ;;  %v14486_v42 = vld [vmem:[%s19534_s6 + $0x48] sm:$0xff]  }
 0x3ba   : > { %12943 = vmatprep.mubr.msk.bf16.mxu1 %vm4855_vm8, %v17009_v45  ;;  %v20650_v45 = vld [vmem:[#allocation43_spill] sm:$0xff] }
 0x3c1   : > { %12944 = vmatmul.mubr.msk.bf16.gmra.mrb[40].mxu1 %vm4855_vm8, %v17013_v2  ;;  %v20651_v2 = vld [vmem:[#allocation197_spill] sm:$0xff] }
 0x3c2   : > { %12947 = vmatprep.mubr.msk.bf16.mxu1 %vm4855_vm8, %v17113_v30  ;;  %v20647_v30 = vld [vmem:[#allocation198_spill] sm:$0xff] }
 0x3c9   : > { %12948 = vmatmul.mubr.msk.bf16.gmra.mrb[44].mxu1 %vm4855_vm8, %v17117_v5  ;;  %v20652_v5 = vpack.c.bf16 %v20650_v45, %v20651_v2  ;;  %v20677_v2 = vld [vmem:[#allocation253_spill] sm:$0xff] }
 0x3ca   : > { %12951 = vmatprep.mubr.msk.bf16.mxu1 %vm4855_vm8, %v17211_v26  ;;  %v20648_v26 = vld [vmem:[#allocation199_spill] sm:$0xff] }
 0x3cb   : > { %v20649_v3 = vpack.c.bf16 %v20647_v30, %v20648_v26  ;;  %v20672_v30 = vld [vmem:[#allocation240_spill] sm:$0xff] }
 0x3d1   : > { %12952 = vmatmul.mubr.msk.bf16.gmra.mrb[48].mxu1 %vm4855_vm8, %v17215_v1  ;;  %v20653_v1 = vld [vmem:[#allocation205_spill] sm:$0xff] }
 0x3d2   : > { %12955 = vmatprep.mubr.msk.bf16.mxu1 %vm4855_vm8, %v17309_v23 }
 0x3d9   : > { %12956 = vmatmul.mubr.msk.bf16.gmra.mrb[52].mxu1 %vm4855_vm8, %v17313_v53  ;;  %v14487_v53 = vld [vmem:[%s19534_s6 + $0x50] sm:$0xff]  }
 0x3da   : > { %12959 = vmatprep.mubr.msk.bf16.mxu1 %vm4855_vm8, %v17434_v63  ;;  %v20656_v63 = vld [vmem:[#allocation207_spill] sm:$0xff] }
 0x3e1   : > { %12960 = vmatmul.mubr.msk.bf16.gmra.mrb[56].mxu1 %vm4855_vm8, %v17438_v48  ;;  %v20657_v48 = vld [vmem:[#allocation206_spill] sm:$0xff] }
 0x3e2   : > { %12963 = vmatprep.mubr.msk.bf16.mxu1 %vm4855_vm8, %v17564_v58  ;;  %v20654_v58 = vld [vmem:[#allocation204_spill] sm:$0xff]  ;;  %v20658_v33 = vpack.c.bf16 %v20656_v63, %v20657_v48  ;;  %v20683_v48 = vld [vmem:[#allocation265_spill] sm:$0xff] }
 0x3e3   : > { %v20655_v23 = vpack.c.bf16 %v20653_v1, %v20654_v58  ;;  %v20680_v58 = vld [vmem:[#allocation255_spill] sm:$0xff] }
 0x3e9   : > { %12964 = vmatmul.mubr.msk.bf16.gmra.mrb[60].mxu1 %vm4855_vm8, %v20646_v6  ;;  %v20671_v6 = vld [vmem:[#allocation241_spill] sm:$0xff] }
 0x3ea   : > { %12971 = vmatprep.mubr.msk.bf16.mxu1 %vm4855_vm8, %v20649_v3  ;;  %v20673_v26 = vpack.c.bf16 %v20671_v6, %v20672_v30  ;;  %v20674_v3 = vld [vmem:[#allocation243_spill] sm:$0xff]  ;;  %v20696_v6 = vld [vmem:[#allocation212_spill] sm:$0xff]  ;;  %v20697_v30 = vld [vmem:[#allocation213_spill] sm:$0xff] }
 0x3f1   : > { %12972 = vmatmul.mubr.msk.bf16.vlgmr.msra.gmra.mrb[32].mxu1 %vm4855_vm8, %v20652_v5  ;;  %v20678_v5 = vld [vmem:[#allocation252_spill] sm:$0xff] }
 0x3f2   : > { %13004 = vmatpush3.bf16.msra.mxu1 %v14485_v24  ;;  %12975 = vmatprep.mubr.msk.bf16.mxu1 %vm4855_vm8, %v20655_v23  ;;  %v20670_v24 = vpack.c.bf16 %v20668_v28, %v20669_v19  ;;  %v20679_v1 = vpack.c.bf16 %v20677_v2, %v20678_v5  ;;  %v20681_v23 = vld [vmem:[#allocation254_spill] sm:$0xff]  ;;  %v14488_v19 = vld [vmem:[%s19534_s6 + $0x58] sm:$0xff]   ;;  %v20702_v2 = vld [vmem:[#allocation248_spill] sm:$0xff] }
 0x3f3   : > { %13005 = vmatprep.subr.bf16.mxu1 %v14486_v42  ;;  %v20682_v63 = vpack.c.bf16 %v20680_v58, %v20681_v23  ;;  %v20703_v5 = vld [vmem:[#allocation249_spill] sm:$0xff]  ;;  %v20706_v23 = vld [vmem:[#allocation272_spill] sm:$0xff] }
 0x3f4   : > { %v20705_v58 = vld [vmem:[#allocation261_spill] sm:$0xff] }
 0x3f6   : > { %13006 = vmatpush3.bf16.msra.mxu1 %v14486_v42  ;;  %v20675_v42 = vld [vmem:[#allocation242_spill] sm:$0xff] }
 0x3f7   : > { %13039 = vmatprep.subr.bf16.mxu1 %v14487_v53  ;;  %v20676_v45 = vpack.c.bf16 %v20674_v3, %v20675_v42  ;;  %v20699_v3 = vld [vmem:[#allocation225_spill] sm:$0xff]  ;;  %v20700_v42 = vld [vmem:[#allocation236_spill] sm:$0xff] }
 0x3f9   : > { %12976 = vmatmul.mubr.msk.bf16.gmra.mrb[36].mxu1 %vm4855_vm8, %v20658_v33  ;;  %v20684_v33 = vld [vmem:[#allocation264_spill] sm:$0xff] }
 0x3fa   : > { %12979 = vmatprep.mubr.msk.bf16.mxu1 %vm4855_vm8, %v20661_v9  ;;  %v20685_v51 = vpack.c.bf16 %v20683_v48, %v20684_v33  ;;  %v20687_v9 = vld [vmem:[#allocation266_spill] sm:$0xff]  ;;  %v20709_v33 = vld [vmem:[#allocation201_spill] sm:$0xff] }
 0x3fb   : > { %v20688_v62 = vpack.c.bf16 %v20686_v25, %v20687_v9  ;;  %v20708_v48 = vld [vmem:[#allocation202_spill] sm:$0xff]  ;;  %v14492_v25 = vld [vmem:[%s19534_s6 + $0x78] sm:$0xff]   ;;  %v20711_v9 = vld [vmem:[#allocation203_spill] sm:$0xff] }
 0x401   : > { %12980 = vmatmul.mubr.msk.bf16.gmra.mrb[40].mxu1 %vm4855_vm8, %v20664_v4  ;;  %v20690_v4 = vld [vmem:[#allocation276_spill] sm:$0xff] }
 0x402   : > { %12983 = vmatprep.mubr.msk.bf16.mxu1 %vm4855_vm8, %v20667_v14  ;;  %v20691_v32 = vpack.c.bf16 %v20689_v54, %v20690_v4  ;;  %v20693_v14 = vld [vmem:[#allocation278_spill] sm:$0xff] }
 0x403   : > { %v20694_v28 = vpack.c.bf16 %v20692_v0, %v20693_v14  ;;  %v20718_v0 = vld [vmem:[#allocation219_spill] sm:$0xff] }
 0x409   : > { %12984 = vmatmul.mubr.msk.bf16.gmra.mrb[44].mxu1 %vm4855_vm8, %v20670_v24  ;;  %v14489_v24 = vld [vmem:[%s19534_s6 + $0x60] sm:$0xff]  }
 0x40a   : > { %12987 = vmatprep.mubr.msk.bf16.mxu1 %vm4855_vm8, %v20673_v26  ;;  %v14491_v26 = vld [vmem:[%s19534_s6 + $0x70] sm:$0xff]  }
 0x411   : > { %12988 = vmatmul.mubr.msk.bf16.gmra.mrb[48].mxu1 %vm4855_vm8, %v20676_v45  ;;  %v20701_v45 = vld [vmem:[#allocation237_spill] sm:$0xff] }
 0x412   : > { %12991 = vmatprep.mubr.msk.bf16.mxu1 %vm4855_vm8, %v20679_v1  ;;  %v20704_v1 = vld [vmem:[#allocation260_spill] sm:$0xff] }
 0x419   : > { %12992 = vmatmul.mubr.msk.bf16.gmra.mrb[52].mxu1 %vm4855_vm8, %v20682_v63  ;;  %v20707_v63 = vld [vmem:[#allocation273_spill] sm:$0xff] }
 0x41a   : > { %12995 = vmatprep.mubr.msk.bf16.mxu1 %vm4855_vm8, %v20685_v51  ;;  %v20710_v51 = vpack.c.bf16 %v20708_v48, %v20709_v33  ;;  %v20738_v48 = vld [vmem:[#allocation259_spill] sm:$0xff]  ;;  %v20739_v33 = vld [vmem:[#allocation258_spill] sm:$0xff] }
 0x421   : > { %12996 = vmatmul.mubr.msk.bf16.gmra.mrb[56].mxu1 %vm4855_vm8, %v20688_v62  ;;  %v20712_v62 = vld [vmem:[#allocation208_spill] sm:$0xff] }
 0x422   : > { %12999 = vmatprep.mubr.msk.bf16.mxu1 %vm4855_vm8, %v20691_v32  ;;  %v20713_v54 = vpack.c.bf16 %v20711_v9, %v20712_v62  ;;  %v20717_v32 = vld [vmem:[#allocation220_spill] sm:$0xff] }
 0x423   : > { %v20719_v14 = vpack.c.bf16 %v20717_v32, %v20718_v0  ;;  %v20742_v9 = vld [vmem:[#allocation268_spill] sm:$0xff]  ;;  %v20748_v32 = vpack.c.bf16 %v17600_v20, %v17596_v43  ;;  %v20749_v0 = vld [vmem:[#allocation26_spill] sm:$0xff]  ;;  %v20752_v20 = vld [vmem:[#allocation275_spill] sm:$0xff] }
 0x424   : > { %v20763_v43 = vld [vmem:[#allocation193_spill] sm:$0xff] }
 0x429   : > { %13000 = vmatmul.mubr.msk.bf16.gmra.mrb[60].mxu1 %vm4855_vm8, %v20694_v28  ;;  %v20720_v28 = vld [vmem:[#allocation222_spill] sm:$0xff] }
 0x42a   : > { %13007 = vmatprep.mubr.msk.bf16.mxu1 %vm4855_vm8, %v16783_v35  ;;  %v20695_v35 = vld [vmem:[#allocation211_spill] sm:$0xff] }
 0x431   : > { %13008 = vmatmul.mubr.msk.bf16.vlgmr.msra.gmra.mrb[32].mxu1 %vm4855_vm8, %v16877_v17 }
 0x432   : > { %13040 = vmatpush3.bf16.msra.mxu1 %v14487_v53  ;;  %13011 = vmatprep.mubr.msk.bf16.mxu1 %vm4855_vm8, %v16897_v7  ;;  %v14490_v53 = vld [vmem:[%s19534_s6 + $0x68] sm:$0xff]  }
 0x433   : > { %13041 = vmatprep.subr.bf16.mxu1 %v14488_v19 }
 0x436   : > { %13042 = vmatpush3.bf16.msra.mxu1 %v14488_v19  ;;  %v20721_v19 = vld [vmem:[#allocation221_spill] sm:$0xff] }
 0x437   : > { %13075 = vmatprep.subr.bf16.mxu1 %v14489_v24 }
 0x439   : > { %13012 = vmatmul.mubr.msk.bf16.gmra.mrb[36].mxu1 %vm4855_vm8, %v17002_v10 }
 0x43a   : > { %13015 = vmatprep.mubr.msk.bf16.mxu1 %vm4855_vm8, %v17016_v13 }
 0x441   : > { %13016 = vmatmul.mubr.msk.bf16.gmra.mrb[40].mxu1 %vm4855_vm8, %v17106_v49 }
 0x442   : > { %13019 = vmatprep.mubr.msk.bf16.mxu1 %vm4855_vm8, %v17120_v60 }
 0x449   : > { %13020 = vmatmul.mubr.msk.bf16.gmra.mrb[44].mxu1 %vm4855_vm8, %v17204_v50 }
 0x44a   : > { %13023 = vmatprep.mubr.msk.bf16.mxu1 %vm4855_vm8, %v17218_v47 }
 0x451   : > { %13024 = vmatmul.mubr.msk.bf16.gmra.mrb[48].mxu1 %vm4855_vm8, %v17302_v46 }
 0x452   : > { %13027 = vmatprep.mubr.msk.bf16.mxu1 %vm4855_vm8, %v17316_v12 }
 0x459   : > { %13028 = vmatmul.mubr.msk.bf16.gmra.mrb[52].mxu1 %vm4855_vm8, %v17426_v36 }
 0x45a   : > { %13031 = vmatprep.mubr.msk.bf16.mxu1 %vm4855_vm8, %v17441_v11 }
 0x461   : > { %13032 = vmatmul.mubr.msk.bf16.gmra.mrb[56].mxu1 %vm4855_vm8, %v17560_v18 }
 0x462   : > { %13035 = vmatprep.mubr.msk.bf16.mxu1 %vm4855_vm8, %v17588_v61 }
 0x469   : > { %13036 = vmatmul.mubr.msk.bf16.gmra.mrb[60].mxu1 %vm4855_vm8, %v17609_v40  ;;  %v20698_v40 = vld [vmem:[#allocation223_spill] sm:$0xff] }
 0x46a   : > { %13043 = vmatprep.mubr.msk.bf16.mxu1 %vm4855_vm8, %v20695_v35  ;;  %v20723_v35 = vld [vmem:[#allocation233_spill] sm:$0xff] }
 0x471   : > { %13044 = vmatmul.mubr.msk.bf16.vlgmr.msra.gmra.mrb[32].mxu1 %vm4855_vm8, %v20696_v6 }
 0x472   : > { %13076 = vmatpush3.bf16.msra.mxu1 %v14489_v24  ;;  %13047 = vmatprep.mubr.msk.bf16.mxu1 %vm4855_vm8, %v20697_v30  ;;  %v20722_v24 = vpack.c.bf16 %v20720_v28, %v20721_v19  ;;  %v20726_v30 = vld [vmem:[#allocation235_spill] sm:$0xff] }
 0x473   : > { %13077 = vmatprep.subr.bf16.mxu1 %v14490_v53  ;;  %v20751_v19 = vld [vmem:[#allocation83_spill] sm:$0xff] }
 0x476   : > { %13078 = vmatpush3.bf16.msra.mxu1 %v14490_v53  ;;  %v20724_v53 = vld [vmem:[#allocation232_spill] sm:$0xff] }
 0x477   : > { %13111 = vmatprep.subr.bf16.mxu1 %v14491_v26  ;;  %v20725_v6 = vpack.c.bf16 %v20723_v35, %v20724_v53 }
 0x479   : > { %13048 = vmatmul.mubr.msk.bf16.gmra.mrb[36].mxu1 %vm4855_vm8, %v20698_v40 }
 0x47a   : > { %13051 = vmatprep.mubr.msk.bf16.mxu1 %vm4855_vm8, %v20699_v3  ;;  %v20729_v3 = vld [vmem:[#allocation245_spill] sm:$0xff] }
 0x481   : > { %13052 = vmatmul.mubr.msk.bf16.gmra.mrb[40].mxu1 %vm4855_vm8, %v20700_v42  ;;  %v20730_v42 = vld [vmem:[#allocation244_spill] sm:$0xff] }
 0x482   : > { %13055 = vmatprep.mubr.msk.bf16.mxu1 %vm4855_vm8, %v20701_v45  ;;  %v20731_v45 = vpack.c.bf16 %v20729_v3, %v20730_v42 }
 0x489   : > { %13056 = vmatmul.mubr.msk.bf16.gmra.mrb[44].mxu1 %vm4855_vm8, %v20702_v2  ;;  %v20732_v2 = vld [vmem:[#allocation247_spill] sm:$0xff] }
 0x48a   : > { %13059 = vmatprep.mubr.msk.bf16.mxu1 %vm4855_vm8, %v20703_v5  ;;  %v20733_v5 = vld [vmem:[#allocation246_spill] sm:$0xff] }
 0x491   : > { %13060 = vmatmul.mubr.msk.bf16.gmra.mrb[48].mxu1 %vm4855_vm8, %v20704_v1  ;;  %v20734_v1 = vpack.c.bf16 %v20732_v2, %v20733_v5 }
 0x492   : > { %13063 = vmatprep.mubr.msk.bf16.mxu1 %vm4855_vm8, %v20705_v58  ;;  %v20735_v58 = vld [vmem:[#allocation257_spill] sm:$0xff] }
 0x499   : > { %13064 = vmatmul.mubr.msk.bf16.gmra.mrb[52].mxu1 %vm4855_vm8, %v20706_v23  ;;  %v20736_v23 = vld [vmem:[#allocation256_spill] sm:$0xff] }
 0x49a   : > { %13067 = vmatprep.mubr.msk.bf16.mxu1 %vm4855_vm8, %v20707_v63  ;;  %v20737_v63 = vpack.c.bf16 %v20735_v58, %v20736_v23 }
 0x4a1   : > { %13068 = vmatmul.mubr.msk.bf16.gmra.mrb[56].mxu1 %vm4855_vm8, %v17622_v27  ;;  %v20714_v27 = vld [vmem:[#allocation210_spill] sm:$0xff] }
 0x4a2   : > { %13071 = vmatprep.mubr.msk.bf16.mxu1 %vm4855_vm8, %v17631_v38  ;;  %v20715_v38 = vld [vmem:[#allocation209_spill] sm:$0xff] }
 0x4a3   : > { %v20716_v4 = vpack.c.bf16 %v20714_v27, %v20715_v38  ;;  %v20745_v27 = vld [vmem:[#allocation270_spill] sm:$0xff] }
 0x4a9   : > { %13072 = vmatmul.mubr.msk.bf16.gmra.mrb[60].mxu1 %vm4855_vm8, %v17637_v55  ;;  %v14493_v55 = vld [vmem:[%s19534_s6 + $0x80] sm:$0xff]  }
 0x4aa   : > { %13079 = vmatprep.mubr.msk.bf16.mxu1 %vm4855_vm8, %v20710_v51  ;;  %v20740_v51 = vpack.c.bf16 %v20738_v48, %v20739_v33 }
 0x4b1   : > { %13080 = vmatmul.mubr.msk.bf16.vlgmr.msra.gmra.mrb[32].mxu1 %vm4855_vm8, %v20713_v54  ;;  %v20744_v54 = vld [vmem:[#allocation271_spill] sm:$0xff] }
 0x4b2   : > { %13112 = vmatpush3.bf16.msra.mxu1 %v14491_v26  ;;  %13083 = vmatprep.mubr.msk.bf16.mxu1 %vm4855_vm8, %v20716_v4  ;;  %v20727_v26 = vld [vmem:[#allocation234_spill] sm:$0xff]  ;;  %v20746_v38 = vpack.c.bf16 %v20744_v54, %v20745_v27  ;;  %v20747_v4 = vpack.c.bf16 %v17592_v56, %v17582_v21  ;;  %v14494_v21 = vld [vmem:[%s19534_s6 + $0x88] sm:$0xff]  }
 0x4b3   : > { %13113 = vmatprep.subr.bf16.mxu1 %v14492_v25  ;;  %v20728_v40 = vpack.c.bf16 %v20726_v30, %v20727_v26 }
 0x4b6   : > { %13114 = vmatpush3.bf16.msra.mxu1 %v14492_v25  ;;  %v20741_v25 = vld [vmem:[#allocation269_spill] sm:$0xff] }
 0x4b7   : > { %13147 = vmatprep.subr.bf16.mxu1 %v14493_v55  ;;  %v20743_v62 = vpack.c.bf16 %v20741_v25, %v20742_v9 }
 0x4b9   : > { %13084 = vmatmul.mubr.msk.bf16.gmra.mrb[36].mxu1 %vm4855_vm8, %v20719_v14  ;;  %v20750_v14 = vld [vmem:[#allocation274_spill] sm:$0xff] }
 0x4ba   : > { %13087 = vmatprep.mubr.msk.bf16.mxu1 %vm4855_vm8, %v20722_v24  ;;  %v6910_v28 = vmul.f32 %v20750_v14, %v20749_v0 }
 0x4bc   : > { %v6926_v24 = vpack.c.bf16 %v20751_v19, %v6910_v28 }
 0x4c1   : > { %13088 = vmatmul.mubr.msk.bf16.gmra.mrb[40].mxu1 %vm4855_vm8, %v20725_v6 }
 0x4c2   : > { %13091 = vmatprep.mubr.msk.bf16.mxu1 %vm4855_vm8, %v20728_v40 }
 0x4c9   : > { %13092 = vmatmul.mubr.msk.bf16.gmra.mrb[44].mxu1 %vm4855_vm8, %v20731_v45 }
 0x4ca   : > { %13095 = vmatprep.mubr.msk.bf16.mxu1 %vm4855_vm8, %v20734_v1 }
 0x4d1   : > { %13096 = vmatmul.mubr.msk.bf16.gmra.mrb[48].mxu1 %vm4855_vm8, %v20737_v63 }
 0x4d2   : > { %13099 = vmatprep.mubr.msk.bf16.mxu1 %vm4855_vm8, %v20740_v51 }
 0x4d9   : > { %13100 = vmatmul.mubr.msk.bf16.gmra.mrb[52].mxu1 %vm4855_vm8, %v20743_v62 }
 0x4da   : > { %13103 = vmatprep.mubr.msk.bf16.mxu1 %vm4855_vm8, %v20746_v38 }
 0x4e1   : > { %13104 = vmatmul.mubr.msk.bf16.gmra.mrb[56].mxu1 %vm4855_vm8, %v20747_v4 }
 0x4e2   : > { %13107 = vmatprep.mubr.msk.bf16.mxu1 %vm4855_vm8, %v20748_v32 }
 0x4e9   : > { %13108 = vmatmul.mubr.msk.bf16.gmra.mrb[60].mxu1 %vm4855_vm8, %v6926_v24 }
 0x4ea   : > { %13115 = vmatprep.mubr.msk.bf16.mxu1 %vm4855_vm8, %v16877_v17  ;;  %v7196_v17 = vshrl.u32 %v20752_v20, 16 }
 0x4f1   : > { %13116 = vmatmul.mubr.msk.bf16.vlgmr.msra.gmra.mrb[32].mxu1 %vm4855_vm8, %v16897_v7  ;;  %v7198_v7 = vor.u32 %v7196_v17, %v17639_v15 }
 0x4f2   : > { %13148 = vmatpush3.bf16.msra.mxu1 %v14493_v55  ;;  %13119 = vmatprep.mubr.msk.bf16.mxu1 %vm4855_vm8, %v17002_v10 }
 0x4f3   : > { %13149 = vmatprep.subr.bf16.mxu1 %v14494_v21  ;;  %v7199_v10 = vsel %vm1361_vm2, %v7198_v7, %v20643_v37 }
 0x4f6   : > { %13150 = vmatpush3.bf16.msra.mxu1 %v14494_v21 }
 0x4f9   : > { %13120 = vmatmul.mubr.msk.bf16.gmra.mrb[36].mxu1 %vm4855_vm8, %v17016_v13  ;;  %v20753_v13 = vld [vmem:[#allocation214_spill] sm:$0xff] }
 0x4fa   : > { %13123 = vmatprep.mubr.msk.bf16.mxu1 %vm4855_vm8, %v17106_v49  ;;  %v20754_v49 = vld [vmem:[#allocation224_spill] sm:$0xff] }
 0x501   : > { %13124 = vmatmul.mubr.msk.bf16.gmra.mrb[40].mxu1 %vm4855_vm8, %v17120_v60  ;;  %v20755_v60 = vld [vmem:[#allocation226_spill] sm:$0xff] }
 0x502   : > { %13127 = vmatprep.mubr.msk.bf16.mxu1 %vm4855_vm8, %v17204_v50  ;;  %v20756_v50 = vld [vmem:[#allocation227_spill] sm:$0xff] }
 0x509   : > { %13128 = vmatmul.mubr.msk.bf16.gmra.mrb[44].mxu1 %vm4855_vm8, %v17218_v47  ;;  %v20757_v47 = vld [vmem:[#allocation238_spill] sm:$0xff] }
 0x50a   : > { %13131 = vmatprep.mubr.msk.bf16.mxu1 %vm4855_vm8, %v17302_v46  ;;  %v20758_v46 = vld [vmem:[#allocation239_spill] sm:$0xff] }
 0x511   : > { %13132 = vmatmul.mubr.msk.bf16.gmra.mrb[48].mxu1 %vm4855_vm8, %v17316_v12  ;;  %v20759_v12 = vld [vmem:[#allocation250_spill] sm:$0xff] }
 0x512   : > { %13135 = vmatprep.mubr.msk.bf16.mxu1 %vm4855_vm8, %v17426_v36  ;;  %v20760_v36 = vld [vmem:[#allocation251_spill] sm:$0xff] }
 0x519   : > { %13136 = vmatmul.mubr.msk.bf16.gmra.mrb[52].mxu1 %vm4855_vm8, %v17441_v11  ;;  %v20761_v11 = vld [vmem:[#allocation262_spill] sm:$0xff] }
 0x51a   : > { %13139 = vmatprep.mubr.msk.bf16.mxu1 %vm4855_vm8, %v17560_v18  ;;  %v20762_v18 = vld [vmem:[#allocation263_spill] sm:$0xff] }
 0x521   : > { %13140 = vmatmul.mubr.msk.bf16.gmra.mrb[56].mxu1 %vm4855_vm8, %v17588_v61  ;;  %v7510_v61 = vsel %vm1999_vm7, %v17663_v39, %v20763_v43 }
 0x522   : > { %13143 = vmatprep.mubr.msk.bf16.mxu1 %vm4855_vm8, %v17657_v16 }
 0x529   : > { %13144 = vmatmul.mubr.msk.bf16.gmra.mrb[60].mxu1 %vm4855_vm8, %v7199_v10 }
 0x52a   : > { %13151 = vmatprep.mubr.msk.bf16.mxu1 %vm4855_vm8, %v20753_v13 }
 0x531   : > { %13152 = vmatmul.mubr.msk.bf16.vlgmr.msra.gmra.mrb[32].mxu1 %vm4855_vm8, %v20754_v49 }
 0x532   : > { %13155 = vmatprep.mubr.msk.bf16.mxu1 %vm4855_vm8, %v20755_v60 }
 0x539   : > { %13156 = vmatmul.mubr.msk.bf16.gmra.mrb[36].mxu1 %vm4855_vm8, %v20756_v50 }
 0x53a   : > { %13159 = vmatprep.mubr.msk.bf16.mxu1 %vm4855_vm8, %v20757_v47 }
 0x541   : > { %13160 = vmatmul.mubr.msk.bf16.gmra.mrb[40].mxu1 %vm4855_vm8, %v20758_v46 }
 0x542   : > { %13163 = vmatprep.mubr.msk.bf16.mxu1 %vm4855_vm8, %v20759_v12 }
 0x549   : > { %13164 = vmatmul.mubr.msk.bf16.gmra.mrb[44].mxu1 %vm4855_vm8, %v20760_v36 }
 0x54a   : > { %13167 = vmatprep.mubr.msk.bf16.mxu1 %vm4855_vm8, %v20761_v11 }
 0x551   : > { %13168 = vmatmul.mubr.msk.bf16.gmra.mrb[48].mxu1 %vm4855_vm8, %v20762_v18 }
 0x552   : > { %13171 = vmatprep.mubr.msk.bf16.mxu1 %vm4855_vm8, %v17647_v59 }
 0x559   : > { %13172 = vmatmul.mubr.msk.bf16.gmra.mrb[52].mxu1 %vm4855_vm8, %v17661_v31 }
 0x55a   : > { %13175 = vmatprep.mubr.msk.bf16.mxu1 %vm4855_vm8, %v17674_v57 }
 0x561   : > { %13176 = vmatmul.mubr.msk.bf16.gmra.mrb[56].mxu1 %vm4855_vm8, %v17677_v41 }
 0x562   : > { %13179 = vmatprep.mubr.msk.bf16.mxu1 %vm4855_vm8, %v17681_v22 }
 0x569   : > { %13180 = vmatmul.mubr.msk.bf16.gmra.mrb[60].mxu1 %vm4855_vm8, %v7510_v61 }
 0x604   : > { %v18095_v56 = vpop.f32.mrb[32].mxu1 }
 0x605   : > { %v18097_v59 = vpop.f32.mrb[33].mxu1  ;;  %v7767_v39 = vsel %vm4855_vm8, %v18095_v56, 0.0 }
 0x606   : > { %v18099_v31 = vpop.f32.mrb[34].mxu1  ;;  %v7764_v16 = vsel %vm4855_vm8, %v18097_v59, 0.0 }
 0x607   : > { %v18101_v15 = vpop.f32.mrb[35].mxu1  ;;  %v7769_v55 = vsel %vm4855_vm8, %v18099_v31, 0.0 }
 0x608   : > { %v7765_v57 = vsel %vm4855_vm8, %v18101_v15, 0.0 }
 0x609   : > { %v7766_v41 = vadd.f32 %v7765_v57, %v7764_v16 }
 0x60b   : > { %v7768_v22 = vadd.f32 %v7767_v39, %v7766_v41 }
 0x60c   : > { %v18111_v35 = vpop.f32.mrb[36].mxu1 }
 0x60d   : > { %v18113_v53 = vpop.f32.mrb[37].mxu1  ;;  %v7770_v6 = vadd.f32 %v7769_v55, %v7768_v22  ;;  %v7775_v2 = vsel %vm4855_vm8, %v18111_v35, 0.0 }
 0x60e   : > { %v7771_v30 = vsel %vm4855_vm8, %v18113_v53, 0.0  ;;  %v18117_v26 = vpop.f32.mrb[38].mxu1 }
 0x60f   : > { %v7772_v40 = vadd.f32 %v7771_v30, %v7770_v6  ;;  %v18119_v3 = vpop.f32.mrb[39].mxu1  ;;  %v7777_v1 = vsel %vm4855_vm8, %v18117_v26, 0.0 }
 0x610   : > { %v7773_v42 = vsel %vm4855_vm8, %v18119_v3, 0.0 }
 0x611   : > { %v7774_v45 = vadd.f32 %v7773_v42, %v7772_v40 }
 0x613   : > { %v7776_v5 = vadd.f32 %v7775_v2, %v7774_v45 }
 0x614   : > { %v18127_v58 = vpop.f32.mrb[40].mxu1 }
 0x615   : > { %v18129_v23 = vpop.f32.mrb[41].mxu1  ;;  %v7778_v63 = vadd.f32 %v7777_v1, %v7776_v5  ;;  %v7783_v54 = vsel %vm4855_vm8, %v18127_v58, 0.0 }
 0x616   : > { %v7779_v48 = vsel %vm4855_vm8, %v18129_v23, 0.0  ;;  %v18133_v33 = vpop.f32.mrb[42].mxu1 }
 0x617   : > { %v7780_v51 = vadd.f32 %v7779_v48, %v7778_v63  ;;  %v18135_v25 = vpop.f32.mrb[43].mxu1  ;;  %v7785_v38 = vsel %vm4855_vm8, %v18133_v33, 0.0 }
 0x618   : > { %v7781_v9 = vsel %vm4855_vm8, %v18135_v25, 0.0 }
 0x619   : > { %v7782_v62 = vadd.f32 %v7781_v9, %v7780_v51 }
 0x61b   : > { %v7784_v27 = vadd.f32 %v7783_v54, %v7782_v62 }
 0x61c   : > { %v18143_v4 = vpop.f32.mrb[44].mxu1 }
 0x61d   : > { %v18145_v32 = vpop.f32.mrb[45].mxu1  ;;  %v7786_v14 = vadd.f32 %v7785_v38, %v7784_v27  ;;  %v7791_v10 = vsel %vm4855_vm8, %v18143_v4, 0.0 }
 0x61e   : > { %v7787_v28 = vsel %vm4855_vm8, %v18145_v32, 0.0  ;;  %v18149_v24 = vpop.f32.mrb[46].mxu1 }
 0x61f   : > { %v7788_v21 = vadd.f32 %v7787_v28, %v7786_v14  ;;  %v18151_v20 = vpop.f32.mrb[47].mxu1  ;;  %v7793_v49 = vsel %vm4855_vm8, %v18149_v24, 0.0 }
 0x620   : > { %v7789_v17 = vsel %vm4855_vm8, %v18151_v20, 0.0 }
 0x621   : > { %v7790_v7 = vadd.f32 %v7789_v17, %v7788_v21 }
 0x623   : > { %v7792_v13 = vadd.f32 %v7791_v10, %v7790_v7 }
 0x624   : > { %v18159_v60 = vpop.f32.mrb[48].mxu1 }
 0x625   : > { %v18161_v50 = vpop.f32.mrb[49].mxu1  ;;  %v7794_v47 = vadd.f32 %v7793_v49, %v7792_v13  ;;  %v7799_v16 = vsel %vm4855_vm8, %v18159_v60, 0.0 }
 0x626   : > { %v7795_v46 = vsel %vm4855_vm8, %v18161_v50, 0.0  ;;  %v18165_v12 = vpop.f32.mrb[50].mxu1 }
 0x627   : > { %v7796_v36 = vadd.f32 %v7795_v46, %v7794_v47  ;;  %v18167_v11 = vpop.f32.mrb[51].mxu1  ;;  %v7801_v41 = vsel %vm4855_vm8, %v18165_v12, 0.0 }
 0x628   : > { %v7797_v18 = vsel %vm4855_vm8, %v18167_v11, 0.0 }
 0x629   : > { %v7798_v61 = vadd.f32 %v7797_v18, %v7796_v36 }
 0x62b   : > { %v7800_v57 = vadd.f32 %v7799_v16, %v7798_v61 }
 0x62c   : > { %v18175_v39 = vpop.f32.mrb[52].mxu1 }
 0x62d   : > { %v18177_v22 = vpop.f32.mrb[53].mxu1  ;;  %v7802_v55 = vadd.f32 %v7801_v41, %v7800_v57  ;;  %v7807_v5 = vsel %vm4855_vm8, %v18175_v39, 0.0 }
 0x62e   : > { %v7803_v6 = vsel %vm4855_vm8, %v18177_v22, 0.0  ;;  %v18181_v30 = vpop.f32.mrb[54].mxu1 }
 0x62f   : > { %v7804_v40 = vadd.f32 %v7803_v6, %v7802_v55  ;;  %v7688_v42 = vpop.f32.mrb[55].mxu1  ;;  %v7809_v63 = vsel %vm4855_vm8, %v18181_v30, 0.0 }
 0x630   : > { %v7805_v45 = vsel %vm4855_vm8, %v7688_v42, 0.0 }
 0x631   : > { %v7806_v2 = vadd.f32 %v7805_v45, %v7804_v40 }
 0x633   : > { %v7808_v1 = vadd.f32 %v7807_v5, %v7806_v2 }
 0x634   : > { %v13177_v48 = vpop.f32.mrb[56].mxu1 }
 0x635   : > { %v7701_v51 = vpop.f32.mrb[57].mxu1  ;;  %v7810_v9 = vadd.f32 %v7809_v63, %v7808_v1  ;;  %v7815_v21 = vsel %vm4855_vm8, %v13177_v48, 0.0 }
 0x636   : > { %v7811_v62 = vsel %vm4855_vm8, %v7701_v51, 0.0  ;;  %v13178_v54 = vpop.f32.mrb[58].mxu1 }
 0x637   : > { %v7812_v27 = vadd.f32 %v7811_v62, %v7810_v9  ;;  %v7704_v38 = vpop.f32.mrb[59].mxu1  ;;  %v7817_v7 = vsel %vm4855_vm8, %v13178_v54, 0.0 }
 0x638   : > { %v7813_v14 = vsel %vm4855_vm8, %v7704_v38, 0.0 }
 0x639   : > { %v7814_v28 = vadd.f32 %v7813_v14, %v7812_v27 }
 0x63b   : > { %v7816_v17 = vadd.f32 %v7815_v21, %v7814_v28 }
 0x63c   : > { %v13181_v10 = vpop.f32.mrb[60].mxu1 }
 0x63d   : > { %v7717_v13 = vpop.f32.mrb[61].mxu1  ;;  %v7818_v49 = vadd.f32 %v7817_v7, %v7816_v17  ;;  %v7823_v57 = vsel %vm4855_vm8, %v13181_v10, 0.0 }
 0x63e   : > { %v7819_v47 = vsel %vm4855_vm8, %v7717_v13, 0.0  ;;  %v13182_v46 = vpop.f32.mrb[62].mxu1 }
 0x63f   : > { %v7820_v36 = vadd.f32 %v7819_v47, %v7818_v49  ;;  %v7720_v18 = vpop.f32.mrb[63].mxu1  ;;  %v7825_v55 = vsel %vm4855_vm8, %v13182_v46, 0.0 }
 0x640   : > { %v7821_v61 = vsel %vm4855_vm8, %v7720_v18, 0.0 }
 0x641   : > { %v7822_v16 = vadd.f32 %v7821_v61, %v7820_v36 }
 0x643   : > { %v7824_v41 = vadd.f32 %v7823_v57, %v7822_v16 }
 0x645   : > { %v7826_v6 = vadd.f32 %v7825_v55, %v7824_v41  ;;  %v14495_v41 = vld [vmem:[%s19536_s8] sm:$0xff]  }
 0x646   : > { %13183 = vmatprep.subr.bf16.mxu0 %v14495_v41 }
 0x647   : > { %v7827_v40 = vrot.slane %v7826_v6, 4  ;;  %13184 = vmatpush3.bf16.msra.mxu0 %v14495_v41 }
 0x649   : > { %v7828_v45 = vadd.f32 %v7827_v40, %v7826_v6 }
 0x64b   : > { %v7829_v2 = vrot.slane %v7828_v45, 2 }
 0x64d   : > { %v7830_v5 = vadd.f32 %v7829_v2, %v7828_v45 }
 0x64f   : > { %v7831_v1 = vrot.slane %v7830_v5, 1 }
 0x651   : > { %v7832_v63 = vadd.f32 %v7831_v1, %v7830_v5  ;;  %v14496_v1 = vld [vmem:[%s19536_s8 + $0x8] sm:$0xff]  }
 0x652   : > { %13185 = vmatprep.subr.bf16.mxu0 %v14496_v1 }
 0x653   : > { %v7833_v9 = vmul.f32 0.00390625, %v7832_v63  ;;  %13186 = vmatpush3.bf16.msra.mxu0 %v14496_v1 }
 0x655   : > { %v18197_v62 = vsub.f32 %v18097_v59, %v7833_v9  ;;  %v18200_v27 = vsub.f32 %v18101_v15, %v7833_v9  ;;  %v18203_v14 = vsub.f32 %v18095_v56, %v7833_v9  ;;  %v18206_v28 = vsub.f32 %v18099_v31, %v7833_v9 }
 0x656   : > { %v18209_v21 = vsub.f32 %v18113_v53, %v7833_v9  ;;  %v18212_v17 = vsub.f32 %v18119_v3, %v7833_v9  ;;  %v18215_v7 = vsub.f32 %v18111_v35, %v7833_v9  ;;  %v18218_v59 = vsub.f32 %v18117_v26, %v7833_v9 }
 0x657   : > { %v18221_v15 = vsub.f32 %v18129_v23, %v7833_v9  ;;  %v18224_v56 = vsub.f32 %v18135_v25, %v7833_v9  ;;  %v18227_v31 = vsub.f32 %v18127_v58, %v7833_v9  ;;  %v18230_v53 = vsub.f32 %v18133_v33, %v7833_v9 }
 0x658   : > { %v18233_v3 = vsub.f32 %v18145_v32, %v7833_v9  ;;  %v18236_v35 = vsub.f32 %v18151_v20, %v7833_v9  ;;  %v18239_v26 = vsub.f32 %v18143_v4, %v7833_v9  ;;  %v18242_v23 = vsub.f32 %v18149_v24, %v7833_v9 }
 0x659   : > { %v18245_v25 = vsub.f32 %v18161_v50, %v7833_v9  ;;  %v18248_v58 = vsub.f32 %v18167_v11, %v7833_v9  ;;  %v18251_v33 = vsub.f32 %v18159_v60, %v7833_v9  ;;  %v18254_v32 = vsub.f32 %v18165_v12, %v7833_v9 }
 0x65a   : > { %v18257_v20 = vsub.f32 %v18177_v22, %v7833_v9  ;;  %v18259_v4 = vsub.f32 %v7688_v42, %v7833_v9  ;;  %v18262_v24 = vsub.f32 %v18175_v39, %v7833_v9  ;;  %v18265_v50 = vsub.f32 %v18181_v30, %v7833_v9 }
 0x65b   : > { %v18267_v49 = vsub.f32 %v7701_v51, %v7833_v9  ;;  %v18269_v11 = vsub.f32 %v7704_v38, %v7833_v9  ;;  %v18271_v60 = vsub.f32 %v13177_v48, %v7833_v9  ;;  %v18273_v47 = vsub.f32 %v13178_v54, %v7833_v9 }
 0x65c   : > { %v18275_v12 = vsub.f32 %v7717_v13, %v7833_v9  ;;  %v18277_v22 = vsub.f32 %v7720_v18, %v7833_v9  ;;  %v18279_v42 = vsub.f32 %v13181_v10, %v7833_v9  ;;  %v18281_v36 = vsub.f32 %v13182_v46, %v7833_v9 }
 0x65d   : > { %v7866_v39 = vmul.f32 %v18197_v62, %v18197_v62  ;;  %v7867_v30 = vmul.f32 %v18200_v27, %v18200_v27  ;;  %v7868_v48 = vmul.f32 %v18203_v14, %v18203_v14  ;;  %v7869_v51 = vmul.f32 %v18206_v28, %v18206_v28 }
 0x65e   : > { %v7870_v13 = vmul.f32 %v18209_v21, %v18209_v21  ;;  %v7871_v61 = vmul.f32 %v18212_v17, %v18212_v17  ;;  %v7872_v55 = vmul.f32 %v18215_v7, %v18215_v7  ;;  %v7873_v45 = vmul.f32 %v18218_v59, %v18218_v59 }
 0x65f   : > { %v7898_v54 = vsel %vm4855_vm8, %v7866_v39, 0.0  ;;  %v7899_v38 = vsel %vm4855_vm8, %v7867_v30, 0.0  ;;  %v7901_v46 = vsel %vm4855_vm8, %v7868_v48, 0.0  ;;  %v7903_v16 = vsel %vm4855_vm8, %v7869_v51, 0.0  ;;  %v14497_v39 = vld [vmem:[%s19535_s7] sm:$0x1f]  }
 0x660   : > { %v7900_v10 = vadd.f32 %v7899_v38, %v7898_v54  ;;  %v7905_v6 = vsel %vm4855_vm8, %v7870_v13, 0.0  ;;  %v7907_v2 = vsel %vm4855_vm8, %v7871_v61, 0.0  ;;  %v7874_v63 = vmul.f32 %v18221_v15, %v18221_v15  ;;  %v20764_v54 = vld [vmem:[#allocation40_spill] sm:$0xff] }
 0x661   : > { %v7909_v9 = vsel %vm4855_vm8, %v7872_v55, 0.0  ;;  %v7875_v48 = vmul.f32 %v18224_v56, %v18224_v56  ;;  %v7911_v51 = vsel %vm4855_vm8, %v7873_v45, 0.0  ;;  %v18321_v38 = vand.u32 %v14497_v39, %v20764_v54 }
 0x662   : > { %v7902_v18 = vadd.f32 %v7901_v46, %v7900_v10  ;;  %v7876_v13 = vmul.f32 %v18227_v31, %v18227_v31  ;;  %v7913_v46 = vsel %vm4855_vm8, %v7874_v63, 0.0  ;;  %v7877_v61 = vmul.f32 %v18230_v53, %v18230_v53 }
 0x663   : > { %13219 = vmatprep.subr.bf16.mxu0 %v18321_v38  ;;  %v7878_v41 = vmul.f32 %v18233_v3, %v18233_v3 }
 0x664   : > { %v7904_v57 = vadd.f32 %v7903_v16, %v7902_v18  ;;  %v7915_v16 = vsel %vm4855_vm8, %v7875_v48, 0.0  ;;  %v7917_v55 = vsel %vm4855_vm8, %v7876_v13, 0.0  ;;  %v7919_v45 = vsel %vm4855_vm8, %v7877_v61, 0.0 }
 0x665   : > { %v7921_v1 = vsel %vm4855_vm8, %v7878_v41, 0.0  ;;  %v7882_v48 = vmul.f32 %v18245_v25, %v18245_v25 }
 0x666   : > { %v7906_v40 = vadd.f32 %v7905_v6, %v7904_v57 }
 0x667   : > { %v7929_v61 = vsel %vm4855_vm8, %v7882_v48, 0.0 }
 0x668   : > { %v7908_v5 = vadd.f32 %v7907_v2, %v7906_v40  ;;  %v7879_v40 = vmul.f32 %v18236_v35, %v18236_v35 }
 0x66a   : > { %v7910_v30 = vadd.f32 %v7909_v9, %v7908_v5  ;;  %v7880_v5 = vmul.f32 %v18239_v26, %v18239_v26  ;;  %v7881_v9 = vmul.f32 %v18242_v23, %v18242_v23  ;;  %v7923_v39 = vsel %vm4855_vm8, %v7879_v40, 0.0 }
 0x66c   : > { %v7912_v10 = vadd.f32 %v7911_v51, %v7910_v30  ;;  %v7925_v51 = vsel %vm4855_vm8, %v7880_v5, 0.0  ;;  %v7927_v13 = vsel %vm4855_vm8, %v7881_v9, 0.0 }
 0x66e   : > { %v7914_v18 = vadd.f32 %v7913_v46, %v7912_v10  ;;  %v7883_v10 = vmul.f32 %v18248_v58, %v18248_v58 }
 0x670   : > { %v7916_v57 = vadd.f32 %v7915_v16, %v7914_v18  ;;  %v7884_v18 = vmul.f32 %v18251_v33, %v18251_v33  ;;  %v7931_v41 = vsel %vm4855_vm8, %v7883_v10, 0.0 }
 0x672   : > { %v7918_v6 = vadd.f32 %v7917_v55, %v7916_v57  ;;  %v7885_v57 = vmul.f32 %v18254_v32, %v18254_v32  ;;  %v7933_v40 = vsel %vm4855_vm8, %v7884_v18, 0.0 }
 0x674   : > { %v7920_v2 = vadd.f32 %v7919_v45, %v7918_v6  ;;  %v7886_v6 = vmul.f32 %v18257_v20, %v18257_v20  ;;  %v7935_v5 = vsel %vm4855_vm8, %v7885_v57, 0.0 }
 0x676   : > { %v7922_v63 = vadd.f32 %v7921_v1, %v7920_v2  ;;  %v7887_v2 = vmul.f32 %v18259_v4, %v18259_v4  ;;  %v7937_v9 = vsel %vm4855_vm8, %v7886_v6, 0.0 }
 0x678   : > { %v7924_v30 = vadd.f32 %v7923_v39, %v7922_v63  ;;  %v7888_v63 = vmul.f32 %v18262_v24, %v18262_v24  ;;  %v7939_v48 = vsel %vm4855_vm8, %v7887_v2, 0.0 }
 0x67a   : > { %v7926_v54 = vadd.f32 %v7925_v51, %v7924_v30  ;;  %v7889_v30 = vmul.f32 %v18265_v50, %v18265_v50  ;;  %v7941_v10 = vsel %vm4855_vm8, %v7888_v63, 0.0 }
 0x67c   : > { %v7928_v46 = vadd.f32 %v7927_v13, %v7926_v54  ;;  %v7890_v54 = vmul.f32 %v18267_v49, %v18267_v49  ;;  %v7943_v18 = vsel %vm4855_vm8, %v7889_v30, 0.0 }
 0x67e   : > { %v7930_v16 = vadd.f32 %v7929_v61, %v7928_v46  ;;  %v7891_v46 = vmul.f32 %v18269_v11, %v18269_v11  ;;  %v7945_v57 = vsel %vm4855_vm8, %v7890_v54, 0.0 }
 0x680   : > { %v7932_v55 = vadd.f32 %v7931_v41, %v7930_v16  ;;  %v7892_v16 = vmul.f32 %v18271_v60, %v18271_v60  ;;  %v7947_v6 = vsel %vm4855_vm8, %v7891_v46, 0.0 }
 0x682   : > { %v7934_v45 = vadd.f32 %v7933_v40, %v7932_v55  ;;  %v7893_v55 = vmul.f32 %v18273_v47, %v18273_v47  ;;  %v7949_v2 = vsel %vm4855_vm8, %v7892_v16, 0.0 }
 0x684   : > { %v7936_v1 = vadd.f32 %v7935_v5, %v7934_v45  ;;  %v7894_v45 = vmul.f32 %v18275_v12, %v18275_v12  ;;  %v7951_v63 = vsel %vm4855_vm8, %v7893_v55, 0.0 }
 0x686   : > { %v7938_v39 = vadd.f32 %v7937_v9, %v7936_v1  ;;  %v7895_v1 = vmul.f32 %v18277_v22, %v18277_v22  ;;  %v7953_v30 = vsel %vm4855_vm8, %v7894_v45, 0.0 }
 0x688   : > { %v7940_v51 = vadd.f32 %v7939_v48, %v7938_v39  ;;  %v7896_v39 = vmul.f32 %v18279_v42, %v18279_v42  ;;  %v7955_v54 = vsel %vm4855_vm8, %v7895_v1, 0.0  ;;  %v18397_v1 = vld [vmem:[%s19537_s9] ss:$0 sm:$0xff] }
 0x68a   : > { %v7942_v13 = vadd.f32 %v7941_v10, %v7940_v51  ;;  %v7897_v51 = vmul.f32 %v18281_v36, %v18281_v36 }
 0x68c   : > { %v7944_v61 = vadd.f32 %v7943_v18, %v7942_v13  ;;  %v7957_v13 = vsel %vm4855_vm8, %v7896_v39, 0.0  ;;  %v7959_v18 = vsel %vm4855_vm8, %v7897_v51, 0.0  ;;  %v18406_v39 = vld [vmem:[%s19538_s10] ss:$0 sm:$0xff] }
 0x68e   : > { %v7946_v41 = vadd.f32 %v7945_v57, %v7944_v61 }
 0x690   : > { %v7948_v40 = vadd.f32 %v7947_v6, %v7946_v41 }
 0x692   : > { %v7950_v5 = vadd.f32 %v7949_v2, %v7948_v40 }
 0x694   : > { %v7952_v9 = vadd.f32 %v7951_v63, %v7950_v5 }
 0x696   : > { %v7954_v48 = vadd.f32 %v7953_v30, %v7952_v9 }
 0x698   : > { %v7956_v10 = vadd.f32 %v7955_v54, %v7954_v48 }
 0x69a   : > { %v7958_v46 = vadd.f32 %v7957_v13, %v7956_v10 }
 0x69c   : > { %v7960_v61 = vadd.f32 %v7959_v18, %v7958_v46 }
 0x69e   : > { %v7961_v16 = vrot.slane %v7960_v61, 4 }
 0x6a0   : > { %v7962_v57 = vadd.f32 %v7961_v16, %v7960_v61 }
 0x6a2   : > { %v7963_v41 = vrot.slane %v7962_v57, 2 }
 0x6a4   : > { %v7964_v55 = vadd.f32 %v7963_v41, %v7962_v57 }
 0x6a6   : > { %v7965_v6 = vrot.slane %v7964_v55, 1 }
 0x6a8   : > { %v7966_v40 = vadd.f32 %v7965_v6, %v7964_v55 }
 0x6aa   : > { %v7967_v45 = vmul.f32 0.00390625, %v7966_v40 }
 0x6ac   : > { %v7968_v2 = vadd.f32 1e-05, %v7967_v45 }
 0x6ae   : > { %14514 = vrsqrt.f32 %v7968_v2 }
 0x6b8   : > { %v18392_v5 = vpop.eup %14514 }
 0x6b9   : > { %v7999_v63 = vmul.f32 %v18392_v5, %v18277_v22  ;;  %v8000_v9 = vmul.f32 %v18392_v5, %v18279_v42  ;;  %v8001_v18 = vmul.f32 %v18392_v5, %v18281_v36  ;;  %v7970_v16 = vmul.f32 %v18392_v5, %v18197_v62 }
 0x6ba   : > { %v7971_v57 = vmul.f32 %v18392_v5, %v18200_v27  ;;  %v7972_v41 = vmul.f32 %v18392_v5, %v18203_v14  ;;  %v7973_v6 = vmul.f32 %v18392_v5, %v18206_v28  ;;  %v7974_v62 = vmul.f32 %v18392_v5, %v18209_v21 }
 0x6bb   : > { %v8038_v30 = vmul.f32 %v18397_v1, %v7999_v63  ;;  %v8039_v48 = vmul.f32 %v18397_v1, %v8000_v9  ;;  %v8040_v61 = vmul.f32 %v18397_v1, %v8001_v18  ;;  %v8009_v40 = vmul.f32 %v18397_v1, %v7970_v16 }
 0x6bc   : > { %v8010_v36 = vmul.f32 %v18397_v1, %v7971_v57  ;;  %v8011_v45 = vmul.f32 %v18397_v1, %v7972_v41  ;;  %v7975_v27 = vmul.f32 %v18392_v5, %v18212_v17  ;;  %v8012_v2 = vmul.f32 %v18397_v1, %v7973_v6 }
 0x6bd   : > { %v8077_v51 = vadd.f32 %v18406_v39, %v8038_v30  ;;  %v8078_v54 = vadd.f32 %v18406_v39, %v8039_v48  ;;  %v8079_v55 = vadd.f32 %v18406_v39, %v8040_v61  ;;  %v7976_v14 = vmul.f32 %v18392_v5, %v18215_v7 }
 0x6be   : > { %v7977_v28 = vmul.f32 %v18392_v5, %v18218_v59  ;;  %v8048_v63 = vadd.f32 %v18406_v39, %v8009_v40  ;;  %v8049_v9 = vadd.f32 %v18406_v39, %v8010_v36  ;;  %v8050_v30 = vadd.f32 %v18406_v39, %v8011_v45 }
 0x6bf   : > { %v8109_v10 = vmax.f32 %v8077_v51, 0.0  ;;  %v8110_v13 = vmax.f32 %v8078_v54, 0.0  ;;  %v8013_v48 = vmul.f32 %v18397_v1, %v7974_v62  ;;  %v8014_v21 = vmul.f32 %v18397_v1, %v7975_v27 }
 0x6c0   : > { %v8051_v17 = vadd.f32 %v18406_v39, %v8012_v2  ;;  %v8015_v51 = vmul.f32 %v18397_v1, %v7976_v14  ;;  %v8016_v54 = vmul.f32 %v18397_v1, %v7977_v28  ;;  %v8080_v7 = vmax.f32 %v8048_v63, 0.0 }
 0x6c1   : > { %v18412_v46 = vrot.slane %v8109_v10, 7  ;;  %v18414_v22 = vrot.slane %v8110_v13, 7  ;;  %v8081_v10 = vmax.f32 %v8049_v9, 0.0  ;;  %v7978_v59 = vmul.f32 %v18392_v5, %v18221_v15 }
 0x6c2   : > { %v7979_v13 = vmul.f32 %v18392_v5, %v18224_v56  ;;  %v8082_v18 = vmax.f32 %v8050_v30, 0.0  ;;  %v7980_v61 = vmul.f32 %v18392_v5, %v18227_v31  ;;  %v7981_v16 = vmul.f32 %v18392_v5, %v18230_v53 }
 0x6c3   : > { %v18419_v42 = vsel %vm516_vm1, %v18412_v46, %v18414_v22  ;;  %v8052_v57 = vadd.f32 %v18406_v39, %v8013_v48  ;;  %v8053_v41 = vadd.f32 %v18406_v39, %v8014_v21  ;;  %v8083_v6 = vmax.f32 %v8051_v17, 0.0 }
 0x6c4   : > { %v8054_v40 = vadd.f32 %v18406_v39, %v8015_v51  ;;  %v8055_v36 = vadd.f32 %v18406_v39, %v8016_v54  ;;  %v8144_v15 = vrot.slane %v8080_v7, 7  ;;  %v8145_v45 = vrot.slane %v8081_v10, 7 }
 0x6c5   : > { %v8017_v56 = vmul.f32 %v18397_v1, %v7978_v59  ;;  %v8018_v62 = vmul.f32 %v18397_v1, %v7979_v13  ;;  %v8147_v27 = vrot.slane %v8082_v18, 7  ;;  %v8019_v31 = vmul.f32 %v18397_v1, %v7980_v61  ;;  %v20765_v61 = vld [vmem:[#allocation42_spill] sm:$0xff] }
 0x6c6   : > { %v8020_v53 = vmul.f32 %v18397_v1, %v7981_v16  ;;  %v8084_v2 = vmax.f32 %v8052_v57, 0.0  ;;  %v8085_v14 = vmax.f32 %v8053_v41, 0.0  ;;  %v7982_v28 = vmul.f32 %v18392_v5, %v18233_v3 }
 0x6c7   : > { %v7983_v63 = vmul.f32 %v18392_v5, %v18236_v35  ;;  %v8111_v9 = vmax.f32 %v8079_v55, 0.0  ;;  %v8149_v30 = vrot.slane %v8083_v6, 7  ;;  %v7984_v48 = vmul.f32 %v18392_v5, %v18239_v26  ;;  %v20766_v6 = vld [vmem:[#allocation41_spill] sm:$0xff] }
 0x6c8   : > { %v8086_v21 = vmax.f32 %v8054_v40, 0.0  ;;  %v8087_v17 = vmax.f32 %v8055_v36, 0.0  ;;  %v18476_v51 = vsel %vm516_vm1, %v8144_v15, %v8145_v45  ;;  %v7985_v54 = vmul.f32 %v18392_v5, %v18242_v23  ;;  %v20767_v36 = vld [vmem:[#allocation45_spill] sm:$0xff] }
 0x6c9   : > { %v8056_v7 = vadd.f32 %v18406_v39, %v8017_v56  ;;  %v8057_v3 = vadd.f32 %v18406_v39, %v8018_v62  ;;  %v18483_v10 = vsel %vm516_vm1, %v8145_v45, %v8147_v27  ;;  %v8058_v35 = vadd.f32 %v18406_v39, %v8019_v31 }
 0x6ca   : > { %v8059_v55 = vadd.f32 %v18406_v39, %v8020_v53  ;;  %v8151_v26 = vrot.slane %v8084_v2, 7  ;;  %v8153_v59 = vrot.slane %v8085_v14, 7  ;;  %v18488_v13 = vsel %vm516_vm1, %v8147_v27, %v8149_v30  ;;  %v20768_v14 = vld [vmem:[#allocation44_spill] sm:$0xff] }
 0x6cb   : > { %v18490_v18 = vrot.slane %v8111_v9, 7  ;;  %v18493_v23 = vsel %vm516_vm1, 0.0, %v8144_v15  ;;  %v8245_v16 = vmul.f32 %v18476_v51, %v20765_v61  ;;  %v8155_v57 = vrot.slane %v8086_v21, 7 }
 0x6cc   : > { %v8157_v41 = vrot.slane %v8087_v17, 7  ;;  %v8244_v40 = vmul.f32 %v18493_v23, %v20766_v6  ;;  %v8246_v45 = vmul.f32 %v18483_v10, %v20767_v36  ;;  %v8021_v56 = vmul.f32 %v18397_v1, %v7982_v28 }
 0x6cd   : > { %v8022_v62 = vmul.f32 %v18397_v1, %v7983_v63  ;;  %v8023_v27 = vmul.f32 %v18397_v1, %v7984_v48  ;;  %v18507_v15 = vsel %vm516_vm1, %v18414_v22, %v18490_v18  ;;  %v8024_v31 = vmul.f32 %v18397_v1, %v7985_v54  ;;  %v18521_v22 = vld [vmem:[%s19536_s8 + $0x10] sm:$0xff]  }
 0x6ce   : > { %v8088_v53 = vmax.f32 %v8056_v7, 0.0  ;;  %v8274_v2 = vpack.c.bf16 %v8245_v16, %v8244_v40  ;;  %v8247_v9 = vmul.f32 %v18488_v13, %v20768_v14  ;;  %v8089_v21 = vmax.f32 %v8057_v3, 0.0  ;;  %v20769_v16 = vld [vmem:[#allocation47_spill] sm:$0xff] }
 0x6cf   : > { %v8090_v17 = vmax.f32 %v8058_v35, 0.0  ;;  %v18513_v28 = vsel %vm516_vm1, %v8149_v30, %v8151_v26  ;;  %v18516_v63 = vsel %vm516_vm1, %v8151_v26, %v8153_v59  ;;  %v8091_v48 = vmax.f32 %v8059_v55, 0.0 }
 0x6d0   : > { %v18524_v54 = vsel %vm516_vm1, %v8153_v59, %v8155_v57  ;;  %v18527_v7 = vsel %vm516_vm1, %v8155_v57, %v8157_v41  ;;  %13188 = vmatmul.mubr.msk.bf16.vlgmr.msra.gmra.mrb[32].mxu0 %vm4855_vm8, %v8274_v2  ;;  %v8275_v3 = vpack.c.bf16 %v8247_v9, %v8246_v45  ;;  %v7986_v30 = vmul.f32 %v18392_v5, %v18245_v25  ;;  %v20770_v57 = vld [vmem:[#allocation46_spill] sm:$0xff] }
 0x6d1   : > { %v7987_v35 = vmul.f32 %v18392_v5, %v18248_v58  ;;  %v7988_v26 = vmul.f32 %v18392_v5, %v18251_v33  ;;  %v7989_v55 = vmul.f32 %v18392_v5, %v18254_v32  ;;  %13220 = vmatpush3.bf16.msra.mxu0 %v18321_v38  ;;  %v8060_v59 = vadd.f32 %v18406_v39, %v8021_v56  ;;  %v20771_v33 = vld [vmem:[#allocation49_spill] sm:$0xff]  ;;  %v20772_v32 = vld [vmem:[#allocation48_spill] sm:$0xff] }
 0x6d2   : > { %v8061_v61 = vadd.f32 %v18406_v39, %v8022_v62  ;;  %13191 = vmatprep.mubr.msk.bf16.mxu0 %vm4855_vm8, %v8275_v3  ;;  %v8248_v25 = vmul.f32 %v18513_v28, %v20769_v16  ;;  %v8249_v58 = vmul.f32 %v18516_v63, %v20770_v57  ;;  %v8159_v6 = vrot.slane %v8088_v53, 7  ;;  %13253 = vmatprep.subr.bf16.mxu0 %v18521_v22 }
 0x6d3   : > { %v8161_v40 = vrot.slane %v8089_v21, 7  ;;  %v8250_v36 = vmul.f32 %v18524_v54, %v20771_v33  ;;  %v8251_v38 = vmul.f32 %v18527_v7, %v20772_v32  ;;  %v8062_v45 = vadd.f32 %v18406_v39, %v8023_v27  ;;  %v20775_v32 = vld [vmem:[#allocation53_spill] sm:$0xff] }
 0x6d4   : > { %v8063_v56 = vadd.f32 %v18406_v39, %v8024_v31  ;;  %v8163_v62 = vrot.slane %v8090_v17, 7  ;;  %v8165_v2 = vrot.slane %v8091_v48, 7  ;;  %v8025_v14 = vmul.f32 %v18397_v1, %v7986_v30 }
 0x6d5   : > { %v8026_v9 = vmul.f32 %v18397_v1, %v7987_v35  ;;  %v8027_v53 = vmul.f32 %v18397_v1, %v7988_v26  ;;  %v8028_v21 = vmul.f32 %v18397_v1, %v7989_v55  ;;  %v8092_v3 = vmax.f32 %v8060_v59, 0.0 }
 0x6d6   : > { %v8276_v16 = vpack.c.bf16 %v8249_v58, %v8248_v25  ;;  %v8093_v57 = vmax.f32 %v8061_v61, 0.0  ;;  %v18558_v33 = vsel %vm516_vm1, %v8157_v41, %v8159_v6  ;;  %v18561_v27 = vsel %vm516_vm1, %v8159_v6, %v8161_v40  ;;  %v20773_v58 = vld [vmem:[#allocation51_spill] sm:$0xff] }
 0x6d7   : > { %v8277_v31 = vpack.c.bf16 %v8251_v38, %v8250_v36  ;;  %v8094_v17 = vmax.f32 %v8062_v45, 0.0  ;;  %v8095_v48 = vmax.f32 %v8063_v56, 0.0  ;;  %v18564_v30 = vsel %vm516_vm1, %v8161_v40, %v8163_v62  ;;  %v20774_v40 = vld [vmem:[#allocation50_spill] sm:$0xff]  ;;  %v20776_v38 = vld [vmem:[#allocation52_spill] sm:$0xff] }
 0x6d8   : > { %v18567_v35 = vsel %vm516_vm1, %v8163_v62, %v8165_v2  ;;  %13192 = vmatmul.mubr.msk.bf16.gmra.mrb[36].mxu0 %vm4855_vm8, %v8276_v16  ;;  %v7990_v26 = vmul.f32 %v18392_v5, %v18257_v20  ;;  %v7991_v41 = vmul.f32 %v18392_v5, %v18259_v4  ;;  %v7992_v55 = vmul.f32 %v18392_v5, %v18262_v24 }
 0x6d9   : > { %v7993_v59 = vmul.f32 %v18392_v5, %v18265_v50  ;;  %13195 = vmatprep.mubr.msk.bf16.mxu0 %vm4855_vm8, %v8277_v31  ;;  %v8064_v61 = vadd.f32 %v18406_v39, %v8025_v14  ;;  %v8065_v25 = vadd.f32 %v18406_v39, %v8026_v9  ;;  %v8252_v6 = vmul.f32 %v18558_v33, %v20773_v58 }
 0x6da   : > { %v8253_v20 = vmul.f32 %v18561_v27, %v20774_v40  ;;  %v8167_v36 = vrot.slane %v8092_v3, 7  ;;  %v8169_v4 = vrot.slane %v8093_v57, 7  ;;  %v8254_v24 = vmul.f32 %v18564_v30, %v20775_v32 }
 0x6db   : > { %v8255_v50 = vmul.f32 %v18567_v35, %v20776_v38  ;;  %v8066_v45 = vadd.f32 %v18406_v39, %v8027_v53  ;;  %v8067_v56 = vadd.f32 %v18406_v39, %v8028_v21  ;;  %v8171_v62 = vrot.slane %v8094_v17, 7  ;;  %v20779_v38 = vld [vmem:[#allocation9_spill] sm:$0xff] }
 0x6dc   : > { %v8173_v14 = vrot.slane %v8095_v48, 7  ;;  %v8029_v9 = vmul.f32 %v18397_v1, %v7990_v26  ;;  %v8030_v16 = vmul.f32 %v18397_v1, %v7991_v41  ;;  %v8031_v31 = vmul.f32 %v18397_v1, %v7992_v55 }
 0x6dd   : > { %v8032_v3 = vmul.f32 %v18397_v1, %v7993_v59  ;;  %v8096_v57 = vmax.f32 %v8064_v61, 0.0  ;;  %v8278_v58 = vpack.c.bf16 %v8253_v20, %v8252_v6  ;;  %v8097_v40 = vmax.f32 %v8065_v25, 0.0  ;;  %v20777_v20 = vld [vmem:[#allocation55_spill] sm:$0xff] }
 0x6de   : > { %v18596_v32 = vsel %vm516_vm1, %v8165_v2, %v8167_v36  ;;  %v18599_v53 = vsel %vm516_vm1, %v8167_v36, %v8169_v4  ;;  %v8279_v21 = vpack.c.bf16 %v8255_v50, %v8254_v24  ;;  %v8098_v17 = vmax.f32 %v8066_v45, 0.0  ;;  %v20780_v50 = vld [vmem:[#allocation8_spill] sm:$0xff] }
 0x6df   : > { %v8099_v48 = vmax.f32 %v8067_v56, 0.0  ;;  %v18602_v26 = vsel %vm516_vm1, %v8169_v4, %v8171_v62  ;;  %v18605_v41 = vsel %vm516_vm1, %v8171_v62, %v8173_v14  ;;  %v7994_v55 = vmul.f32 %v18392_v5, %v18267_v49  ;;  %v20778_v4 = vld [vmem:[#allocation54_spill] sm:$0xff] }
 0x6e0   : > { %13196 = vmatmul.mubr.msk.bf16.gmra.mrb[40].mxu0 %vm4855_vm8, %v8278_v58  ;;  %v7995_v2 = vmul.f32 %v18392_v5, %v18269_v11  ;;  %v7996_v59 = vmul.f32 %v18392_v5, %v18271_v60  ;;  %v7997_v61 = vmul.f32 %v18392_v5, %v18273_v47  ;;  %v8068_v25 = vadd.f32 %v18406_v39, %v8029_v9 }
 0x6e1   : > { %13199 = vmatprep.mubr.msk.bf16.mxu0 %vm4855_vm8, %v8279_v21  ;;  %v8069_v6 = vadd.f32 %v18406_v39, %v8030_v16  ;;  %v8256_v36 = vmul.f32 %v18596_v32, %v20777_v20  ;;  %v8257_v49 = vmul.f32 %v18599_v53, %v20778_v4  ;;  %v8175_v24 = vrot.slane %v8096_v57, 7 }
 0x6e2   : > { %v8177_v11 = vrot.slane %v8097_v40, 7  ;;  %v8258_v60 = vmul.f32 %v18602_v26, %v20779_v38  ;;  %v8259_v47 = vmul.f32 %v18605_v41, %v20780_v50  ;;  %v8070_v45 = vadd.f32 %v18406_v39, %v8031_v31 }
 0x6e3   : > { %v8071_v56 = vadd.f32 %v18406_v39, %v8032_v3  ;;  %v8179_v62 = vrot.slane %v8098_v17, 7  ;;  %v8181_v9 = vrot.slane %v8099_v48, 7  ;;  %v8033_v16 = vmul.f32 %v18397_v1, %v7994_v55 }
 0x6e4   : > { %v8034_v58 = vmul.f32 %v18397_v1, %v7995_v2  ;;  %v8035_v21 = vmul.f32 %v18397_v1, %v7996_v59  ;;  %v8036_v57 = vmul.f32 %v18397_v1, %v7997_v61  ;;  %v8100_v40 = vmax.f32 %v8068_v25, 0.0  ;;  %v20781_v25 = vld [vmem:[#allocation12_spill] sm:$0xff] }
 0x6e5   : > { %v8280_v20 = vpack.c.bf16 %v8257_v49, %v8256_v36  ;;  %v8101_v4 = vmax.f32 %v8069_v6, 0.0  ;;  %v18634_v38 = vsel %vm516_vm1, %v8173_v14, %v8175_v24  ;;  %v18637_v31 = vsel %vm516_vm1, %v8175_v24, %v8177_v11  ;;  %v20782_v36 = vld [vmem:[#allocation11_spill] sm:$0xff] }
 0x6e6   : > { %v8281_v3 = vpack.c.bf16 %v8259_v47, %v8258_v60  ;;  %v8102_v17 = vmax.f32 %v8070_v45, 0.0  ;;  %v8103_v48 = vmax.f32 %v8071_v56, 0.0  ;;  %v18640_v55 = vsel %vm516_vm1, %v8177_v11, %v8179_v62  ;;  %v20783_v60 = vld [vmem:[#allocation15_spill] sm:$0xff]  ;;  %v20784_v47 = vld [vmem:[#allocation14_spill] sm:$0xff] }
 0x6e7   : > { %v18643_v2 = vsel %vm516_vm1, %v8179_v62, %v8181_v9  ;;  %v7998_v59 = vmul.f32 %v18392_v5, %v18275_v12  ;;  %v8072_v14 = vadd.f32 %v18406_v39, %v8033_v16  ;;  %v8073_v61 = vadd.f32 %v18406_v39, %v8034_v58 }
 0x6e8   : > { %13200 = vmatmul.mubr.msk.bf16.gmra.mrb[44].mxu0 %vm4855_vm8, %v8280_v20  ;;  %v8260_v6 = vmul.f32 %v18634_v38, %v20781_v25  ;;  %v8261_v49 = vmul.f32 %v18637_v31, %v20782_v36  ;;  %v8183_v24 = vrot.slane %v8100_v40, 7  ;;  %v8185_v11 = vrot.slane %v8101_v4, 7 }
 0x6e9   : > { %13203 = vmatprep.mubr.msk.bf16.mxu0 %vm4855_vm8, %v8281_v3  ;;  %v8262_v50 = vmul.f32 %v18640_v55, %v20783_v60  ;;  %v8263_v12 = vmul.f32 %v18643_v2, %v20784_v47  ;;  %v8074_v5 = vadd.f32 %v18406_v39, %v8035_v21  ;;  %v8075_v45 = vadd.f32 %v18406_v39, %v8036_v57 }
 0x6ea   : > { %v8187_v56 = vrot.slane %v8102_v17, 7  ;;  %v8189_v62 = vrot.slane %v8103_v48, 7  ;;  %v8037_v16 = vmul.f32 %v18397_v1, %v7998_v59  ;;  %v8104_v58 = vmax.f32 %v8072_v14, 0.0  ;;  %v20786_v48 = vld [vmem:[#allocation56_spill] sm:$0xff] }
 0x6eb   : > { %v8282_v20 = vpack.c.bf16 %v8261_v49, %v8260_v6  ;;  %v8105_v3 = vmax.f32 %v8073_v61, 0.0  ;;  %v18663_v40 = vsel %vm516_vm1, %v8181_v9, %v8183_v24  ;;  %v18666_v4 = vsel %vm516_vm1, %v8183_v24, %v8185_v11  ;;  %v20785_v9 = vld [vmem:[#allocation57_spill] sm:$0xff]  ;;  %v20787_v6 = vld [vmem:[#allocation58_spill] sm:$0xff] }
 0x6ec   : > { %v8283_v25 = vpack.c.bf16 %v8263_v12, %v8262_v50  ;;  %v8106_v36 = vmax.f32 %v8074_v5, 0.0  ;;  %v8107_v60 = vmax.f32 %v8075_v45, 0.0  ;;  %v18669_v21 = vsel %vm516_vm1, %v8185_v11, %v8187_v56  ;;  %v20788_v24 = vld [vmem:[#allocation21_spill] sm:$0xff] }
 0x6ed   : > { %v18672_v57 = vsel %vm516_vm1, %v8187_v56, %v8189_v62  ;;  %v8076_v1 = vadd.f32 %v18406_v39, %v8037_v16  ;;  %v8264_v17 = vmul.f32 %v18663_v40, %v20785_v9  ;;  %v8265_v59 = vmul.f32 %v18666_v4, %v20786_v48  ;;  %v20792_v9 = vld [vmem:[#allocation61_spill] sm:$0xff] }
 0x6ee   : > { %v8191_v14 = vrot.slane %v8104_v58, 7  ;;  %v8193_v61 = vrot.slane %v8105_v3, 7  ;;  %v8266_v49 = vmul.f32 %v18669_v21, %v20787_v6  ;;  %v8267_v11 = vmul.f32 %v18672_v57, %v20788_v24  ;;  %v20793_v6 = vld [vmem:[#allocation64_spill] sm:$0xff]  ;;  %v20794_v24 = vld [vmem:[#allocation63_spill] sm:$0xff] }
 0x6ef   : > { %v8195_v50 = vrot.slane %v8106_v36, 7  ;;  %v8197_v47 = vrot.slane %v8107_v60, 7  ;;  %v8284_v12 = vpack.c.bf16 %v8265_v59, %v8264_v17  ;;  %v8108_v5 = vmax.f32 %v8076_v1, 0.0  ;;  %v20791_v60 = vld [vmem:[#allocation62_spill] sm:$0xff] }
 0x6f0   : > { %13204 = vmatmul.mubr.msk.bf16.gmra.mrb[48].mxu0 %vm4855_vm8, %v8282_v20  ;;  %v18686_v39 = vsel %vm516_vm1, %v8189_v62, %v8191_v14  ;;  %v18689_v45 = vsel %vm516_vm1, %v8191_v14, %v8193_v61  ;;  %v8285_v56 = vpack.c.bf16 %v8267_v11, %v8266_v49  ;;  %v20789_v20 = vld [vmem:[#allocation60_spill] sm:$0xff]  ;;  %v8690_v19 = vpack.c.bf16 %v18666_v4, %v18663_v40 }
 0x6f1   : > { %13207 = vmatprep.mubr.msk.bf16.mxu0 %vm4855_vm8, %v8283_v25  ;;  %v18692_v16 = vsel %vm516_vm1, %v8193_v61, %v8195_v50  ;;  %v18695_v58 = vsel %vm516_vm1, %v8195_v50, %v8197_v47  ;;  %v8268_v3 = vmul.f32 %v18686_v39, %v20789_v20  ;;  %v20790_v25 = vld [vmem:[#allocation59_spill] sm:$0xff]  ;;  %v8199_v36 = vrot.slane %v8108_v5, 7  ;;  %v14499_v20 = vld [vmem:[%s19536_s8 + $0x18] sm:$0xff]  }
 0x6f2   : > { %v8269_v62 = vmul.f32 %v18689_v45, %v20790_v25  ;;  %v8270_v1 = vmul.f32 %v18692_v16, %v20791_v60  ;;  %v8271_v17 = vmul.f32 %v18695_v58, %v20792_v9  ;;  %v18729_v5 = vsel %vm516_vm1, %v18490_v18, 0.0  ;;  %v14572_v18 = vld [vmem:[%s19528_s0 + $0x10] sm:$0xff]  }
 0x6f3   : > { %v18709_v59 = vsel %vm516_vm1, %v8199_v36, %v18412_v46  ;;  %v18712_v14 = vsel %vm516_vm1, %v8197_v47, %v8199_v36  ;;  %v14570_v46 = vld [vmem:[%s19528_s0] sm:$0xff]   ;;  %20795 = vst [vmem:[#allocation187_spill] sm:$0xff] %v18729_v5  ;;  %v9738_v25 = vpack.c.bf16 %v18507_v15, %v18419_v42  ;;  %v14571_v36 = vld [vmem:[%s19528_s0 + $0x8] sm:$0xff]   ;;  %v8692_v0 = vpack.c.bf16 %v18689_v45, %v18686_v39 }
 0x6f4   : > { %v8286_v48 = vpack.c.bf16 %v8269_v62, %v8268_v3  ;;  %v8287_v61 = vpack.c.bf16 %v8271_v17, %v8270_v1  ;;  %v8272_v49 = vmul.f32 %v18712_v14, %v20793_v6  ;;  %v8273_v11 = vmul.f32 %v18709_v59, %v20794_v24  ;;  %v18755_v17 = vld [vmem:[%s19536_s8 + $0x20] sm:$0xff]  }
 0x6f5   : > { %v8694_v50 = vpack.c.bf16 %v18709_v59, %v18712_v14  ;;  %v9739_v62 = vpack.c.bf16 %v18729_v5, %v18729_v5  ;;  %v9746_v1 = vshll.u32 %v9738_v25, 16 }
 0x6f7   : > { %v8814_v47 = vshll.u32 %v8694_v50, 16  ;;  %v8818_v3 = vshrl.u32 %v8694_v50, 16  ;;  %v9754_v9 = vshll.u32 %v9739_v62, 16  ;;  %v14574_v50 = vld [vmem:[%s19528_s0 + $0x20] sm:$0xff]  }
 0x6f8   : > { %13208 = vmatmul.mubr.msk.bf16.gmra.mrb[52].mxu0 %vm4855_vm8, %v8284_v12  ;;  %v8288_v12 = vpack.c.bf16 %v8273_v11, %v8272_v49  ;;  %v14573_v11 = vld [vmem:[%s19528_s0 + $0x18] sm:$0xff]   ;;  %v20800_v62 = vld [vmem:[#allocation110_spill] sm:$0xff] }
 0x6f9   : > { %13211 = vmatprep.mubr.msk.bf16.mxu0 %vm4855_vm8, %v8285_v56  ;;  %v18731_v56 = vrot.slane %v8814_v47, 1  ;;  %v9756_v49 = vrot.slane %v9754_v9, 1  ;;  %v20798_v47 = vld [vmem:[#allocation4_spill] sm:$0xff] }
 0x6fb   : > { %v18750_v60 = vor.u32 %v8818_v3, %v18731_v56  ;;  %v20799_v3 = vld [vmem:[#allocation111_spill] sm:$0xff] }
 0x700   : > { %13212 = vmatmul.mubr.msk.bf16.gmra.mrb[56].mxu0 %vm4855_vm8, %v8286_v48  ;;  %v9748_v48 = vrot.slane %v9746_v1, 1 }
 0x701   : > { %13215 = vmatprep.mubr.msk.bf16.mxu0 %vm4855_vm8, %v8287_v61  ;;  %v9750_v61 = vshrl.u32 %v9738_v25, 16  ;;  %v10000_v25 = vmul.f32 %v18507_v15, %v20799_v3 }
 0x703   : > { %v9752_v6 = vor.u32 %v9750_v61, %v9748_v48  ;;  %v14577_v61 = vld [vmem:[%s19528_s0 + $0x38] sm:$0xff]  }
 0x705   : > { %v18763_v24 = vsel %vm1361_vm2, %v9752_v6, %v9756_v49  ;;  %v14578_v49 = vld [vmem:[%s19528_s0 + $0x40] sm:$0xff]  }
 0x706   : > { %20797 = vst [vmem:[#allocation191_spill] sm:$0xff] %v18763_v24 }
 0x708   : > { %13216 = vmatmul.mubr.msk.bf16.gmra.mrb[60].mxu0 %vm4855_vm8, %v8288_v12  ;;  %v14575_v12 = vld [vmem:[%s19528_s0 + $0x28] sm:$0xff]  }
 0x709   : > { %13221 = vmatprep.mubr.msk.bf16.mxu0 %vm1125_vm6, %v14570_v46  ;;  %v14576_v46 = vld [vmem:[%s19528_s0 + $0x30] sm:$0xff]  }
 0x710   : > { %13222 = vmatmul.mubr.msk.bf16.vlgmr.msra.gmra.mrb[32].mxu0 %vm1125_vm6, %v14571_v36  ;;  %v10001_v36 = vmul.f32 %v18729_v5, %v20800_v62 }
 0x711   : > { %13254 = vmatpush3.bf16.msra.mxu0 %v18521_v22  ;;  %13225 = vmatprep.mubr.msk.bf16.mxu0 %vm1125_vm6, %v14572_v18  ;;  %v18759_v22 = vsel %vm1361_vm2, %v18750_v60, %v9748_v48 }
 0x712   : > { %13255 = vmatprep.subr.bf16.mxu0 %v14499_v20  ;;  %20796 = vst [vmem:[#allocation188_spill] sm:$0xff] %v18759_v22  ;;  %v10018_v1 = vpack.c.bf16 %v10001_v36, %v10001_v36  ;;  %v14582_v36 = vld [vmem:[%s19528_s0 + $0x60] sm:$0xff]  }
 0x713   : > { %v20818_v22 = vld [vmem:[#allocation2_spill] sm:$0xff] }
 0x714   : > { %v10072_v48 = vrot.slane %v10018_v1, 1  ;;  %v14583_v1 = vld [vmem:[%s19528_s0 + $0x68] sm:$0xff]  }
 0x715   : > { %13256 = vmatpush3.bf16.msra.mxu0 %v14499_v20  ;;  %v9999_v20 = vmul.f32 %v18419_v42, %v20798_v47 }
 0x716   : > { %13289 = vmatprep.subr.bf16.mxu0 %v18755_v17 }
 0x717   : > { %v10017_v18 = vpack.c.bf16 %v10000_v25, %v9999_v20  ;;  %v14581_v25 = vld [vmem:[%s19528_s0 + $0x58] sm:$0xff]  }
 0x718   : > { %13226 = vmatmul.mubr.msk.bf16.gmra.mrb[36].mxu0 %vm1125_vm6, %v14573_v11 }
 0x719   : > { %13229 = vmatprep.mubr.msk.bf16.mxu0 %vm1125_vm6, %v14574_v50  ;;  %v18787_v9 = vrot.slane %v10017_v18, 1  ;;  %v14579_v50 = vld [vmem:[%s19528_s0 + $0x48] sm:$0xff]   ;;  %v8680_v18 = vpack.c.bf16 %v18476_v51, %v18493_v23 }
 0x71b   : > { %20801 = vst [vmem:[#allocation90_spill] sm:$0xff] %v18787_v9  ;;  %v18799_v11 = vsel %vm1999_vm7, %v18787_v9, %v10072_v48  ;;  %v8702_v48 = vshll.u32 %v8680_v18, 16  ;;  %v8706_v52 = vshrl.u32 %v8680_v18, 16  ;;  %v14501_v18 = vld [vmem:[%s19536_s8 + $0x28] sm:$0xff]  }
 0x71c   : > { %20802 = vst [vmem:[#allocation200_spill] sm:$0xff] %v18799_v11 }
 0x720   : > { %13230 = vmatmul.mubr.msk.bf16.gmra.mrb[40].mxu0 %vm1125_vm6, %v14575_v12  ;;  %v14580_v12 = vld [vmem:[%s19528_s0 + $0x50] sm:$0xff]  }
 0x721   : > { %13233 = vmatprep.mubr.msk.bf16.mxu0 %vm1125_vm6, %v14576_v46  ;;  %v20803_v46 = vmov 0.0  }
 0x722   : > { %v18811_v47 = vpack.c.bf16 %v20803_v46, %v18729_v5  ;;  %v10887_v46 = vmul.f32 %v18507_v15, %v20641_v44  ;;  %v8683_v44 = vpack.c.bf16 %v18527_v7, %v18524_v54 }
 0x724   : > { %20804 = vst [vmem:[#allocation280_spill] sm:$0xff] %v18811_v47  ;;  %v10639_v20 = vshll.u32 %v18811_v47, 16  ;;  %v8688_v47 = vpack.c.bf16 %v18637_v31, %v18634_v38 }
 0x726   : > { %v18814_v3 = vrot.slane %v10639_v20, 1  ;;  %v20807_v20 = vld [vmem:[#allocation190_spill] sm:$0xff] }
 0x728   : > { %13234 = vmatmul.mubr.msk.bf16.gmra.mrb[44].mxu0 %vm1125_vm6, %v14577_v61  ;;  %20805 = vst [vmem:[#allocation198_spill] sm:$0xff] %v18814_v3  ;;  %v18822_v62 = vsel %vm1361_vm2, %v9752_v6, %v18814_v3  ;;  %v8681_v6 = vpack.c.bf16 %v18488_v13, %v18483_v10  ;;  %v14584_v61 = vld [vmem:[%s19528_s0 + $0x70] sm:$0xff]  }
 0x729   : > { %13237 = vmatprep.mubr.msk.bf16.mxu0 %vm1125_vm6, %v14578_v49  ;;  %20806 = vst [vmem:[#allocation199_spill] sm:$0xff] %v18822_v62  ;;  %v10886_v49 = vmul.f32 %v18419_v42, %v20640_v8 }
 0x730   : > { %13238 = vmatmul.mubr.msk.bf16.gmra.mrb[48].mxu0 %vm1125_vm6, %v14579_v50  ;;  %v8704_v50 = vrot.slane %v8702_v48, 1 }
 0x731   : > { %13241 = vmatprep.mubr.msk.bf16.mxu0 %vm1125_vm6, %v14580_v12  ;;  %v8710_v12 = vshll.u32 %v8681_v6, 16 }
 0x732   : > { %v8705_v8 = vsel %vm1361_vm2, %v20643_v37, %v8704_v50 }
 0x733   : > { %v8712_v48 = vrot.slane %v8710_v12, 1  ;;  %v8726_v12 = vshll.u32 %v8683_v44, 16 }
 0x738   : > { %13242 = vmatmul.mubr.msk.bf16.gmra.mrb[52].mxu0 %vm1125_vm6, %v14581_v25  ;;  %v10888_v25 = vmul.f32 %v18729_v5, %v20807_v20 }
 0x739   : > { %13245 = vmatprep.mubr.msk.bf16.mxu0 %vm1125_vm6, %v14582_v36  ;;  %v8682_v36 = vpack.c.bf16 %v18516_v63, %v18513_v28 }
 0x73a   : > { %v10904_v43 = vpack.c.bf16 %v20642_v34, %v10888_v25  ;;  %v8714_v34 = vshrl.u32 %v8681_v6, 16  ;;  %v8708_v25 = vor.u32 %v8706_v52, %v8704_v50  ;;  %v8728_v6 = vrot.slane %v8726_v12, 1 }
 0x73b   : > { %v8685_v50 = vpack.c.bf16 %v18567_v35, %v18564_v30 }
 0x73c   : > { %v8716_v37 = vor.u32 %v8714_v34, %v8712_v48  ;;  %v8730_v34 = vshrl.u32 %v8683_v44, 16 }
 0x73d   : > { %v8742_v12 = vshll.u32 %v8685_v50, 16 }
 0x740   : > { %13246 = vmatmul.mubr.msk.bf16.gmra.mrb[56].mxu0 %vm1125_vm6, %v14583_v1  ;;  %v10903_v1 = vpack.c.bf16 %v10887_v46, %v10886_v49  ;;  %v18860_v49 = vrot.slane %v10904_v43, 1  ;;  %v8718_v46 = vshll.u32 %v8682_v36, 16  ;;  %v18873_v43 = vsel %vm1361_vm2, %v8708_v25, %v8712_v48  ;;  %v18888_v48 = vld [vmem:[%s19536_s8 + $0x30] sm:$0xff]  }
 0x741   : > { %13249 = vmatprep.mubr.msk.bf16.mxu0 %vm1125_vm6, %v14584_v61  ;;  %v14585_v61 = vld [vmem:[%s19528_s0 + $0x78] sm:$0xff]   ;;  %v8732_v25 = vor.u32 %v8730_v34, %v8728_v6 }
 0x742   : > { %v18857_v20 = vrot.slane %v10903_v1, 1  ;;  %20809 = vst [vmem:[#allocation197_spill] sm:$0xff] %v18860_v49  ;;  %v8720_v3 = vrot.slane %v8718_v46, 1  ;;  %v8684_v1 = vpack.c.bf16 %v18561_v27, %v18558_v33 }
 0x744   : > { %20808 = vst [vmem:[#allocation43_spill] sm:$0xff] %v18857_v20  ;;  %v18878_v52 = vsel %vm1361_vm2, %v8716_v37, %v8720_v3  ;;  %v8734_v46 = vshll.u32 %v8684_v1, 16 }
 0x748   : > { %13250 = vmatmul.mubr.msk.bf16.gmra.mrb[60].mxu0 %vm1125_vm6, %v14585_v61  ;;  %v18865_v61 = vsel %vm1999_vm7, %v18857_v20, %v18860_v49  ;;  %v8736_v49 = vrot.slane %v8734_v46, 1 }
 0x749   : > { %13257 = vmatprep.mubr.msk.bf16.mxu0 %vm4855_vm8, %v8705_v8  ;;  %20810 = vst [vmem:[#allocation205_spill] sm:$0xff] %v18865_v61  ;;  %v8722_v8 = vshrl.u32 %v8682_v36, 16  ;;  %v8744_v61 = vrot.slane %v8742_v12, 1 }
 0x74a   : > { %v18899_v44 = vsel %vm1361_vm2, %v8732_v25, %v8736_v49 }
 0x74b   : > { %v8724_v37 = vor.u32 %v8722_v8, %v8720_v3  ;;  %v8687_v3 = vpack.c.bf16 %v18605_v41, %v18602_v26  ;;  %v8746_v8 = vshrl.u32 %v8685_v50, 16 }
 0x74d   : > { %v18894_v36 = vsel %vm1361_vm2, %v8724_v37, %v8728_v6  ;;  %v8748_v20 = vor.u32 %v8746_v8, %v8744_v61  ;;  %v8758_v6 = vshll.u32 %v8687_v3, 16  ;;  %v8762_v50 = vshrl.u32 %v8687_v3, 16 }
 0x74e   : > { %v8770_v3 = vshrl.u32 %v8688_v47, 16 }
 0x74f   : > { %v8760_v62 = vrot.slane %v8758_v6, 1 }
 0x750   : > { %13258 = vmatmul.mubr.msk.bf16.vlgmr.msra.gmra.mrb[32].mxu0 %vm4855_vm8, %v18873_v43 }
 0x751   : > { %13290 = vmatpush3.bf16.msra.mxu0 %v18755_v17  ;;  %13261 = vmatprep.mubr.msk.bf16.mxu0 %vm4855_vm8, %v18878_v52  ;;  %v8686_v17 = vpack.c.bf16 %v18599_v53, %v18596_v32 }
 0x752   : > { %13291 = vmatprep.subr.bf16.mxu0 %v14501_v18 }
 0x753   : > { %v8750_v34 = vshll.u32 %v8686_v17, 16 }
 0x755   : > { %13292 = vmatpush3.bf16.msra.mxu0 %v14501_v18  ;;  %v8738_v18 = vshrl.u32 %v8684_v1, 16  ;;  %v8752_v37 = vrot.slane %v8750_v34, 1  ;;  %v8689_v1 = vpack.c.bf16 %v18643_v2, %v18640_v55  ;;  %v8764_v34 = vor.u32 %v8762_v50, %v8760_v62 }
 0x756   : > { %13325 = vmatprep.subr.bf16.mxu0 %v18888_v48 }
 0x757   : > { %v8740_v46 = vor.u32 %v8738_v18, %v8736_v49  ;;  %v18913_v12 = vsel %vm1361_vm2, %v8748_v20, %v8752_v37  ;;  %v8754_v49 = vshrl.u32 %v8686_v17, 16  ;;  %v8766_v18 = vshll.u32 %v8688_v47, 16 }
 0x758   : > { %13262 = vmatmul.mubr.msk.bf16.gmra.mrb[36].mxu0 %vm4855_vm8, %v18894_v36  ;;  %v8691_v17 = vpack.c.bf16 %v18672_v57, %v18669_v21  ;;  %v8693_v47 = vpack.c.bf16 %v18695_v58, %v18692_v16 }
 0x759   : > { %13265 = vmatprep.mubr.msk.bf16.mxu0 %vm4855_vm8, %v18899_v44  ;;  %v18908_v25 = vsel %vm1361_vm2, %v8740_v46, %v8744_v61  ;;  %v8756_v8 = vor.u32 %v8754_v49, %v8752_v37  ;;  %v8774_v61 = vshll.u32 %v8689_v1, 16  ;;  %v8768_v46 = vrot.slane %v8766_v18, 1 }
 0x75a   : > { %v8778_v37 = vshrl.u32 %v8689_v1, 16  ;;  %v8782_v49 = vshll.u32 %v8690_v19, 16  ;;  %v8786_v1 = vshrl.u32 %v8690_v19, 16  ;;  %v8802_v19 = vshrl.u32 %v8692_v0, 16 }
 0x75b   : > { %v18922_v20 = vsel %vm1361_vm2, %v8756_v8, %v8760_v62  ;;  %v18927_v6 = vsel %vm1361_vm2, %v8764_v34, %v8768_v46  ;;  %v8776_v5 = vrot.slane %v8774_v61, 1  ;;  %v8772_v50 = vor.u32 %v8770_v3, %v8768_v46 }
 0x75c   : > { %v8790_v62 = vshll.u32 %v8691_v17, 16  ;;  %v8784_v8 = vrot.slane %v8782_v49, 1  ;;  %v8794_v46 = vshrl.u32 %v8691_v17, 16  ;;  %v8798_v3 = vshll.u32 %v8692_v0, 16 }
 0x75d   : > { %v8780_v18 = vor.u32 %v8778_v37, %v8776_v5  ;;  %v18936_v34 = vsel %vm1361_vm2, %v8772_v50, %v8776_v5  ;;  %v8806_v5 = vshll.u32 %v8693_v47, 16  ;;  %v8810_v17 = vshrl.u32 %v8693_v47, 16 }
 0x75e   : > { %v8792_v11 = vrot.slane %v8790_v62, 1  ;;  %v8788_v37 = vor.u32 %v8786_v1, %v8784_v8  ;;  %v8800_v50 = vrot.slane %v8798_v3, 1  ;;  %v20811_v1 = vld [vmem:[#allocation34_spill] sm:$0xff]  ;;  %v20812_v3 = vld [vmem:[#allocation36_spill] sm:$0xff] }
 0x75f   : > { %v18941_v61 = vsel %vm1361_vm2, %v8780_v18, %v8784_v8  ;;  %v8808_v62 = vrot.slane %v8806_v5, 1 }
 0x760   : > { %13266 = vmatmul.mubr.msk.bf16.gmra.mrb[40].mxu0 %vm4855_vm8, %v18908_v25  ;;  %v8796_v49 = vor.u32 %v8794_v46, %v8792_v11  ;;  %v18948_v9 = vsel %vm1361_vm2, %v8788_v37, %v8792_v11  ;;  %v8804_v24 = vor.u32 %v8802_v19, %v8800_v50  ;;  %v9079_v46 = vmul.f32 %v18493_v23, %v20811_v1 }
 0x761   : > { %13269 = vmatprep.mubr.msk.bf16.mxu0 %vm4855_vm8, %v18913_v12  ;;  %v8812_v8 = vor.u32 %v8810_v17, %v8808_v62  ;;  %v9080_v11 = vmul.f32 %v18476_v51, %v20812_v3  ;;  %v8695_v37 = vpack.c.bf16 %v18419_v42, %v18419_v42  ;;  %v20816_v17 = vld [vmem:[#allocation77_spill] sm:$0xff] }
 0x762   : > { %v18953_v18 = vsel %vm1361_vm2, %v8796_v49, %v8800_v50  ;;  %v18964_v49 = vsel %vm1361_vm2, %v8804_v24, %v8808_v62  ;;  %v20815_v50 = vld [vmem:[#allocation37_spill] sm:$0xff]  ;;  %v9082_v1 = vmul.f32 %v18488_v13, %v20816_v17 }
 0x763   : > { %20813 = vst [vmem:[#allocation204_spill] sm:$0xff] %v18964_v49  ;;  %v18970_v0 = vsel %vm1361_vm2, %v8812_v8, %v18731_v56  ;;  %v9110_v47 = vpack.c.bf16 %v9080_v11, %v9079_v46  ;;  %v8822_v5 = vshll.u32 %v8695_v37, 16  ;;  %v9081_v19 = vmul.f32 %v18483_v10, %v20815_v50  ;;  %v20817_v62 = vld [vmem:[#allocation97_spill] sm:$0xff]  ;;  %v20819_v50 = vld [vmem:[#allocation3_spill] sm:$0xff] }
 0x764   : > { %20814 = vst [vmem:[#allocation207_spill] sm:$0xff] %v18970_v0  ;;  %v9083_v3 = vmul.f32 %v18513_v28, %v20817_v62  ;;  %v9085_v17 = vmul.f32 %v18524_v54, %v20819_v50  ;;  %v20820_v62 = vld [vmem:[#allocation87_spill] sm:$0xff] }
 0x765   : > { %v9147_v24 = vrot.slane %v9110_v47, 1  ;;  %v8824_v56 = vrot.slane %v8822_v5, 1  ;;  %v9111_v46 = vpack.c.bf16 %v9082_v1, %v9081_v19  ;;  %v20822_v19 = vld [vmem:[#allocation84_spill] sm:$0xff] }
 0x766   : > { %v9088_v1 = vmul.f32 %v18561_v27, %v20822_v19 }
 0x767   : > { %v8825_v8 = vsel %vm1361_vm2, %v18750_v60, %v8824_v56  ;;  %v9148_v11 = vsel %vm1999_vm7, %v20644_v29, %v9147_v24  ;;  %v9149_v47 = vrot.slane %v9111_v46, 1  ;;  %v14503_v29 = vld [vmem:[%s19536_s8 + $0x38] sm:$0xff]  }
 0x768   : > { %13270 = vmatmul.mubr.msk.bf16.gmra.mrb[44].mxu0 %vm4855_vm8, %v18922_v20 }
 0x769   : > { %13273 = vmatprep.mubr.msk.bf16.mxu0 %vm4855_vm8, %v18927_v6 }
 0x770   : > { %13274 = vmatmul.mubr.msk.bf16.gmra.mrb[48].mxu0 %vm4855_vm8, %v18936_v34 }
 0x771   : > { %13277 = vmatprep.mubr.msk.bf16.mxu0 %vm4855_vm8, %v18941_v61 }
 0x778   : > { %13278 = vmatmul.mubr.msk.bf16.gmra.mrb[52].mxu0 %vm4855_vm8, %v18948_v9 }
 0x779   : > { %13281 = vmatprep.mubr.msk.bf16.mxu0 %vm4855_vm8, %v18953_v18 }
 0x780   : > { %13282 = vmatmul.mubr.msk.bf16.gmra.mrb[56].mxu0 %vm4855_vm8, %v18964_v49  ;;  %v9084_v49 = vmul.f32 %v18516_v63, %v20818_v22  ;;  %v9086_v22 = vmul.f32 %v18527_v7, %v20820_v62 }
 0x781   : > { %13285 = vmatprep.mubr.msk.bf16.mxu0 %vm4855_vm8, %v18970_v0  ;;  %v20821_v0 = vld [vmem:[#allocation104_spill] sm:$0xff] }
 0x782   : > { %v9112_v37 = vpack.c.bf16 %v9084_v49, %v9083_v3  ;;  %v9087_v60 = vmul.f32 %v18558_v33, %v20821_v0  ;;  %v9150_v49 = vsel %vm1999_vm7, %v9147_v24, %v9149_v47  ;;  %v9113_v3 = vpack.c.bf16 %v9086_v22, %v9085_v17  ;;  %v19007_v0 = vld [vmem:[%s19536_s8 + $0x40] sm:$0xff]  }
 0x784   : > { %v9151_v5 = vrot.slane %v9112_v37, 1  ;;  %v9153_v46 = vrot.slane %v9113_v3, 1  ;;  %v20824_v37 = vld [vmem:[#allocation131_spill] sm:$0xff] }
 0x785   : > { %v9090_v50 = vmul.f32 %v18567_v35, %v20824_v37 }
 0x786   : > { %v9152_v56 = vsel %vm1999_vm7, %v9149_v47, %v9151_v5  ;;  %v20825_v47 = vld [vmem:[#allocation132_spill] sm:$0xff] }
 0x787   : > { %v9091_v62 = vmul.f32 %v18596_v32, %v20825_v47  ;;  %v20829_v47 = vld [vmem:[#allocation135_spill] sm:$0xff] }
 0x788   : > { %13286 = vmatmul.mubr.msk.bf16.gmra.mrb[60].mxu0 %vm4855_vm8, %v8825_v8  ;;  %v9114_v8 = vpack.c.bf16 %v9088_v1, %v9087_v60  ;;  %v9154_v60 = vsel %vm1999_vm7, %v9151_v5, %v9153_v46  ;;  %v20830_v5 = vld [vmem:[#allocation136_spill] sm:$0xff] }
 0x789   : > { %13293 = vmatprep.mubr.msk.bf16.mxu0 %vm4855_vm8, %v9148_v11  ;;  %v20823_v11 = vld [vmem:[#allocation130_spill] sm:$0xff] }
 0x78a   : > { %v9089_v24 = vmul.f32 %v18564_v30, %v20823_v11  ;;  %v9155_v17 = vrot.slane %v9114_v8, 1  ;;  %v20828_v11 = vld [vmem:[#allocation134_spill] sm:$0xff] }
 0x78b   : > { %v9094_v37 = vmul.f32 %v18605_v41, %v20828_v11 }
 0x78c   : > { %v9115_v19 = vpack.c.bf16 %v9090_v50, %v9089_v24  ;;  %v9156_v1 = vsel %vm1999_vm7, %v9153_v46, %v9155_v17  ;;  %v9096_v24 = vmul.f32 %v18637_v31, %v20830_v5 }
 0x78e   : > { %v9157_v3 = vrot.slane %v9115_v19, 1  ;;  %v20831_v19 = vld [vmem:[#allocation91_spill] sm:$0xff] }
 0x790   : > { %13294 = vmatmul.mubr.msk.bf16.vlgmr.msra.gmra.mrb[32].mxu0 %vm4855_vm8, %v9150_v49  ;;  %v9158_v50 = vsel %vm1999_vm7, %v9155_v17, %v9157_v3  ;;  %v20834_v17 = vld [vmem:[#allocation17_spill] sm:$0xff] }
 0x791   : > { %13326 = vmatpush3.bf16.msra.mxu0 %v18888_v48  ;;  %13297 = vmatprep.mubr.msk.bf16.mxu0 %vm4855_vm8, %v9152_v56  ;;  %v20826_v48 = vld [vmem:[#allocation133_spill] sm:$0xff]  ;;  %v20827_v56 = vld [vmem:[#allocation94_spill] sm:$0xff] }
 0x792   : > { %13327 = vmatprep.subr.bf16.mxu0 %v14503_v29  ;;  %v9092_v22 = vmul.f32 %v18599_v53, %v20826_v48  ;;  %v9093_v8 = vmul.f32 %v18602_v26, %v20827_v56  ;;  %v9095_v48 = vmul.f32 %v18634_v38, %v20829_v47  ;;  %v20833_v47 = vld [vmem:[#allocation18_spill] sm:$0xff] }
 0x793   : > { %v9099_v5 = vmul.f32 %v18663_v40, %v20833_v47  ;;  %v20837_v47 = vld [vmem:[#allocation24_spill] sm:$0xff] }
 0x794   : > { %v9116_v49 = vpack.c.bf16 %v9092_v22, %v9091_v62  ;;  %v9117_v46 = vpack.c.bf16 %v9094_v37, %v9093_v8  ;;  %v9118_v22 = vpack.c.bf16 %v9096_v24, %v9095_v48  ;;  %v9100_v8 = vmul.f32 %v18666_v4, %v20834_v17 }
 0x795   : > { %13328 = vmatpush3.bf16.msra.mxu0 %v14503_v29  ;;  %v9103_v17 = vmul.f32 %v18686_v39, %v20837_v47  ;;  %v20841_v47 = vld [vmem:[#allocation30_spill] sm:$0xff] }
 0x796   : > { %13361 = vmatprep.subr.bf16.mxu0 %v19007_v0  ;;  %v9159_v29 = vrot.slane %v9116_v49, 1  ;;  %v20832_v49 = vld [vmem:[#allocation137_spill] sm:$0xff]  ;;  %v9163_v11 = vrot.slane %v9118_v22, 1  ;;  %v9120_v24 = vpack.c.bf16 %v9100_v8, %v9099_v5  ;;  %v20836_v22 = vld [vmem:[#allocation138_spill] sm:$0xff] }
 0x797   : > { %v9098_v56 = vmul.f32 %v18643_v2, %v20832_v49 }
 0x798   : > { %13298 = vmatmul.mubr.msk.bf16.gmra.mrb[36].mxu0 %vm4855_vm8, %v9154_v60  ;;  %v9160_v62 = vsel %vm1999_vm7, %v9157_v3, %v9159_v29  ;;  %v9161_v60 = vrot.slane %v9117_v46, 1  ;;  %v20835_v46 = vld [vmem:[#allocation20_spill] sm:$0xff]  ;;  %v9167_v49 = vrot.slane %v9120_v24, 1  ;;  %v20840_v24 = vld [vmem:[#allocation139_spill] sm:$0xff] }
 0x799   : > { %13301 = vmatprep.mubr.msk.bf16.mxu0 %vm4855_vm8, %v9156_v1  ;;  %v9097_v1 = vmul.f32 %v18640_v55, %v20831_v19  ;;  %v9102_v19 = vmul.f32 %v18672_v57, %v20836_v22 }
 0x79a   : > { %v9162_v37 = vsel %vm1999_vm7, %v9159_v29, %v9161_v60  ;;  %v9164_v48 = vsel %vm1999_vm7, %v9161_v60, %v9163_v11  ;;  %v20838_v29 = vld [vmem:[#allocation23_spill] sm:$0xff] }
 0x79b   : > { %v9119_v3 = vpack.c.bf16 %v9098_v56, %v9097_v1  ;;  %v9104_v1 = vmul.f32 %v18689_v45, %v20838_v29  ;;  %v9107_v29 = vmul.f32 %v18712_v14, %v20841_v47  ;;  %v20845_v47 = vld [vmem:[#allocation140_spill] sm:$0xff] }
 0x79d   : > { %v9122_v8 = vpack.c.bf16 %v9104_v1, %v9103_v17 }
 0x79f   : > { %v9171_v22 = vrot.slane %v9122_v8, 1 }
 0x7a0   : > { %13302 = vmatmul.mubr.msk.bf16.gmra.mrb[40].mxu0 %vm4855_vm8, %v9158_v50  ;;  %v9165_v50 = vrot.slane %v9119_v3, 1  ;;  %v20839_v3 = vld [vmem:[#allocation27_spill] sm:$0xff] }
 0x7a1   : > { %13305 = vmatprep.mubr.msk.bf16.mxu0 %vm4855_vm8, %v9160_v62  ;;  %v9101_v62 = vmul.f32 %v18669_v21, %v20835_v46  ;;  %v9106_v46 = vmul.f32 %v18695_v58, %v20840_v24 }
 0x7a2   : > { %v9166_v56 = vsel %vm1999_vm7, %v9163_v11, %v9165_v50  ;;  %v9168_v5 = vsel %vm1999_vm7, %v9165_v50, %v9167_v49  ;;  %v20842_v11 = vld [vmem:[#allocation29_spill] sm:$0xff] }
 0x7a3   : > { %v9121_v60 = vpack.c.bf16 %v9102_v19, %v9101_v62  ;;  %v9108_v62 = vmul.f32 %v18709_v59, %v20842_v11 }
 0x7a5   : > { %v9124_v1 = vpack.c.bf16 %v9108_v62, %v9107_v29  ;;  %v9433_v29 = vmul.f32 %v18476_v51, %v20845_v47  ;;  %v14506_v47 = vld [vmem:[%s19536_s8 + $0x50] sm:$0xff]  }
 0x7a7   : > { %v9175_v8 = vrot.slane %v9124_v1, 1  ;;  %v20848_v1 = vld [vmem:[#allocation145_spill] sm:$0xff] }
 0x7a8   : > { %13306 = vmatmul.mubr.msk.bf16.gmra.mrb[44].mxu0 %vm4855_vm8, %v9162_v37  ;;  %v9169_v37 = vrot.slane %v9121_v60, 1  ;;  %v20843_v60 = vld [vmem:[#allocation101_spill] sm:$0xff] }
 0x7a9   : > { %13309 = vmatprep.mubr.msk.bf16.mxu0 %vm4855_vm8, %v9164_v48  ;;  %v9105_v48 = vmul.f32 %v18692_v16, %v20839_v3 }
 0x7aa   : > { %v9170_v19 = vsel %vm1999_vm7, %v9167_v49, %v9169_v37  ;;  %v9172_v17 = vsel %vm1999_vm7, %v9169_v37, %v9171_v22 }
 0x7ab   : > { %v9123_v50 = vpack.c.bf16 %v9106_v46, %v9105_v48  ;;  %v20844_v46 = vld [vmem:[#allocation141_spill] sm:$0xff] }
 0x7ac   : > { %v9432_v37 = vmul.f32 %v18493_v23, %v20844_v46  ;;  %v20851_v46 = vld [vmem:[#allocation149_spill] sm:$0xff] }
 0x7ae   : > { %v9464_v62 = vpack.c.bf16 %v9433_v29, %v9432_v37  ;;  %v9439_v37 = vmul.f32 %v18527_v7, %v20851_v46  ;;  %v20852_v29 = vld [vmem:[#allocation153_spill] sm:$0xff] }
 0x7b0   : > { %13310 = vmatmul.mubr.msk.bf16.gmra.mrb[48].mxu0 %vm4855_vm8, %v9166_v56  ;;  %v9173_v56 = vrot.slane %v9123_v50, 1  ;;  %v20847_v50 = vld [vmem:[#allocation144_spill] sm:$0xff] }
 0x7b1   : > { %13313 = vmatprep.mubr.msk.bf16.mxu0 %vm4855_vm8, %v9168_v5  ;;  %v9109_v5 = vmul.f32 %v18419_v42, %v20843_v60  ;;  %v20849_v60 = vld [vmem:[#allocation148_spill] sm:$0xff] }
 0x7b2   : > { %v9174_v3 = vsel %vm1999_vm7, %v9171_v22, %v9173_v56  ;;  %v9176_v49 = vsel %vm1999_vm7, %v9173_v56, %v9175_v8  ;;  %v20846_v22 = vld [vmem:[#allocation105_spill] sm:$0xff]  ;;  %v9436_v56 = vmul.f32 %v18513_v28, %v20848_v1 }
 0x7b3   : > { %v9125_v24 = vpack.c.bf16 %v9109_v5, %v9109_v5  ;;  %v9437_v5 = vmul.f32 %v18516_v63, %v20849_v60  ;;  %v20855_v1 = vld [vmem:[#allocation157_spill] sm:$0xff]  ;;  %v20856_v60 = vld [vmem:[#allocation162_spill] sm:$0xff] }
 0x7b5   : > { %v9177_v48 = vrot.slane %v9125_v24, 1  ;;  %v9466_v24 = vpack.c.bf16 %v9437_v5, %v9436_v56  ;;  %v9443_v56 = vmul.f32 %v18567_v35, %v20855_v1  ;;  %v9444_v5 = vmul.f32 %v18596_v32, %v20856_v60 }
 0x7b7   : > { %v9178_v11 = vsel %vm1999_vm7, %v9175_v8, %v9177_v48  ;;  %v14505_v8 = vld [vmem:[%s19536_s8 + $0x48] sm:$0xff]  }
 0x7b8   : > { %13314 = vmatmul.mubr.msk.bf16.gmra.mrb[52].mxu0 %vm4855_vm8, %v9170_v19  ;;  %v9434_v19 = vmul.f32 %v18483_v10, %v20846_v22 }
 0x7b9   : > { %13317 = vmatprep.mubr.msk.bf16.mxu0 %vm4855_vm8, %v9172_v17  ;;  %v9435_v17 = vmul.f32 %v18488_v13, %v20847_v50  ;;  %v20854_v50 = vld [vmem:[#allocation158_spill] sm:$0xff] }
 0x7c0   : > { %13318 = vmatmul.mubr.msk.bf16.gmra.mrb[56].mxu0 %vm4855_vm8, %v9174_v3  ;;  %v9465_v3 = vpack.c.bf16 %v9435_v17, %v9434_v19  ;;  %v9442_v17 = vmul.f32 %v18564_v30, %v20854_v50 }
 0x7c1   : > { %13321 = vmatprep.mubr.msk.bf16.mxu0 %vm4855_vm8, %v9176_v49  ;;  %v20850_v49 = vld [vmem:[#allocation150_spill] sm:$0xff] }
 0x7c2   : > { %v9438_v48 = vmul.f32 %v18524_v54, %v20850_v49 }
 0x7c8   : > { %13322 = vmatmul.mubr.msk.bf16.gmra.mrb[60].mxu0 %vm4855_vm8, %v9178_v11  ;;  %v9440_v11 = vmul.f32 %v18558_v33, %v20852_v29 }
 0x7c9   : > { %13329 = vmatprep.mubr.msk.bf16.mxu0 %vm4855_vm8, %v9464_v62  ;;  %v20853_v62 = vld [vmem:[#allocation156_spill] sm:$0xff] }
 0x7ca   : > { %v9441_v22 = vmul.f32 %v18561_v27, %v20853_v62 }
 0x7cc   : > { %v9468_v19 = vpack.c.bf16 %v9441_v22, %v9440_v11  ;;  %v20860_v11 = vld [vmem:[#allocation170_spill] sm:$0xff]  ;;  %v20861_v22 = vld [vmem:[#allocation172_spill] sm:$0xff] }
 0x7cd   : > { %v9448_v62 = vmul.f32 %v18634_v38, %v20860_v11 }
 0x7d0   : > { %13330 = vmatmul.mubr.msk.bf16.vlgmr.msra.gmra.mrb[32].mxu0 %vm4855_vm8, %v9465_v3  ;;  %v20857_v3 = vld [vmem:[#allocation164_spill] sm:$0xff] }
 0x7d1   : > { %13362 = vmatpush3.bf16.msra.mxu0 %v19007_v0  ;;  %13333 = vmatprep.mubr.msk.bf16.mxu0 %vm4855_vm8, %v9466_v24  ;;  %v9467_v0 = vpack.c.bf16 %v9439_v37, %v9438_v48  ;;  %v9445_v24 = vmul.f32 %v18599_v53, %v20857_v3  ;;  %v20858_v48 = vld [vmem:[#allocation166_spill] sm:$0xff]  ;;  %v20859_v37 = vld [vmem:[#allocation165_spill] sm:$0xff] }
 0x7d2   : > { %13363 = vmatprep.subr.bf16.mxu0 %v14505_v8  ;;  %v9446_v46 = vmul.f32 %v18602_v26, %v20858_v48  ;;  %v9447_v29 = vmul.f32 %v18605_v41, %v20859_v37 }
 0x7d3   : > { %v9470_v49 = vpack.c.bf16 %v9445_v24, %v9444_v5  ;;  %v20864_v5 = vld [vmem:[#allocation178_spill] sm:$0xff]  ;;  %v20865_v24 = vld [vmem:[#allocation180_spill] sm:$0xff] }
 0x7d4   : > { %v9452_v3 = vmul.f32 %v18663_v40, %v20864_v5 }
 0x7d5   : > { %13364 = vmatpush3.bf16.msra.mxu0 %v14505_v8  ;;  %v9469_v8 = vpack.c.bf16 %v9443_v56, %v9442_v17  ;;  %v20862_v17 = vld [vmem:[#allocation174_spill] sm:$0xff]  ;;  %v20863_v56 = vld [vmem:[#allocation173_spill] sm:$0xff] }
 0x7d6   : > { %13397 = vmatprep.subr.bf16.mxu0 %v14506_v47  ;;  %v9450_v1 = vmul.f32 %v18640_v55, %v20862_v17  ;;  %v9451_v60 = vmul.f32 %v18643_v2, %v20863_v56 }
 0x7d8   : > { %13334 = vmatmul.mubr.msk.bf16.gmra.mrb[36].mxu0 %vm4855_vm8, %v9467_v0  ;;  %v9449_v0 = vmul.f32 %v18637_v31, %v20861_v22 }
 0x7d9   : > { %13337 = vmatprep.mubr.msk.bf16.mxu0 %vm4855_vm8, %v9468_v19  ;;  %v9471_v19 = vpack.c.bf16 %v9447_v29, %v9446_v46  ;;  %v20866_v46 = vld [vmem:[#allocation182_spill] sm:$0xff]  ;;  %v20867_v29 = vld [vmem:[#allocation181_spill] sm:$0xff] }
 0x7da   : > { %v9472_v50 = vpack.c.bf16 %v9449_v0, %v9448_v62  ;;  %v9454_v37 = vmul.f32 %v18669_v21, %v20866_v46  ;;  %v9455_v11 = vmul.f32 %v18672_v57, %v20867_v29  ;;  %v20868_v62 = vld [vmem:[#allocation183_spill] sm:$0xff] }
 0x7db   : > { %v9456_v22 = vmul.f32 %v18686_v39, %v20868_v62  ;;  %v20869_v0 = vld [vmem:[#allocation35_spill] sm:$0xff] }
 0x7e0   : > { %13338 = vmatmul.mubr.msk.bf16.gmra.mrb[40].mxu0 %vm4855_vm8, %v9469_v8  ;;  %v9453_v8 = vmul.f32 %v18666_v4, %v20865_v24 }
 0x7e1   : > { %13341 = vmatprep.mubr.msk.bf16.mxu0 %vm4855_vm8, %v9470_v49  ;;  %v9473_v49 = vpack.c.bf16 %v9451_v60, %v9450_v1  ;;  %v20870_v1 = vld [vmem:[#allocation189_spill] sm:$0xff]  ;;  %v20871_v60 = vld [vmem:[#allocation186_spill] sm:$0xff] }
 0x7e2   : > { %v9474_v48 = vpack.c.bf16 %v9453_v8, %v9452_v3  ;;  %v9458_v56 = vmul.f32 %v18692_v16, %v20870_v1  ;;  %v9459_v5 = vmul.f32 %v18695_v58, %v20871_v60  ;;  %v20872_v3 = vld [vmem:[#allocation192_spill] sm:$0xff]  ;;  %v20873_v8 = vld [vmem:[#allocation194_spill] sm:$0xff] }
 0x7e3   : > { %v9460_v24 = vmul.f32 %v18712_v14, %v20872_v3 }
 0x7e8   : > { %13342 = vmatmul.mubr.msk.bf16.gmra.mrb[44].mxu0 %vm4855_vm8, %v9471_v19  ;;  %v9457_v19 = vmul.f32 %v18689_v45, %v20869_v0  ;;  %v14507_v0 = vld [vmem:[%s19536_s8 + $0x58] sm:$0xff]  }
 0x7e9   : > { %13345 = vmatprep.mubr.msk.bf16.mxu0 %vm4855_vm8, %v9472_v50  ;;  %v9475_v50 = vpack.c.bf16 %v9455_v11, %v9454_v37  ;;  %v20874_v37 = vld [vmem:[#allocation195_spill] sm:$0xff]  ;;  %v20875_v11 = vld [vmem:[#allocation196_spill] sm:$0xff] }
 0x7ea   : > { %v9476_v17 = vpack.c.bf16 %v9457_v19, %v9456_v22  ;;  %v9462_v29 = vmul.f32 %v18419_v42, %v20874_v37  ;;  %v9463_v62 = vmul.f32 %v18507_v15, %v20875_v11  ;;  %v14508_v19 = vld [vmem:[%s19536_s8 + $0x60] sm:$0xff]  }
 0x7eb   : > { %v20884_v37 = vld [vmem:[#allocation70_spill] sm:$0xff] }
 0x7ec   : > { %v9479_v22 = vpack.c.bf16 %v9463_v62, %v9462_v29  ;;  %v20885_v62 = vld [vmem:[#allocation71_spill] sm:$0xff] }
 0x7f0   : > { %13346 = vmatmul.mubr.msk.bf16.gmra.mrb[48].mxu0 %vm4855_vm8, %v9473_v49  ;;  %v9461_v49 = vmul.f32 %v18709_v59, %v20873_v8 }
 0x7f1   : > { %13349 = vmatprep.mubr.msk.bf16.mxu0 %vm4855_vm8, %v9474_v48  ;;  %v9477_v48 = vpack.c.bf16 %v9459_v5, %v9458_v56  ;;  %v20879_v56 = vld [vmem:[#allocation67_spill] sm:$0xff]  ;;  %v20880_v5 = vld [vmem:[#allocation68_spill] sm:$0xff] }
 0x7f2   : > { %v9478_v46 = vpack.c.bf16 %v9461_v49, %v9460_v24  ;;  %v9971_v60 = vmul.f32 %v18483_v10, %v20879_v56  ;;  %v9972_v3 = vmul.f32 %v18488_v13, %v20880_v5  ;;  %v20881_v24 = vld [vmem:[#allocation207_spill] sm:$0xff]  ;;  %v20888_v5 = vld [vmem:[#allocation73_spill] sm:$0xff] }
 0x7f4   : > { %v10003_v49 = vpack.c.bf16 %v9972_v3, %v9971_v60  ;;  %v9977_v3 = vmul.f32 %v18558_v33, %v20888_v5 }
 0x7f6   : > { %v10042_v11 = vrot.slane %v10003_v49, 1 }
 0x7f8   : > { %13350 = vmatmul.mubr.msk.bf16.gmra.mrb[52].mxu0 %vm4855_vm8, %v9475_v50 }
 0x7f9   : > { %13353 = vmatprep.mubr.msk.bf16.mxu0 %vm4855_vm8, %v9476_v17  ;;  %v20878_v17 = vld [vmem:[#allocation66_spill] sm:$0xff] }
 0x7fa   : > { %v9970_v1 = vmul.f32 %v18476_v51, %v20878_v17  ;;  %v9974_v51 = vmul.f32 %v18516_v63, %v20884_v37  ;;  %v20890_v37 = vld [vmem:[#allocation75_spill] sm:$0xff] }
 0x800   : > { %13354 = vmatmul.mubr.msk.bf16.gmra.mrb[56].mxu0 %vm4855_vm8, %v9477_v48  ;;  %v20882_v48 = vld [vmem:[#allocation188_spill] sm:$0xff] }
 0x801   : > { %13357 = vmatprep.mubr.msk.bf16.mxu0 %vm4855_vm8, %v9478_v46  ;;  %v20883_v46 = vld [vmem:[#allocation69_spill] sm:$0xff] }
 0x808   : > { %13358 = vmatmul.mubr.msk.bf16.gmra.mrb[60].mxu0 %vm4855_vm8, %v9479_v22  ;;  %v9975_v22 = vmul.f32 %v18524_v54, %v20885_v62  ;;  %v9979_v62 = vmul.f32 %v18564_v30, %v20890_v37 }
 0x809   : > { %13365 = vmatprep.mubr.msk.bf16.mxu0 %vm4855_vm8, %v18873_v43  ;;  %v20876_v43 = vld [vmem:[#allocation204_spill] sm:$0xff] }
 0x810   : > { %13366 = vmatmul.mubr.msk.bf16.vlgmr.msra.gmra.mrb[32].mxu0 %vm4855_vm8, %v18878_v52 }
 0x811   : > { %13398 = vmatpush3.bf16.msra.mxu0 %v14506_v47  ;;  %13369 = vmatprep.mubr.msk.bf16.mxu0 %vm4855_vm8, %v18894_v36  ;;  %v20877_v47 = vld [vmem:[#allocation65_spill] sm:$0xff] }
 0x812   : > { %13399 = vmatprep.subr.bf16.mxu0 %v14507_v0  ;;  %v9969_v50 = vmul.f32 %v18493_v23, %v20877_v47  ;;  %v9973_v23 = vmul.f32 %v18513_v28, %v20883_v46 }
 0x814   : > { %v10002_v8 = vpack.c.bf16 %v9970_v1, %v9969_v50  ;;  %v10004_v17 = vpack.c.bf16 %v9974_v51, %v9973_v23  ;;  %v20887_v50 = vld [vmem:[#allocation191_spill] sm:$0xff]  ;;  %v20891_v23 = vld [vmem:[#allocation76_spill] sm:$0xff] }
 0x815   : > { %13400 = vmatpush3.bf16.msra.mxu0 %v14507_v0  ;;  %v20886_v0 = vld [vmem:[#allocation72_spill] sm:$0xff]  ;;  %v9980_v51 = vmul.f32 %v18567_v35, %v20891_v23 }
 0x816   : > { %13433 = vmatprep.subr.bf16.mxu0 %v14508_v19  ;;  %v10041_v29 = vrot.slane %v10002_v8, 1  ;;  %v9976_v47 = vmul.f32 %v18527_v7, %v20886_v0  ;;  %v10044_v60 = vrot.slane %v10004_v17, 1  ;;  %v20889_v8 = vld [vmem:[#allocation74_spill] sm:$0xff] }
 0x817   : > { %v9978_v49 = vmul.f32 %v18561_v27, %v20889_v8  ;;  %v10007_v17 = vpack.c.bf16 %v9980_v51, %v9979_v62 }
 0x818   : > { %13370 = vmatmul.mubr.msk.bf16.gmra.mrb[36].mxu0 %vm4855_vm8, %v18899_v44  ;;  %v10043_v1 = vsel %vm1999_vm7, %v10041_v29, %v10042_v11  ;;  %v10005_v56 = vpack.c.bf16 %v9976_v47, %v9975_v22  ;;  %v14509_v29 = vld [vmem:[%s19536_s8 + $0x68] sm:$0xff]   ;;  %v10045_v22 = vsel %vm1999_vm7, %v10042_v11, %v10044_v60 }
 0x819   : > { %13373 = vmatprep.mubr.msk.bf16.mxu0 %vm4855_vm8, %v18908_v25  ;;  %v10006_v0 = vpack.c.bf16 %v9978_v49, %v9977_v3  ;;  %v20893_v11 = vld [vmem:[#allocation79_spill] sm:$0xff]  ;;  %v10050_v8 = vrot.slane %v10007_v17, 1  ;;  %v20894_v49 = vld [vmem:[#allocation81_spill] sm:$0xff] }
 0x81a   : > { %v10046_v46 = vrot.slane %v10005_v56, 1  ;;  %v20892_v56 = vld [vmem:[#allocation78_spill] sm:$0xff]  ;;  %v9982_v3 = vmul.f32 %v18599_v53, %v20893_v11 }
 0x81b   : > { %v9981_v5 = vmul.f32 %v18596_v32, %v20892_v56  ;;  %v20897_v56 = vld [vmem:[#allocation86_spill] sm:$0xff] }
 0x81c   : > { %v10047_v47 = vsel %vm1999_vm7, %v10044_v60, %v10046_v46  ;;  %v9983_v60 = vmul.f32 %v18602_v26, %v20894_v49  ;;  %v9986_v11 = vmul.f32 %v18637_v31, %v20897_v56  ;;  %v20898_v49 = vld [vmem:[#allocation88_spill] sm:$0xff] }
 0x81d   : > { %v10008_v23 = vpack.c.bf16 %v9982_v3, %v9981_v5 }
 0x820   : > { %13374 = vmatmul.mubr.msk.bf16.gmra.mrb[40].mxu0 %vm4855_vm8, %v18913_v12 }
 0x821   : > { %13377 = vmatprep.mubr.msk.bf16.mxu0 %vm4855_vm8, %v18922_v20 }
 0x828   : > { %13378 = vmatmul.mubr.msk.bf16.gmra.mrb[44].mxu0 %vm4855_vm8, %v18927_v6 }
 0x829   : > { %13381 = vmatprep.mubr.msk.bf16.mxu0 %vm4855_vm8, %v18936_v34 }
 0x830   : > { %13382 = vmatmul.mubr.msk.bf16.gmra.mrb[48].mxu0 %vm4855_vm8, %v18941_v61 }
 0x831   : > { %13385 = vmatprep.mubr.msk.bf16.mxu0 %vm4855_vm8, %v18948_v9 }
 0x838   : > { %13386 = vmatmul.mubr.msk.bf16.gmra.mrb[52].mxu0 %vm4855_vm8, %v18953_v18 }
 0x839   : > { %13389 = vmatprep.mubr.msk.bf16.mxu0 %vm4855_vm8, %v20876_v43 }
 0x840   : > { %13390 = vmatmul.mubr.msk.bf16.gmra.mrb[56].mxu0 %vm4855_vm8, %v20881_v24 }
 0x841   : > { %13393 = vmatprep.mubr.msk.bf16.mxu0 %vm4855_vm8, %v20882_v48 }
 0x848   : > { %13394 = vmatmul.mubr.msk.bf16.gmra.mrb[60].mxu0 %vm4855_vm8, %v20887_v50  ;;  %v19239_v50 = vld [vmem:[%s19536_s8 + $0x70] sm:$0xff]  }
 0x849   : > { %13401 = vmatprep.mubr.msk.bf16.mxu0 %vm4855_vm8, %v10043_v1  ;;  %v10048_v1 = vrot.slane %v10006_v0, 1  ;;  %v10052_v0 = vrot.slane %v10008_v23, 1  ;;  %v20900_v23 = vld [vmem:[#allocation92_spill] sm:$0xff] }
 0x84b   : > { %v10049_v62 = vsel %vm1999_vm7, %v10046_v46, %v10048_v1  ;;  %v10051_v51 = vsel %vm1999_vm7, %v10048_v1, %v10050_v8  ;;  %v20899_v46 = vld [vmem:[#allocation89_spill] sm:$0xff]  ;;  %v10053_v3 = vsel %vm1999_vm7, %v10050_v8, %v10052_v0  ;;  %v20903_v8 = vld [vmem:[#allocation96_spill] sm:$0xff] }
 0x84c   : > { %v9988_v5 = vmul.f32 %v18643_v2, %v20899_v46 }
 0x850   : > { %13402 = vmatmul.mubr.msk.bf16.vlgmr.msra.gmra.mrb[32].mxu0 %vm4855_vm8, %v10045_v22 }
 0x851   : > { %13434 = vmatpush3.bf16.msra.mxu0 %v14508_v19  ;;  %13405 = vmatprep.mubr.msk.bf16.mxu0 %vm4855_vm8, %v10047_v47  ;;  %v20895_v19 = vld [vmem:[#allocation82_spill] sm:$0xff]  ;;  %v20896_v47 = vld [vmem:[#allocation85_spill] sm:$0xff] }
 0x852   : > { %13435 = vmatprep.subr.bf16.mxu0 %v14509_v29  ;;  %v9984_v37 = vmul.f32 %v18605_v41, %v20895_v19  ;;  %v9985_v17 = vmul.f32 %v18634_v38, %v20896_v47  ;;  %v9987_v19 = vmul.f32 %v18640_v55, %v20898_v49  ;;  %v20902_v49 = vld [vmem:[#allocation95_spill] sm:$0xff] }
 0x853   : > { %v9991_v46 = vmul.f32 %v18669_v21, %v20902_v49  ;;  %v20906_v49 = vld [vmem:[#allocation102_spill] sm:$0xff] }
 0x854   : > { %v10009_v22 = vpack.c.bf16 %v9984_v37, %v9983_v60  ;;  %v10010_v1 = vpack.c.bf16 %v9986_v11, %v9985_v17  ;;  %v10011_v37 = vpack.c.bf16 %v9988_v5, %v9987_v19  ;;  %v9992_v17 = vmul.f32 %v18672_v57, %v20903_v8 }
 0x855   : > { %13436 = vmatpush3.bf16.msra.mxu0 %v14509_v29  ;;  %v9995_v8 = vmul.f32 %v18692_v16, %v20906_v49 }
 0x856   : > { %13469 = vmatprep.subr.bf16.mxu0 %v19239_v50  ;;  %v10054_v29 = vrot.slane %v10009_v22, 1  ;;  %v20901_v22 = vld [vmem:[#allocation93_spill] sm:$0xff]  ;;  %v10058_v56 = vrot.slane %v10011_v37, 1  ;;  %v10013_v5 = vpack.c.bf16 %v9992_v17, %v9991_v46  ;;  %v20905_v37 = vld [vmem:[#allocation100_spill] sm:$0xff] }
 0x857   : > { %v9990_v47 = vmul.f32 %v18666_v4, %v20901_v22 }
 0x858   : > { %13406 = vmatmul.mubr.msk.bf16.gmra.mrb[36].mxu0 %vm4855_vm8, %v10049_v62  ;;  %v10055_v60 = vsel %vm1999_vm7, %v10052_v0, %v10054_v29  ;;  %v10056_v62 = vrot.slane %v10010_v1, 1  ;;  %v20904_v1 = vld [vmem:[#allocation99_spill] sm:$0xff]  ;;  %v10062_v22 = vrot.slane %v10013_v5, 1  ;;  %v20909_v5 = vld [vmem:[#allocation108_spill] sm:$0xff] }
 0x859   : > { %13409 = vmatprep.mubr.msk.bf16.mxu0 %vm4855_vm8, %v10051_v51  ;;  %v9989_v51 = vmul.f32 %v18663_v40, %v20900_v23  ;;  %v9994_v23 = vmul.f32 %v18689_v45, %v20905_v37 }
 0x85a   : > { %v10057_v11 = vsel %vm1999_vm7, %v10054_v29, %v10056_v62  ;;  %v10059_v19 = vsel %vm1999_vm7, %v10056_v62, %v10058_v56  ;;  %v20907_v29 = vld [vmem:[#allocation103_spill] sm:$0xff] }
 0x85b   : > { %v10012_v0 = vpack.c.bf16 %v9990_v47, %v9989_v51  ;;  %v9996_v51 = vmul.f32 %v18695_v58, %v20907_v29 }
 0x85d   : > { %v10015_v17 = vpack.c.bf16 %v9996_v51, %v9995_v8  ;;  %v20911_v51 = vld [vmem:[#allocation113_spill] sm:$0xff] }
 0x85f   : > { %v10066_v37 = vrot.slane %v10015_v17, 1  ;;  %v20913_v17 = vld [vmem:[#allocation200_spill] sm:$0xff] }
 0x860   : > { %13410 = vmatmul.mubr.msk.bf16.gmra.mrb[40].mxu0 %vm4855_vm8, %v10053_v3  ;;  %v10060_v3 = vrot.slane %v10012_v0, 1  ;;  %v20908_v0 = vld [vmem:[#allocation107_spill] sm:$0xff] }
 0x861   : > { %13413 = vmatprep.mubr.msk.bf16.mxu0 %vm4855_vm8, %v10055_v60  ;;  %v9993_v60 = vmul.f32 %v18686_v39, %v20904_v1  ;;  %v9998_v1 = vmul.f32 %v18709_v59, %v20909_v5 }
 0x862   : > { %v10061_v47 = vsel %vm1999_vm7, %v10058_v56, %v10060_v3  ;;  %v10063_v46 = vsel %vm1999_vm7, %v10060_v3, %v10062_v22 }
 0x863   : > { %v10014_v62 = vpack.c.bf16 %v9994_v23, %v9993_v60  ;;  %v20910_v23 = vld [vmem:[#allocation90_spill] sm:$0xff] }
 0x868   : > { %13414 = vmatmul.mubr.msk.bf16.gmra.mrb[44].mxu0 %vm4855_vm8, %v10057_v11  ;;  %v10064_v11 = vrot.slane %v10014_v62, 1 }
 0x869   : > { %13417 = vmatprep.mubr.msk.bf16.mxu0 %vm4855_vm8, %v10059_v19  ;;  %v9997_v19 = vmul.f32 %v18712_v14, %v20908_v0 }
 0x86a   : > { %v10065_v49 = vsel %vm1999_vm7, %v10062_v22, %v10064_v11  ;;  %v10067_v56 = vsel %vm1999_vm7, %v10064_v11, %v10066_v37  ;;  %v10327_v22 = vmul.f32 %v18483_v10, %v20911_v51  ;;  %v20914_v11 = vld [vmem:[#allocation115_spill] sm:$0xff] }
 0x86b   : > { %v10016_v29 = vpack.c.bf16 %v9998_v1, %v9997_v19  ;;  %v10329_v0 = vmul.f32 %v18513_v28, %v20914_v11  ;;  %v20915_v19 = vld [vmem:[#allocation117_spill] sm:$0xff]  ;;  %v20916_v1 = vld [vmem:[#allocation116_spill] sm:$0xff]  ;;  %v20919_v51 = vld [vmem:[#allocation119_spill] sm:$0xff] }
 0x86c   : > { %v10330_v5 = vmul.f32 %v18516_v63, %v20915_v19  ;;  %v20922_v19 = vld [vmem:[#allocation120_spill] sm:$0xff] }
 0x86d   : > { %v10068_v3 = vrot.slane %v10016_v29, 1 }
 0x86f   : > { %v10069_v60 = vsel %vm1999_vm7, %v10066_v37, %v10068_v3  ;;  %v10071_v8 = vsel %vm1999_vm7, %v10068_v3, %v20910_v23  ;;  %v10331_v37 = vmul.f32 %v18524_v54, %v20916_v1  ;;  %v14511_v3 = vld [vmem:[%s19536_s8 + $0x78] sm:$0xff]   ;;  %v20918_v23 = vld [vmem:[#allocation118_spill] sm:$0xff] }
 0x870   : > { %13418 = vmatmul.mubr.msk.bf16.gmra.mrb[48].mxu0 %vm4855_vm8, %v10061_v47  ;;  %v20912_v47 = vld [vmem:[#allocation114_spill] sm:$0xff]  ;;  %v20923_v1 = vld [vmem:[#allocation121_spill] sm:$0xff] }
 0x871   : > { %13421 = vmatprep.mubr.msk.bf16.mxu0 %vm4855_vm8, %v10063_v46  ;;  %v10328_v62 = vmul.f32 %v18488_v13, %v20912_v47  ;;  %v14512_v47 = vld [vmem:[%s19536_s8 + $0x80] sm:$0xff]  }
 0x873   : > { %v10358_v46 = vpack.c.bf16 %v10328_v62, %v10327_v22  ;;  %v10334_v22 = vmul.f32 %v18561_v27, %v20919_v51  ;;  %v20920_v62 = vld [vmem:[#allocation6_spill] sm:$0xff] }
 0x878   : > { %13422 = vmatmul.mubr.msk.bf16.gmra.mrb[52].mxu0 %vm4855_vm8, %v10065_v49  ;;  %v20917_v49 = vld [vmem:[#allocation5_spill] sm:$0xff] }
 0x879   : > { %13425 = vmatprep.mubr.msk.bf16.mxu0 %vm4855_vm8, %v10067_v56  ;;  %v10332_v29 = vmul.f32 %v18527_v7, %v20917_v49  ;;  %v10359_v56 = vpack.c.bf16 %v10330_v5, %v10329_v0  ;;  %v10337_v5 = vmul.f32 %v18596_v32, %v20922_v19  ;;  %v20924_v49 = vld [vmem:[#allocation10_spill] sm:$0xff] }
 0x880   : > { %13426 = vmatmul.mubr.msk.bf16.gmra.mrb[56].mxu0 %vm4855_vm8, %v10069_v60  ;;  %v10360_v60 = vpack.c.bf16 %v10332_v29, %v10331_v37  ;;  %v10338_v37 = vmul.f32 %v18599_v53, %v20923_v1  ;;  %v10339_v29 = vmul.f32 %v18602_v26, %v20924_v49 }
 0x881   : > { %13429 = vmatprep.mubr.msk.bf16.mxu0 %vm4855_vm8, %v10071_v8  ;;  %v10333_v8 = vmul.f32 %v18558_v33, %v20918_v23 }
 0x888   : > { %13430 = vmatmul.mubr.msk.bf16.gmra.mrb[60].mxu0 %vm4855_vm8, %v20913_v17  ;;  %v20921_v17 = vld [vmem:[#allocation7_spill] sm:$0xff] }
 0x889   : > { %13437 = vmatprep.mubr.msk.bf16.mxu0 %vm4855_vm8, %v10358_v46  ;;  %v10335_v46 = vmul.f32 %v18564_v30, %v20920_v62  ;;  %v10336_v11 = vmul.f32 %v18567_v35, %v20921_v17 }
 0x88b   : > { %v10362_v0 = vpack.c.bf16 %v10336_v11, %v10335_v46  ;;  %v20928_v46 = vld [vmem:[#allocation16_spill] sm:$0xff]  ;;  %v20929_v11 = vld [vmem:[#allocation19_spill] sm:$0xff] }
 0x88c   : > { %v10343_v17 = vmul.f32 %v18640_v55, %v20928_v46 }
 0x890   : > { %13438 = vmatmul.mubr.msk.bf16.vlgmr.msra.gmra.mrb[32].mxu0 %vm4855_vm8, %v10359_v56  ;;  %v20925_v56 = vld [vmem:[#allocation13_spill] sm:$0xff] }
 0x891   : > { %13470 = vmatpush3.bf16.msra.mxu0 %v19239_v50  ;;  %13441 = vmatprep.mubr.msk.bf16.mxu0 %vm4855_vm8, %v10360_v60  ;;  %v10361_v50 = vpack.c.bf16 %v10334_v22, %v10333_v8  ;;  %v10340_v60 = vmul.f32 %v18605_v41, %v20925_v56  ;;  %v20926_v8 = vld [vmem:[#allocation122_spill] sm:$0xff]  ;;  %v20927_v22 = vld [vmem:[#allocation123_spill] sm:$0xff] }
 0x892   : > { %13471 = vmatprep.subr.bf16.mxu0 %v14511_v3  ;;  %v10341_v51 = vmul.f32 %v18634_v38, %v20926_v8  ;;  %v10342_v62 = vmul.f32 %v18637_v31, %v20927_v22 }
 0x893   : > { %v10364_v23 = vpack.c.bf16 %v10340_v60, %v10339_v29  ;;  %v20932_v29 = vld [vmem:[#allocation22_spill] sm:$0xff]  ;;  %v20933_v60 = vld [vmem:[#allocation25_spill] sm:$0xff] }
 0x894   : > { %v10347_v56 = vmul.f32 %v18669_v21, %v20932_v29 }
 0x895   : > { %13472 = vmatpush3.bf16.msra.mxu0 %v14511_v3  ;;  %v10363_v3 = vpack.c.bf16 %v10338_v37, %v10337_v5  ;;  %v20930_v5 = vld [vmem:[#allocation124_spill] sm:$0xff]  ;;  %v20931_v37 = vld [vmem:[#allocation125_spill] sm:$0xff] }
 0x896   : > { %13505 = vmatprep.subr.bf16.mxu0 %v14512_v47  ;;  %v10345_v1 = vmul.f32 %v18663_v40, %v20930_v5  ;;  %v10346_v49 = vmul.f32 %v18666_v4, %v20931_v37 }
 0x898   : > { %13442 = vmatmul.mubr.msk.bf16.gmra.mrb[36].mxu0 %vm4855_vm8, %v10361_v50  ;;  %v10344_v50 = vmul.f32 %v18643_v2, %v20929_v11 }
 0x899   : > { %13445 = vmatprep.mubr.msk.bf16.mxu0 %vm4855_vm8, %v10362_v0  ;;  %v10365_v0 = vpack.c.bf16 %v10342_v62, %v10341_v51  ;;  %v20934_v51 = vld [vmem:[#allocation126_spill] sm:$0xff]  ;;  %v20935_v62 = vld [vmem:[#allocation127_spill] sm:$0xff] }
 0x89a   : > { %v10366_v19 = vpack.c.bf16 %v10344_v50, %v10343_v17  ;;  %v10349_v22 = vmul.f32 %v18686_v39, %v20934_v51  ;;  %v10350_v46 = vmul.f32 %v18689_v45, %v20935_v62  ;;  %v20936_v17 = vld [vmem:[#allocation28_spill] sm:$0xff]  ;;  %v20937_v50 = vld [vmem:[#allocation31_spill] sm:$0xff] }
 0x89b   : > { %v10351_v11 = vmul.f32 %v18692_v16, %v20936_v17  ;;  %v20943_v62 = vld [vmem:[#allocation187_spill] sm:$0xff] }
 0x89c   : > { %v20944_v17 = vld [vmem:[#allocation83_spill] sm:$0xff] }
 0x8a0   : > { %13446 = vmatmul.mubr.msk.bf16.gmra.mrb[40].mxu0 %vm4855_vm8, %v10363_v3  ;;  %v10348_v3 = vmul.f32 %v18672_v57, %v20933_v60 }
 0x8a1   : > { %13449 = vmatprep.mubr.msk.bf16.mxu0 %vm4855_vm8, %v10364_v23  ;;  %v10367_v23 = vpack.c.bf16 %v10346_v49, %v10345_v1  ;;  %v20938_v1 = vld [vmem:[#allocation128_spill] sm:$0xff]  ;;  %v20939_v49 = vld [vmem:[#allocation33_spill] sm:$0xff] }
 0x8a2   : > { %v10368_v8 = vpack.c.bf16 %v10348_v3, %v10347_v56  ;;  %v10353_v37 = vmul.f32 %v18712_v14, %v20938_v1  ;;  %v10354_v29 = vmul.f32 %v18709_v59, %v20939_v49  ;;  %v20940_v56 = vld [vmem:[#allocation129_spill] sm:$0xff]  ;;  %v20941_v3 = vld [vmem:[#allocation80_spill] sm:$0xff] }
 0x8a3   : > { %v10355_v60 = vmul.f32 %v18419_v42, %v20940_v56  ;;  %v14513_v42 = vld [vmem:[%s19536_s8 + $0x88] sm:$0xff]  }
 0x8a8   : > { %13450 = vmatmul.mubr.msk.bf16.gmra.mrb[44].mxu0 %vm4855_vm8, %v10365_v0  ;;  %v10352_v0 = vmul.f32 %v18695_v58, %v20937_v50  ;;  %v20953_v50 = vld [vmem:[#allocation112_spill] sm:$0xff] }
 0x8a9   : > { %13453 = vmatprep.mubr.msk.bf16.mxu0 %vm4855_vm8, %v10366_v19  ;;  %v10369_v19 = vpack.c.bf16 %v10350_v46, %v10349_v22  ;;  %v20942_v22 = vld [vmem:[#allocation26_spill] sm:$0xff] }
 0x8aa   : > { %v10370_v5 = vpack.c.bf16 %v10352_v0, %v10351_v11  ;;  %v10357_v46 = vmul.f32 %v20943_v62, %v20942_v22  ;;  %v20960_v22 = vld [vmem:[#allocation152_spill] sm:$0xff] }
 0x8ab   : > { %v10869_v62 = vmul.f32 %v18599_v53, %v20960_v22 }
 0x8ac   : > { %v10373_v11 = vpack.c.bf16 %v20944_v17, %v10357_v46 }
 0x8b0   : > { %13454 = vmatmul.mubr.msk.bf16.gmra.mrb[48].mxu0 %vm4855_vm8, %v10367_v23  ;;  %v10356_v23 = vmul.f32 %v18507_v15, %v20941_v3  ;;  %v20945_v15 = vld [vmem:[#allocation39_spill] sm:$0xff] }
 0x8b1   : > { %13457 = vmatprep.mubr.msk.bf16.mxu0 %vm4855_vm8, %v10368_v8  ;;  %v10371_v8 = vpack.c.bf16 %v10354_v29, %v10353_v37  ;;  %v20956_v37 = vld [vmem:[#allocation106_spill] sm:$0xff] }
 0x8b2   : > { %v10372_v51 = vpack.c.bf16 %v10356_v23, %v10355_v60  ;;  %v20957_v60 = vld [vmem:[#allocation146_spill] sm:$0xff]  ;;  %v20958_v23 = vld [vmem:[#allocation147_spill] sm:$0xff] }
 0x8b3   : > { %v10866_v3 = vmul.f32 %v18564_v30, %v20957_v60  ;;  %v20974_v60 = vld [vmem:[#allocation179_spill] sm:$0xff] }
 0x8b8   : > { %13458 = vmatmul.mubr.msk.bf16.gmra.mrb[52].mxu0 %vm4855_vm8, %v10369_v19  ;;  %v20954_v19 = vld [vmem:[#allocation142_spill] sm:$0xff] }
 0x8b9   : > { %13461 = vmatprep.mubr.msk.bf16.mxu0 %vm4855_vm8, %v10370_v5  ;;  %v20955_v5 = vld [vmem:[#allocation143_spill] sm:$0xff] }
 0x8ba   : > { %v10865_v1 = vmul.f32 %v18561_v27, %v20955_v5  ;;  %v20959_v27 = vld [vmem:[#allocation151_spill] sm:$0xff] }
 0x8bb   : > { %v20971_v5 = vld [vmem:[#allocation175_spill] sm:$0xff] }
 0x8c0   : > { %13462 = vmatmul.mubr.msk.bf16.gmra.mrb[56].mxu0 %vm4855_vm8, %v10371_v8 }
 0x8c1   : > { %13465 = vmatprep.mubr.msk.bf16.mxu0 %vm4855_vm8, %v10372_v51  ;;  %v10868_v51 = vmul.f32 %v18596_v32, %v20959_v27 }
 0x8c8   : > { %13466 = vmatmul.mubr.msk.bf16.gmra.mrb[60].mxu0 %vm4855_vm8, %v10373_v11 }
 0x8c9   : > { %13473 = vmatprep.mubr.msk.bf16.mxu0 %vm4855_vm8, %v18878_v52  ;;  %v10858_v52 = vmul.f32 %v18483_v10, %v20945_v15  ;;  %v20951_v10 = vld [vmem:[#allocation198_spill] sm:$0xff] }
 0x8ca   : > { %v20961_v15 = vld [vmem:[#allocation154_spill] sm:$0xff] }
 0x8d0   : > { %13474 = vmatmul.mubr.msk.bf16.vlgmr.msra.gmra.mrb[32].mxu0 %vm4855_vm8, %v18894_v36  ;;  %v20946_v36 = vld [vmem:[#allocation98_spill] sm:$0xff] }
 0x8d1   : > { %13506 = vmatpush3.bf16.msra.mxu0 %v14512_v47  ;;  %13477 = vmatprep.mubr.msk.bf16.mxu0 %vm4855_vm8, %v18899_v44  ;;  %v10859_v44 = vmul.f32 %v18488_v13, %v20946_v36  ;;  %v20952_v47 = vld [vmem:[#allocation109_spill] sm:$0xff] }
 0x8d2   : > { %13507 = vmatprep.subr.bf16.mxu0 %v14513_v42  ;;  %v10862_v13 = vmul.f32 %v18524_v54, %v20952_v47 }
 0x8d5   : > { %13508 = vmatpush3.bf16.msra.mxu0 %v14513_v42  ;;  %v10894_v42 = vpack.c.bf16 %v10869_v62, %v10868_v51 }
 0x8d7   : > { %v10935_v36 = vrot.slane %v10894_v42, 1  ;;  %v20979_v42 = vld [vmem:[#allocation193_spill] sm:$0xff] }
 0x8d8   : > { %13478 = vmatmul.mubr.msk.bf16.gmra.mrb[36].mxu0 %vm4855_vm8, %v18908_v25  ;;  %v20947_v25 = vld [vmem:[#allocation38_spill] sm:$0xff] }
 0x8d9   : > { %13481 = vmatprep.mubr.msk.bf16.mxu0 %vm4855_vm8, %v18913_v12  ;;  %v10860_v12 = vmul.f32 %v18513_v28, %v20947_v25  ;;  %v10863_v28 = vmul.f32 %v18527_v7, %v20953_v50  ;;  %v20964_v25 = vld [vmem:[#allocation160_spill] sm:$0xff] }
 0x8db   : > { %v10891_v29 = vpack.c.bf16 %v10863_v28, %v10862_v13 }
 0x8dd   : > { %v10929_v7 = vrot.slane %v10891_v29, 1 }
 0x8e0   : > { %13482 = vmatmul.mubr.msk.bf16.gmra.mrb[40].mxu0 %vm4855_vm8, %v18922_v20  ;;  %v20948_v20 = vld [vmem:[#allocation32_spill] sm:$0xff] }
 0x8e1   : > { %13485 = vmatprep.mubr.msk.bf16.mxu0 %vm4855_vm8, %v18927_v6  ;;  %v10889_v6 = vpack.c.bf16 %v10859_v44, %v10858_v52  ;;  %v20962_v52 = vld [vmem:[#allocation155_spill] sm:$0xff] }
 0x8e2   : > { %v10871_v32 = vmul.f32 %v18605_v41, %v20962_v52  ;;  %v20963_v44 = vld [vmem:[#allocation159_spill] sm:$0xff] }
 0x8e3   : > { %v10926_v0 = vrot.slane %v10889_v6, 1  ;;  %v10872_v53 = vmul.f32 %v18634_v38, %v20963_v44 }
 0x8e8   : > { %13486 = vmatmul.mubr.msk.bf16.gmra.mrb[44].mxu0 %vm4855_vm8, %v18936_v34 }
 0x8e9   : > { %13489 = vmatprep.mubr.msk.bf16.mxu0 %vm4855_vm8, %v18941_v61  ;;  %v20949_v61 = vld [vmem:[#allocation199_spill] sm:$0xff] }
 0x8f0   : > { %13490 = vmatmul.mubr.msk.bf16.gmra.mrb[48].mxu0 %vm4855_vm8, %v18948_v9  ;;  %v10861_v9 = vmul.f32 %v18516_v63, %v20948_v20 }
 0x8f1   : > { %13493 = vmatprep.mubr.msk.bf16.mxu0 %vm4855_vm8, %v18953_v18  ;;  %v20950_v18 = vld [vmem:[#allocation280_spill] sm:$0xff] }
 0x8f2   : > { %v10890_v34 = vpack.c.bf16 %v10861_v9, %v10860_v12  ;;  %v10873_v12 = vmul.f32 %v18637_v31, %v20964_v25 }
 0x8f4   : > { %v10927_v63 = vrot.slane %v10890_v34, 1  ;;  %v10896_v34 = vpack.c.bf16 %v10873_v12, %v10872_v53 }
 0x8f6   : > { %v10928_v56 = vsel %vm1999_vm7, %v10926_v0, %v10927_v63  ;;  %v10930_v46 = vsel %vm1999_vm7, %v10927_v63, %v10929_v7  ;;  %v20969_v63 = vld [vmem:[#allocation169_spill] sm:$0xff] }
 0x8f8   : > { %13494 = vmatmul.mubr.msk.bf16.gmra.mrb[52].mxu0 %vm4855_vm8, %v20876_v43  ;;  %v10643_v43 = vshrl.u32 %v20950_v18, 16  ;;  %v20966_v18 = vld [vmem:[#allocation163_spill] sm:$0xff] }
 0x8f9   : > { %13497 = vmatprep.mubr.msk.bf16.mxu0 %vm4855_vm8, %v20881_v24  ;;  %v10875_v38 = vmul.f32 %v18643_v2, %v20966_v18  ;;  %v10878_v2 = vmul.f32 %v18669_v21, %v20969_v63 }
 0x8fa   : > { %v10645_v24 = vor.u32 %v10643_v43, %v20951_v10  ;;  %v10939_v43 = vrot.slane %v10896_v34, 1  ;;  %v20967_v10 = vld [vmem:[#allocation167_spill] sm:$0xff] }
 0x8fb   : > { %v10876_v31 = vmul.f32 %v18663_v40, %v20967_v10 }
 0x8fc   : > { %v10646_v49 = vsel %vm1361_vm2, %v10645_v24, %v20956_v37  ;;  %v20968_v24 = vld [vmem:[#allocation168_spill] sm:$0xff] }
 0x8fd   : > { %v10877_v47 = vmul.f32 %v18666_v4, %v20968_v24  ;;  %v10880_v4 = vmul.f32 %v18686_v39, %v20971_v5  ;;  %v10883_v39 = vmul.f32 %v18695_v58, %v20974_v60  ;;  %v20981_v5 = vmov 8  }
 0x8ff   : > { %v10898_v0 = vpack.c.bf16 %v10877_v47, %v10876_v31 }
 0x900   : > { %13498 = vmatmul.mubr.msk.bf16.gmra.mrb[56].mxu0 %vm4855_vm8, %v20882_v48  ;;  %v10864_v48 = vmul.f32 %v18558_v33, %v20954_v19  ;;  %v10867_v33 = vmul.f32 %v18567_v35, %v20958_v23  ;;  %v10870_v35 = vmul.f32 %v18602_v26, %v20961_v15  ;;  %v20970_v19 = vld [vmem:[#allocation171_spill] sm:$0xff]  ;;  %v20975_v23 = vld [vmem:[#allocation184_spill] sm:$0xff] }
 0x901   : > { %13501 = vmatprep.mubr.msk.bf16.mxu0 %vm4855_vm8, %v20949_v61  ;;  %v20965_v61 = vld [vmem:[#allocation161_spill] sm:$0xff]  ;;  %v10879_v40 = vmul.f32 %v18672_v57, %v20970_v19 }
 0x902   : > { %v10892_v54 = vpack.c.bf16 %v10865_v1, %v10864_v48  ;;  %v10893_v17 = vpack.c.bf16 %v10867_v33, %v10866_v3  ;;  %v10895_v9 = vpack.c.bf16 %v10871_v32, %v10870_v35  ;;  %v10874_v41 = vmul.f32 %v18640_v55, %v20965_v61  ;;  %v20972_v1 = vld [vmem:[#allocation176_spill] sm:$0xff]  ;;  %v20976_v33 = vld [vmem:[#allocation185_spill] sm:$0xff] }
 0x903   : > { %v10943_v48 = vrot.slane %v10898_v0, 1  ;;  %v10881_v37 = vmul.f32 %v18689_v45, %v20972_v1  ;;  %v10899_v29 = vpack.c.bf16 %v10879_v40, %v10878_v2  ;;  %v10884_v45 = vmul.f32 %v18712_v14, %v20975_v23 }
 0x904   : > { %v10931_v8 = vrot.slane %v10892_v54, 1  ;;  %v10933_v30 = vrot.slane %v10893_v17, 1  ;;  %v10937_v26 = vrot.slane %v10895_v9, 1  ;;  %v10897_v50 = vpack.c.bf16 %v10875_v38, %v10874_v41 }
 0x905   : > { %v10900_v54 = vpack.c.bf16 %v10881_v37, %v10880_v4  ;;  %v10945_v21 = vrot.slane %v10899_v29, 1 }
 0x906   : > { %v10932_v11 = vsel %vm1999_vm7, %v10929_v7, %v10931_v8  ;;  %v10934_v20 = vsel %vm1999_vm7, %v10931_v8, %v10933_v30  ;;  %v10936_v6 = vsel %vm1999_vm7, %v10933_v30, %v10935_v36  ;;  %v10938_v13 = vsel %vm1999_vm7, %v10935_v36, %v10937_v26  ;;  %v20973_v7 = vld [vmem:[#allocation177_spill] sm:$0xff] }
 0x907   : > { %v10940_v28 = vsel %vm1999_vm7, %v10937_v26, %v10939_v43  ;;  %v10941_v55 = vrot.slane %v10897_v50, 1  ;;  %v10882_v57 = vmul.f32 %v18692_v16, %v20973_v7  ;;  %v10947_v3 = vrot.slane %v10900_v54, 1  ;;  %v20980_v30 = vld [vmem:[#allocation197_spill] sm:$0xff] }
 0x908   : > { %13502 = vmatmul.mubr.msk.bf16.gmra.mrb[60].mxu0 %vm4855_vm8, %v10646_v49  ;;  %v10885_v8 = vmul.f32 %v18709_v59, %v20976_v33  ;;  %v10946_v27 = vsel %vm1999_vm7, %v10943_v48, %v10945_v21  ;;  %v20977_v59 = vld [vmem:[#allocation43_spill] sm:$0xff]  ;;  %v10957_v15 = vsel %vm1999_vm7, %v20980_v30, %v20979_v42 }
 0x909   : > { %13509 = vmatprep.mubr.msk.bf16.mxu0 %vm4855_vm8, %v10928_v56  ;;  %v10942_v49 = vsel %vm1999_vm7, %v10939_v43, %v10941_v55  ;;  %v10944_v56 = vsel %vm1999_vm7, %v10941_v55, %v10943_v48  ;;  %v10901_v51 = vpack.c.bf16 %v10883_v39, %v10882_v57  ;;  %v10948_v22 = vsel %vm1999_vm7, %v10945_v21, %v10947_v3 }
 0x90a   : > { %v10902_v62 = vpack.c.bf16 %v10885_v8, %v10884_v45 }
 0x90b   : > { %v10949_v16 = vrot.slane %v10901_v51, 1 }
 0x90d   : > { %v10950_v58 = vsel %vm1999_vm7, %v10947_v3, %v10949_v16 }
 0x910   : > { %13510 = vmatmul.mubr.msk.bf16.vlgmr.msra.gmra.mrb[32].mxu0 %vm4855_vm8, %v10930_v46  ;;  %v10951_v46 = vrot.slane %v10902_v62, 1 }
 0x911   : > { %13513 = vmatprep.mubr.msk.bf16.mxu0 %vm4855_vm8, %v10932_v11  ;;  %v20978_v11 = vld [vmem:[#allocation205_spill] sm:$0xff] }
 0x912   : > { %v10952_v14 = vsel %vm1999_vm7, %v10949_v16, %v10951_v46  ;;  %v10954_v17 = vsel %vm1999_vm7, %v10951_v46, %v20977_v59 }
 0x918   : > { %13514 = vmatmul.mubr.msk.bf16.gmra.mrb[36].mxu0 %vm4855_vm8, %v10934_v20 }
 0x919   : > { %13517 = vmatprep.mubr.msk.bf16.mxu0 %vm4855_vm8, %v10936_v6 }
 0x920   : > { %13518 = vmatmul.mubr.msk.bf16.gmra.mrb[40].mxu0 %vm4855_vm8, %v10938_v13 }
 0x921   : > { %13521 = vmatprep.mubr.msk.bf16.mxu0 %vm4855_vm8, %v10940_v28 }
 0x928   : > { %13522 = vmatmul.mubr.msk.bf16.gmra.mrb[44].mxu0 %vm4855_vm8, %v10942_v49 }
 0x929   : > { %13525 = vmatprep.mubr.msk.bf16.mxu0 %vm4855_vm8, %v10944_v56 }
 0x930   : > { %13526 = vmatmul.mubr.msk.bf16.gmra.mrb[48].mxu0 %vm4855_vm8, %v10946_v27 }
 0x931   : > { %13529 = vmatprep.mubr.msk.bf16.mxu0 %vm4855_vm8, %v10948_v22 }
 0x938   : > { %13530 = vmatmul.mubr.msk.bf16.gmra.mrb[52].mxu0 %vm4855_vm8, %v10950_v58 }
 0x939   : > { %13533 = vmatprep.mubr.msk.bf16.mxu0 %vm4855_vm8, %v10952_v14 }
 0x940   : > { %13534 = vmatmul.mubr.msk.bf16.gmra.mrb[56].mxu0 %vm4855_vm8, %v10954_v17 }
 0x941   : > { %13537 = vmatprep.mubr.msk.bf16.mxu0 %vm4855_vm8, %v20978_v11 }
 0x948   : > { %13538 = vmatmul.mubr.msk.bf16.gmra.mrb[60].mxu0 %vm4855_vm8, %v10957_v15 }
 0x9e3   : > { %v13511_v35 = vpop.f32.mrb[32].mxu0 }
 0x9e4   : > { %v11052_v52 = vpop.f32.mrb[33].mxu0 }
 0x9e5   : > { %11211 = vxpose.xlu1.b32.start [1/16] (narrow) %v11052_v52, 8  ;;  %v13512_v32 = vpop.f32.mrb[34].mxu0 }
 0x9e6   : > { %v11055_v36 = vpop.f32.mrb[35].mxu0 }
 0x9e9   : > { %11212 = vxpose.xlu1.b32.cont [2/16] (narrow) %v11055_v36, 8 }
 0x9eb   : > { %v13515_v44 = vpop.f32.mrb[36].mxu0 }
 0x9ec   : > { %v11068_v53 = vpop.f32.mrb[37].mxu0 }
 0x9ed   : > { %11213 = vxpose.xlu1.b32.cont [3/16] (narrow) %v13511_v35, 8  ;;  %v13516_v25 = vpop.f32.mrb[38].mxu0 }
 0x9ee   : > { %v11071_v12 = vpop.f32.mrb[39].mxu0 }
 0x9f1   : > { %11214 = vxpose.xlu1.b32.cont [4/16] (narrow) %v13512_v32, 8 }
 0x9f3   : > { %v13519_v20 = vpop.f32.mrb[40].mxu0 }
 0x9f4   : > { %v11084_v9 = vpop.f32.mrb[41].mxu0 }
 0x9f5   : > { %11215 = vxpose.xlu1.b32.cont [5/16] (narrow) %v11068_v53, 8  ;;  %v13520_v6 = vpop.f32.mrb[42].mxu0 }
 0x9f6   : > { %v11087_v34 = vpop.f32.mrb[43].mxu0 }
 0x9f9   : > { %11216 = vxpose.xlu1.b32.cont [6/16] (narrow) %v11071_v12, 8 }
 0x9fb   : > { %v13523_v26 = vpop.f32.mrb[44].mxu0 }
 0x9fc   : > { %v11100_v61 = vpop.f32.mrb[45].mxu0 }
 0x9fd   : > { %11217 = vxpose.xlu1.b32.cont [7/16] (narrow) %v13515_v44, 8  ;;  %v13524_v41 = vpop.f32.mrb[46].mxu0 }
 0x9fe   : > { %v11103_v18 = vpop.f32.mrb[47].mxu0 }
 0xa01   : > { %11218 = vxpose.xlu1.b32.cont [8/16] (narrow) %v13516_v25, 8 }
 0xa03   : > { %v13527_v38 = vpop.f32.mrb[48].mxu0 }
 0xa04   : > { %v11116_v43 = vpop.f32.mrb[49].mxu0 }
 0xa05   : > { %11219 = vxpose.xlu1.b32.cont [9/16] (narrow) %v11084_v9, 8  ;;  %11243 = vxpose.xlu0.b32.start [1/16] (narrow) %v11116_v43, 8  ;;  %v13528_v10 = vpop.f32.mrb[50].mxu0 }
 0xa06   : > { %v11119_v31 = vpop.f32.mrb[51].mxu0 }
 0xa09   : > { %11220 = vxpose.xlu1.b32.cont [10/16] (narrow) %v11087_v34, 8  ;;  %11244 = vxpose.xlu0.b32.cont [2/16] (narrow) %v11119_v31, 8 }
 0xa0b   : > { %v13531_v24 = vpop.f32.mrb[52].mxu0 }
 0xa0c   : > { %v11132_v47 = vpop.f32.mrb[53].mxu0 }
 0xa0d   : > { %11221 = vxpose.xlu1.b32.cont [11/16] (narrow) %v13519_v20, 8  ;;  %11245 = vxpose.xlu0.b32.cont [3/16] (narrow) %v13527_v38, 8  ;;  %v13532_v13 = vpop.f32.mrb[54].mxu0 }
 0xa0e   : > { %v11135_v50 = vpop.f32.mrb[55].mxu0 }
 0xa11   : > { %11222 = vxpose.xlu1.b32.cont [12/16] (narrow) %v13520_v6, 8  ;;  %11246 = vxpose.xlu0.b32.cont [4/16] (narrow) %v13528_v10, 8 }
 0xa13   : > { %v13535_v28 = vpop.f32.mrb[56].mxu0 }
 0xa14   : > { %v11148_v0 = vpop.f32.mrb[57].mxu0 }
 0xa15   : > { %11223 = vxpose.xlu1.b32.cont [13/16] (narrow) %v11100_v61, 8  ;;  %11247 = vxpose.xlu0.b32.cont [5/16] (narrow) %v11132_v47, 8  ;;  %v13536_v55 = vpop.f32.mrb[58].mxu0 }
 0xa16   : > { %v11151_v63 = vpop.f32.mrb[59].mxu0 }
 0xa19   : > { %11224 = vxpose.xlu1.b32.cont [14/16] (narrow) %v11103_v18, 8  ;;  %11248 = vxpose.xlu0.b32.cont [6/16] (narrow) %v11135_v50, 8 }
 0xa1b   : > { %v13539_v2 = vpop.f32.mrb[60].mxu0 }
 0xa1c   : > { %v11164_v19 = vpop.f32.mrb[61].mxu0 }
 0xa1d   : > { %11225 = vxpose.xlu1.b32.cont [15/16] (narrow) %v13523_v26, 8  ;;  %11249 = vxpose.xlu0.b32.cont [7/16] (narrow) %v13531_v24, 8  ;;  %v13540_v40 = vpop.f32.mrb[62].mxu0 }
 0xa1e   : > { %v11167_v48 = vpop.f32.mrb[63].mxu0 }
 0xa21   : > { %11226 = vxpose.xlu1.b32.end [16/16] (narrow) %v13524_v41, 8  ;;  %11250 = vxpose.xlu0.b32.cont [8/16] (narrow) %v13532_v13, 8 }
 0xa25   : > { %11251 = vxpose.xlu0.b32.cont [9/16] (narrow) %v11148_v0, 8 }
 0xa29   : > { %11252 = vxpose.xlu0.b32.cont [10/16] (narrow) %v11151_v63, 8 }
 0xa2d   : > { %11253 = vxpose.xlu0.b32.cont [11/16] (narrow) %v13535_v28, 8 }
 0xa31   : > { %11254 = vxpose.xlu0.b32.cont [12/16] (narrow) %v13536_v55, 8 }
 0xa35   : > { %11255 = vxpose.xlu0.b32.cont [13/16] (narrow) %v11164_v19, 8 }
 0xa39   : > { %11256 = vxpose.xlu0.b32.cont [14/16] (narrow) %v11167_v48, 8 }
 0xa3d   : > { %11257 = vxpose.xlu0.b32.cont [15/16] (narrow) %v13539_v2, 8 }
 0xa41   : > { %11258 = vxpose.xlu0.b32.end [16/16] (narrow) %v13540_v40, 8 }
 0xa65   : > { %v11227_v4 = vpop.trf.xlu1 }
 0xa6a   : > { %14458 = vset.pattern.permute.xlu0 %v20981_v5 }
 0xa85   : > { %v11259_v1 = vpop.trf.xlu0 }
 0xa86   : > { %v11277_v37 = vcombine.low %v11227_v4, %v11259_v1 }
 0xa88   : > { %11279 = vst [vmem:[%s386_s25] sm:$0xff] %v11277_v37 }
 0xa89 PF: > { %s21_s17 = sadd.s32 1, %s14592_s17  }
 0xa8a   : > { %p18_p4 = scmp.ge.s32.totalorder %s21_s17, 4  }
 0xa8c   :  { %20 = sbr.rel (!%p18_p4) target bundleno = 1 (0x1), region = 118 }

</bundles_post_ra>
